<compile_context>
chip_gen: v5e
topology: v5e:2x2
jax: 0.10.0
libtpu: 0.0.40
codegen_flags: <defaults>
</compile_context>

<pallas_src>
import functools
import math

import jax
import jax.numpy as jnp
from jax.experimental import pallas as pl
from jax.experimental.pallas import tpu as pltpu

BN_EPS = 1e-3   # nn.BatchNorm1d(..., eps=0.001) inside FCLayers


def _ceil_to(x, m):
    return ((x + m - 1) // m) * m


def _vmem_bytes(shape, dtype):
    """Approximate VMEM footprint of one buffer (sublane/lane padded)."""
    itemsize = jnp.dtype(dtype).itemsize
    shape = tuple(int(s) for s in shape)
    if len(shape) == 1:
        shape = (1,) + shape
    lead = math.prod(shape[:-2]) if len(shape) > 2 else 1
    sub = 8 * (4 // itemsize)                       # f32 -> 8 sublanes, bf16 -> 16
    return lead * _ceil_to(shape[-2], sub) * _ceil_to(shape[-1], 128) * itemsize


def multi_encoder_kernel(x_ref, oh_ref, eps_ref,
                         w1x_ref, wc_ref, wsh_ref,
                         b_ref, gam_ref, bet_ref,
                         wh_ref, bh_ref,
                         out_ref,
                         h_s, stat_s,
                         *, fin_chunk):
    ki = pl.program_id(0)                 # layer-0 reduction (K) axis -- OUTER
    bi = pl.program_id(1)                 # batch-tile axis            -- INNER
    nk = pl.num_programs(0)
    nb = pl.num_programs(1)
    tile_b = x_ref.shape[0]
    off = pl.multiple_of(bi * tile_b, tile_b)
    f32 = jnp.float32

    # ---------- Phase A (every grid step): stream one (tile_b, tile_k) x block ----------
    part = jnp.dot(x_ref[...], w1x_ref[...], preferred_element_type=f32)

    @pl.when(ki == 0)
    def _init_tile():
        # Fold covariate one-hot contribution and bias in at the first K block.
        oh_t = oh_ref[pl.ds(off, tile_b), :]
        h_s[pl.ds(off, tile_b), :] = (
            part
            + jnp.dot(oh_t, wc_ref[0], preferred_element_type=f32)
            + b_ref[0:1, :])

    @pl.when(ki != 0)
    def _acc_tile():
        h_s[pl.ds(off, tile_b), :] += part

    # One-pass BN statistics (sum / sumsq) accumulated under the DMA-bound stream.
    @pl.when((ki == nk - 1) & (bi == 0))
    def _zero_stats():
        stat_s[...] = jnp.zeros_like(stat_s)

    @pl.when(ki == nk - 1)
    def _accum_stats():
        y0 = h_s[pl.ds(off, tile_b), :]
        stat_s[0:1, :] += jnp.sum(y0, axis=0, keepdims=True)
        stat_s[1:2, :] += jnp.sum(y0 * y0, axis=0, keepdims=True)

    # ---------- Phase B (last grid step): chunked full-batch BN + shared + heads ----------
    @pl.when((ki == nk - 1) & (bi == nb - 1))
    def _finalize():
        B = h_s.shape[0]
        n_chunks = B // fin_chunk
        inv_b = 1.0 / B
        nout_pad = wh_ref.shape[1] // 2

        def bn_scale_shift(layer):
            # BatchNorm1d training-style batch stats (biased var), folded to scale/shift.
            mean = stat_s[0:1, :] * inv_b
            var = jnp.maximum(stat_s[1:2, :] * inv_b - mean * mean, 0.0)
            scale = gam_ref[layer:layer + 1, :] * jax.lax.rsqrt(var + BN_EPS)
            shift = bet_ref[layer:layer + 1, :] - mean * scale
            return scale, shift

        scale, shift = bn_scale_shift(0)

        # encoder_shared: 2 layers, covariates injected into each; processed in
        # fin_chunk-row blocks, in place through h_s (each chunk only needs its own
        # rows once the global stats are known).
        for l in range(2):
            stat_s[...] = jnp.zeros_like(stat_s)
            sc_l, sh_l = scale, shift

            @pl.loop(0, n_chunks)
            def _shared_layer(c):
                o = pl.multiple_of(c * fin_chunk, fin_chunk)
                h = jnp.maximum(h_s[pl.ds(o, fin_chunk), :] * sc_l + sh_l, 0.0)
                # TODO(synk): Dropout(p=0.1) training-mode mask omitted (identity).
                ohc = oh_ref[pl.ds(o, fin_chunk), :]
                y = (jnp.dot(h, wsh_ref[l], preferred_element_type=f32)
                     + jnp.dot(ohc, wc_ref[l + 1], preferred_element_type=f32)
                     + b_ref[l + 1:l + 2, :])
                h_s[pl.ds(o, fin_chunk), :] = y
                stat_s[0:1, :] += jnp.sum(y, axis=0, keepdims=True)
                stat_s[1:2, :] += jnp.sum(y * y, axis=0, keepdims=True)

            scale, shift = bn_scale_shift(l + 1)

        sc2, sh2 = scale, shift

        @pl.loop(0, n_chunks)
        def _heads(c):
            o = pl.multiple_of(c * fin_chunk, fin_chunk)
            h = jnp.maximum(h_s[pl.ds(o, fin_chunk), :] * sc2 + sh2, 0.0)
            # Fused mean|var heads: single (H, 2*nout_pad) matmul.
            mv = jnp.dot(h, wh_ref[...], preferred_element_type=f32) + bh_ref[...]
            q_m = mv[:, :nout_pad]
            q_v = jnp.exp(mv[:, nout_pad:])
            z = q_m + jnp.sqrt(q_v) * eps_ref[pl.ds(o, fin_chunk), :]
            # Lane-dense packed output: each slab is a 128-lane-aligned full store.
            out_ref[pl.ds(o, fin_chunk), 0:nout_pad] = q_m
            out_ref[pl.ds(o, fin_chunk), nout_pad:2 * nout_pad] = q_v
            out_ref[pl.ds(o, fin_chunk), 2 * nout_pad:] = z


def multi_encoder_forward(x, cat, head_id, params, noise, *,
                          tile_b=None, tile_k=None, stream_dtype=jnp.bfloat16):
    """Returns (q_m, q_v, latent) == MultiEncoder.forward(x, head_id, cat)."""
    B, n_input = x.shape
    H = params["n_hidden"]
    n_out = params["n_output"]
    n_cat = params["n_cat"]
    assert n_cat > 1, "kernel assumes one categorical covariate with n_cat > 1"
    ncat_pad = max(8, _ceil_to(n_cat, 8))
    nout_pad = _ceil_to(max(n_out, 1), 128)

    head = params["heads"][head_id]

    def split_cat(w):
        # concat(h, one_hot) @ W  ==  h @ W[:-n_cat]  +  one_hot @ W[-n_cat:]
        wx = w[:-n_cat]
        wcat = jnp.zeros((ncat_pad, H), jnp.float32).at[:n_cat].set(w[-n_cat:])
        return wx, wcat

    w1x, w1c = split_cat(head["w"])
    s0, s1 = params["shared"]
    w2h, w2c = split_cat(s0["w"])
    w3h, w3c = split_cat(s1["w"])

    wc = jnp.stack([w1c, w2c, w3c]).astype(jnp.float32)        # (3, ncat_pad, H)
    wsh = jnp.stack([w2h, w3h]).astype(jnp.float32)            # (2, H, H)
    b = jnp.stack([head["b"], s0["b"], s1["b"]]).astype(jnp.float32)
    gam = jnp.stack([head["gamma"], s0["gamma"], s1["gamma"]]).astype(jnp.float32)
    bet = jnp.stack([head["beta"], s0["beta"], s1["beta"]]).astype(jnp.float32)

    def pad_head(w, bias):
        wp = jnp.zeros((H, nout_pad), jnp.float32).at[:, :n_out].set(w)
        bp = jnp.zeros((nout_pad,), jnp.float32).at[:n_out].set(bias)
        return wp, bp

    wm, bm = pad_head(params["wm"], params["bm"])
    wv, bv = pad_head(params["wv"], params["bv"])
    whead = jnp.concatenate([wm, wv], axis=1)                  # (H, 2*nout_pad)
    bhead = jnp.concatenate([bm, bv])[None, :]                 # (1, 2*nout_pad)

    # ---- layer-0 K tiling (streams arbitrarily large gene counts) ----
    if tile_k is None:
        tile_k = n_input if n_input <= 2048 else 2048
    if tile_k >= n_input:
        tile_k, k_pad = n_input, n_input
    else:
        tile_k = _ceil_to(tile_k, 128)
        k_pad = _ceil_to(n_input, tile_k)
    nk = k_pad // tile_k

    # bf16 streaming of the HBM-bound operands (x, layer-0 weight); f32 accumulate.
    # TODO(synk): bf16 streaming deviates slightly from the f32 torch reference.
    xs = x.astype(stream_dtype)
    w1xs = w1x.astype(stream_dtype)
    if k_pad != n_input:
        xs = jnp.pad(xs, ((0, 0), (0, k_pad - n_input)))
        w1xs = jnp.pad(w1xs, ((0, k_pad - n_input), (0, 0)))

    oh = jax.nn.one_hot(cat, ncat_pad, dtype=jnp.float32)      # (B, ncat_pad)
    eps = jnp.zeros((B, nout_pad), jnp.float32).at[:, :n_out].set(noise)

    # ---- per-generation VMEM budget & batch-tile selection ----
    try:
        vmem_cap = int(pltpu.get_tpu_info().vmem_capacity_bytes)
    except Exception:
        vmem_cap = 64 << 20                 # conservative (v7x-sized) fallback
    vmem_budget = int(vmem_cap * 0.78)      # ~50 MiB on v7x, ~100 MiB on v5e/v6e

    resident = (_vmem_bytes((B, ncat_pad), jnp.float32)         # one-hot (Buffered(1))
                + _vmem_bytes((B, nout_pad), jnp.float32)       # eps
                + _vmem_bytes(wc.shape, jnp.float32)
                + _vmem_bytes(wsh.shape, jnp.float32)
                + 3 * _vmem_bytes((3, H), jnp.float32)
                + _vmem_bytes(whead.shape, jnp.float32)
                + _vmem_bytes(bhead.shape, jnp.float32)
                + _vmem_bytes((B, 3 * nout_pad), jnp.float32)   # packed output
                + _vmem_bytes((B, H), jnp.float32)              # h_s scratch
                + _vmem_bytes((2, H), jnp.float32))             # BN stat scratch

    def footprint(tb):
        streamed = 2 * (_vmem_bytes((tb, tile_k), stream_dtype)
                        + _vmem_bytes((tile_k, H), stream_dtype))
        return resident + streamed

    if tile_b is None:
        cands = [c for c in (1024, 512, 256, 128, 64, 32, 16, 8)
                 if c <= B and B % c == 0]
        if not cands:
            cands = [B]
        tile_b = next((c for c in cands if footprint(c) <= vmem_budget), cands[-1])
    assert B % tile_b == 0, "batch must be divisible by tile_b (full-batch BN)"
    nb = B // tile_b
    fin_chunk = 256 if tile_b % 256 == 0 else tile_b

    vmem_limit = int(max(1.5 * footprint(tile_b) + (4 << 20), 8 << 20))
    vmem_limit = min(vmem_limit, int(vmem_cap * 0.9))

    def build_call(use_buffered):
        def spec(shape, index_map, nbuf=None):
            if nbuf is not None and use_buffered:
                return pl.BlockSpec(shape, index_map,
                                    pipeline_mode=pl.Buffered(nbuf))
            return pl.BlockSpec(shape, index_map)

        def res(shape):
            nd = len(shape)
            return spec(shape, lambda ki, bi, nd=nd: (0,) * nd, nbuf=1)

        return pl.pallas_call(
            functools.partial(multi_encoder_kernel, fin_chunk=fin_chunk),
            out_shape=jax.ShapeDtypeStruct((B, 3 * nout_pad), jnp.float32),
            grid=(nk, nb),
            in_specs=[
                spec((tile_b, tile_k), lambda ki, bi: (bi, ki)),            # x (streamed)
                res((B, ncat_pad)),                                         # one-hot
                res((B, nout_pad)),                                         # reparam eps
                spec((tile_k, H), lambda ki, bi: (ki, 0),
                     nbuf=(1 if nk == 1 else None)),                        # layer-0 W
                res(wc.shape), res(wsh.shape), res(b.shape),
                res(gam.shape), res(bet.shape),
                res(whead.shape), res(bhead.shape),
            ],
            out_specs=res((B, 3 * nout_pad)),
            scratch_shapes=[pltpu.VMEM((B, H), jnp.float32),   # resident activations
                            pltpu.VMEM((2, H), jnp.float32)],  # BN sum / sumsq
            compiler_params=pltpu.CompilerParams(
                # BN couples the whole batch; K is a reduction -> both "arbitrary".
                dimension_semantics=("arbitrary", "arbitrary"),
                vmem_limit_bytes=vmem_limit),
        )(xs, oh, eps, w1xs, wc, wsh, b, gam, bet, whead, bhead)

    try:
        out = build_call(True)
    except Exception:
        # Compatibility fallback for JAX versions without BlockSpec pipeline_mode.
        out = build_call(False)

    q_m = out[:, :n_out]
    q_v = out[:, nout_pad:nout_pad + n_out]
    z = out[:, 2 * nout_pad:2 * nout_pad + n_out]
    return q_m, q_v, z


def multi_encoder_reference(x, cat, head_id, params, noise):
    """Pure-JAX reference matching the torch module (train-mode BN, eval dropout)."""
    n_cat = params["n_cat"]
    oh = jax.nn.one_hot(cat, n_cat, dtype=jnp.float32)

    def fc_layer(h, p):
        y = jnp.concatenate([h, oh], axis=1) @ p["w"] + p["b"]
        mean = jnp.mean(y, axis=0)
        var = jnp.mean((y - mean) ** 2, axis=0)          # biased batch variance
        y = (y - mean) * jax.lax.rsqrt(var + BN_EPS) * p["gamma"] + p["beta"]
        return jnp.maximum(y, 0.0)

    h = fc_layer(x, params["heads"][head_id])
    for p in params["shared"]:
        h = fc_layer(h, p)
    q_m = h @ params["wm"] + params["bm"]
    q_v = jnp.exp(h @ params["wv"] + params["bv"])
    return q_m, q_v, q_m + jnp.sqrt(q_v) * noise


def init_params(key, n_heads, n_input_list, n_hidden, n_output, n_cat):
    """Synthetic params, torch-style uniform init; Linear weights stored (in, out)."""
    def linear(k, d_in, d_out):
        kw, kb = jax.random.split(k)
        s = 1.0 / jnp.sqrt(d_in)
        return (jax.random.uniform(kw, (d_in, d_out), jnp.float32, -s, s),
                jax.random.uniform(kb, (d_out,), jnp.float32, -s, s))

    keys = jax.random.split(key, n_heads + 4)
    heads = []
    for i in range(n_heads):
        w, b = linear(keys[i], n_input_list[i] + n_cat, n_hidden)
        heads.append({"w": w, "b": b,
                      "gamma": jnp.ones((n_hidden,), jnp.float32),
                      "beta": jnp.zeros((n_hidden,), jnp.float32)})
    shared = []
    for l in range(2):   # n_layers_shared = 2 (module default)
        w, b = linear(keys[n_heads + l], n_hidden + n_cat, n_hidden)
        shared.append({"w": w, "b": b,
                       "gamma": jnp.ones((n_hidden,), jnp.float32),
                       "beta": jnp.zeros((n_hidden,), jnp.float32)})
    wm, bm = linear(keys[n_heads + 2], n_hidden, n_output)
    wv, bv = linear(keys[n_heads + 3], n_hidden, n_output)
    return {"n_hidden": n_hidden, "n_output": n_output, "n_cat": n_cat,
            "heads": heads, "shared": shared,
            "wm": wm, "bm": bm, "wv": wv, "bv": bv}


if __name__ == "__main__":
    B, N_HIDDEN, N_OUTPUT, N_CAT = 256, 128, 16, 3
    N_HEADS, N_INPUT_LIST = 2, [256, 192]
    HEAD_ID = 0

    key = jax.random.PRNGKey(0)
    k_param, k_x, k_cat, k_noise = jax.random.split(key, 4)

    params = init_params(k_param, N_HEADS, N_INPUT_LIST, N_HIDDEN, N_OUTPUT, N_CAT)
    x = jax.random.normal(k_x, (B, N_INPUT_LIST[HEAD_ID]), jnp.float32)
    cat = jax.random.randint(k_cat, (B,), 0, N_CAT, jnp.int32)
    noise = jax.random.normal(k_noise, (B, N_OUTPUT), jnp.float32)   # reparam eps

    # tile_b=128, tile_k=128 -> 2x2 grid: exercises K accumulation, multi-tile
    # BN-stat accumulation and the chunked finalize (2 chunks).
    q_m, q_v, latent = multi_encoder_forward(x, cat, HEAD_ID, params, noise,
                                             tile_b=128, tile_k=128)
    jax.block_until_ready((q_m, q_v, latent))

    assert q_m.shape == (B, N_OUTPUT) and q_v.shape == (B, N_OUTPUT)
    assert latent.shape == (B, N_OUTPUT)
    assert bool(jnp.all(q_v > 0))
    assert bool(jnp.all(jnp.isfinite(q_m))) and bool(jnp.all(jnp.isfinite(latent)))

    # Self-check vs the f32 reference; loose tolerance covers bf16 streaming of
    # x / layer-0 weight (errors ~1e-3 expected, limits well above that).
    r_m, r_v, r_z = multi_encoder_reference(x, cat, HEAD_ID, params, noise)
    assert float(jnp.max(jnp.abs(q_m - r_m))) < 7e-2
    assert float(jnp.max(jnp.abs(jnp.log(q_v) - jnp.log(r_v)))) < 7e-2
    assert float(jnp.max(jnp.abs(latent - r_z))) < 1.5e-1
    print("KERNEL_OK")
</pallas_src>

<mosaic_0001>
module attributes {stable_mosaic.version = 11 : i64} {
  func.func @multi_encoder_kernel(%arg0: i32, %arg1: i32, %arg2: memref<128x128xbf16, #tpu.memory_space<vmem>>, %arg3: memref<256x8xf32, #tpu.memory_space<vmem>>, %arg4: memref<256x128xf32, #tpu.memory_space<vmem>>, %arg5: memref<128x128xbf16, #tpu.memory_space<vmem>>, %arg6: memref<3x8x128xf32, #tpu.memory_space<vmem>>, %arg7: memref<2x128x128xf32, #tpu.memory_space<vmem>>, %arg8: memref<3x128xf32, #tpu.memory_space<vmem>>, %arg9: memref<3x128xf32, #tpu.memory_space<vmem>>, %arg10: memref<3x128xf32, #tpu.memory_space<vmem>>, %arg11: memref<128x256xf32, #tpu.memory_space<vmem>>, %arg12: memref<1x256xf32, #tpu.memory_space<vmem>>, %arg13: memref<256x384xf32, #tpu.memory_space<vmem>>, %arg14: memref<256x128xf32, #tpu.memory_space<vmem>>, %arg15: memref<2x128xf32, #tpu.memory_space<vmem>>) attributes {dimension_semantics = [#tpu.dimension_semantics<arbitrary>, #tpu.dimension_semantics<arbitrary>], iteration_bounds = array<i64: 2, 2>, scalar_prefetch = 0 : i64, scratch_operands = 2 : i64, tpu.core_type = #tpu.core_type<tc>, window_params = [{transform_indices = @transform_0, window_bounds = array<i64: 128, 128>}, {pipeline_mode = #tpu.pipeline_mode<synchronous>, transform_indices = @transform_1, window_bounds = array<i64: 256, 8>}, {pipeline_mode = #tpu.pipeline_mode<synchronous>, transform_indices = @transform_2, window_bounds = array<i64: 256, 128>}, {transform_indices = @transform_3, window_bounds = array<i64: 128, 128>}, {pipeline_mode = #tpu.pipeline_mode<synchronous>, transform_indices = @transform_4, window_bounds = array<i64: 3, 8, 128>}, {pipeline_mode = #tpu.pipeline_mode<synchronous>, transform_indices = @transform_5, window_bounds = array<i64: 2, 128, 128>}, {pipeline_mode = #tpu.pipeline_mode<synchronous>, transform_indices = @transform_6, window_bounds = array<i64: 3, 128>}, {pipeline_mode = #tpu.pipeline_mode<synchronous>, transform_indices = @transform_7, window_bounds = array<i64: 3, 128>}, {pipeline_mode = #tpu.pipeline_mode<synchronous>, transform_indices = @transform_8, window_bounds = array<i64: 3, 128>}, {pipeline_mode = #tpu.pipeline_mode<synchronous>, transform_indices = @transform_9, window_bounds = array<i64: 128, 256>}, {pipeline_mode = #tpu.pipeline_mode<synchronous>, transform_indices = @transform_10, window_bounds = array<i64: 1, 256>}, {pipeline_mode = #tpu.pipeline_mode<synchronous>, transform_indices = @transform_11, window_bounds = array<i64: 256, 384>}]} {
    %c128_i32 = arith.constant 128 : i32
    %0 = arith.muli %arg1, %c128_i32 : i32
    %1 = tpu.assume_multiple %0, 128 : i32
    %c0 = arith.constant 0 : index
    %c0_0 = arith.constant 0 : index
    %2 = vector.load %arg2[%c0, %c0_0] : memref<128x128xbf16, #tpu.memory_space<vmem>>, vector<128x128xbf16>
    %c0_1 = arith.constant 0 : index
    %c0_2 = arith.constant 0 : index
    %3 = vector.load %arg5[%c0_1, %c0_2] : memref<128x128xbf16, #tpu.memory_space<vmem>>, vector<128x128xbf16>
    %cst = arith.constant dense<0.000000e+00> : vector<128x128xf32>
    %4 = tpu.matmul %2, %3, %cst {dimension_numbers = #tpu.dot_dimension_numbers<[1], [0], [0], [1], [0, 0, 1, 1], [], []>} : vector<128x128xbf16>, vector<128x128xbf16>, vector<128x128xf32> -> vector<128x128xf32>
    %c0_i32 = arith.constant 0 : i32
    %5 = arith.cmpi eq, %arg0, %c0_i32 : i32
    %6 = arith.extui %5 : i1 to i32
    %c0_i32_3 = arith.constant 0 : i32
    %7 = arith.cmpi ne, %6, %c0_i32_3 : i32
    scf.if %7 {
      %24 = arith.index_cast %1 : i32 to index
      %c0_13 = arith.constant 0 : index
      %25 = vector.load %arg3[%24, %c0_13] : memref<256x8xf32, #tpu.memory_space<vmem>>, vector<128x8xf32>
      %c0_14 = arith.constant 0 : index
      %c0_15 = arith.constant 0 : index
      %c0_16 = arith.constant 0 : index
      %26 = vector.load %arg6[%c0_14, %c0_15, %c0_16] : memref<3x8x128xf32, #tpu.memory_space<vmem>>, vector<1x8x128xf32>
      %27 = vector.shape_cast %26 : vector<1x8x128xf32> to vector<8x128xf32>
      %cst_17 = arith.constant dense<0.000000e+00> : vector<128x128xf32>
      %28 = tpu.matmul %25, %27, %cst_17 {dimension_numbers = #tpu.dot_dimension_numbers<[1], [0], [0], [1], [0, 0, 1, 1], [], []>} : vector<128x8xf32>, vector<8x128xf32>, vector<128x128xf32> -> vector<128x128xf32>
      %29 = arith.addf %4, %28 : vector<128x128xf32>
      %c0_18 = arith.constant 0 : index
      %c0_19 = arith.constant 0 : index
      %30 = vector.load %arg8[%c0_18, %c0_19] : memref<3x128xf32, #tpu.memory_space<vmem>>, vector<1x128xf32>
      %31 = vector.broadcast %30 : vector<1x128xf32> to vector<128x128xf32>
      %32 = arith.addf %29, %31 : vector<128x128xf32>
      %33 = arith.index_cast %1 : i32 to index
      %c0_20 = arith.constant 0 : index
      %34 = vector.load %arg14[%33, %c0_20] : memref<256x128xf32, #tpu.memory_space<vmem>>, vector<128x128xf32>
      tpu.vector_store %arg14[%33, %c0_20], %32 {strides = array<i32>} : memref<256x128xf32, #tpu.memory_space<vmem>>, vector<128x128xf32>,
    } else {
    }
    %c0_i32_4 = arith.constant 0 : i32
    %8 = arith.cmpi ne, %arg0, %c0_i32_4 : i32
    %9 = arith.extui %8 : i1 to i32
    %c0_i32_5 = arith.constant 0 : i32
    %10 = arith.cmpi ne, %9, %c0_i32_5 : i32
    scf.if %10 {
      %24 = arith.index_cast %1 : i32 to index
      %c0_13 = arith.constant 0 : index
      %25 = vector.load %arg14[%24, %c0_13] : memref<256x128xf32, #tpu.memory_space<vmem>>, vector<128x128xf32>
      %26 = arith.addf %25, %4 : vector<128x128xf32>
      %27 = arith.index_cast %1 : i32 to index
      %c0_14 = arith.constant 0 : index
      %28 = vector.load %arg14[%27, %c0_14] : memref<256x128xf32, #tpu.memory_space<vmem>>, vector<128x128xf32>
      tpu.vector_store %arg14[%27, %c0_14], %26 {strides = array<i32>} : memref<256x128xf32, #tpu.memory_space<vmem>>, vector<128x128xf32>,
    } else {
    }
    %c1_i32 = arith.constant 1 : i32
    %11 = arith.cmpi eq, %arg0, %c1_i32 : i32
    %c0_i32_6 = arith.constant 0 : i32
    %12 = arith.cmpi eq, %arg1, %c0_i32_6 : i32
    %13 = arith.andi %11, %12 : i1
    %14 = arith.extui %13 : i1 to i32
    %c0_i32_7 = arith.constant 0 : i32
    %15 = arith.cmpi ne, %14, %c0_i32_7 : i32
    scf.if %15 {
      %cst_13 = arith.constant 0.000000e+00 : f32
      %24 = vector.broadcast %cst_13 : f32 to vector<2x128xf32>
      %c0_14 = arith.constant 0 : index
      %c0_15 = arith.constant 0 : index
      %25 = vector.load %arg15[%c0_14, %c0_15] : memref<2x128xf32, #tpu.memory_space<vmem>>, vector<2x128xf32>
      tpu.vector_store %arg15[%c0_14, %c0_15], %24 {strides = array<i32>} : memref<2x128xf32, #tpu.memory_space<vmem>>, vector<2x128xf32>,
    } else {
    }
    %c1_i32_8 = arith.constant 1 : i32
    %16 = arith.cmpi eq, %arg0, %c1_i32_8 : i32
    %17 = arith.extui %16 : i1 to i32
    %c0_i32_9 = arith.constant 0 : i32
    %18 = arith.cmpi ne, %17, %c0_i32_9 : i32
    scf.if %18 {
      %24 = arith.index_cast %1 : i32 to index
      %c0_13 = arith.constant 0 : index
      %25 = vector.load %arg14[%24, %c0_13] : memref<256x128xf32, #tpu.memory_space<vmem>>, vector<128x128xf32>
      %c0_14 = arith.constant 0 : index
      %c0_15 = arith.constant 0 : index
      %26 = vector.load %arg15[%c0_14, %c0_15] : memref<2x128xf32, #tpu.memory_space<vmem>>, vector<1x128xf32>
      %cst_16 = arith.constant dense<0.000000e+00> : vector<128xf32>
      %27 = vector.multi_reduction <add>, %25, %cst_16 [0] : vector<128x128xf32> to vector<128xf32>
      %28 = vector.shape_cast %27 : vector<128xf32> to vector<1x128xf32>
      %29 = arith.addf %26, %28 : vector<1x128xf32>
      %c0_17 = arith.constant 0 : index
      %c0_18 = arith.constant 0 : index
      %30 = vector.load %arg15[%c0_17, %c0_18] : memref<2x128xf32, #tpu.memory_space<vmem>>, vector<1x128xf32>
      tpu.vector_store %arg15[%c0_17, %c0_18], %29 {strides = array<i32>} : memref<2x128xf32, #tpu.memory_space<vmem>>, vector<1x128xf32>,
      %c1 = arith.constant 1 : index
      %c0_19 = arith.constant 0 : index
      %31 = vector.load %arg15[%c1, %c0_19] : memref<2x128xf32, #tpu.memory_space<vmem>>, vector<1x128xf32>
      %32 = arith.mulf %25, %25 : vector<128x128xf32>
      %cst_20 = arith.constant dense<0.000000e+00> : vector<128xf32>
      %33 = vector.multi_reduction <add>, %32, %cst_20 [0] : vector<128x128xf32> to vector<128xf32>
      %34 = vector.shape_cast %33 : vector<128xf32> to vector<1x128xf32>
      %35 = arith.addf %31, %34 : vector<1x128xf32>
      %c1_21 = arith.constant 1 : index
      %c0_22 = arith.constant 0 : index
      %36 = vector.load %arg15[%c1_21, %c0_22] : memref<2x128xf32, #tpu.memory_space<vmem>>, vector<1x128xf32>
      tpu.vector_store %arg15[%c1_21, %c0_22], %35 {strides = array<i32>} : memref<2x128xf32, #tpu.memory_space<vmem>>, vector<1x128xf32>,
    } else {
    }
    %c1_i32_10 = arith.constant 1 : i32
    %19 = arith.cmpi eq, %arg0, %c1_i32_10 : i32
    %c1_i32_11 = arith.constant 1 : i32
    %20 = arith.cmpi eq, %arg1, %c1_i32_11 : i32
    %21 = arith.andi %19, %20 : i1
    %22 = arith.extui %21 : i1 to i32
    %c0_i32_12 = arith.constant 0 : i32
    %23 = arith.cmpi ne, %22, %c0_i32_12 : i32
    scf.if %23 {
      %c0_13 = arith.constant 0 : index
      %c0_14 = arith.constant 0 : index
      %24 = vector.load %arg15[%c0_13, %c0_14] : memref<2x128xf32, #tpu.memory_space<vmem>>, vector<1x128xf32>
      %cst_15 = arith.constant 3.906250e-03 : f32
      %25 = vector.broadcast %cst_15 : f32 to vector<1x128xf32>
      %26 = arith.mulf %24, %25 : vector<1x128xf32>
      %c1 = arith.constant 1 : index
      %c0_16 = arith.constant 0 : index
      %27 = vector.load %arg15[%c1, %c0_16] : memref<2x128xf32, #tpu.memory_space<vmem>>, vector<1x128xf32>
      %cst_17 = arith.constant 3.906250e-03 : f32
      %28 = vector.broadcast %cst_17 : f32 to vector<1x128xf32>
      %29 = arith.mulf %27, %28 : vector<1x128xf32>
      %30 = arith.mulf %26, %26 : vector<1x128xf32>
      %31 = arith.subf %29, %30 : vector<1x128xf32>
      %cst_18 = arith.constant 0.000000e+00 : f32
      %32 = vector.broadcast %cst_18 : f32 to vector<1x128xf32>
      %33 = arith.maximumf %31, %32 : vector<1x128xf32>
      %c0_19 = arith.constant 0 : index
      %c0_20 = arith.constant 0 : index
      %34 = vector.load %arg9[%c0_19, %c0_20] : memref<3x128xf32, #tpu.memory_space<vmem>>, vector<1x128xf32>
      %cst_21 = arith.constant 1.000000e-03 : f32
      %35 = vector.broadcast %cst_21 : f32 to vector<1x128xf32>
      %36 = arith.addf %33, %35 : vector<1x128xf32>
      %37 = math.rsqrt %36 : vector<1x128xf32>
      %38 = arith.mulf %34, %37 : vector<1x128xf32>
      %c0_22 = arith.constant 0 : index
      %c0_23 = arith.constant 0 : index
      %39 = vector.load %arg10[%c0_22, %c0_23] : memref<3x128xf32, #tpu.memory_space<vmem>>, vector<1x128xf32>
      %40 = arith.mulf %26, %38 : vector<1x128xf32>
      %41 = arith.subf %39, %40 : vector<1x128xf32>
      %cst_24 = arith.constant 0.000000e+00 : f32
      %42 = vector.broadcast %cst_24 : f32 to vector<2x128xf32>
      %c0_25 = arith.constant 0 : index
      %c0_26 = arith.constant 0 : index
      %43 = vector.load %arg15[%c0_25, %c0_26] : memref<2x128xf32, #tpu.memory_space<vmem>>, vector<2x128xf32>
      tpu.vector_store %arg15[%c0_25, %c0_26], %42 {strides = array<i32>} : memref<2x128xf32, #tpu.memory_space<vmem>>, vector<2x128xf32>,
      %c0_i32_27 = arith.constant 0 : i32
      %c2_i32 = arith.constant 2 : i32
      %44 = arith.addi %c0_i32_27, %c2_i32 : i32
      %c1_i32_28 = arith.constant 1 : i32
      scf.for %arg16 = %c0_i32_27 to %44 step %c1_i32_28  : i32 {
        %c1_i32_64 = arith.constant 1 : i32
        %85 = arith.muli %arg16, %c1_i32_64 : i32
        %c0_i32_65 = arith.constant 0 : i32
        %86 = arith.addi %c0_i32_65, %85 : i32
        %c128_i32_66 = arith.constant 128 : i32
        %87 = arith.muli %86, %c128_i32_66 : i32
        %88 = tpu.assume_multiple %87, 128 : i32
        %89 = arith.index_cast %88 : i32 to index
        %c0_67 = arith.constant 0 : index
        %90 = vector.load %arg14[%89, %c0_67] : memref<256x128xf32, #tpu.memory_space<vmem>>, vector<128x128xf32>
        %91 = vector.broadcast %38 : vector<1x128xf32> to vector<128x128xf32>
        %92 = arith.mulf %90, %91 : vector<128x128xf32>
        %93 = vector.broadcast %41 : vector<1x128xf32> to vector<128x128xf32>
        %94 = arith.addf %92, %93 : vector<128x128xf32>
        %cst_68 = arith.constant 0.000000e+00 : f32
        %95 = vector.broadcast %cst_68 : f32 to vector<128x128xf32>
        %96 = arith.maximumf %94, %95 : vector<128x128xf32>
        %97 = arith.index_cast %88 : i32 to index
        %c0_69 = arith.constant 0 : index
        %98 = vector.load %arg3[%97, %c0_69] : memref<256x8xf32, #tpu.memory_space<vmem>>, vector<128x8xf32>
        %c0_70 = arith.constant 0 : index
        %c0_71 = arith.constant 0 : index
        %c0_72 = arith.constant 0 : index
        %99 = vector.load %arg7[%c0_70, %c0_71, %c0_72] : memref<2x128x128xf32, #tpu.memory_space<vmem>>, vector<1x128x128xf32>
        %100 = vector.shape_cast %99 : vector<1x128x128xf32> to vector<128x128xf32>
        %cst_73 = arith.constant dense<0.000000e+00> : vector<128x128xf32>
        %101 = tpu.matmul %96, %100, %cst_73 {dimension_numbers = #tpu.dot_dimension_numbers<[1], [0], [0], [1], [0, 0, 1, 1], [], []>} : vector<128x128xf32>, vector<128x128xf32>, vector<128x128xf32> -> vector<128x128xf32>
        %c1_74 = arith.constant 1 : index
        %c0_75 = arith.constant 0 : index
        %c0_76 = arith.constant 0 : index
        %102 = vector.load %arg6[%c1_74, %c0_75, %c0_76] : memref<3x8x128xf32, #tpu.memory_space<vmem>>, vector<1x8x128xf32>
        %103 = vector.shape_cast %102 : vector<1x8x128xf32> to vector<8x128xf32>
        %cst_77 = arith.constant dense<0.000000e+00> : vector<128x128xf32>
        %104 = tpu.matmul %98, %103, %cst_77 {dimension_numbers = #tpu.dot_dimension_numbers<[1], [0], [0], [1], [0, 0, 1, 1], [], []>} : vector<128x8xf32>, vector<8x128xf32>, vector<128x128xf32> -> vector<128x128xf32>
        %105 = arith.addf %101, %104 : vector<128x128xf32>
        %c1_78 = arith.constant 1 : index
        %c0_79 = arith.constant 0 : index
        %106 = vector.load %arg8[%c1_78, %c0_79] : memref<3x128xf32, #tpu.memory_space<vmem>>, vector<1x128xf32>
        %107 = vector.broadcast %106 : vector<1x128xf32> to vector<128x128xf32>
        %108 = arith.addf %105, %107 : vector<128x128xf32>
        %109 = arith.index_cast %88 : i32 to index
        %c0_80 = arith.constant 0 : index
        %110 = vector.load %arg14[%109, %c0_80] : memref<256x128xf32, #tpu.memory_space<vmem>>, vector<128x128xf32>
        tpu.vector_store %arg14[%109, %c0_80], %108 {strides = array<i32>} : memref<256x128xf32, #tpu.memory_space<vmem>>, vector<128x128xf32>,
        %c0_81 = arith.constant 0 : index
        %c0_82 = arith.constant 0 : index
        %111 = vector.load %arg15[%c0_81, %c0_82] : memref<2x128xf32, #tpu.memory_space<vmem>>, vector<1x128xf32>
        %cst_83 = arith.constant dense<0.000000e+00> : vector<128xf32>
        %112 = vector.multi_reduction <add>, %108, %cst_83 [0] : vector<128x128xf32> to vector<128xf32>
        %113 = vector.shape_cast %112 : vector<128xf32> to vector<1x128xf32>
        %114 = arith.addf %111, %113 : vector<1x128xf32>
        %c0_84 = arith.constant 0 : index
        %c0_85 = arith.constant 0 : index
        %115 = vector.load %arg15[%c0_84, %c0_85] : memref<2x128xf32, #tpu.memory_space<vmem>>, vector<1x128xf32>
        tpu.vector_store %arg15[%c0_84, %c0_85], %114 {strides = array<i32>} : memref<2x128xf32, #tpu.memory_space<vmem>>, vector<1x128xf32>,
        %c1_86 = arith.constant 1 : index
        %c0_87 = arith.constant 0 : index
        %116 = vector.load %arg15[%c1_86, %c0_87] : memref<2x128xf32, #tpu.memory_space<vmem>>, vector<1x128xf32>
        %117 = arith.mulf %108, %108 : vector<128x128xf32>
        %cst_88 = arith.constant dense<0.000000e+00> : vector<128xf32>
        %118 = vector.multi_reduction <add>, %117, %cst_88 [0] : vector<128x128xf32> to vector<128xf32>
        %119 = vector.shape_cast %118 : vector<128xf32> to vector<1x128xf32>
        %120 = arith.addf %116, %119 : vector<1x128xf32>
        %c1_89 = arith.constant 1 : index
        %c0_90 = arith.constant 0 : index
        %121 = vector.load %arg15[%c1_89, %c0_90] : memref<2x128xf32, #tpu.memory_space<vmem>>, vector<1x128xf32>
        tpu.vector_store %arg15[%c1_89, %c0_90], %120 {strides = array<i32>} : memref<2x128xf32, #tpu.memory_space<vmem>>, vector<1x128xf32>,
      }
      %c2_i32_29 = arith.constant 2 : i32
      %c0_30 = arith.constant 0 : index
      %c0_31 = arith.constant 0 : index
      %45 = vector.load %arg15[%c0_30, %c0_31] : memref<2x128xf32, #tpu.memory_space<vmem>>, vector<1x128xf32>
      %cst_32 = arith.constant 3.906250e-03 : f32
      %46 = vector.broadcast %cst_32 : f32 to vector<1x128xf32>
      %47 = arith.mulf %45, %46 : vector<1x128xf32>
      %c1_33 = arith.constant 1 : index
      %c0_34 = arith.constant 0 : index
      %48 = vector.load %arg15[%c1_33, %c0_34] : memref<2x128xf32, #tpu.memory_space<vmem>>, vector<1x128xf32>
      %cst_35 = arith.constant 3.906250e-03 : f32
      %49 = vector.broadcast %cst_35 : f32 to vector<1x128xf32>
      %50 = arith.mulf %48, %49 : vector<1x128xf32>
      %51 = arith.mulf %47, %47 : vector<1x128xf32>
      %52 = arith.subf %50, %51 : vector<1x128xf32>
      %cst_36 = arith.constant 0.000000e+00 : f32
      %53 = vector.broadcast %cst_36 : f32 to vector<1x128xf32>
      %54 = arith.maximumf %52, %53 : vector<1x128xf32>
      %c1_37 = arith.constant 1 : index
      %c0_38 = arith.constant 0 : index
      %55 = vector.load %arg9[%c1_37, %c0_38] : memref<3x128xf32, #tpu.memory_space<vmem>>, vector<1x128xf32>
      %cst_39 = arith.constant 1.000000e-03 : f32
      %56 = vector.broadcast %cst_39 : f32 to vector<1x128xf32>
      %57 = arith.addf %54, %56 : vector<1x128xf32>
      %58 = math.rsqrt %57 : vector<1x128xf32>
      %59 = arith.mulf %55, %58 : vector<1x128xf32>
      %c1_40 = arith.constant 1 : index
      %c0_41 = arith.constant 0 : index
      %60 = vector.load %arg10[%c1_40, %c0_41] : memref<3x128xf32, #tpu.memory_space<vmem>>, vector<1x128xf32>
      %61 = arith.mulf %47, %59 : vector<1x128xf32>
      %62 = arith.subf %60, %61 : vector<1x128xf32>
      %cst_42 = arith.constant 0.000000e+00 : f32
      %63 = vector.broadcast %cst_42 : f32 to vector<2x128xf32>
      %c0_43 = arith.constant 0 : index
      %c0_44 = arith.constant 0 : index
      %64 = vector.load %arg15[%c0_43, %c0_44] : memref<2x128xf32, #tpu.memory_space<vmem>>, vector<2x128xf32>
      tpu.vector_store %arg15[%c0_43, %c0_44], %63 {strides = array<i32>} : memref<2x128xf32, #tpu.memory_space<vmem>>, vector<2x128xf32>,
      %c0_i32_45 = arith.constant 0 : i32
      %c2_i32_46 = arith.constant 2 : i32
      %65 = arith.addi %c0_i32_45, %c2_i32_46 : i32
      %c1_i32_47 = arith.constant 1 : i32
      scf.for %arg16 = %c0_i32_45 to %65 step %c1_i32_47  : i32 {
        %c1_i32_64 = arith.constant 1 : i32
        %85 = arith.muli %arg16, %c1_i32_64 : i32
        %c0_i32_65 = arith.constant 0 : i32
        %86 = arith.addi %c0_i32_65, %85 : i32
        %c128_i32_66 = arith.constant 128 : i32
        %87 = arith.muli %86, %c128_i32_66 : i32
        %88 = tpu.assume_multiple %87, 128 : i32
        %89 = arith.index_cast %88 : i32 to index
        %c0_67 = arith.constant 0 : index
        %90 = vector.load %arg14[%89, %c0_67] : memref<256x128xf32, #tpu.memory_space<vmem>>, vector<128x128xf32>
        %91 = vector.broadcast %59 : vector<1x128xf32> to vector<128x128xf32>
        %92 = arith.mulf %90, %91 : vector<128x128xf32>
        %93 = vector.broadcast %62 : vector<1x128xf32> to vector<128x128xf32>
        %94 = arith.addf %92, %93 : vector<128x128xf32>
        %cst_68 = arith.constant 0.000000e+00 : f32
        %95 = vector.broadcast %cst_68 : f32 to vector<128x128xf32>
        %96 = arith.maximumf %94, %95 : vector<128x128xf32>
        %97 = arith.index_cast %88 : i32 to index
        %c0_69 = arith.constant 0 : index
        %98 = vector.load %arg3[%97, %c0_69] : memref<256x8xf32, #tpu.memory_space<vmem>>, vector<128x8xf32>
        %c1_70 = arith.constant 1 : index
        %c0_71 = arith.constant 0 : index
        %c0_72 = arith.constant 0 : index
        %99 = vector.load %arg7[%c1_70, %c0_71, %c0_72] : memref<2x128x128xf32, #tpu.memory_space<vmem>>, vector<1x128x128xf32>
        %100 = vector.shape_cast %99 : vector<1x128x128xf32> to vector<128x128xf32>
        %cst_73 = arith.constant dense<0.000000e+00> : vector<128x128xf32>
        %101 = tpu.matmul %96, %100, %cst_73 {dimension_numbers = #tpu.dot_dimension_numbers<[1], [0], [0], [1], [0, 0, 1, 1], [], []>} : vector<128x128xf32>, vector<128x128xf32>, vector<128x128xf32> -> vector<128x128xf32>
        %c2_74 = arith.constant 2 : index
        %c0_75 = arith.constant 0 : index
        %c0_76 = arith.constant 0 : index
        %102 = vector.load %arg6[%c2_74, %c0_75, %c0_76] : memref<3x8x128xf32, #tpu.memory_space<vmem>>, vector<1x8x128xf32>
        %103 = vector.shape_cast %102 : vector<1x8x128xf32> to vector<8x128xf32>
        %cst_77 = arith.constant dense<0.000000e+00> : vector<128x128xf32>
        %104 = tpu.matmul %98, %103, %cst_77 {dimension_numbers = #tpu.dot_dimension_numbers<[1], [0], [0], [1], [0, 0, 1, 1], [], []>} : vector<128x8xf32>, vector<8x128xf32>, vector<128x128xf32> -> vector<128x128xf32>
        %105 = arith.addf %101, %104 : vector<128x128xf32>
        %c2_78 = arith.constant 2 : index
        %c0_79 = arith.constant 0 : index
        %106 = vector.load %arg8[%c2_78, %c0_79] : memref<3x128xf32, #tpu.memory_space<vmem>>, vector<1x128xf32>
        %107 = vector.broadcast %106 : vector<1x128xf32> to vector<128x128xf32>
        %108 = arith.addf %105, %107 : vector<128x128xf32>
        %109 = arith.index_cast %88 : i32 to index
        %c0_80 = arith.constant 0 : index
        %110 = vector.load %arg14[%109, %c0_80] : memref<256x128xf32, #tpu.memory_space<vmem>>, vector<128x128xf32>
        tpu.vector_store %arg14[%109, %c0_80], %108 {strides = array<i32>} : memref<256x128xf32, #tpu.memory_space<vmem>>, vector<128x128xf32>,
        %c0_81 = arith.constant 0 : index
        %c0_82 = arith.constant 0 : index
        %111 = vector.load %arg15[%c0_81, %c0_82] : memref<2x128xf32, #tpu.memory_space<vmem>>, vector<1x128xf32>
        %cst_83 = arith.constant dense<0.000000e+00> : vector<128xf32>
        %112 = vector.multi_reduction <add>, %108, %cst_83 [0] : vector<128x128xf32> to vector<128xf32>
        %113 = vector.shape_cast %112 : vector<128xf32> to vector<1x128xf32>
        %114 = arith.addf %111, %113 : vector<1x128xf32>
        %c0_84 = arith.constant 0 : index
        %c0_85 = arith.constant 0 : index
        %115 = vector.load %arg15[%c0_84, %c0_85] : memref<2x128xf32, #tpu.memory_space<vmem>>, vector<1x128xf32>
        tpu.vector_store %arg15[%c0_84, %c0_85], %114 {strides = array<i32>} : memref<2x128xf32, #tpu.memory_space<vmem>>, vector<1x128xf32>,
        %c1_86 = arith.constant 1 : index
        %c0_87 = arith.constant 0 : index
        %116 = vector.load %arg15[%c1_86, %c0_87] : memref<2x128xf32, #tpu.memory_space<vmem>>, vector<1x128xf32>
        %117 = arith.mulf %108, %108 : vector<128x128xf32>
        %cst_88 = arith.constant dense<0.000000e+00> : vector<128xf32>
        %118 = vector.multi_reduction <add>, %117, %cst_88 [0] : vector<128x128xf32> to vector<128xf32>
        %119 = vector.shape_cast %118 : vector<128xf32> to vector<1x128xf32>
        %120 = arith.addf %116, %119 : vector<1x128xf32>
        %c1_89 = arith.constant 1 : index
        %c0_90 = arith.constant 0 : index
        %121 = vector.load %arg15[%c1_89, %c0_90] : memref<2x128xf32, #tpu.memory_space<vmem>>, vector<1x128xf32>
        tpu.vector_store %arg15[%c1_89, %c0_90], %120 {strides = array<i32>} : memref<2x128xf32, #tpu.memory_space<vmem>>, vector<1x128xf32>,
      }
      %c2_i32_48 = arith.constant 2 : i32
      %c0_49 = arith.constant 0 : index
      %c0_50 = arith.constant 0 : index
      %66 = vector.load %arg15[%c0_49, %c0_50] : memref<2x128xf32, #tpu.memory_space<vmem>>, vector<1x128xf32>
      %cst_51 = arith.constant 3.906250e-03 : f32
      %67 = vector.broadcast %cst_51 : f32 to vector<1x128xf32>
      %68 = arith.mulf %66, %67 : vector<1x128xf32>
      %c1_52 = arith.constant 1 : index
      %c0_53 = arith.constant 0 : index
      %69 = vector.load %arg15[%c1_52, %c0_53] : memref<2x128xf32, #tpu.memory_space<vmem>>, vector<1x128xf32>
      %cst_54 = arith.constant 3.906250e-03 : f32
      %70 = vector.broadcast %cst_54 : f32 to vector<1x128xf32>
      %71 = arith.mulf %69, %70 : vector<1x128xf32>
      %72 = arith.mulf %68, %68 : vector<1x128xf32>
      %73 = arith.subf %71, %72 : vector<1x128xf32>
      %cst_55 = arith.constant 0.000000e+00 : f32
      %74 = vector.broadcast %cst_55 : f32 to vector<1x128xf32>
      %75 = arith.maximumf %73, %74 : vector<1x128xf32>
      %c2 = arith.constant 2 : index
      %c0_56 = arith.constant 0 : index
      %76 = vector.load %arg9[%c2, %c0_56] : memref<3x128xf32, #tpu.memory_space<vmem>>, vector<1x128xf32>
      %cst_57 = arith.constant 1.000000e-03 : f32
      %77 = vector.broadcast %cst_57 : f32 to vector<1x128xf32>
      %78 = arith.addf %75, %77 : vector<1x128xf32>
      %79 = math.rsqrt %78 : vector<1x128xf32>
      %80 = arith.mulf %76, %79 : vector<1x128xf32>
      %c2_58 = arith.constant 2 : index
      %c0_59 = arith.constant 0 : index
      %81 = vector.load %arg10[%c2_58, %c0_59] : memref<3x128xf32, #tpu.memory_space<vmem>>, vector<1x128xf32>
      %82 = arith.mulf %68, %80 : vector<1x128xf32>
      %83 = arith.subf %81, %82 : vector<1x128xf32>
      %c0_i32_60 = arith.constant 0 : i32
      %c2_i32_61 = arith.constant 2 : i32
      %84 = arith.addi %c0_i32_60, %c2_i32_61 : i32
      %c1_i32_62 = arith.constant 1 : i32
      scf.for %arg16 = %c0_i32_60 to %84 step %c1_i32_62  : i32 {
        %c1_i32_64 = arith.constant 1 : i32
        %85 = arith.muli %arg16, %c1_i32_64 : i32
        %c0_i32_65 = arith.constant 0 : i32
        %86 = arith.addi %c0_i32_65, %85 : i32
        %c128_i32_66 = arith.constant 128 : i32
        %87 = arith.muli %86, %c128_i32_66 : i32
        %88 = tpu.assume_multiple %87, 128 : i32
        %89 = arith.index_cast %88 : i32 to index
        %c0_67 = arith.constant 0 : index
        %90 = vector.load %arg14[%89, %c0_67] : memref<256x128xf32, #tpu.memory_space<vmem>>, vector<128x128xf32>
        %91 = vector.broadcast %80 : vector<1x128xf32> to vector<128x128xf32>
        %92 = arith.mulf %90, %91 : vector<128x128xf32>
        %93 = vector.broadcast %83 : vector<1x128xf32> to vector<128x128xf32>
        %94 = arith.addf %92, %93 : vector<128x128xf32>
        %cst_68 = arith.constant 0.000000e+00 : f32
        %95 = vector.broadcast %cst_68 : f32 to vector<128x128xf32>
        %96 = arith.maximumf %94, %95 : vector<128x128xf32>
        %c0_69 = arith.constant 0 : index
        %c0_70 = arith.constant 0 : index
        %97 = vector.load %arg11[%c0_69, %c0_70] : memref<128x256xf32, #tpu.memory_space<vmem>>, vector<128x256xf32>
        %cst_71 = arith.constant dense<0.000000e+00> : vector<128x256xf32>
        %98 = tpu.matmul %96, %97, %cst_71 {dimension_numbers = #tpu.dot_dimension_numbers<[1], [0], [0], [1], [0, 0, 1, 1], [], []>} : vector<128x128xf32>, vector<128x256xf32>, vector<128x256xf32> -> vector<128x256xf32>
        %c0_72 = arith.constant 0 : index
        %c0_73 = arith.constant 0 : index
        %99 = vector.load %arg12[%c0_72, %c0_73] : memref<1x256xf32, #tpu.memory_space<vmem>>, vector<1x256xf32>
        %100 = vector.broadcast %99 : vector<1x256xf32> to vector<128x256xf32>
        %101 = arith.addf %98, %100 : vector<128x256xf32>
        %102 = vector.extract_strided_slice %101 {offsets = [0, 0], sizes = [128, 128], strides = [1, 1]} : vector<128x256xf32> to vector<128x128xf32>
        %103 = vector.extract_strided_slice %101 {offsets = [0, 128], sizes = [128, 128], strides = [1, 1]} : vector<128x256xf32> to vector<128x128xf32>
        %104 = math.exp %103 : vector<128x128xf32>
        %105 = math.sqrt %104 : vector<128x128xf32>
        %106 = arith.index_cast %88 : i32 to index
        %c0_74 = arith.constant 0 : index
        %107 = vector.load %arg4[%106, %c0_74] : memref<256x128xf32, #tpu.memory_space<vmem>>, vector<128x128xf32>
        %108 = arith.mulf %105, %107 : vector<128x128xf32>
        %109 = arith.addf %102, %108 : vector<128x128xf32>
        %110 = arith.index_cast %88 : i32 to index
        %c0_75 = arith.constant 0 : index
        %111 = vector.load %arg13[%110, %c0_75] : memref<256x384xf32, #tpu.memory_space<vmem>>, vector<128x128xf32>
        tpu.vector_store %arg13[%110, %c0_75], %102 {strides = array<i32>} : memref<256x384xf32, #tpu.memory_space<vmem>>, vector<128x128xf32>,
        %112 = arith.index_cast %88 : i32 to index
        %c128 = arith.constant 128 : index
        %113 = vector.load %arg13[%112, %c128] : memref<256x384xf32, #tpu.memory_space<vmem>>, vector<128x128xf32>
        tpu.vector_store %arg13[%112, %c128], %104 {strides = array<i32>} : memref<256x384xf32, #tpu.memory_space<vmem>>, vector<128x128xf32>,
        %114 = arith.index_cast %88 : i32 to index
        %c256 = arith.constant 256 : index
        %115 = vector.load %arg13[%114, %c256] : memref<256x384xf32, #tpu.memory_space<vmem>>, vector<128x128xf32>
        tpu.vector_store %arg13[%114, %c256], %109 {strides = array<i32>} : memref<256x384xf32, #tpu.memory_space<vmem>>, vector<128x128xf32>,
      }
      %c2_i32_63 = arith.constant 2 : i32
    } else {
    }
    return
  }
  func.func @transform_0(%arg0: i32, %arg1: i32) -> (i32, i32) {
    %c0_i32 = arith.constant 0 : i32
    return %arg1, %arg0 : i32, i32
  }
  func.func @transform_1(%arg0: i32, %arg1: i32) -> (i32, i32) {
    %c0_i32 = arith.constant 0 : i32
    %c0_i32_0 = arith.constant 0 : i32
    %c0_i32_1 = arith.constant 0 : i32
    return %c0_i32, %c0_i32_0 : i32, i32
  }
  func.func @transform_2(%arg0: i32, %arg1: i32) -> (i32, i32) {
    %c0_i32 = arith.constant 0 : i32
    %c0_i32_0 = arith.constant 0 : i32
    %c0_i32_1 = arith.constant 0 : i32
    return %c0_i32, %c0_i32_0 : i32, i32
  }
  func.func @transform_3(%arg0: i32, %arg1: i32) -> (i32, i32) {
    %c0_i32 = arith.constant 0 : i32
    %c0_i32_0 = arith.constant 0 : i32
    return %arg0, %c0_i32 : i32, i32
  }
  func.func @transform_4(%arg0: i32, %arg1: i32) -> (i32, i32, i32) {
    %c0_i32 = arith.constant 0 : i32
    %c0_i32_0 = arith.constant 0 : i32
    %c0_i32_1 = arith.constant 0 : i32
    %c0_i32_2 = arith.constant 0 : i32
    return %c0_i32, %c0_i32_0, %c0_i32_1 : i32, i32, i32
  }
  func.func @transform_5(%arg0: i32, %arg1: i32) -> (i32, i32, i32) {
    %c0_i32 = arith.constant 0 : i32
    %c0_i32_0 = arith.constant 0 : i32
    %c0_i32_1 = arith.constant 0 : i32
    %c0_i32_2 = arith.constant 0 : i32
    return %c0_i32, %c0_i32_0, %c0_i32_1 : i32, i32, i32
  }
  func.func @transform_6(%arg0: i32, %arg1: i32) -> (i32, i32) {
    %c0_i32 = arith.constant 0 : i32
    %c0_i32_0 = arith.constant 0 : i32
    %c0_i32_1 = arith.constant 0 : i32
    return %c0_i32, %c0_i32_0 : i32, i32
  }
  func.func @transform_7(%arg0: i32, %arg1: i32) -> (i32, i32) {
    %c0_i32 = arith.constant 0 : i32
    %c0_i32_0 = arith.constant 0 : i32
    %c0_i32_1 = arith.constant 0 : i32
    return %c0_i32, %c0_i32_0 : i32, i32
  }
  func.func @transform_8(%arg0: i32, %arg1: i32) -> (i32, i32) {
    %c0_i32 = arith.constant 0 : i32
    %c0_i32_0 = arith.constant 0 : i32
    %c0_i32_1 = arith.constant 0 : i32
    return %c0_i32, %c0_i32_0 : i32, i32
  }
  func.func @transform_9(%arg0: i32, %arg1: i32) -> (i32, i32) {
    %c0_i32 = arith.constant 0 : i32
    %c0_i32_0 = arith.constant 0 : i32
    %c0_i32_1 = arith.constant 0 : i32
    return %c0_i32, %c0_i32_0 : i32, i32
  }
  func.func @transform_10(%arg0: i32, %arg1: i32) -> (i32, i32) {
    %c0_i32 = arith.constant 0 : i32
    %c0_i32_0 = arith.constant 0 : i32
    %c0_i32_1 = arith.constant 0 : i32
    return %c0_i32, %c0_i32_0 : i32, i32
  }
  func.func @transform_11(%arg0: i32, %arg1: i32) -> (i32, i32) {
    %c0_i32 = arith.constant 0 : i32
    %c0_i32_0 = arith.constant 0 : i32
    %c0_i32_1 = arith.constant 0 : i32
    return %c0_i32, %c0_i32_0 : i32, i32
  }
}

module attributes {stable_mosaic.version = 11 : i64} {
  func.func @multi_encoder_kernel(%arg0: i32, %arg1: i32, %arg2: memref<128x128xbf16, #tpu.memory_space<vmem>>, %arg3: memref<256x8xf32, #tpu.memory_space<vmem>>, %arg4: memref<256x128xf32, #tpu.memory_space<vmem>>, %arg5: memref<128x128xbf16, #tpu.memory_space<vmem>>, %arg6: memref<3x8x128xf32, #tpu.memory_space<vmem>>, %arg7: memref<2x128x128xf32, #tpu.memory_space<vmem>>, %arg8: memref<3x128xf32, #tpu.memory_space<vmem>>, %arg9: memref<3x128xf32, #tpu.memory_space<vmem>>, %arg10: memref<3x128xf32, #tpu.memory_space<vmem>>, %arg11: memref<128x256xf32, #tpu.memory_space<vmem>>, %arg12: memref<1x256xf32, #tpu.memory_space<vmem>>, %arg13: memref<256x384xf32, #tpu.memory_space<vmem>>, %arg14: memref<256x128xf32, #tpu.memory_space<vmem>>, %arg15: memref<2x128xf32, #tpu.memory_space<vmem>>) attributes {dimension_semantics = [#tpu.dimension_semantics<arbitrary>, #tpu.dimension_semantics<arbitrary>], iteration_bounds = array<i64: 2, 2>, scalar_prefetch = 0 : i64, scratch_operands = 2 : i64, tpu.core_type = #tpu.core_type<tc>, window_params = [{transform_indices = @transform_0, window_bounds = array<i64: 128, 128>}, {pipeline_mode = #tpu.pipeline_mode<synchronous>, transform_indices = @transform_1, window_bounds = array<i64: 256, 8>}, {pipeline_mode = #tpu.pipeline_mode<synchronous>, transform_indices = @transform_2, window_bounds = array<i64: 256, 128>}, {transform_indices = @transform_3, window_bounds = array<i64: 128, 128>}, {pipeline_mode = #tpu.pipeline_mode<synchronous>, transform_indices = @transform_4, window_bounds = array<i64: 3, 8, 128>}, {pipeline_mode = #tpu.pipeline_mode<synchronous>, transform_indices = @transform_5, window_bounds = array<i64: 2, 128, 128>}, {pipeline_mode = #tpu.pipeline_mode<synchronous>, transform_indices = @transform_6, window_bounds = array<i64: 3, 128>}, {pipeline_mode = #tpu.pipeline_mode<synchronous>, transform_indices = @transform_7, window_bounds = array<i64: 3, 128>}, {pipeline_mode = #tpu.pipeline_mode<synchronous>, transform_indices = @transform_8, window_bounds = array<i64: 3, 128>}, {pipeline_mode = #tpu.pipeline_mode<synchronous>, transform_indices = @transform_9, window_bounds = array<i64: 128, 256>}, {pipeline_mode = #tpu.pipeline_mode<synchronous>, transform_indices = @transform_10, window_bounds = array<i64: 1, 256>}, {pipeline_mode = #tpu.pipeline_mode<synchronous>, transform_indices = @transform_11, window_bounds = array<i64: 256, 384>}]} {
    %c128_i32 = arith.constant 128 : i32
    %0 = arith.muli %arg1, %c128_i32 : i32
    %1 = tpu.assume_multiple %0, 128 : i32
    %c0 = arith.constant 0 : index
    %c0_0 = arith.constant 0 : index
    %2 = vector.load %arg2[%c0, %c0_0] : memref<128x128xbf16, #tpu.memory_space<vmem>>, vector<128x128xbf16>
    %c0_1 = arith.constant 0 : index
    %c0_2 = arith.constant 0 : index
    %3 = vector.load %arg5[%c0_1, %c0_2] : memref<128x128xbf16, #tpu.memory_space<vmem>>, vector<128x128xbf16>
    %cst = arith.constant dense<0.000000e+00> : vector<128x128xf32>
    %4 = tpu.matmul %2, %3, %cst {dimension_numbers = #tpu.dot_dimension_numbers<[1], [0], [0], [1], [0, 0, 1, 1], [], []>} : vector<128x128xbf16>, vector<128x128xbf16>, vector<128x128xf32> -> vector<128x128xf32>
    %c0_i32 = arith.constant 0 : i32
    %5 = arith.cmpi eq, %arg0, %c0_i32 : i32
    %6 = arith.extui %5 : i1 to i32
    %c0_i32_3 = arith.constant 0 : i32
    %7 = arith.cmpi ne, %6, %c0_i32_3 : i32
    scf.if %7 {
      %24 = arith.index_cast %1 : i32 to index
      %c0_13 = arith.constant 0 : index
      %25 = vector.load %arg3[%24, %c0_13] : memref<256x8xf32, #tpu.memory_space<vmem>>, vector<128x8xf32>
      %c0_14 = arith.constant 0 : index
      %c0_15 = arith.constant 0 : index
      %c0_16 = arith.constant 0 : index
      %26 = vector.load %arg6[%c0_14, %c0_15, %c0_16] : memref<3x8x128xf32, #tpu.memory_space<vmem>>, vector<1x8x128xf32>
      %27 = vector.shape_cast %26 : vector<1x8x128xf32> to vector<8x128xf32>
      %cst_17 = arith.constant dense<0.000000e+00> : vector<128x128xf32>
      %28 = tpu.matmul %25, %27, %cst_17 {dimension_numbers = #tpu.dot_dimension_numbers<[1], [0], [0], [1], [0, 0, 1, 1], [], []>} : vector<128x8xf32>, vector<8x128xf32>, vector<128x128xf32> -> vector<128x128xf32>
      %29 = arith.addf %4, %28 : vector<128x128xf32>
      %c0_18 = arith.constant 0 : index
      %c0_19 = arith.constant 0 : index
      %30 = vector.load %arg8[%c0_18, %c0_19] : memref<3x128xf32, #tpu.memory_space<vmem>>, vector<1x128xf32>
      %31 = vector.broadcast %30 : vector<1x128xf32> to vector<128x128xf32>
      %32 = arith.addf %29, %31 : vector<128x128xf32>
      %33 = arith.index_cast %1 : i32 to index
      %c0_20 = arith.constant 0 : index
      %34 = vector.load %arg14[%33, %c0_20] : memref<256x128xf32, #tpu.memory_space<vmem>>, vector<128x128xf32>
      tpu.vector_store %arg14[%33, %c0_20], %32 {strides = array<i32>} : memref<256x128xf32, #tpu.memory_space<vmem>>, vector<128x128xf32>,
    } else {
    }
    %c0_i32_4 = arith.constant 0 : i32
    %8 = arith.cmpi ne, %arg0, %c0_i32_4 : i32
    %9 = arith.extui %8 : i1 to i32
    %c0_i32_5 = arith.constant 0 : i32
    %10 = arith.cmpi ne, %9, %c0_i32_5 : i32
    scf.if %10 {
      %24 = arith.index_cast %1 : i32 to index
      %c0_13 = arith.constant 0 : index
      %25 = vector.load %arg14[%24, %c0_13] : memref<256x128xf32, #tpu.memory_space<vmem>>, vector<128x128xf32>
      %26 = arith.addf %25, %4 : vector<128x128xf32>
      %27 = arith.index_cast %1 : i32 to index
      %c0_14 = arith.constant 0 : index
      %28 = vector.load %arg14[%27, %c0_14] : memref<256x128xf32, #tpu.memory_space<vmem>>, vector<128x128xf32>
      tpu.vector_store %arg14[%27, %c0_14], %26 {strides = array<i32>} : memref<256x128xf32, #tpu.memory_space<vmem>>, vector<128x128xf32>,
    } else {
    }
    %c1_i32 = arith.constant 1 : i32
    %11 = arith.cmpi eq, %arg0, %c1_i32 : i32
    %c0_i32_6 = arith.constant 0 : i32
    %12 = arith.cmpi eq, %arg1, %c0_i32_6 : i32
    %13 = arith.andi %11, %12 : i1
    %14 = arith.extui %13 : i1 to i32
    %c0_i32_7 = arith.constant 0 : i32
    %15 = arith.cmpi ne, %14, %c0_i32_7 : i32
    scf.if %15 {
      %cst_13 = arith.constant 0.000000e+00 : f32
      %24 = vector.broadcast %cst_13 : f32 to vector<2x128xf32>
      %c0_14 = arith.constant 0 : index
      %c0_15 = arith.constant 0 : index
      %25 = vector.load %arg15[%c0_14, %c0_15] : memref<2x128xf32, #tpu.memory_space<vmem>>, vector<2x128xf32>
      tpu.vector_store %arg15[%c0_14, %c0_15], %24 {strides = array<i32>} : memref<2x128xf32, #tpu.memory_space<vmem>>, vector<2x128xf32>,
    } else {
    }
    %c1_i32_8 = arith.constant 1 : i32
    %16 = arith.cmpi eq, %arg0, %c1_i32_8 : i32
    %17 = arith.extui %16 : i1 to i32
    %c0_i32_9 = arith.constant 0 : i32
    %18 = arith.cmpi ne, %17, %c0_i32_9 : i32
    scf.if %18 {
      %24 = arith.index_cast %1 : i32 to index
      %c0_13 = arith.constant 0 : index
      %25 = vector.load %arg14[%24, %c0_13] : memref<256x128xf32, #tpu.memory_space<vmem>>, vector<128x128xf32>
      %c0_14 = arith.constant 0 : index
      %c0_15 = arith.constant 0 : index
      %26 = vector.load %arg15[%c0_14, %c0_15] : memref<2x128xf32, #tpu.memory_space<vmem>>, vector<1x128xf32>
      %cst_16 = arith.constant dense<0.000000e+00> : vector<128xf32>
      %27 = vector.multi_reduction <add>, %25, %cst_16 [0] : vector<128x128xf32> to vector<128xf32>
      %28 = vector.shape_cast %27 : vector<128xf32> to vector<1x128xf32>
      %29 = arith.addf %26, %28 : vector<1x128xf32>
      %c0_17 = arith.constant 0 : index
      %c0_18 = arith.constant 0 : index
      %30 = vector.load %arg15[%c0_17, %c0_18] : memref<2x128xf32, #tpu.memory_space<vmem>>, vector<1x128xf32>
      tpu.vector_store %arg15[%c0_17, %c0_18], %29 {strides = array<i32>} : memref<2x128xf32, #tpu.memory_space<vmem>>, vector<1x128xf32>,
      %c1 = arith.constant 1 : index
      %c0_19 = arith.constant 0 : index
      %31 = vector.load %arg15[%c1, %c0_19] : memref<2x128xf32, #tpu.memory_space<vmem>>, vector<1x128xf32>
      %32 = arith.mulf %25, %25 : vector<128x128xf32>
      %cst_20 = arith.constant dense<0.000000e+00> : vector<128xf32>
      %33 = vector.multi_reduction <add>, %32, %cst_20 [0] : vector<128x128xf32> to vector<128xf32>
      %34 = vector.shape_cast %33 : vector<128xf32> to vector<1x128xf32>
      %35 = arith.addf %31, %34 : vector<1x128xf32>
      %c1_21 = arith.constant 1 : index
      %c0_22 = arith.constant 0 : index
      %36 = vector.load %arg15[%c1_21, %c0_22] : memref<2x128xf32, #tpu.memory_space<vmem>>, vector<1x128xf32>
      tpu.vector_store %arg15[%c1_21, %c0_22], %35 {strides = array<i32>} : memref<2x128xf32, #tpu.memory_space<vmem>>, vector<1x128xf32>,
    } else {
    }
    %c1_i32_10 = arith.constant 1 : i32
    %19 = arith.cmpi eq, %arg0, %c1_i32_10 : i32
    %c1_i32_11 = arith.constant 1 : i32
    %20 = arith.cmpi eq, %arg1, %c1_i32_11 : i32
    %21 = arith.andi %19, %20 : i1
    %22 = arith.extui %21 : i1 to i32
    %c0_i32_12 = arith.constant 0 : i32
    %23 = arith.cmpi ne, %22, %c0_i32_12 : i32
    scf.if %23 {
      %c0_13 = arith.constant 0 : index
      %c0_14 = arith.constant 0 : index
      %24 = vector.load %arg15[%c0_13, %c0_14] : memref<2x128xf32, #tpu.memory_space<vmem>>, vector<1x128xf32>
      %cst_15 = arith.constant 3.906250e-03 : f32
      %25 = vector.broadcast %cst_15 : f32 to vector<1x128xf32>
      %26 = arith.mulf %24, %25 : vector<1x128xf32>
      %c1 = arith.constant 1 : index
      %c0_16 = arith.constant 0 : index
      %27 = vector.load %arg15[%c1, %c0_16] : memref<2x128xf32, #tpu.memory_space<vmem>>, vector<1x128xf32>
      %cst_17 = arith.constant 3.906250e-03 : f32
      %28 = vector.broadcast %cst_17 : f32 to vector<1x128xf32>
      %29 = arith.mulf %27, %28 : vector<1x128xf32>
      %30 = arith.mulf %26, %26 : vector<1x128xf32>
      %31 = arith.subf %29, %30 : vector<1x128xf32>
      %cst_18 = arith.constant 0.000000e+00 : f32
      %32 = vector.broadcast %cst_18 : f32 to vector<1x128xf32>
      %33 = arith.maximumf %31, %32 : vector<1x128xf32>
      %c0_19 = arith.constant 0 : index
      %c0_20 = arith.constant 0 : index
      %34 = vector.load %arg9[%c0_19, %c0_20] : memref<3x128xf32, #tpu.memory_space<vmem>>, vector<1x128xf32>
      %cst_21 = arith.constant 1.000000e-03 : f32
      %35 = vector.broadcast %cst_21 : f32 to vector<1x128xf32>
      %36 = arith.addf %33, %35 : vector<1x128xf32>
      %37 = math.rsqrt %36 : vector<1x128xf32>
      %38 = arith.mulf %34, %37 : vector<1x128xf32>
      %c0_22 = arith.constant 0 : index
      %c0_23 = arith.constant 0 : index
      %39 = vector.load %arg10[%c0_22, %c0_23] : memref<3x128xf32, #tpu.memory_space<vmem>>, vector<1x128xf32>
      %40 = arith.mulf %26, %38 : vector<1x128xf32>
      %41 = arith.subf %39, %40 : vector<1x128xf32>
      %cst_24 = arith.constant 0.000000e+00 : f32
      %42 = vector.broadcast %cst_24 : f32 to vector<2x128xf32>
      %c0_25 = arith.constant 0 : index
      %c0_26 = arith.constant 0 : index
      %43 = vector.load %arg15[%c0_25, %c0_26] : memref<2x128xf32, #tpu.memory_space<vmem>>, vector<2x128xf32>
      tpu.vector_store %arg15[%c0_25, %c0_26], %42 {strides = array<i32>} : memref<2x128xf32, #tpu.memory_space<vmem>>, vector<2x128xf32>,
      %c0_i32_27 = arith.constant 0 : i32
      %c2_i32 = arith.constant 2 : i32
      %44 = arith.addi %c0_i32_27, %c2_i32 : i32
      %c1_i32_28 = arith.constant 1 : i32
      scf.for %arg16 = %c0_i32_27 to %44 step %c1_i32_28  : i32 {
        %c1_i32_64 = arith.constant 1 : i32
        %85 = arith.muli %arg16, %c1_i32_64 : i32
        %c0_i32_65 = arith.constant 0 : i32
        %86 = arith.addi %c0_i32_65, %85 : i32
        %c128_i32_66 = arith.constant 128 : i32
        %87 = arith.muli %86, %c128_i32_66 : i32
        %88 = tpu.assume_multiple %87, 128 : i32
        %89 = arith.index_cast %88 : i32 to index
        %c0_67 = arith.constant 0 : index
        %90 = vector.load %arg14[%89, %c0_67] : memref<256x128xf32, #tpu.memory_space<vmem>>, vector<128x128xf32>
        %91 = vector.broadcast %38 : vector<1x128xf32> to vector<128x128xf32>
        %92 = arith.mulf %90, %91 : vector<128x128xf32>
        %93 = vector.broadcast %41 : vector<1x128xf32> to vector<128x128xf32>
        %94 = arith.addf %92, %93 : vector<128x128xf32>
        %cst_68 = arith.constant 0.000000e+00 : f32
        %95 = vector.broadcast %cst_68 : f32 to vector<128x128xf32>
        %96 = arith.maximumf %94, %95 : vector<128x128xf32>
        %97 = arith.index_cast %88 : i32 to index
        %c0_69 = arith.constant 0 : index
        %98 = vector.load %arg3[%97, %c0_69] : memref<256x8xf32, #tpu.memory_space<vmem>>, vector<128x8xf32>
        %c0_70 = arith.constant 0 : index
        %c0_71 = arith.constant 0 : index
        %c0_72 = arith.constant 0 : index
        %99 = vector.load %arg7[%c0_70, %c0_71, %c0_72] : memref<2x128x128xf32, #tpu.memory_space<vmem>>, vector<1x128x128xf32>
        %100 = vector.shape_cast %99 : vector<1x128x128xf32> to vector<128x128xf32>
        %cst_73 = arith.constant dense<0.000000e+00> : vector<128x128xf32>
        %101 = tpu.matmul %96, %100, %cst_73 {dimension_numbers = #tpu.dot_dimension_numbers<[1], [0], [0], [1], [0, 0, 1, 1], [], []>} : vector<128x128xf32>, vector<128x128xf32>, vector<128x128xf32> -> vector<128x128xf32>
        %c1_74 = arith.constant 1 : index
        %c0_75 = arith.constant 0 : index
        %c0_76 = arith.constant 0 : index
        %102 = vector.load %arg6[%c1_74, %c0_75, %c0_76] : memref<3x8x128xf32, #tpu.memory_space<vmem>>, vector<1x8x128xf32>
        %103 = vector.shape_cast %102 : vector<1x8x128xf32> to vector<8x128xf32>
        %cst_77 = arith.constant dense<0.000000e+00> : vector<128x128xf32>
        %104 = tpu.matmul %98, %103, %cst_77 {dimension_numbers = #tpu.dot_dimension_numbers<[1], [0], [0], [1], [0, 0, 1, 1], [], []>} : vector<128x8xf32>, vector<8x128xf32>, vector<128x128xf32> -> vector<128x128xf32>
        %105 = arith.addf %101, %104 : vector<128x128xf32>
        %c1_78 = arith.constant 1 : index
        %c0_79 = arith.constant 0 : index
        %106 = vector.load %arg8[%c1_78, %c0_79] : memref<3x128xf32, #tpu.memory_space<vmem>>, vector<1x128xf32>
        %107 = vector.broadcast %106 : vector<1x128xf32> to vector<128x128xf32>
        %108 = arith.addf %105, %107 : vector<128x128xf32>
        %109 = arith.index_cast %88 : i32 to index
        %c0_80 = arith.constant 0 : index
        %110 = vector.load %arg14[%109, %c0_80] : memref<256x128xf32, #tpu.memory_space<vmem>>, vector<128x128xf32>
        tpu.vector_store %arg14[%109, %c0_80], %108 {strides = array<i32>} : memref<256x128xf32, #tpu.memory_space<vmem>>, vector<128x128xf32>,
        %c0_81 = arith.constant 0 : index
        %c0_82 = arith.constant 0 : index
        %111 = vector.load %arg15[%c0_81, %c0_82] : memref<2x128xf32, #tpu.memory_space<vmem>>, vector<1x128xf32>
        %cst_83 = arith.constant dense<0.000000e+00> : vector<128xf32>
        %112 = vector.multi_reduction <add>, %108, %cst_83 [0] : vector<128x128xf32> to vector<128xf32>
        %113 = vector.shape_cast %112 : vector<128xf32> to vector<1x128xf32>
        %114 = arith.addf %111, %113 : vector<1x128xf32>
        %c0_84 = arith.constant 0 : index
        %c0_85 = arith.constant 0 : index
        %115 = vector.load %arg15[%c0_84, %c0_85] : memref<2x128xf32, #tpu.memory_space<vmem>>, vector<1x128xf32>
        tpu.vector_store %arg15[%c0_84, %c0_85], %114 {strides = array<i32>} : memref<2x128xf32, #tpu.memory_space<vmem>>, vector<1x128xf32>,
        %c1_86 = arith.constant 1 : index
        %c0_87 = arith.constant 0 : index
        %116 = vector.load %arg15[%c1_86, %c0_87] : memref<2x128xf32, #tpu.memory_space<vmem>>, vector<1x128xf32>
        %117 = arith.mulf %108, %108 : vector<128x128xf32>
        %cst_88 = arith.constant dense<0.000000e+00> : vector<128xf32>
        %118 = vector.multi_reduction <add>, %117, %cst_88 [0] : vector<128x128xf32> to vector<128xf32>
        %119 = vector.shape_cast %118 : vector<128xf32> to vector<1x128xf32>
        %120 = arith.addf %116, %119 : vector<1x128xf32>
        %c1_89 = arith.constant 1 : index
        %c0_90 = arith.constant 0 : index
        %121 = vector.load %arg15[%c1_89, %c0_90] : memref<2x128xf32, #tpu.memory_space<vmem>>, vector<1x128xf32>
        tpu.vector_store %arg15[%c1_89, %c0_90], %120 {strides = array<i32>} : memref<2x128xf32, #tpu.memory_space<vmem>>, vector<1x128xf32>,
      }
      %c2_i32_29 = arith.constant 2 : i32
      %c0_30 = arith.constant 0 : index
      %c0_31 = arith.constant 0 : index
      %45 = vector.load %arg15[%c0_30, %c0_31] : memref<2x128xf32, #tpu.memory_space<vmem>>, vector<1x128xf32>
      %cst_32 = arith.constant 3.906250e-03 : f32
      %46 = vector.broadcast %cst_32 : f32 to vector<1x128xf32>
      %47 = arith.mulf %45, %46 : vector<1x128xf32>
      %c1_33 = arith.constant 1 : index
      %c0_34 = arith.constant 0 : index
      %48 = vector.load %arg15[%c1_33, %c0_34] : memref<2x128xf32, #tpu.memory_space<vmem>>, vector<1x128xf32>
      %cst_35 = arith.constant 3.906250e-03 : f32
      %49 = vector.broadcast %cst_35 : f32 to vector<1x128xf32>
      %50 = arith.mulf %48, %49 : vector<1x128xf32>
      %51 = arith.mulf %47, %47 : vector<1x128xf32>
      %52 = arith.subf %50, %51 : vector<1x128xf32>
      %cst_36 = arith.constant 0.000000e+00 : f32
      %53 = vector.broadcast %cst_36 : f32 to vector<1x128xf32>
      %54 = arith.maximumf %52, %53 : vector<1x128xf32>
      %c1_37 = arith.constant 1 : index
      %c0_38 = arith.constant 0 : index
      %55 = vector.load %arg9[%c1_37, %c0_38] : memref<3x128xf32, #tpu.memory_space<vmem>>, vector<1x128xf32>
      %cst_39 = arith.constant 1.000000e-03 : f32
      %56 = vector.broadcast %cst_39 : f32 to vector<1x128xf32>
      %57 = arith.addf %54, %56 : vector<1x128xf32>
      %58 = math.rsqrt %57 : vector<1x128xf32>
      %59 = arith.mulf %55, %58 : vector<1x128xf32>
      %c1_40 = arith.constant 1 : index
      %c0_41 = arith.constant 0 : index
      %60 = vector.load %arg10[%c1_40, %c0_41] : memref<3x128xf32, #tpu.memory_space<vmem>>, vector<1x128xf32>
      %61 = arith.mulf %47, %59 : vector<1x128xf32>
      %62 = arith.subf %60, %61 : vector<1x128xf32>
      %cst_42 = arith.constant 0.000000e+00 : f32
      %63 = vector.broadcast %cst_42 : f32 to vector<2x128xf32>
      %c0_43 = arith.constant 0 : index
      %c0_44 = arith.constant 0 : index
      %64 = vector.load %arg15[%c0_43, %c0_44] : memref<2x128xf32, #tpu.memory_space<vmem>>, vector<2x128xf32>
      tpu.vector_store %arg15[%c0_43, %c0_44], %63 {strides = array<i32>} : memref<2x128xf32, #tpu.memory_space<vmem>>, vector<2x128xf32>,
      %c0_i32_45 = arith.constant 0 : i32
      %c2_i32_46 = arith.constant 2 : i32
      %65 = arith.addi %c0_i32_45, %c2_i32_46 : i32
      %c1_i32_47 = arith.constant 1 : i32
      scf.for %arg16 = %c0_i32_45 to %65 step %c1_i32_47  : i32 {
        %c1_i32_64 = arith.constant 1 : i32
        %85 = arith.muli %arg16, %c1_i32_64 : i32
        %c0_i32_65 = arith.constant 0 : i32
        %86 = arith.addi %c0_i32_65, %85 : i32
        %c128_i32_66 = arith.constant 128 : i32
        %87 = arith.muli %86, %c128_i32_66 : i32
        %88 = tpu.assume_multiple %87, 128 : i32
        %89 = arith.index_cast %88 : i32 to index
        %c0_67 = arith.constant 0 : index
        %90 = vector.load %arg14[%89, %c0_67] : memref<256x128xf32, #tpu.memory_space<vmem>>, vector<128x128xf32>
        %91 = vector.broadcast %59 : vector<1x128xf32> to vector<128x128xf32>
        %92 = arith.mulf %90, %91 : vector<128x128xf32>
        %93 = vector.broadcast %62 : vector<1x128xf32> to vector<128x128xf32>
        %94 = arith.addf %92, %93 : vector<128x128xf32>
        %cst_68 = arith.constant 0.000000e+00 : f32
        %95 = vector.broadcast %cst_68 : f32 to vector<128x128xf32>
        %96 = arith.maximumf %94, %95 : vector<128x128xf32>
        %97 = arith.index_cast %88 : i32 to index
        %c0_69 = arith.constant 0 : index
        %98 = vector.load %arg3[%97, %c0_69] : memref<256x8xf32, #tpu.memory_space<vmem>>, vector<128x8xf32>
        %c1_70 = arith.constant 1 : index
        %c0_71 = arith.constant 0 : index
        %c0_72 = arith.constant 0 : index
        %99 = vector.load %arg7[%c1_70, %c0_71, %c0_72] : memref<2x128x128xf32, #tpu.memory_space<vmem>>, vector<1x128x128xf32>
        %100 = vector.shape_cast %99 : vector<1x128x128xf32> to vector<128x128xf32>
        %cst_73 = arith.constant dense<0.000000e+00> : vector<128x128xf32>
        %101 = tpu.matmul %96, %100, %cst_73 {dimension_numbers = #tpu.dot_dimension_numbers<[1], [0], [0], [1], [0, 0, 1, 1], [], []>} : vector<128x128xf32>, vector<128x128xf32>, vector<128x128xf32> -> vector<128x128xf32>
        %c2_74 = arith.constant 2 : index
        %c0_75 = arith.constant 0 : index
        %c0_76 = arith.constant 0 : index
        %102 = vector.load %arg6[%c2_74, %c0_75, %c0_76] : memref<3x8x128xf32, #tpu.memory_space<vmem>>, vector<1x8x128xf32>
        %103 = vector.shape_cast %102 : vector<1x8x128xf32> to vector<8x128xf32>
        %cst_77 = arith.constant dense<0.000000e+00> : vector<128x128xf32>
        %104 = tpu.matmul %98, %103, %cst_77 {dimension_numbers = #tpu.dot_dimension_numbers<[1], [0], [0], [1], [0, 0, 1, 1], [], []>} : vector<128x8xf32>, vector<8x128xf32>, vector<128x128xf32> -> vector<128x128xf32>
        %105 = arith.addf %101, %104 : vector<128x128xf32>
        %c2_78 = arith.constant 2 : index
        %c0_79 = arith.constant 0 : index
        %106 = vector.load %arg8[%c2_78, %c0_79] : memref<3x128xf32, #tpu.memory_space<vmem>>, vector<1x128xf32>
        %107 = vector.broadcast %106 : vector<1x128xf32> to vector<128x128xf32>
        %108 = arith.addf %105, %107 : vector<128x128xf32>
        %109 = arith.index_cast %88 : i32 to index
        %c0_80 = arith.constant 0 : index
        %110 = vector.load %arg14[%109, %c0_80] : memref<256x128xf32, #tpu.memory_space<vmem>>, vector<128x128xf32>
        tpu.vector_store %arg14[%109, %c0_80], %108 {strides = array<i32>} : memref<256x128xf32, #tpu.memory_space<vmem>>, vector<128x128xf32>,
        %c0_81 = arith.constant 0 : index
        %c0_82 = arith.constant 0 : index
        %111 = vector.load %arg15[%c0_81, %c0_82] : memref<2x128xf32, #tpu.memory_space<vmem>>, vector<1x128xf32>
        %cst_83 = arith.constant dense<0.000000e+00> : vector<128xf32>
        %112 = vector.multi_reduction <add>, %108, %cst_83 [0] : vector<128x128xf32> to vector<128xf32>
        %113 = vector.shape_cast %112 : vector<128xf32> to vector<1x128xf32>
        %114 = arith.addf %111, %113 : vector<1x128xf32>
        %c0_84 = arith.constant 0 : index
        %c0_85 = arith.constant 0 : index
        %115 = vector.load %arg15[%c0_84, %c0_85] : memref<2x128xf32, #tpu.memory_space<vmem>>, vector<1x128xf32>
        tpu.vector_store %arg15[%c0_84, %c0_85], %114 {strides = array<i32>} : memref<2x128xf32, #tpu.memory_space<vmem>>, vector<1x128xf32>,
        %c1_86 = arith.constant 1 : index
        %c0_87 = arith.constant 0 : index
        %116 = vector.load %arg15[%c1_86, %c0_87] : memref<2x128xf32, #tpu.memory_space<vmem>>, vector<1x128xf32>
        %117 = arith.mulf %108, %108 : vector<128x128xf32>
        %cst_88 = arith.constant dense<0.000000e+00> : vector<128xf32>
        %118 = vector.multi_reduction <add>, %117, %cst_88 [0] : vector<128x128xf32> to vector<128xf32>
        %119 = vector.shape_cast %118 : vector<128xf32> to vector<1x128xf32>
        %120 = arith.addf %116, %119 : vector<1x128xf32>
        %c1_89 = arith.constant 1 : index
        %c0_90 = arith.constant 0 : index
        %121 = vector.load %arg15[%c1_89, %c0_90] : memref<2x128xf32, #tpu.memory_space<vmem>>, vector<1x128xf32>
        tpu.vector_store %arg15[%c1_89, %c0_90], %120 {strides = array<i32>} : memref<2x128xf32, #tpu.memory_space<vmem>>, vector<1x128xf32>,
      }
      %c2_i32_48 = arith.constant 2 : i32
      %c0_49 = arith.constant 0 : index
      %c0_50 = arith.constant 0 : index
      %66 = vector.load %arg15[%c0_49, %c0_50] : memref<2x128xf32, #tpu.memory_space<vmem>>, vector<1x128xf32>
      %cst_51 = arith.constant 3.906250e-03 : f32
      %67 = vector.broadcast %cst_51 : f32 to vector<1x128xf32>
      %68 = arith.mulf %66, %67 : vector<1x128xf32>
      %c1_52 = arith.constant 1 : index
      %c0_53 = arith.constant 0 : index
      %69 = vector.load %arg15[%c1_52, %c0_53] : memref<2x128xf32, #tpu.memory_space<vmem>>, vector<1x128xf32>
      %cst_54 = arith.constant 3.906250e-03 : f32
      %70 = vector.broadcast %cst_54 : f32 to vector<1x128xf32>
      %71 = arith.mulf %69, %70 : vector<1x128xf32>
      %72 = arith.mulf %68, %68 : vector<1x128xf32>
      %73 = arith.subf %71, %72 : vector<1x128xf32>
      %cst_55 = arith.constant 0.000000e+00 : f32
      %74 = vector.broadcast %cst_55 : f32 to vector<1x128xf32>
      %75 = arith.maximumf %73, %74 : vector<1x128xf32>
      %c2 = arith.constant 2 : index
      %c0_56 = arith.constant 0 : index
      %76 = vector.load %arg9[%c2, %c0_56] : memref<3x128xf32, #tpu.memory_space<vmem>>, vector<1x128xf32>
      %cst_57 = arith.constant 1.000000e-03 : f32
      %77 = vector.broadcast %cst_57 : f32 to vector<1x128xf32>
      %78 = arith.addf %75, %77 : vector<1x128xf32>
      %79 = math.rsqrt %78 : vector<1x128xf32>
      %80 = arith.mulf %76, %79 : vector<1x128xf32>
      %c2_58 = arith.constant 2 : index
      %c0_59 = arith.constant 0 : index
      %81 = vector.load %arg10[%c2_58, %c0_59] : memref<3x128xf32, #tpu.memory_space<vmem>>, vector<1x128xf32>
      %82 = arith.mulf %68, %80 : vector<1x128xf32>
      %83 = arith.subf %81, %82 : vector<1x128xf32>
      %c0_i32_60 = arith.constant 0 : i32
      %c2_i32_61 = arith.constant 2 : i32
      %84 = arith.addi %c0_i32_60, %c2_i32_61 : i32
      %c1_i32_62 = arith.constant 1 : i32
      scf.for %arg16 = %c0_i32_60 to %84 step %c1_i32_62  : i32 {
        %c1_i32_64 = arith.constant 1 : i32
        %85 = arith.muli %arg16, %c1_i32_64 : i32
        %c0_i32_65 = arith.constant 0 : i32
        %86 = arith.addi %c0_i32_65, %85 : i32
        %c128_i32_66 = arith.constant 128 : i32
        %87 = arith.muli %86, %c128_i32_66 : i32
        %88 = tpu.assume_multiple %87, 128 : i32
        %89 = arith.index_cast %88 : i32 to index
        %c0_67 = arith.constant 0 : index
        %90 = vector.load %arg14[%89, %c0_67] : memref<256x128xf32, #tpu.memory_space<vmem>>, vector<128x128xf32>
        %91 = vector.broadcast %80 : vector<1x128xf32> to vector<128x128xf32>
        %92 = arith.mulf %90, %91 : vector<128x128xf32>
        %93 = vector.broadcast %83 : vector<1x128xf32> to vector<128x128xf32>
        %94 = arith.addf %92, %93 : vector<128x128xf32>
        %cst_68 = arith.constant 0.000000e+00 : f32
        %95 = vector.broadcast %cst_68 : f32 to vector<128x128xf32>
        %96 = arith.maximumf %94, %95 : vector<128x128xf32>
        %c0_69 = arith.constant 0 : index
        %c0_70 = arith.constant 0 : index
        %97 = vector.load %arg11[%c0_69, %c0_70] : memref<128x256xf32, #tpu.memory_space<vmem>>, vector<128x256xf32>
        %cst_71 = arith.constant dense<0.000000e+00> : vector<128x256xf32>
        %98 = tpu.matmul %96, %97, %cst_71 {dimension_numbers = #tpu.dot_dimension_numbers<[1], [0], [0], [1], [0, 0, 1, 1], [], []>} : vector<128x128xf32>, vector<128x256xf32>, vector<128x256xf32> -> vector<128x256xf32>
        %c0_72 = arith.constant 0 : index
        %c0_73 = arith.constant 0 : index
        %99 = vector.load %arg12[%c0_72, %c0_73] : memref<1x256xf32, #tpu.memory_space<vmem>>, vector<1x256xf32>
        %100 = vector.broadcast %99 : vector<1x256xf32> to vector<128x256xf32>
        %101 = arith.addf %98, %100 : vector<128x256xf32>
        %102 = vector.extract_strided_slice %101 {offsets = [0, 0], sizes = [128, 128], strides = [1, 1]} : vector<128x256xf32> to vector<128x128xf32>
        %103 = vector.extract_strided_slice %101 {offsets = [0, 128], sizes = [128, 128], strides = [1, 1]} : vector<128x256xf32> to vector<128x128xf32>
        %104 = math.exp %103 : vector<128x128xf32>
        %105 = math.sqrt %104 : vector<128x128xf32>
        %106 = arith.index_cast %88 : i32 to index
        %c0_74 = arith.constant 0 : index
        %107 = vector.load %arg4[%106, %c0_74] : memref<256x128xf32, #tpu.memory_space<vmem>>, vector<128x128xf32>
        %108 = arith.mulf %105, %107 : vector<128x128xf32>
        %109 = arith.addf %102, %108 : vector<128x128xf32>
        %110 = arith.index_cast %88 : i32 to index
        %c0_75 = arith.constant 0 : index
        %111 = vector.load %arg13[%110, %c0_75] : memref<256x384xf32, #tpu.memory_space<vmem>>, vector<128x128xf32>
        tpu.vector_store %arg13[%110, %c0_75], %102 {strides = array<i32>} : memref<256x384xf32, #tpu.memory_space<vmem>>, vector<128x128xf32>,
        %112 = arith.index_cast %88 : i32 to index
        %c128 = arith.constant 128 : index
        %113 = vector.load %arg13[%112, %c128] : memref<256x384xf32, #tpu.memory_space<vmem>>, vector<128x128xf32>
        tpu.vector_store %arg13[%112, %c128], %104 {strides = array<i32>} : memref<256x384xf32, #tpu.memory_space<vmem>>, vector<128x128xf32>,
        %114 = arith.index_cast %88 : i32 to index
        %c256 = arith.constant 256 : index
        %115 = vector.load %arg13[%114, %c256] : memref<256x384xf32, #tpu.memory_space<vmem>>, vector<128x128xf32>
        tpu.vector_store %arg13[%114, %c256], %109 {strides = array<i32>} : memref<256x384xf32, #tpu.memory_space<vmem>>, vector<128x128xf32>,
      }
      %c2_i32_63 = arith.constant 2 : i32
    } else {
    }
    return
  }
  func.func @transform_0(%arg0: i32, %arg1: i32) -> (i32, i32) {
    %c0_i32 = arith.constant 0 : i32
    return %arg1, %arg0 : i32, i32
  }
  func.func @transform_1(%arg0: i32, %arg1: i32) -> (i32, i32) {
    %c0_i32 = arith.constant 0 : i32
    %c0_i32_0 = arith.constant 0 : i32
    %c0_i32_1 = arith.constant 0 : i32
    return %c0_i32, %c0_i32_0 : i32, i32
  }
  func.func @transform_2(%arg0: i32, %arg1: i32) -> (i32, i32) {
    %c0_i32 = arith.constant 0 : i32
    %c0_i32_0 = arith.constant 0 : i32
    %c0_i32_1 = arith.constant 0 : i32
    return %c0_i32, %c0_i32_0 : i32, i32
  }
  func.func @transform_3(%arg0: i32, %arg1: i32) -> (i32, i32) {
    %c0_i32 = arith.constant 0 : i32
    %c0_i32_0 = arith.constant 0 : i32
    return %arg0, %c0_i32 : i32, i32
  }
  func.func @transform_4(%arg0: i32, %arg1: i32) -> (i32, i32, i32) {
    %c0_i32 = arith.constant 0 : i32
    %c0_i32_0 = arith.constant 0 : i32
    %c0_i32_1 = arith.constant 0 : i32
    %c0_i32_2 = arith.constant 0 : i32
    return %c0_i32, %c0_i32_0, %c0_i32_1 : i32, i32, i32
  }
  func.func @transform_5(%arg0: i32, %arg1: i32) -> (i32, i32, i32) {
    %c0_i32 = arith.constant 0 : i32
    %c0_i32_0 = arith.constant 0 : i32
    %c0_i32_1 = arith.constant 0 : i32
    %c0_i32_2 = arith.constant 0 : i32
    return %c0_i32, %c0_i32_0, %c0_i32_1 : i32, i32, i32
  }
  func.func @transform_6(%arg0: i32, %arg1: i32) -> (i32, i32) {
    %c0_i32 = arith.constant 0 : i32
    %c0_i32_0 = arith.constant 0 : i32
    %c0_i32_1 = arith.constant 0 : i32
    return %c0_i32, %c0_i32_0 : i32, i32
  }
  func.func @transform_7(%arg0: i32, %arg1: i32) -> (i32, i32) {
    %c0_i32 = arith.constant 0 : i32
    %c0_i32_0 = arith.constant 0 : i32
    %c0_i32_1 = arith.constant 0 : i32
    return %c0_i32, %c0_i32_0 : i32, i32
  }
  func.func @transform_8(%arg0: i32, %arg1: i32) -> (i32, i32) {
    %c0_i32 = arith.constant 0 : i32
    %c0_i32_0 = arith.constant 0 : i32
    %c0_i32_1 = arith.constant 0 : i32
    return %c0_i32, %c0_i32_0 : i32, i32
  }
  func.func @transform_9(%arg0: i32, %arg1: i32) -> (i32, i32) {
    %c0_i32 = arith.constant 0 : i32
    %c0_i32_0 = arith.constant 0 : i32
    %c0_i32_1 = arith.constant 0 : i32
    return %c0_i32, %c0_i32_0 : i32, i32
  }
  func.func @transform_10(%arg0: i32, %arg1: i32) -> (i32, i32) {
    %c0_i32 = arith.constant 0 : i32
    %c0_i32_0 = arith.constant 0 : i32
    %c0_i32_1 = arith.constant 0 : i32
    return %c0_i32, %c0_i32_0 : i32, i32
  }
  func.func @transform_11(%arg0: i32, %arg1: i32) -> (i32, i32) {
    %c0_i32 = arith.constant 0 : i32
    %c0_i32_0 = arith.constant 0 : i32
    %c0_i32_1 = arith.constant 0 : i32
    return %c0_i32, %c0_i32_0 : i32, i32
  }
}

</mosaic_0001>

<bundles_post_ra>
// kernel: tpu_custom_call.1
= control target key start
LH: loop header
LB: loop body
LE: loop exit
PB: predicated region body
PF: predicated region fallthrough
CT: control target
= control target key end

     0   :  { %s4865_s0 = inlined_call_operand.vmem [shape: bf16[256,256], index: 0, kind: input, shape index: {}]   ;;  %s4866_s1 = inlined_call_operand.vmem [shape: f32[256,8], index: 1, kind: input, shape index: {}]   ;;  %s4867_s2 = inlined_call_operand.hbm [shape: f32[256,128], index: 2, kind: input, shape index: {}]   ;;  %s4868_s3 = inlined_call_operand.hbm [shape: bf16[256,128], index: 3, kind: input, shape index: {}]   ;;  %s4869_s4 = inlined_call_operand.hbm [shape: f32[3,8,128], index: 4, kind: input, shape index: {}]   ;;  %s4870_s5 = inlined_call_operand.hbm [shape: f32[2,128,128], index: 5, kind: input, shape index: {}]   ;;  %s4871_s6 = inlined_call_operand.vmem [shape: f32[3,128], index: 6, kind: input, shape index: {}]   ;;  %s4872_s7 = inlined_call_operand.vmem [shape: f32[3,128], index: 7, kind: input, shape index: {}]   ;;  %s4873_s8 = inlined_call_operand.vmem [shape: f32[3,128], index: 8, kind: input, shape index: {}]   ;;  %s4874_s9 = inlined_call_operand.hbm [shape: f32[128,256], index: 9, kind: input, shape index: {}]   ;;  %s4875_s10 = inlined_call_operand.vmem [shape: f32[1,256], index: 10, kind: input, shape index: {}]   ;;  %s4876_s11 = inlined_call_operand.hbm [shape: f32[256,384], index: 11, kind: output, shape index: {}]  }
   0x1   :  { %4883 = sst [smem:[#allocation28_spill]] %s4866_s1 }
   0x2   :  { %4884 = sst [smem:[#allocation29_spill]] %s4867_s2 }
   0x3   :  { %4885 = sst [smem:[#allocation30_spill]] %s4870_s5 }
   0x4   :  { %4886 = sst [smem:[#allocation31_spill]] %s4871_s6 }
   0x5   :  { %4887 = sst [smem:[#allocation32_spill]] %s4872_s7 }
   0x6   :  { %4888 = sst [smem:[#allocation33_spill]] %s4873_s8 }
   0x7   :  { %4889 = sst [smem:[#allocation34_spill]] %s4875_s10 }
   0x8   :  { %4890 = sst [smem:[#allocation35_spill]] %s4876_s11 }
   0x9   :  { %16 = vsyncpa [#allocation6], 0 }
   0xa   :  { %17 = vsyncpa [#allocation9], 0 }
   0xb   :  { %19 = vsyncpa [#allocation9 + $0x1], 0 }
   0xc   :  { %20 = vsyncpa [#allocation12], 0 }
   0xd   :  { %21 = vsyncpa [#allocation7], 0  ;;  %s3600_s17 = smov 0   ;;  %s3602_s18 = smov 0  }
   0xe   :  { %s3604_s19 = smov 0   ;;  %s3606_s20 = smov 0  }
   0xf   :  { %s3608_s21 = smov 0   ;;  %s3610_s22 = smov 0  }
  0x10   :  { %s3612_s23 = smov 0   ;;  %s3614_s24 = smov 0  }
  0x11   :  { %s3616_s25 = smov 0   ;;  %s3618_s26 = smov 0  }
  0x12 LB: > { %4891 = sst [smem:[#allocation20_spill]] %s3479_s18  ;;  %s3651_s27 = sadd.s32 4294967295, %s3511_s26   ;;  %s3511_s26 = sphi %s3618_s26, %s27_s26   ;;  %s3507_s25 = sphi %s3616_s25, %s4942_s25   ;;  %s3503_s24 = sphi %s3614_s24, %s4941_s24   ;;  %s3499_s23 = sphi %s3612_s23, %s4940_s23   ;;  %s3495_s22 = sphi %s3610_s22, %s4939_s22   ;;  %s3491_s21 = sphi %s3608_s21, %s4938_s21   ;;  %s3487_s20 = sphi %s3606_s20, %s4937_s20   ;;  %s3483_s19 = sphi %s3604_s19, %s4936_s19   ;;  %s3479_s18 = sphi %s3602_s18, %s4935_s18   ;;  %s3475_s17 = sphi %s3600_s17, %s4930_s17  }
  0x13   : > { %4892 = sst [smem:[#allocation21_spill]] %s3495_s22  ;;  %s36_s28 = sadd.s32 1, %s3503_s24 }
  0x14   : > { %4893 = sst [smem:[#allocation22_spill]] %s3499_s23  ;;  %p37_p0 = scmp.ge.s32.totalorder %s36_s28, 2 }
  0x15   : > { %s39_s29 = sadd.s32 1, %s3507_s25  ;;  %s48_s30 = sadd.s32 1, %s3491_s21 }
  0x16   : > { %p55_p1 = scmp.ne.s32.totalorder %s3491_s21, %s3487_s20  ;;  %s4944_s28 = smov (%p37_p0, %s36_s28), 0 }
  0x17   : > { %4894 = sst [smem:[#allocation23_spill]] %s4944_s28  ;;  %s4946_s29 = smov (!%p37_p0, %s39_s29), %s3507_s25 }
  0x18   : > { %s43_s12 = ssub.s32 %s3503_s24, %s4944_s28  ;;  %p56_p2 = scmp.eq.s32.totalorder %s3511_s26, 0 }
  0x19   : > { %p41_p3 = scmp.ge.s32.totalorder %s4946_s29, 2  ;;  %s116_s13 = sadd.s32 1, %s3483_s19 }
  0x1a   : > { %p3665_p4 = por %p56_p2, %p55_p1  ;;  %p123_p5 = scmp.ne.s32.totalorder %s3483_s19, %s3479_s18 }
  0x1b   : > { %s4948_s29 = smov (%p41_p3, %s4946_s29), 0  ;;  %p129_p7 = scmp.ne.s32.totalorder %s3479_s18, %s3475_s17 }
  0x1c   : > { %4896 = sst [smem:[#allocation24_spill]] %s4948_s29  ;;  %p3673_p6 = por %p123_p5, %p56_p2 }
  0x1d   : > { %s44_s16 = ssub.s32 %s3507_s25, %s4948_s29  ;;  %p130_p8 = scmp.eq.s32.totalorder %s3651_s27, 0 }
  0x1e   : > { %s45_s28 = sor.u32 %s44_s16, %s43_s12  ;;  %p114_p9 = scmp.eq.s32.totalorder %s44_s16, 0 }
  0x1f   : > { %p46_p10 = scmp.eq.s32.totalorder %s45_s28, 0  ;;  %p3684_p11 = por %p130_p8, %p129_p7 }
  0x20   : > { %s3689_s10 = scalar_select %p114_p9, %s3483_s19, %s116_s13  }
  0x21   : > { %s4898_s11 = scalar_select %p3684_p11, 1, 0 }
  0x22   : > { %4900 = sst [smem:[#allocation26_spill]] %s3689_s10  ;;  %p2700_p12 = scmp.ge.s32.totalorder %s3511_s26, 1 }
  0x23   : > { %4899 = sst [smem:[#allocation25_spill]] %s4898_s11  ;;  %p308_p13 = scmp.lt.s32.totalorder %s3511_s26, 5 }
  0x24   : > { %s3692_s8 = scalar_select %p46_p10, %s3491_s21, %s48_s30  }
  0x25   : > { %p3696_p0 = pnand %p2700_p12, %p308_p13  ;;  %s4903_s5 = sld [smem:[#allocation30_spill]] }
  0x26   : > { %4901 = sst [smem:[#allocation27_spill]] %s3692_s8  ;;  %s3525_s12 = smov [#allocation11]  }
  0x27   : > { %p3010_p1 = pneg %p3696_p0  ;;  %s352_s16 = sshll.u32 %s3525_s12, 4  ;;  %s353_s16 = int_to_ptr.vmem [resolvable:$true] %s352_s16 }
  0x28   : > { %s3526_s13 = smov 128   ;;  %s3527_s8 = smov 8  }
  0x29   : > { %p3707_p2 = pnand %p3010_p1, %p130_p8  ;;  %s4905_s2 = sld [smem:[#allocation29_spill]] }
  0x2a   : > { %s3528_s10 = smov [#allocation5]   ;;  %s336_s23 = sshll.u32 %s4869_s4, 4  ;;  %s337_s23 = int_to_ptr.hbm [resolvable:$true] %s336_s23 }
  0x2b   : > { %s350_s28 = sshll.u32 %s4903_s5, 4  ;;  %s324_s12 = sshll.u32 %s3528_s10, 4  ;;  %s351_s28 = int_to_ptr.hbm [resolvable:$true] %s350_s28  ;;  %s325_s12 = int_to_ptr.vmem [resolvable:$true] %s324_s12 }
  0x2c   : > { %3019 = dma.hbm_to_vmem [thread:$0]  (!%p3707_p2), %s351_s28, 4096, %s353_s16, [#allocation12], %s3526_s13, %s3526_s13, %s3527_s8  }
  0x2d   : > { %s3529_s22 = smov [#allocation10]   ;;  %s373_s16 = sshll.u32 %s4874_s9, 4  ;;  %s374_s16 = int_to_ptr.hbm [resolvable:$true] %s373_s16 }
  0x2e   : > { %s338_s11 = sshll.u32 %s3529_s22, 4  ;;  %s3530_s10 = smov [#allocation13]   ;;  %s339_s11 = int_to_ptr.vmem [resolvable:$true] %s338_s11 }
  0x2f   : > { %s322_s5 = sshll.u32 %s4905_s2, 4  ;;  %s375_s29 = sshll.u32 %s3530_s10, 4  ;;  %s323_s5 = int_to_ptr.hbm [resolvable:$true] %s322_s5  ;;  %s376_s29 = int_to_ptr.vmem [resolvable:$true] %s375_s29 }
  0x30   : > { %3013 = dma.hbm_to_vmem [thread:$0]  (!%p3707_p2), %s323_s5, 4096, %s325_s12, [#allocation6], %s3526_s13, %s3526_s13, %s3527_s8  }
  0x31   : > { %3016 = dma.hbm_to_vmem [thread:$0]  (!%p3707_p2), %s337_s23, 384, %s339_s11, [#allocation9], %s3526_s13, %s3526_s13, %s3527_s8  }
  0x32   : > { %s3531_s17 = smov 256   ;;  %s3532_s2 = smov 16  }
  0x33   : > { %3022 = dma.hbm_to_vmem [thread:$0]  (!%p3707_p2), %s374_s16, 4096, %s376_s29, [#allocation12], %s3531_s17, %s3531_s17, %s3532_s2  }
  0x34   : > { %p2705_p3 = scmp.ge.s32.totalorder %s3511_s26, 4 }
  0x36   : > { %388 = sbr.rel (%p2705_p3) target bundleno = 88 (0x58), region = 52 }
  0x3b   : > { %391 = sbr.rel (!%p3665_p4) target bundleno = 81 (0x51), region = 56  ;;  %s393_s1 = sand.u32 (%p3665_p4), 1, %s3491_s21  }
  0x3c   : > { %s2844_s5 = sshll.u32 (%p3665_p4), %s3503_s24, 5  ;;  %s2706_s6 = sshll.u32 (%p3665_p4), %s393_s1, 6 }
  0x3d   : > { %s398_s8 = sadd.s32 (%p3665_p4), %s3507_s25, %s2844_s5  ;;  %s395_s2 = scalar_lea.vmem (%p3665_p4), [#allocation4], %s2706_s6 }
  0x3e   : > { %s2709_s11 = sshll.u32 (%p3665_p4), %s398_s8, 2 }
  0x3f   : > { %s3737_s23 = scalar_lea.vmem (%p3665_p4), %s4865_s0, %s2709_s11 }
  0x40   : > { %v417_v0 = vld [vmem:[%s3737_s23] sm:$0xf]  ;;  %v419_v1 = vld [vmem:[%s3737_s23 + $0x8] sm:$0xf]  ;;  %v421_v2 = vld [vmem:[%s3737_s23 + $0x10] sm:$0xf] }
  0x41   : > { %418 = vst [vmem:[%s395_s2] sm:$0xf] %v417_v0  ;;  %v423_v3 = vld [vmem:[%s3737_s23 + $0x18] sm:$0xf]  ;;  %v425_v4 = vld [vmem:[%s3737_s23 + $0x20] sm:$0xf] }
  0x42   : > { %420 = vst [vmem:[%s395_s2 + $0x4] sm:$0xf] %v419_v1  ;;  %v427_v5 = vld [vmem:[%s3737_s23 + $0x28] sm:$0xf]  ;;  %v429_v6 = vld [vmem:[%s3737_s23 + $0x30] sm:$0xf] }
  0x43   : > { %422 = vst [vmem:[%s395_s2 + $0x8] sm:$0xf] %v421_v2  ;;  %v431_v7 = vld [vmem:[%s3737_s23 + $0x38] sm:$0xf]  ;;  %v433_v8 = vld [vmem:[%s3737_s23 + $0x40] sm:$0xf] }
  0x44   : > { %424 = vst [vmem:[%s395_s2 + $0xc] sm:$0xf] %v423_v3  ;;  %v435_v9 = vld [vmem:[%s3737_s23 + $0x48] sm:$0xf]  ;;  %v437_v10 = vld [vmem:[%s3737_s23 + $0x50] sm:$0xf] }
  0x45   : > { %426 = vst [vmem:[%s395_s2 + $0x10] sm:$0xf] %v425_v4  ;;  %v439_v11 = vld [vmem:[%s3737_s23 + $0x58] sm:$0xf]  ;;  %v441_v12 = vld [vmem:[%s3737_s23 + $0x60] sm:$0xf] }
  0x46   : > { %428 = vst [vmem:[%s395_s2 + $0x14] sm:$0xf] %v427_v5  ;;  %v443_v13 = vld [vmem:[%s3737_s23 + $0x68] sm:$0xf]  ;;  %v445_v14 = vld [vmem:[%s3737_s23 + $0x70] sm:$0xf] }
  0x47   : > { %430 = vst [vmem:[%s395_s2 + $0x18] sm:$0xf] %v429_v6  ;;  %v447_v15 = vld [vmem:[%s3737_s23 + $0x78] sm:$0xf] }
  0x48   : > { %432 = vst [vmem:[%s395_s2 + $0x1c] sm:$0xf] %v431_v7 }
  0x49   : > { %434 = vst [vmem:[%s395_s2 + $0x20] sm:$0xf] %v433_v8 }
  0x4a   : > { %436 = vst [vmem:[%s395_s2 + $0x24] sm:$0xf] %v435_v9 }
  0x4b   : > { %438 = vst [vmem:[%s395_s2 + $0x28] sm:$0xf] %v437_v10 }
  0x4c   : > { %440 = vst [vmem:[%s395_s2 + $0x2c] sm:$0xf] %v439_v11 }
  0x4d   : > { %442 = vst [vmem:[%s395_s2 + $0x30] sm:$0xf] %v441_v12 }
  0x4e   : > { %444 = vst [vmem:[%s395_s2 + $0x34] sm:$0xf] %v443_v13 }
  0x4f   : > { %446 = vst [vmem:[%s395_s2 + $0x38] sm:$0xf] %v445_v14 }
  0x50   : > { %448 = vst [vmem:[%s395_s2 + $0x3c] sm:$0xf] %v447_v15 }
  0x51 PF: > { %s505_s14 = sand.u32 1, %s3511_s26   ;;  %s507_s30 = sand.u32 1, %s3483_s19  }
  0x52   : > { %s2710_s13 = sshll.u32 %s507_s30, 6  ;;  %s2845_s12 = sshll.u32 %s3507_s25, 6 }
  0x53   : > { %s514_s10 = scalar_lea.hbm %s4868_s3, %s2845_s12  ;;  %s509_s29 = scalar_lea.vmem [#allocation8], %s2710_s13 }
  0x54   : > { %s517_s17 = sshll.u32 %s509_s29, 4  ;;  %s515_s1 = sshll.u32 %s514_s10, 4  ;;  %s518_s17 = int_to_ptr.vmem [resolvable:$true] %s517_s17  ;;  %s516_s1 = int_to_ptr.hbm [resolvable:$true] %s515_s1 }
  0x55   : > { %s506_s5 = scalar_lea.sflag [#allocation9], %s505_s14  ;;  %s3533_s6 = smov 64  }
  0x56   : > { %s3534_s8 = smov 4  }
  0x57   : > { %2996 = dma.hbm_to_vmem [thread:$0]  (%p3673_p6), %s516_s1, 1024, %s518_s17, %s506_s5, %s3533_s6, %s3533_s6, %s3534_s8  }
  0x58 PF: > { %529 = sbr.rel (%p3696_p0) target bundleno = 1450 (0x5aa), region = 101  ;;  %s532_s11 = sand.u32 (!%p3696_p0), 1, %s3487_s20  }
  0x59   : > { %s2714_s18 = sshll.u32 (!%p3696_p0), %s532_s11, 6 }
  0x5a   : > { %s3766_s22 = scalar_lea.vmem (!%p3696_p0), [#allocation4], %s2714_s18 }
  0x5d   : > { %3454 = dma.done.wait (%p130_p8), [#allocation6], 4096  }
  0x5e   : > { %3456 = vsyncadd (%p130_p8), [#allocation6], 4294963200  ;;  %s4906_s23 = sld [smem:[#allocation20_spill]]  ;;  %s543_s15 = sand.u32 1, %s3651_s27  }
  0x5f   : > { %s544_s13 = scalar_lea.sflag [#allocation9], %s543_s15 }
  0x64   : > { %s545_s14 = sand.u32 1, %s4906_s23  }
  0x65   : > { %s2716_s30 = sshll.u32 %s545_s14, 6 }
  0x66   : > { %s3774_s7 = scalar_lea.vmem [#allocation8], %s2716_s30 }
  0x67   : > { %3458 = dma.done.wait (%p3684_p11), %s544_s13, 1024  }
  0x68   : > { %3460 = vsyncadd (%p3684_p11), %s544_s13, 4294966272 }
  0x69   : > { %3462 = dma.done.wait (%p130_p8), [#allocation9], 384  }
  0x6a   : > { %3464 = vsyncadd (%p130_p8), [#allocation9], 4294966912 }
  0x6b   : > { %3466 = dma.done.wait (%p130_p8), [#allocation12], 8192  }
  0x6c   : > { %3468 = vsyncadd (%p130_p8), [#allocation12], 4294959104  ;;  %s4908_s20 = sld [smem:[#allocation21_spill]]  ;;  %v2861_v16 = vld [vmem:[%s3774_s7 + $0x38] sm:$0xff]  ;;  %v2860_v17 = vld [vmem:[%s3774_s7 + $0x30] sm:$0xff] }
  0x6d   : > { %732 = vmatpush.bf16.msra.mxu0 %v2861_v16  ;;  %2863 = vmatpush.bf16.msra.mxu1 %v2861_v16  ;;  %v2859_v18 = vld [vmem:[%s3774_s7 + $0x28] sm:$0xff]  ;;  %v2858_v19 = vld [vmem:[%s3774_s7 + $0x20] sm:$0xff]  ;;  %v2857_v20 = vld [vmem:[%s3774_s7 + $0x18] sm:$0xff]  ;;  %s4909_s28 = sld [smem:[#allocation22_spill]] }
  0x6e   : > { %2864 = vmatpush.bf16.msra.mxu2 %v2861_v16  ;;  %2865 = vmatpush.bf16.msra.mxu3 %v2861_v16  ;;  %v2856_v21 = vld [vmem:[%s3774_s7 + $0x10] sm:$0xff]  ;;  %v2855_v22 = vld [vmem:[%s3774_s7 + $0x8] sm:$0xff]  ;;  %v2854_v23 = vld [vmem:[%s3774_s7] sm:$0xff] }
  0x6f   : > { %v2846_v24 = vld [vmem:[%s3766_s22] sm:$0xff]  ;;  %v2848_v25 = vld [vmem:[%s3766_s22 + $0x10] sm:$0xff]  ;;  %v2847_v28 = vld [vmem:[%s3766_s22 + $0x8] sm:$0xff] }
  0x70   : > { %v2850_v26 = vld [vmem:[%s3766_s22 + $0x20] sm:$0xff]  ;;  %v2852_v27 = vld [vmem:[%s3766_s22 + $0x30] sm:$0xff]  ;;  %v2849_v29 = vld [vmem:[%s3766_s22 + $0x18] sm:$0xff] }
  0x71   : > { %733 = vmatpush.bf16.msra.mxu0 %v2860_v17  ;;  %2866 = vmatpush.bf16.msra.mxu1 %v2860_v17  ;;  %v2851_v30 = vld [vmem:[%s3766_s22 + $0x28] sm:$0xff]  ;;  %v2853_v31 = vld [vmem:[%s3766_s22 + $0x38] sm:$0xff] }
  0x72   : > { %s3789_s12 = sshll.u32 %s4908_s20, 7  ;;  %2867 = vmatpush.bf16.msra.mxu2 %v2860_v17  ;;  %2868 = vmatpush.bf16.msra.mxu3 %v2860_v17 }
  0x73   : > { %p2785_p4 = scmp.ne.s32.totalorder %s4909_s28, 0 }
  0x74   : > { %s4910_s29 = sld [smem:[#allocation28_spill]] (!%p2785_p4)  ;;  %s3888_s8 = scalar_lea.vmem (!%p2785_p4), [#allocation2], %s3789_s12 }
  0x75   : > { %734 = vmatpush.bf16.msra.mxu0 %v2859_v18  ;;  %2869 = vmatpush.bf16.msra.mxu1 %v2859_v18  ;;  %s4911_s6 = sld [smem:[#allocation31_spill]] (!%p2785_p4) }
  0x76   : > { %2870 = vmatpush.bf16.msra.mxu2 %v2859_v18  ;;  %2871 = vmatpush.bf16.msra.mxu3 %v2859_v18 }
  0x79   : > { %735 = vmatpush.bf16.msra.mxu0 %v2858_v19  ;;  %2872 = vmatpush.bf16.msra.mxu1 %v2858_v19 }
  0x7a   : > { %2873 = vmatpush.bf16.msra.mxu2 %v2858_v19  ;;  %2874 = vmatpush.bf16.msra.mxu3 %v2858_v19  ;;  %s3844_s17 = scalar_lea.vmem (!%p2785_p4), %s4910_s29, %s3789_s12 }
  0x7d   : > { %736 = vmatpush.bf16.msra.mxu0 %v2857_v20  ;;  %2875 = vmatpush.bf16.msra.mxu1 %v2857_v20 }
  0x7e   : > { %2876 = vmatpush.bf16.msra.mxu2 %v2857_v20  ;;  %2877 = vmatpush.bf16.msra.mxu3 %v2857_v20 }
  0x81   : > { %737 = vmatpush.bf16.msra.mxu0 %v2856_v21  ;;  %2878 = vmatpush.bf16.msra.mxu1 %v2856_v21 }
  0x82   : > { %2879 = vmatpush.bf16.msra.mxu2 %v2856_v21  ;;  %2880 = vmatpush.bf16.msra.mxu3 %v2856_v21 }
  0x85   : > { %738 = vmatpush.bf16.msra.mxu0 %v2855_v22  ;;  %2881 = vmatpush.bf16.msra.mxu1 %v2855_v22 }
  0x86   : > { %2882 = vmatpush.bf16.msra.mxu2 %v2855_v22  ;;  %2883 = vmatpush.bf16.msra.mxu3 %v2855_v22 }
  0x89   : > { %739 = vmatpush.bf16.msra.mxu0 %v2854_v23  ;;  %2884 = vmatpush.bf16.msra.mxu1 %v2854_v23 }
  0x8a   : > { %2885 = vmatpush.bf16.msra.mxu2 %v2854_v23  ;;  %2886 = vmatpush.bf16.msra.mxu3 %v2854_v23 }
  0x8c   : > { %740 = vmatmul.bf16.vlgmr.msra.gmra.mxu0 %v2846_v24  ;;  %750 = vmatmul.bf16.vlgmr.msra.gmra.mxu1 %v2848_v25 }
  0x8d   : > { %760 = vmatmul.bf16.vlgmr.msra.gmra.mxu2 %v2850_v26  ;;  %770 = vmatmul.bf16.vlgmr.msra.gmra.mxu3 %v2852_v27 }
  0x9c   : > { %745 = vmatmul.bf16.gmra.mxu0 %v2847_v28  ;;  %755 = vmatmul.bf16.gmra.mxu1 %v2849_v29 }
  0x9d   : > { %765 = vmatmul.bf16.gmra.mxu2 %v2851_v30  ;;  %775 = vmatmul.bf16.gmra.mxu3 %v2853_v31 }
 0x109   : > { %v3807_v32 = vpop.f32.mrf.mxu0  ;;  %v3809_v33 = vpop.f32.mrf.mxu1 }
 0x110   : > { %v3811_v34 = vpop.f32.mrf.mxu2  ;;  %v3813_v35 = vpop.f32.mrf.mxu3 }
 0x111   : > { %v3815_v36 = vpop.f32.mrf.mxu0  ;;  %v3817_v37 = vpop.f32.mrf.mxu1 }
 0x118   : > { %v3819_v38 = vpop.f32.mrf.mxu2  ;;  %v3821_v39 = vpop.f32.mrf.mxu3 }
 0x119   : > { %v3823_v40 = vpop.f32.mrf.mxu0  ;;  %v3825_v41 = vpop.f32.mrf.mxu1 }
 0x120   : > { %v3827_v42 = vpop.f32.mrf.mxu2  ;;  %v3829_v43 = vpop.f32.mrf.mxu3 }
 0x121   : > { %v3831_v44 = vpop.f32.mrf.mxu0  ;;  %v3833_v45 = vpop.f32.mrf.mxu1 }
 0x124   : > { %784 = sbr.rel (%p2785_p4) target bundleno = 461 (0x1cd), region = 129 }
 0x128   : > { %v3835_v46 = vpop.f32.mrf.mxu2  ;;  %v3837_v47 = vpop.f32.mrf.mxu3 }
 0x129   : > { %v802_v48 = vld [vmem:[#allocation10] sm:$0xff]  ;;  %vm803_vm0 = vcmask 64512   ;;  %v796_v57 = vld [vmem:[%s3844_s17 + $0x50] sm:$0xff]  ;;  %v797_v61 = vld [vmem:[%s3844_s17 + $0x58] sm:$0xff] }
 0x12a   : > { %2888 = vmatpush.msra.mxu2 %v802_v48  ;;  %2889 = vmatpush.msra.mxu3 %v802_v48  ;;  %v794_v49 = vld [vmem:[%s3844_s17 + $0x40] sm:$0xff]  ;;  %v795_v53 = vld [vmem:[%s3844_s17 + $0x48] sm:$0xff]  ;;  %v800_v58 = vld [vmem:[%s3844_s17 + $0x70] sm:$0xff] }
 0x12b   : > { %v798_v50 = vld [vmem:[%s3844_s17 + $0x60] sm:$0xff]  ;;  %2794 = vmatmul.msk.f32.vlgmr.msra.gmra.mxu2 %vm803_vm0, %v794_v49  ;;  %867 = vmatpush.msra.mxu0 %v802_v48  ;;  %v799_v54 = vld [vmem:[%s3844_s17 + $0x68] sm:$0xff]  ;;  %v788_v59 = vld [vmem:[%s3844_s17 + $0x10] sm:$0xff] }
 0x12c   : > { %v786_v51 = vld [vmem:[%s3844_s17] sm:$0xff]  ;;  %2798 = vmatmul.msk.f32.vlgmr.msra.gmra.mxu3 %vm803_vm0, %v798_v50  ;;  %2887 = vmatpush.msra.mxu1 %v802_v48  ;;  %v787_v55 = vld [vmem:[%s3844_s17 + $0x8] sm:$0xff]  ;;  %v792_v60 = vld [vmem:[%s3844_s17 + $0x30] sm:$0xff] }
 0x12d   : > { %v790_v52 = vld [vmem:[%s3844_s17 + $0x20] sm:$0xff]  ;;  %2786 = vmatmul.msk.f32.vlgmr.msra.gmra.mxu0 %vm803_vm0, %v786_v51  ;;  %v791_v56 = vld [vmem:[%s3844_s17 + $0x28] sm:$0xff]  ;;  %v801_v62 = vld [vmem:[%s3844_s17 + $0x78] sm:$0xff] }
 0x12e   : > { %2790 = vmatmul.msk.f32.vlgmr.msra.gmra.mxu1 %vm803_vm0, %v790_v52  ;;  %v789_v63 = vld [vmem:[%s3844_s17 + $0x18] sm:$0xff]  ;;  %v3881_v1 = vld [vmem:[%s4911_s6] ss:$0 sm:$0xff] }
 0x12f   : > { %v793_v0 = vld [vmem:[%s3844_s17 + $0x38] sm:$0xff] }
 0x133   : > { %2795 = vmatmul.msk.f32.gmra.mxu2 %vm803_vm0, %v795_v53 }
 0x134   : > { %2799 = vmatmul.msk.f32.gmra.mxu3 %vm803_vm0, %v799_v54 }
 0x135   : > { %2787 = vmatmul.msk.f32.gmra.mxu0 %vm803_vm0, %v787_v55 }
 0x136   : > { %2791 = vmatmul.msk.f32.gmra.mxu1 %vm803_vm0, %v791_v56 }
 0x13b   : > { %2796 = vmatmul.msk.f32.gmra.mxu2 %vm803_vm0, %v796_v57 }
 0x13c   : > { %2800 = vmatmul.msk.f32.gmra.mxu3 %vm803_vm0, %v800_v58 }
 0x13d   : > { %2788 = vmatmul.msk.f32.gmra.mxu0 %vm803_vm0, %v788_v59 }
 0x13e   : > { %2792 = vmatmul.msk.f32.gmra.mxu1 %vm803_vm0, %v792_v60 }
 0x143   : > { %2797 = vmatmul.msk.f32.gmra.mxu2 %vm803_vm0, %v797_v61 }
 0x144   : > { %2801 = vmatmul.msk.f32.gmra.mxu3 %vm803_vm0, %v801_v62 }
 0x145   : > { %2789 = vmatmul.msk.f32.gmra.mxu0 %vm803_vm0, %v789_v63 }
 0x146   : > { %2793 = vmatmul.msk.f32.gmra.mxu1 %vm803_vm0, %v793_v0 }
 0x1aa   : > { %v869_v2 = vpop.f32.mrf.mxu0 }
 0x1ab   : > { %v881_v3 = vpop.f32.mrf.mxu1  ;;  %v917_v4 = vadd.f32 %v869_v2, %v3807_v32 }
 0x1ac   : > { %v921_v5 = vadd.f32 %v881_v3, %v3809_v33 }
 0x1ad   : > { %v935_v6 = vadd.f32 %v3881_v1, %v917_v4 }
 0x1ae   : > { %v939_v7 = vadd.f32 %v3881_v1, %v921_v5  ;;  %v893_v8 = vpop.f32.mrf.mxu2 }
 0x1af   : > { %v905_v9 = vpop.f32.mrf.mxu3  ;;  %952 = vst [vmem:[%s3888_s8] sm:$0xff] %v935_v6  ;;  %v925_v10 = vadd.f32 %v893_v8, %v3811_v34 }
 0x1b0   : > { %v929_v11 = vadd.f32 %v905_v9, %v3813_v35  ;;  %956 = vst [vmem:[%s3888_s8 + $0x20] sm:$0xff] %v939_v7 }
 0x1b1   : > { %v943_v12 = vadd.f32 %v3881_v1, %v925_v10 }
 0x1b2   : > { %v947_v13 = vadd.f32 %v3881_v1, %v929_v11  ;;  %v872_v14 = vpop.f32.mrf.mxu0 }
 0x1b3   : > { %v884_v15 = vpop.f32.mrf.mxu1  ;;  %960 = vst [vmem:[%s3888_s8 + $0x40] sm:$0xff] %v943_v12  ;;  %v918_v16 = vadd.f32 %v872_v14, %v3815_v36 }
 0x1b4   : > { %v922_v17 = vadd.f32 %v884_v15, %v3817_v37  ;;  %964 = vst [vmem:[%s3888_s8 + $0x60] sm:$0xff] %v947_v13 }
 0x1b5   : > { %v936_v18 = vadd.f32 %v3881_v1, %v918_v16 }
 0x1b6   : > { %v940_v19 = vadd.f32 %v3881_v1, %v922_v17  ;;  %v896_v20 = vpop.f32.mrf.mxu2 }
 0x1b7   : > { %v908_v21 = vpop.f32.mrf.mxu3  ;;  %953 = vst [vmem:[%s3888_s8 + $0x8] sm:$0xff] %v936_v18  ;;  %v926_v22 = vadd.f32 %v896_v20, %v3819_v38 }
 0x1b8   : > { %v930_v23 = vadd.f32 %v908_v21, %v3821_v39  ;;  %957 = vst [vmem:[%s3888_s8 + $0x28] sm:$0xff] %v940_v19 }
 0x1b9   : > { %v944_v24 = vadd.f32 %v3881_v1, %v926_v22 }
 0x1ba   : > { %v948_v25 = vadd.f32 %v3881_v1, %v930_v23  ;;  %v875_v26 = vpop.f32.mrf.mxu0 }
 0x1bb   : > { %v887_v27 = vpop.f32.mrf.mxu1  ;;  %961 = vst [vmem:[%s3888_s8 + $0x48] sm:$0xff] %v944_v24  ;;  %v919_v28 = vadd.f32 %v875_v26, %v3823_v40 }
 0x1bc   : > { %v923_v29 = vadd.f32 %v887_v27, %v3825_v41  ;;  %965 = vst [vmem:[%s3888_s8 + $0x68] sm:$0xff] %v948_v25 }
 0x1bd   : > { %v937_v30 = vadd.f32 %v3881_v1, %v919_v28 }
 0x1be   : > { %v941_v31 = vadd.f32 %v3881_v1, %v923_v29  ;;  %v899_v48 = vpop.f32.mrf.mxu2 }
 0x1bf   : > { %v911_v49 = vpop.f32.mrf.mxu3  ;;  %954 = vst [vmem:[%s3888_s8 + $0x10] sm:$0xff] %v937_v30  ;;  %v927_v50 = vadd.f32 %v899_v48, %v3827_v42 }
 0x1c0   : > { %v931_v51 = vadd.f32 %v911_v49, %v3829_v43  ;;  %958 = vst [vmem:[%s3888_s8 + $0x30] sm:$0xff] %v941_v31 }
 0x1c1   : > { %v945_v52 = vadd.f32 %v3881_v1, %v927_v50 }
 0x1c2   : > { %v949_v53 = vadd.f32 %v3881_v1, %v931_v51  ;;  %v878_v54 = vpop.f32.mrf.mxu0 }
 0x1c3   : > { %v890_v55 = vpop.f32.mrf.mxu1  ;;  %962 = vst [vmem:[%s3888_s8 + $0x50] sm:$0xff] %v945_v52  ;;  %v920_v56 = vadd.f32 %v878_v54, %v3831_v44 }
 0x1c4   : > { %v924_v57 = vadd.f32 %v890_v55, %v3833_v45  ;;  %966 = vst [vmem:[%s3888_s8 + $0x70] sm:$0xff] %v949_v53 }
 0x1c5   : > { %v938_v58 = vadd.f32 %v3881_v1, %v920_v56 }
 0x1c6   : > { %v942_v59 = vadd.f32 %v3881_v1, %v924_v57  ;;  %v902_v60 = vpop.f32.mrf.mxu2 }
 0x1c7   : > { %v914_v61 = vpop.f32.mrf.mxu3  ;;  %955 = vst [vmem:[%s3888_s8 + $0x18] sm:$0xff] %v938_v58  ;;  %v928_v62 = vadd.f32 %v902_v60, %v3835_v46 }
 0x1c8   : > { %v932_v63 = vadd.f32 %v914_v61, %v3837_v47  ;;  %959 = vst [vmem:[%s3888_s8 + $0x38] sm:$0xff] %v942_v59 }
 0x1c9   : > { %v946_v0 = vadd.f32 %v3881_v1, %v928_v62 }
 0x1ca   : > { %v950_v2 = vadd.f32 %v3881_v1, %v932_v63 }
 0x1cb   : > { %963 = vst [vmem:[%s3888_s8 + $0x58] sm:$0xff] %v946_v0 }
 0x1cc   : > { %967 = vst [vmem:[%s3888_s8 + $0x78] sm:$0xff] %v950_v2 }
 0x1cd PF: > { %s4912_s11 = sld [smem:[#allocation22_spill]] }
 0x1d3   : > { %p2802_p5 = scmp.eq.s32.totalorder %s4912_s11, 0 }
 0x1d4   : > { %s3936_s18 = scalar_lea.vmem (!%p2802_p5), [#allocation2], %s3789_s12 }
 0x1d5   : > { %971 = sbr.rel (%p2802_p5) target bundleno = 493 (0x1ed), region = 133 }
 0x1da   : > { %v973_v1 = vld [vmem:[%s3936_s18] sm:$0xff]  ;;  %v974_v3 = vld [vmem:[%s3936_s18 + $0x8] sm:$0xff]  ;;  %v975_v4 = vld [vmem:[%s3936_s18 + $0x10] sm:$0xff] }
 0x1db   : > { %v989_v5 = vadd.f32 %v973_v1, %v3807_v32  ;;  %v990_v6 = vadd.f32 %v974_v3, %v3815_v36  ;;  %v991_v7 = vadd.f32 %v975_v4, %v3823_v40  ;;  %v976_v8 = vld [vmem:[%s3936_s18 + $0x18] sm:$0xff]  ;;  %v977_v9 = vld [vmem:[%s3936_s18 + $0x20] sm:$0xff]  ;;  %v978_v10 = vld [vmem:[%s3936_s18 + $0x28] sm:$0xff] }
 0x1dc   : > { %v992_v11 = vadd.f32 %v976_v8, %v3831_v44  ;;  %v979_v12 = vld [vmem:[%s3936_s18 + $0x30] sm:$0xff]  ;;  %v993_v13 = vadd.f32 %v977_v9, %v3809_v33  ;;  %v980_v32 = vld [vmem:[%s3936_s18 + $0x38] sm:$0xff]  ;;  %v994_v36 = vadd.f32 %v978_v10, %v3817_v37  ;;  %v981_v40 = vld [vmem:[%s3936_s18 + $0x40] sm:$0xff] }
 0x1dd   : > { %1005 = vst [vmem:[%s3936_s18] sm:$0xff] %v989_v5  ;;  %v995_v14 = vadd.f32 %v979_v12, %v3825_v41  ;;  %v982_v44 = vld [vmem:[%s3936_s18 + $0x48] sm:$0xff]  ;;  %v996_v15 = vadd.f32 %v980_v32, %v3833_v45  ;;  %v983_v33 = vld [vmem:[%s3936_s18 + $0x50] sm:$0xff]  ;;  %v997_v16 = vadd.f32 %v981_v40, %v3811_v34  ;;  %v984_v37 = vld [vmem:[%s3936_s18 + $0x58] sm:$0xff] }
 0x1de   : > { %1006 = vst [vmem:[%s3936_s18 + $0x8] sm:$0xff] %v990_v6  ;;  %v998_v17 = vadd.f32 %v982_v44, %v3819_v38  ;;  %v985_v18 = vld [vmem:[%s3936_s18 + $0x60] sm:$0xff]  ;;  %v999_v41 = vadd.f32 %v983_v33, %v3827_v42  ;;  %v986_v45 = vld [vmem:[%s3936_s18 + $0x68] sm:$0xff]  ;;  %v1000_v19 = vadd.f32 %v984_v37, %v3835_v46  ;;  %v987_v20 = vld [vmem:[%s3936_s18 + $0x70] sm:$0xff] }
 0x1df   : > { %1007 = vst [vmem:[%s3936_s18 + $0x10] sm:$0xff] %v991_v7  ;;  %v1001_v34 = vadd.f32 %v985_v18, %v3813_v35  ;;  %v988_v21 = vld [vmem:[%s3936_s18 + $0x78] sm:$0xff]  ;;  %v1002_v38 = vadd.f32 %v986_v45, %v3821_v39  ;;  %v1003_v22 = vadd.f32 %v987_v20, %v3829_v43 }
 0x1e0   : > { %1008 = vst [vmem:[%s3936_s18 + $0x18] sm:$0xff] %v992_v11  ;;  %v1004_v42 = vadd.f32 %v988_v21, %v3837_v47 }
 0x1e1   : > { %1009 = vst [vmem:[%s3936_s18 + $0x20] sm:$0xff] %v993_v13 }
 0x1e2   : > { %1010 = vst [vmem:[%s3936_s18 + $0x28] sm:$0xff] %v994_v36 }
 0x1e3   : > { %1011 = vst [vmem:[%s3936_s18 + $0x30] sm:$0xff] %v995_v14 }
 0x1e4   : > { %1012 = vst [vmem:[%s3936_s18 + $0x38] sm:$0xff] %v996_v15 }
 0x1e5   : > { %1013 = vst [vmem:[%s3936_s18 + $0x40] sm:$0xff] %v997_v16 }
 0x1e6   : > { %1014 = vst [vmem:[%s3936_s18 + $0x48] sm:$0xff] %v998_v17 }
 0x1e7   : > { %1015 = vst [vmem:[%s3936_s18 + $0x50] sm:$0xff] %v999_v41 }
 0x1e8   : > { %1016 = vst [vmem:[%s3936_s18 + $0x58] sm:$0xff] %v1000_v19 }
 0x1e9   : > { %1017 = vst [vmem:[%s3936_s18 + $0x60] sm:$0xff] %v1001_v34 }
 0x1ea   : > { %1018 = vst [vmem:[%s3936_s18 + $0x68] sm:$0xff] %v1002_v38 }
 0x1eb   : > { %1019 = vst [vmem:[%s3936_s18 + $0x70] sm:$0xff] %v1003_v22 }
 0x1ec   : > { %1020 = vst [vmem:[%s3936_s18 + $0x78] sm:$0xff] %v1004_v42 }
 0x1ed PF: > { %s4913_s22 = sld [smem:[#allocation22_spill]] }
 0x1ee   : > { %s4914_s23 = sld [smem:[#allocation21_spill]] }
 0x1f3   : > { %p1021_p6 = scmp.eq.s32.totalorder %s4913_s22, 1 }
 0x1f4   : > { %p1022_p7 = scmp.eq.s32.totalorder %s4914_s23, 0 }
 0x1f6   : > { %p1023_p8 = pnand %p1022_p7, %p1021_p6 }
 0x1f8   : > { %1026 = sbr.rel (%p1023_p8) target bundleno = 511 (0x1ff), region = 137 }
 0x1fd   : > { %v3535_v35 = vmov 0.0  }
 0x1fe   : > { %1027 = vst [vmem:[#allocation3] sm:$0x3] %v3535_v35 }
 0x1ff PF: > { %s4915_s2 = sld [smem:[#allocation22_spill]] }
 0x205   : > { %p2803_p9 = scmp.ne.s32.totalorder %s4915_s2, 1 }
 0x206   : > { %s3992_s15 = scalar_lea.vmem (!%p2803_p9), [#allocation2], %s3789_s12 }
 0x207   : > { %1030 = sbr.rel (%p2803_p9) target bundleno = 572 (0x23c), region = 141 }
 0x20c   : > { %v1032_v39 = vld [vmem:[%s3992_s15] sm:$0xff]  ;;  %v1033_v43 = vld [vmem:[%s3992_s15 + $0x8] sm:$0xff]  ;;  %v1034_v46 = vld [vmem:[%s3992_s15 + $0x10] sm:$0xff] }
 0x20d   : > { %v1035_v47 = vld [vmem:[%s3992_s15 + $0x18] sm:$0xff]  ;;  %v1049_v23 = vadd.f32 %v1033_v43, %v1032_v39  ;;  %v1073_v24 = vmul.f32 %v1032_v39, %v1032_v39  ;;  %v1074_v25 = vmul.f32 %v1033_v43, %v1033_v43  ;;  %v1075_v26 = vmul.f32 %v1034_v46, %v1034_v46  ;;  %v1036_v27 = vld [vmem:[%s3992_s15 + $0x20] sm:$0xff]  ;;  %v1037_v31 = vld [vmem:[%s3992_s15 + $0x28] sm:$0xff] }
 0x20e   : > { %v1076_v29 = vmul.f32 %v1035_v47, %v1035_v47  ;;  %v1077_v49 = vmul.f32 %v1036_v27, %v1036_v27  ;;  %v1038_v51 = vld [vmem:[%s3992_s15 + $0x30] sm:$0xff]  ;;  %v1078_v53 = vmul.f32 %v1037_v31, %v1037_v31  ;;  %v1039_v55 = vld [vmem:[%s3992_s15 + $0x38] sm:$0xff]  ;;  %v1040_v59 = vld [vmem:[%s3992_s15 + $0x40] sm:$0xff] }
 0x20f   : > { %v1050_v28 = vadd.f32 %v1049_v23, %v1034_v46  ;;  %v1089_v30 = vadd.f32 %v1074_v25, %v1073_v24  ;;  %v1079_v57 = vmul.f32 %v1038_v51, %v1038_v51  ;;  %v1080_v61 = vmul.f32 %v1039_v55, %v1039_v55  ;;  %v1041_v63 = vld [vmem:[%s3992_s15 + $0x48] sm:$0xff]  ;;  %v1042_v3 = vld [vmem:[%s3992_s15 + $0x50] sm:$0xff]  ;;  %v1043_v7 = vld [vmem:[%s3992_s15 + $0x58] sm:$0xff] }
 0x210   : > { %v1081_v2 = vmul.f32 %v1040_v59, %v1040_v59  ;;  %v1082_v5 = vmul.f32 %v1041_v63, %v1041_v63  ;;  %v1083_v9 = vmul.f32 %v1042_v3, %v1042_v3  ;;  %v1044_v11 = vld [vmem:[%s3992_s15 + $0x60] sm:$0xff]  ;;  %v1084_v13 = vmul.f32 %v1043_v7, %v1043_v7  ;;  %v1045_v36 = vld [vmem:[%s3992_s15 + $0x68] sm:$0xff]  ;;  %v1046_v15 = vld [vmem:[%s3992_s15 + $0x70] sm:$0xff] }
 0x211   : > { %v1051_v48 = vadd.f32 %v1050_v28, %v1035_v47  ;;  %v1090_v50 = vadd.f32 %v1089_v30, %v1075_v26  ;;  %v1085_v14 = vmul.f32 %v1044_v11, %v1044_v11  ;;  %v1086_v16 = vmul.f32 %v1045_v36, %v1045_v36  ;;  %v1047_v17 = vld [vmem:[%s3992_s15 + $0x78] sm:$0xff]  ;;  %v1048_v25 = vld [vmem:[#allocation3] sm:$0x1]  ;;  %v1072_v30 = vld [vmem:[#allocation3 + $0x1] sm:$0x1] }
 0x212   : > { %v1087_v41 = vmul.f32 %v1046_v15, %v1046_v15  ;;  %v1088_v20 = vmul.f32 %v1047_v17, %v1047_v17 }
 0x213   : > { %v1052_v52 = vadd.f32 %v1051_v48, %v1036_v27  ;;  %v1091_v54 = vadd.f32 %v1090_v50, %v1076_v29 }
 0x215   : > { %v1053_v56 = vadd.f32 %v1052_v52, %v1037_v31  ;;  %v1092_v58 = vadd.f32 %v1091_v54, %v1077_v49 }
 0x217   : > { %v1054_v60 = vadd.f32 %v1053_v56, %v1038_v51  ;;  %v1093_v62 = vadd.f32 %v1092_v58, %v1078_v53 }
 0x219   : > { %v1055_v0 = vadd.f32 %v1054_v60, %v1039_v55  ;;  %v1094_v1 = vadd.f32 %v1093_v62, %v1079_v57 }
 0x21b   : > { %v1056_v4 = vadd.f32 %v1055_v0, %v1040_v59  ;;  %v1095_v6 = vadd.f32 %v1094_v1, %v1080_v61 }
 0x21d   : > { %v1057_v8 = vadd.f32 %v1056_v4, %v1041_v63  ;;  %v1096_v10 = vadd.f32 %v1095_v6, %v1081_v2 }
 0x21f   : > { %v1058_v12 = vadd.f32 %v1057_v8, %v1042_v3  ;;  %v1097_v32 = vadd.f32 %v1096_v10, %v1082_v5 }
 0x221   : > { %v1059_v40 = vadd.f32 %v1058_v12, %v1043_v7  ;;  %v1098_v44 = vadd.f32 %v1097_v32, %v1083_v9 }
 0x223   : > { %v1060_v33 = vadd.f32 %v1059_v40, %v1044_v11  ;;  %v1099_v37 = vadd.f32 %v1098_v44, %v1084_v13 }
 0x225   : > { %v1061_v18 = vadd.f32 %v1060_v33, %v1045_v36  ;;  %v1100_v45 = vadd.f32 %v1099_v37, %v1085_v14 }
 0x227   : > { %v1062_v19 = vadd.f32 %v1061_v18, %v1046_v15  ;;  %v1101_v34 = vadd.f32 %v1100_v45, %v1086_v16 }
 0x229   : > { %v1063_v21 = vadd.f32 %v1062_v19, %v1047_v17  ;;  %v1102_v38 = vadd.f32 %v1101_v34, %v1087_v41 }
 0x22b   : > { %v1064_v22 = vrot.slane %v1063_v21, 4  ;;  %v1103_v42 = vadd.f32 %v1102_v38, %v1088_v20 }
 0x22d   : > { %v1065_v35 = vadd.f32 %v1064_v22, %v1063_v21  ;;  %v1104_v39 = vrot.slane %v1103_v42, 4 }
 0x22f   : > { %v1066_v43 = vrot.slane %v1065_v35, 2  ;;  %v1105_v46 = vadd.f32 %v1104_v39, %v1103_v42 }
 0x231   : > { %v1067_v47 = vadd.f32 %v1066_v43, %v1065_v35  ;;  %v1106_v23 = vrot.slane %v1105_v46, 2 }
 0x233   : > { %v1068_v24 = vrot.slane %v1067_v47, 1  ;;  %v1107_v26 = vadd.f32 %v1106_v23, %v1105_v46 }
 0x235   : > { %v1069_v27 = vadd.f32 %v1068_v24, %v1067_v47  ;;  %v1108_v28 = vrot.slane %v1107_v26, 1 }
 0x237   : > { %v1070_v29 = vadd.f32 %v1069_v27, %v1048_v25  ;;  %v1109_v31 = vadd.f32 %v1108_v28, %v1107_v26 }
 0x239   : > { %1071 = vst [vmem:[#allocation3] sm:$0x1] %v1070_v29  ;;  %v1110_v48 = vadd.f32 %v1109_v31, %v1072_v30 }
 0x23b   : > { %1111 = vst [vmem:[#allocation3 + $0x1] sm:$0x1] %v1110_v48 }
 0x23c PF: > { %s4916_s14 = sld [smem:[#allocation21_spill]] }
 0x242   : > { %p1112_p10 = scmp.eq.s32.totalorder %s4916_s14, 1 }
 0x244   : > { %p1113_p11 = pnand %p1112_p10, %p1021_p6 }
 0x245   : > { %s4918_s20 = sld [smem:[#allocation32_spill]] (!%p1113_p11)  ;;  %s4029_s10 = smov (!%p1113_p11), 0  }
 0x246   : > { %1116 = sbr.rel (%p1113_p11) target bundleno = 1440 (0x5a0), region = 145  ;;  %s4919_s16 = sld [smem:[#allocation33_spill]] (!%p1113_p11) }
 0x24b   : > { %v1117_v49 = vld [vmem:[#allocation3] sm:$0x1]  ;;  %v1119_v50 = vld [vmem:[#allocation3 + $0x1] sm:$0x1]  ;;  %v3536_v53 = vmov 0.0  }
 0x24c   : > { %v1118_v51 = vmul.f32 0.00390625, %v1117_v49  ;;  %v1120_v52 = vmul.f32 0.00390625, %v1119_v50  ;;  %1140 = vst [vmem:[#allocation3] sm:$0x3] %v3536_v53  ;;  %v1124_v63 = vld [vmem:[%s4918_s20] sm:$0x1] }
 0x24d   : > { %v4022_v3 = vld [vmem:[%s4919_s16] sm:$0x1] }
 0x24e   : > { %v1121_v54 = vmul.f32 %v1118_v51, %v1118_v51 }
 0x250   : > { %v1122_v55 = vsub.f32 %v1120_v52, %v1121_v54 }
 0x252   : > { %v1123_v56 = vmax.f32 %v1122_v55, 0.0 }
 0x254   : > { %v1125_v57 = vadd.f32 0.001, %v1123_v56 }
 0x256   : > { %3153 = vrsqrt.f32 %v1125_v57  ;;  %vm1132_vm1 = vweird.f32 %v1125_v57 }
 0x25c   : > { %v3154_v58 = vpop.eup %3153 }
 0x25d   : > { %v1127_v59 = vmul.f32 %v3154_v58, %v1125_v57  ;;  %vm1133_vm2 = vweird.f32 %v3154_v58 }
 0x25e   : > { %vm1134_vm3 = vmor %vm1132_vm1, %vm1133_vm2 }
 0x25f   : > { %v1128_v60 = vmul.f32 %v3154_v58, %v1127_v59 }
 0x261   : > { %v1129_v61 = vmul.f32 0.5, %v1128_v60 }
 0x263   : > { %v1130_v62 = vsub.f32 1.5, %v1129_v61 }
 0x265   : > { %v1131_v0 = vmul.f32 %v3154_v58, %v1130_v62 }
 0x267   : > { %v1135_v2 = vsel %vm1134_vm3, %v3154_v58, %v1131_v0 }
 0x268   : > { %v4017_v1 = vmul.f32 %v1135_v2, %v1124_v63 }
 0x26a   : > { %v4025_v4 = vmul.f32 %v4017_v1, %v1118_v51 }
 0x26c   : > { %v1139_v5 = vsub.f32 %v4022_v3, %v4025_v4 }
 0x26d LB: >> { %v1247_v6 = vld [vmem:[#allocation11 + $0x78] sm:$0xff]  ;;  %v1246_v7 = vld [vmem:[#allocation11 + $0x70] sm:$0xff]  ;;  %s2804_s29 = sshll.u32 %s3515_s10, 7  ;;  %vm1250_vm4 = vcmask 64512   ;;  %s4920_s5 = sld [smem:[#allocation28_spill]]  ;;  %v1245_v9 = vld [vmem:[#allocation11 + $0x68] sm:$0xff]  ;;  %s3515_s10 = sphi %s4029_s10, %s1146_s10  }
 0x26e   : >> { %v1249_v8 = vld [vmem:[#allocation10 + $0x8] sm:$0xff]  ;;  %1364 = vmatpush.msra.mxu1 %v1247_v6  ;;  %2891 = vmatpush.msra.mxu2 %v1247_v6  ;;  %v1244_v12 = vld [vmem:[#allocation11 + $0x60] sm:$0xff]  ;;  %v1243_v13 = vld [vmem:[#allocation11 + $0x58] sm:$0xff]  ;;  %v4052_v37 = vperm.slane %v4017_v1, 0  ;;  %s4057_s8 = scalar_lea.vmem [#allocation2], %s2804_s29  ;;  %v4067_v34 = vperm.slane %v1139_v5, 0 }
 0x26f   : >> { %1314 = vmatpush.msra.mxu0 %v1249_v8  ;;  %2890 = vmatpush.msra.mxu3 %v1249_v8  ;;  %v1242_v32 = vld [vmem:[#allocation11 + $0x50] sm:$0xff]  ;;  %v1241_v14 = vld [vmem:[#allocation11 + $0x48] sm:$0xff]  ;;  %v1240_v44 = vld [vmem:[#allocation11 + $0x40] sm:$0xff]  ;;  %s4921_s22 = sld [smem:[#allocation31_spill]]  ;;  %s1146_s10 = sadd.s32 1, %s3515_s10  }
 0x270   : >> { %1365 = vmatpush.msra.mxu1 %v1246_v7  ;;  %2893 = vmatpush.msra.mxu2 %v1246_v7  ;;  %v1239_v15 = vld [vmem:[#allocation11 + $0x38] sm:$0xff]  ;;  %v1238_v33 = vld [vmem:[#allocation11 + $0x30] sm:$0xff]  ;;  %v1149_v18 = vld [vmem:[%s4057_s8] sm:$0xff]  ;;  %p1143_p12 = scmp.ge.s32.totalorder %s1146_s10, 2  }
 0x271   : >> { %2892 = vmatpush.msrb.mxu3 %v1247_v6  ;;  %v1155_v41 = vld [vmem:[%s4057_s8 + $0x30] sm:$0xff]  ;;  %v1237_v45 = vld [vmem:[#allocation11 + $0x28] sm:$0xff]  ;;  %v1236_v19 = vld [vmem:[#allocation11 + $0x20] sm:$0xff]  ;;  %v1166_v20 = vmul.f32 %v4052_v37, %v1149_v18  ;;  %s4922_s15 = sld [smem:[#allocation32_spill]] (%p1143_p12)  ;;  %s4211_s7 = smov (%p1143_p12), 0  }
 0x272   : >> { %1366 = vmatpush.msra.mxu1 %v1245_v9  ;;  %2895 = vmatpush.msra.mxu2 %v1245_v9  ;;  %v1172_v21 = vmul.f32 %v4052_v37, %v1155_v41  ;;  %v1235_v38 = vld [vmem:[#allocation11 + $0x18] sm:$0xff]  ;;  %v1234_v22 = vld [vmem:[#allocation11 + $0x10] sm:$0xff]  ;;  %v1233_v23 = vld [vmem:[#allocation11 + $0x8] sm:$0xff]  ;;  %s4923_s13 = sld [smem:[#allocation33_spill]] (%p1143_p12) }
 0x273   : >> { %s4040_s6 = scalar_lea.vmem %s4920_s5, %s2804_s29  ;;  %2894 = vmatpush.msrb.mxu3 %v1246_v7  ;;  %v1183_v35 = vadd.f32 %v4067_v34, %v1166_v20  ;;  %v1150_v46 = vld [vmem:[%s4057_s8 + $0x8] sm:$0xff]  ;;  %v1156_v47 = vld [vmem:[%s4057_s8 + $0x38] sm:$0xff]  ;;  %v1151_v31 = vld [vmem:[%s4057_s8 + $0x10] sm:$0xff] }
 0x274   : >> { %v1216_v10 = vld [vmem:[%s4040_s6] sm:$0xff]  ;;  %v1226_v11 = vld [vmem:[%s4040_s6 + $0x50] sm:$0xff]  ;;  %1367 = vmatpush.msra.mxu1 %v1244_v12  ;;  %2897 = vmatpush.msra.mxu2 %v1244_v12  ;;  %v1217_v36 = vld [vmem:[%s4040_s6 + $0x8] sm:$0xff]  ;;  %v1189_v39 = vadd.f32 %v4067_v34, %v1172_v21  ;;  %v1167_v27 = vmul.f32 %v4052_v37, %v1150_v46  ;;  %v1173_v28 = vmul.f32 %v4052_v37, %v1156_v47 }
 0x275   : >> { %2805 = vmatmul.msk.f32.vlgmr.msra.gmra.mxu0 %vm1250_vm4, %v1216_v10  ;;  %2815 = vmatmul.msk.f32.vlgmr.msra.gmra.mxu3 %vm1250_vm4, %v1226_v11  ;;  %v1227_v40 = vld [vmem:[%s4040_s6 + $0x58] sm:$0xff]  ;;  %v1218_v16 = vld [vmem:[%s4040_s6 + $0x10] sm:$0xff]  ;;  %v1228_v17 = vld [vmem:[%s4040_s6 + $0x60] sm:$0xff]  ;;  %v1199_v25 = vmax.f32 %v1183_v35, 0.0  ;;  %v1168_v51 = vmul.f32 %v4052_v37, %v1151_v31 }
 0x276   : >> { %2896 = vmatpush.msrb.mxu3 %v1245_v9  ;;  %1368 = vmatpush.msra.mxu1 %v1243_v13  ;;  %v1219_v42 = vld [vmem:[%s4040_s6 + $0x18] sm:$0xff]  ;;  %v1229_v43 = vld [vmem:[%s4040_s6 + $0x68] sm:$0xff]  ;;  %v1205_v26 = vmax.f32 %v1189_v39, 0.0  ;;  %v1184_v29 = vadd.f32 %v4067_v34, %v1167_v27  ;;  %v1190_v30 = vadd.f32 %v4067_v34, %v1173_v28  ;;  %v1220_v48 = vld [vmem:[%s4040_s6 + $0x20] sm:$0xff] }
 0x277   : >> { %2899 = vmatpush.msra.mxu2 %v1243_v13  ;;  %v1232_v24 = vld [vmem:[#allocation11] sm:$0xff]  ;;  %v1230_v49 = vld [vmem:[%s4040_s6 + $0x70] sm:$0xff]  ;;  %v1162_v56 = vld [vmem:[%s4057_s8 + $0x68] sm:$0xff]  ;;  %v1185_v57 = vadd.f32 %v4067_v34, %v1168_v51 }
 0x278   : >> { %2898 = vmatpush.msrb.mxu3 %v1244_v12  ;;  %1369 = vmatpush.msra.mxu1 %v1242_v32  ;;  %v1157_v50 = vld [vmem:[%s4057_s8 + $0x40] sm:$0xff]  ;;  %v1200_v52 = vmax.f32 %v1184_v29, 0.0  ;;  %v1206_v54 = vmax.f32 %v1190_v30, 0.0  ;;  %v1221_v58 = vld [vmem:[%s4040_s6 + $0x28] sm:$0xff]  ;;  %v1179_v60 = vmul.f32 %v4052_v37, %v1162_v56  ;;  %v1231_v61 = vld [vmem:[%s4040_s6 + $0x78] sm:$0xff] }
 0x279   : >> { %2901 = vmatpush.msra.mxu2 %v1242_v32  ;;  %v1174_v55 = vmul.f32 %v4052_v37, %v1157_v50  ;;  %v1152_v62 = vld [vmem:[%s4057_s8 + $0x18] sm:$0xff]  ;;  %v1158_v63 = vld [vmem:[%s4057_s8 + $0x48] sm:$0xff]  ;;  %v1201_v0 = vmax.f32 %v1185_v57, 0.0  ;;  %v1163_v9 = vld [vmem:[%s4057_s8 + $0x70] sm:$0xff] }
 0x27a   : >> { %1370 = vmatpush.msra.mxu1 %v1241_v14  ;;  %2900 = vmatpush.msrb.mxu3 %v1243_v13  ;;  %v1196_v6 = vadd.f32 %v4067_v34, %v1179_v60  ;;  %v1169_v7 = vmul.f32 %v4052_v37, %v1152_v62  ;;  %v1175_v8 = vmul.f32 %v4052_v37, %v1158_v63  ;;  %v1223_v20 = vld [vmem:[%s4040_s6 + $0x38] sm:$0xff]  ;;  %v1154_v21 = vld [vmem:[%s4057_s8 + $0x28] sm:$0xff]  ;;  %v1534_v1 = vld [vmem:[%s4922_s15 + $0x1] sm:$0x1] (%p1143_p12) }
 0x27b   : >> { %2903 = vmatpush.msra.mxu2 %v1241_v14  ;;  %v1191_v59 = vadd.f32 %v4067_v34, %v1174_v55  ;;  %v1180_v13 = vmul.f32 %v4052_v37, %v1163_v9  ;;  %v1171_v39 = vmul.f32 %v4052_v37, %v1154_v21  ;;  %v1225_v30 = vld [vmem:[%s4040_s6 + $0x48] sm:$0xff]  ;;  %v4204_v5 = vld [vmem:[%s4923_s13 + $0x1] sm:$0x1] (%p1143_p12) }
 0x27c   : >> { %1371 = vmatpush.msra.mxu1 %v1240_v44  ;;  %2902 = vmatpush.msrb.mxu3 %v1242_v32  ;;  %v1212_v10 = vmax.f32 %v1196_v6, 0.0  ;;  %v1186_v11 = vadd.f32 %v4067_v34, %v1169_v7  ;;  %v1192_v12 = vadd.f32 %v4067_v34, %v1175_v8  ;;  %v1153_v32 = vld [vmem:[%s4057_s8 + $0x20] sm:$0xff] }
 0x27d   : >> { %2806 = vmatmul.msk.f32.gmra.mxu0 %vm1250_vm4, %v1217_v36  ;;  %2816 = vmatmul.msk.f32.gmra.mxu3 %vm1250_vm4, %v1227_v40  ;;  %v1207_v2 = vmax.f32 %v1191_v59, 0.0  ;;  %v1222_v36 = vld [vmem:[%s4040_s6 + $0x30] sm:$0xff]  ;;  %v1188_v47 = vadd.f32 %v4067_v34, %v1171_v39 }
 0x27e   : >> { %2905 = vmatpush.msra.mxu2 %v1240_v44  ;;  %1372 = vmatpush.msra.mxu1 %v1239_v15  ;;  %v1159_v40 = vld [vmem:[%s4057_s8 + $0x50] sm:$0xff] }
 0x27f   : >> { %2904 = vmatpush.msrb.mxu3 %v1241_v14  ;;  %v1170_v14 = vmul.f32 %v4052_v37, %v1153_v32 }
 0x280   : >> { %2907 = vmatpush.msra.mxu2 %v1239_v15  ;;  %1373 = vmatpush.msra.mxu1 %v1238_v33 }
 0x281   : >> { %2906 = vmatpush.msrb.mxu3 %v1240_v44  ;;  %v1202_v44 = vmax.f32 %v1186_v11, 0.0  ;;  %v1187_v18 = vadd.f32 %v4067_v34, %v1170_v14 }
 0x282   : >> { %2909 = vmatpush.msra.mxu2 %v1238_v33  ;;  %1374 = vmatpush.msra.mxu1 %v1237_v45 }
 0x283   : >> { %2908 = vmatpush.msrb.mxu3 %v1239_v15  ;;  %v1208_v15 = vmax.f32 %v1192_v12, 0.0 }
 0x284   : >> { %2911 = vmatpush.msra.mxu2 %v1237_v45  ;;  %1375 = vmatpush.msra.mxu1 %v1236_v19 }
 0x285   : >> { %2807 = vmatmul.msk.f32.gmra.mxu0 %vm1250_vm4, %v1218_v16  ;;  %2817 = vmatmul.msk.f32.gmra.mxu3 %vm1250_vm4, %v1228_v17  ;;  %v1176_v16 = vmul.f32 %v4052_v37, %v1159_v40  ;;  %v1164_v17 = vld [vmem:[%s4057_s8 + $0x78] sm:$0xff] }
 0x286   : >> { %2913 = vmatpush.msra.mxu2 %v1236_v19  ;;  %1376 = vmatpush.msra.mxu1 %v1235_v38 }
 0x287   : >> { %2910 = vmatpush.msrb.mxu3 %v1238_v33  ;;  %v1197_v33 = vadd.f32 %v4067_v34, %v1180_v13 }
 0x288   : >> { %2915 = vmatpush.msra.mxu2 %v1235_v38  ;;  %1377 = vmatpush.msra.mxu1 %v1234_v22 }
 0x289   : >> { %2912 = vmatpush.msrb.mxu3 %v1237_v45  ;;  %v1213_v41 = vmax.f32 %v1197_v33, 0.0  ;;  %v1193_v45 = vadd.f32 %v4067_v34, %v1176_v16 }
 0x28a   : >> { %2917 = vmatpush.msra.mxu2 %v1234_v22  ;;  %1378 = vmatpush.msra.mxu1 %v1233_v23 }
 0x28b   : >> { %2914 = vmatpush.msrb.mxu3 %v1236_v19  ;;  %v1181_v19 = vmul.f32 %v4052_v37, %v1164_v17 }
 0x28c   : >> { %2919 = vmatpush.msra.mxu2 %v1233_v23  ;;  %1379 = vmatpush.msra.mxu1 %v1232_v24 }
 0x28d   : >> { %2808 = vmatmul.msk.f32.gmra.mxu0 %vm1250_vm4, %v1219_v42  ;;  %2818 = vmatmul.msk.f32.gmra.mxu3 %vm1250_vm4, %v1229_v43  ;;  %v1209_v42 = vmax.f32 %v1193_v45, 0.0  ;;  %v1198_v35 = vadd.f32 %v4067_v34, %v1181_v19 }
 0x28e   : >> { %2921 = vmatpush.msra.mxu2 %v1232_v24  ;;  %1380 = vmatmul.f32.vlgmr.msra.gmra.mxu1 %v1199_v25  ;;  %v1161_v25 = vld [vmem:[%s4057_s8 + $0x60] sm:$0xff] }
 0x28f   : >> { %1398 = vmatmul.f32.vlgmr.msra.gmra.mxu2 %v1205_v26  ;;  %2916 = vmatpush.msrb.mxu3 %v1235_v38  ;;  %v1160_v38 = vld [vmem:[%s4057_s8 + $0x58] sm:$0xff]  ;;  %v1214_v46 = vmax.f32 %v1198_v35, 0.0  ;;  %v1204_v26 = vmax.f32 %v1188_v47, 0.0  ;;  %v1178_v28 = vmul.f32 %v4052_v37, %v1161_v25 }
 0x290   : >> { %v1177_v43 = vmul.f32 %v4052_v37, %v1160_v38 }
 0x291   : >> { %2918 = vmatpush.msrb.mxu3 %v1234_v22  ;;  %v1203_v22 = vmax.f32 %v1187_v18, 0.0  ;;  %v1195_v29 = vadd.f32 %v4067_v34, %v1178_v28 }
 0x293   : >> { %2920 = vmatpush.msrb.mxu3 %v1233_v23  ;;  %v1194_v23 = vadd.f32 %v4067_v34, %v1177_v43  ;;  %v1211_v31 = vmax.f32 %v1195_v29, 0.0  ;;  %v4143_v34 = vld [vmem:[%s4921_s22 + $0x1] ss:$0 sm:$0xff] }
 0x295   : >> { %2809 = vmatmul.msk.f32.gmra.mxu0 %vm1250_vm4, %v1220_v48  ;;  %2819 = vmatmul.msk.f32.gmra.mxu3 %vm1250_vm4, %v1230_v49  ;;  %v1210_v27 = vmax.f32 %v1194_v23, 0.0 }
 0x296   : >> { %1383 = vmatmul.f32.gmra.mxu1 %v1200_v52  ;;  %2922 = vmatpush.msrb.mxu3 %v1232_v24  ;;  %v1224_v24 = vld [vmem:[%s4040_s6 + $0x40] sm:$0xff] }
 0x297   : >> { %1401 = vmatmul.f32.gmra.mxu2 %v1206_v54 }
 0x29d   : >> { %2810 = vmatmul.msk.f32.gmra.mxu0 %vm1250_vm4, %v1221_v58  ;;  %2820 = vmatmul.msk.f32.gmra.mxu3 %vm1250_vm4, %v1231_v61 }
 0x29e   : >> { %1386 = vmatmul.f32.gmra.mxu1 %v1201_v0 }
 0x29f   : >> { %1404 = vmatmul.f32.gmra.mxu2 %v1207_v2 }
 0x2a5   : >> { %2811 = vmatmul.msk.f32.gmra.mxu0 %vm1250_vm4, %v1222_v36  ;;  %1419 = vmatmul.f32.vlgmr.msrb.gmra.mxu3 %v1212_v10 }
 0x2a6   : >> { %1389 = vmatmul.f32.gmra.mxu1 %v1202_v44 }
 0x2a7   : >> { %1407 = vmatmul.f32.gmra.mxu2 %v1208_v15 }
 0x2ad   : >> { %2812 = vmatmul.msk.f32.gmra.mxu0 %vm1250_vm4, %v1223_v20  ;;  %1422 = vmatmul.f32.gmra.mxu3 %v1213_v41 }
 0x2ae   : >> { %1392 = vmatmul.f32.gmra.mxu1 %v1203_v22 }
 0x2af   : >> { %1410 = vmatmul.f32.gmra.mxu2 %v1209_v42 }
 0x2b5   : >> { %2813 = vmatmul.msk.f32.gmra.mxu0 %vm1250_vm4, %v1224_v24  ;;  %1425 = vmatmul.f32.gmra.mxu3 %v1214_v46 }
 0x2b6   : >> { %1395 = vmatmul.f32.gmra.mxu1 %v1204_v26 }
 0x2b7   : >> { %1413 = vmatmul.f32.gmra.mxu2 %v1210_v27 }
 0x2bd   : >> { %2814 = vmatmul.msk.f32.gmra.mxu0 %vm1250_vm4, %v1225_v30 }
 0x2bf   : >> { %1416 = vmatmul.f32.gmra.mxu2 %v1211_v31 }
 0x2f2   : >> { %v1316_v48 = vpop.f32.mrf.mxu0 }
 0x2f8   : >> { %v4134_v49 = vpop.f32.mrf.mxu3 }
 0x2fa   : >> { %v1319_v50 = vpop.f32.mrf.mxu0 }
 0x300   : >> { %v4136_v51 = vpop.f32.mrf.mxu3 }
 0x302   : >> { %v1322_v52 = vpop.f32.mrf.mxu0 }
 0x308   : >> { %v4138_v54 = vpop.f32.mrf.mxu3 }
 0x30a   : >> { %v1325_v37 = vpop.f32.mrf.mxu0 }
 0x30b   : >> { %v1381_v55 = vpop.f32.mrf.mxu1 }
 0x30c   : >> { %v1382_v56 = vadd.f32 %v1381_v55, %v1316_v48 }
 0x30e   : >> { %v1431_v58 = vadd.f32 %v4143_v34, %v1382_v56 }
 0x310   : >> { %v1355_v57 = vpop.f32.mrf.mxu3  ;;  %1447 = vst [vmem:[%s4057_s8] sm:$0xff] %v1431_v58  ;;  %v1488_v42 = vmul.f32 %v1431_v58, %v1431_v58 }
 0x312   : >> { %v1328_v59 = vpop.f32.mrf.mxu0  ;;  %v1399_v60 = vpop.f32.mrf.mxu2 }
 0x313   : >> { %v1384_v61 = vpop.f32.mrf.mxu1 }
 0x314   : >> { %v1385_v62 = vadd.f32 %v1384_v61, %v1319_v50 }
 0x316   : >> { %v1432_v0 = vadd.f32 %v4143_v34, %v1385_v62 }
 0x318   : >> { %v1358_v63 = vpop.f32.mrf.mxu3  ;;  %1448 = vst [vmem:[%s4057_s8 + $0x8] sm:$0xff] %v1432_v0  ;;  %v1489_v20 = vmul.f32 %v1432_v0, %v1432_v0  ;;  %v1464_v43 = vadd.f32 %v1432_v0, %v1431_v58 }
 0x31a   : >> { %v1331_v2 = vpop.f32.mrf.mxu0  ;;  %v1402_v6 = vpop.f32.mrf.mxu2  ;;  %v1504_v23 = vadd.f32 %v1489_v20, %v1488_v42 }
 0x31b   : >> { %v1387_v7 = vpop.f32.mrf.mxu1 }
 0x31c   : >> { %v1388_v8 = vadd.f32 %v1387_v7, %v1322_v52 }
 0x31e   : >> { %v1433_v10 = vadd.f32 %v4143_v34, %v1388_v8 }
 0x320   : >> { %v1361_v9 = vpop.f32.mrf.mxu3  ;;  %1449 = vst [vmem:[%s4057_s8 + $0x10] sm:$0xff] %v1433_v10  ;;  %v1490_v35 = vmul.f32 %v1433_v10, %v1433_v10  ;;  %v1465_v26 = vadd.f32 %v1464_v43, %v1433_v10 }
 0x322   : >> { %v1334_v11 = vpop.f32.mrf.mxu0  ;;  %v1405_v13 = vpop.f32.mrf.mxu2  ;;  %v1505_v29 = vadd.f32 %v1504_v23, %v1490_v35 }
 0x323   : >> { %v1400_v12 = vadd.f32 %v1399_v60, %v1334_v11  ;;  %v1390_v36 = vpop.f32.mrf.mxu1 }
 0x324   : >> { %v1391_v40 = vadd.f32 %v1390_v36, %v1325_v37 }
 0x325   : >> { %v1437_v32 = vadd.f32 %v4143_v34, %v1400_v12 }
 0x326   : >> { %v1434_v44 = vadd.f32 %v4143_v34, %v1391_v40 }
 0x327   : >> { %1453 = vst [vmem:[%s4057_s8 + $0x30] sm:$0xff] %v1437_v32 }
 0x328   : >> { %v1420_v14 = vpop.f32.mrf.mxu3  ;;  %1450 = vst [vmem:[%s4057_s8 + $0x18] sm:$0xff] %v1434_v44  ;;  %v1491_v24 = vmul.f32 %v1434_v44, %v1434_v44  ;;  %v1466_v48 = vadd.f32 %v1465_v26, %v1434_v44 }
 0x329   : >> { %v1421_v15 = vadd.f32 %v1420_v14, %v1355_v57 }
 0x32a   : >> { %v1337_v33 = vpop.f32.mrf.mxu0  ;;  %v1408_v18 = vpop.f32.mrf.mxu2  ;;  %v1506_v37 = vadd.f32 %v1505_v29, %v1491_v24 }
 0x32b   : >> { %v4156_v16 = vadd.f32 %v4143_v34, %v1421_v15  ;;  %v1403_v17 = vadd.f32 %v1402_v6, %v1337_v33  ;;  %v1393_v45 = vpop.f32.mrf.mxu1 }
 0x32c   : >> { %v1394_v19 = vadd.f32 %v1393_v45, %v1328_v59 }
 0x32d   : >> { %1460 = vst [vmem:[%s4057_s8 + $0x68] sm:$0xff] %v4156_v16  ;;  %v1438_v41 = vadd.f32 %v4143_v34, %v1403_v17  ;;  %v1501_v35 = vmul.f32 %v4156_v16, %v4156_v16 }
 0x32e   : >> { %v1435_v38 = vadd.f32 %v4143_v34, %v1394_v19 }
 0x32f   : >> { %1454 = vst [vmem:[%s4057_s8 + $0x38] sm:$0xff] %v1438_v41 }
 0x330   : >> { %v1423_v21 = vpop.f32.mrf.mxu3  ;;  %1451 = vst [vmem:[%s4057_s8 + $0x20] sm:$0xff] %v1435_v38  ;;  %v1492_v30 = vmul.f32 %v1435_v38, %v1435_v38  ;;  %v1467_v56 = vadd.f32 %v1466_v48, %v1435_v38 }
 0x331   : >> { %v1424_v22 = vadd.f32 %v1423_v21, %v1358_v63 }
 0x332   : >> { %v1340_v39 = vpop.f32.mrf.mxu0  ;;  %v1411_v25 = vpop.f32.mrf.mxu2  ;;  %v1507_v59 = vadd.f32 %v1506_v37, %v1492_v30  ;;  %v1463_v37 = vld [vmem:[#allocation3] sm:$0x1] }
 0x333   : >> { %v4165_v46 = vadd.f32 %v4143_v34, %v1424_v22  ;;  %v1406_v47 = vadd.f32 %v1405_v13, %v1340_v39  ;;  %v1412_v28 = vadd.f32 %v1411_v25, %v4134_v49  ;;  %v1396_v31 = vpop.f32.mrf.mxu1 }
 0x334   : >> { %v1397_v52 = vadd.f32 %v1396_v31, %v1331_v2  ;;  %v1494_v2 = vmul.f32 %v1437_v32, %v1437_v32 }
 0x335   : >> { %1461 = vst [vmem:[%s4057_s8 + $0x70] sm:$0xff] %v4165_v46  ;;  %v1439_v27 = vadd.f32 %v4143_v34, %v1406_v47  ;;  %v1441_v50 = vadd.f32 %v4143_v34, %v1412_v28  ;;  %v1502_v47 = vmul.f32 %v4165_v46, %v4165_v46 }
 0x336   : >> { %v1436_v57 = vadd.f32 %v4143_v34, %v1397_v52 }
 0x337   : >> { %1455 = vst [vmem:[%s4057_s8 + $0x40] sm:$0xff] %v1439_v27  ;;  %v1496_v36 = vmul.f32 %v1439_v27, %v1439_v27  ;;  %v1498_v17 = vmul.f32 %v1441_v50, %v1441_v50 }
 0x338   : >> { %v1426_v55 = vpop.f32.mrf.mxu3  ;;  %1457 = vst [vmem:[%s4057_s8 + $0x50] sm:$0xff] %v1441_v50  ;;  %v1468_v60 = vadd.f32 %v1467_v56, %v1436_v57  ;;  %v1493_v61 = vmul.f32 %v1436_v57, %v1436_v57 }
 0x339   : >> { %v1427_v58 = vadd.f32 %v1426_v55, %v1361_v9  ;;  %1452 = vst [vmem:[%s4057_s8 + $0x28] sm:$0xff] %v1436_v57  ;;  %v1495_v9 = vmul.f32 %v1438_v41, %v1438_v41  ;;  %v1487_v57 = vld [vmem:[#allocation3 + $0x1] sm:$0x1] }
 0x33a   : >> { %v1343_v49 = vpop.f32.mrf.mxu0  ;;  %v1414_v0 = vpop.f32.mrf.mxu2  ;;  %v1469_v6 = vadd.f32 %v1468_v60, %v1437_v32  ;;  %v1508_v7 = vadd.f32 %v1507_v59, %v1493_v61 }
 0x33b   : >> { %v1446_v62 = vadd.f32 %v4143_v34, %v1427_v58  ;;  %v1409_v63 = vadd.f32 %v1408_v18, %v1343_v49  ;;  %v1415_v10 = vadd.f32 %v1414_v0, %v4136_v51 }
 0x33c   : >> { %v1509_v11 = vadd.f32 %v1508_v7, %v1494_v2  ;;  %v1470_v12 = vadd.f32 %v1469_v6, %v1438_v41 }
 0x33d   : >> { %1462 = vst [vmem:[%s4057_s8 + $0x78] sm:$0xff] %v1446_v62  ;;  %v1440_v8 = vadd.f32 %v4143_v34, %v1409_v63  ;;  %v1442_v13 = vadd.f32 %v4143_v34, %v1415_v10  ;;  %v1503_v24 = vmul.f32 %v1446_v62, %v1446_v62 }
 0x33e   : >> { %v1471_v40 = vadd.f32 %v1470_v12, %v1439_v27  ;;  %v1510_v14 = vadd.f32 %v1509_v11, %v1495_v9 }
 0x33f   : >> { %1456 = vst [vmem:[%s4057_s8 + $0x48] sm:$0xff] %v1440_v8  ;;  %v1497_v15 = vmul.f32 %v1440_v8, %v1440_v8  ;;  %v1499_v20 = vmul.f32 %v1442_v13, %v1442_v13 }
 0x340   : >> { %1458 = vst [vmem:[%s4057_s8 + $0x58] sm:$0xff] %v1442_v13  ;;  %v1472_v44 = vadd.f32 %v1471_v40, %v1440_v8  ;;  %v1511_v32 = vadd.f32 %v1510_v14, %v1496_v36 }
 0x342   : >> { %v1417_v33 = vpop.f32.mrf.mxu2  ;;  %v1512_v18 = vadd.f32 %v1511_v32, %v1497_v15  ;;  %v1473_v45 = vadd.f32 %v1472_v44, %v1441_v50 }
 0x343   : >> { %v1418_v51 = vadd.f32 %v1417_v33, %v4138_v54 }
 0x344   : >> { %v1474_v19 = vadd.f32 %v1473_v45, %v1442_v13  ;;  %v1513_v21 = vadd.f32 %v1512_v18, %v1498_v17 }
 0x345   : >> { %v1443_v41 = vadd.f32 %v4143_v34, %v1418_v51 }
 0x346   : >> { %v1514_v38 = vadd.f32 %v1513_v21, %v1499_v20 }
 0x347   : >> { %1459 = vst [vmem:[%s4057_s8 + $0x60] sm:$0xff] %v1443_v41  ;;  %v1475_v22 = vadd.f32 %v1474_v19, %v1443_v41  ;;  %v1500_v42 = vmul.f32 %v1443_v41, %v1443_v41 }
 0x349   : >> { %v1476_v39 = vadd.f32 %v1475_v22, %v4156_v16  ;;  %v1515_v43 = vadd.f32 %v1514_v38, %v1500_v42 }
 0x34b   : >> { %v1477_v54 = vadd.f32 %v1476_v39, %v4165_v46  ;;  %v1516_v23 = vadd.f32 %v1515_v43, %v1501_v35 }
 0x34d   : >> { %v1478_v25 = vadd.f32 %v1477_v54, %v1446_v62  ;;  %v1517_v26 = vadd.f32 %v1516_v23, %v1502_v47 }
 0x34f   : >> { %v1479_v34 = vrot.slane %v1478_v25, 4  ;;  %v1518_v27 = vadd.f32 %v1517_v26, %v1503_v24 }
 0x351   : >> { %v1480_v28 = vadd.f32 %v1479_v34, %v1478_v25  ;;  %v1519_v29 = vrot.slane %v1518_v27, 4 }
 0x353   : >> { %v1481_v30 = vrot.slane %v1480_v28, 2  ;;  %v1520_v31 = vadd.f32 %v1519_v29, %v1518_v27 }
 0x355   : >> { %v1482_v48 = vadd.f32 %v1481_v30, %v1480_v28  ;;  %v1521_v50 = vrot.slane %v1520_v31, 2 }
 0x357   : >> { %v1483_v52 = vrot.slane %v1482_v48, 1  ;;  %v1522_v16 = vadd.f32 %v1521_v50, %v1520_v31 }
 0x359   : >> { %v1484_v55 = vadd.f32 %v1483_v52, %v1482_v48  ;;  %v1523_v56 = vrot.slane %v1522_v16, 1 }
 0x35b   : >> { %v1485_v58 = vadd.f32 %v1484_v55, %v1463_v37  ;;  %v1524_v46 = vadd.f32 %v1523_v56, %v1522_v16  ;;  %1145 = sbr.rel (!%p1143_p12) target bundleno = 621 (0x26d), region = 222 }
 0x35d   : >> { %1486 = vst [vmem:[#allocation3] sm:$0x1] %v1485_v58  ;;  %v1525_v59 = vadd.f32 %v1524_v46, %v1487_v57 }
 0x35f   : >> { %1526 = vst [vmem:[#allocation3 + $0x1] sm:$0x1] %v1525_v59 }
 0x364   : > { %v1527_v49 = vld [vmem:[#allocation3] sm:$0x1] }
 0x365   : > { %v1528_v61 = vmul.f32 0.00390625, %v1527_v49 }
 0x366   : > { %v1529_v60 = vld [vmem:[#allocation3 + $0x1] sm:$0x1] }
 0x367   : > { %v1530_v62 = vmul.f32 0.00390625, %v1529_v60  ;;  %1550 = vst [vmem:[#allocation3] sm:$0x3] %v3536_v53  ;;  %v1531_v63 = vmul.f32 %v1528_v61, %v1528_v61 }
 0x369   : > { %v1532_v0 = vsub.f32 %v1530_v62, %v1531_v63 }
 0x36b   : > { %v1533_v2 = vmax.f32 %v1532_v0, 0.0 }
 0x36d   : > { %v1535_v6 = vadd.f32 0.001, %v1533_v2 }
 0x36f   : > { %3156 = vrsqrt.f32 %v1535_v6  ;;  %vm1542_vm5 = vweird.f32 %v1535_v6 }
 0x375   : > { %v3157_v7 = vpop.eup %3156 }
 0x376   : > { %v1537_v8 = vmul.f32 %v3157_v7, %v1535_v6  ;;  %vm1543_vm6 = vweird.f32 %v3157_v7 }
 0x377   : > { %vm1544_vm7 = vmor %vm1542_vm5, %vm1543_vm6 }
 0x378   : > { %v1538_v10 = vmul.f32 %v3157_v7, %v1537_v8 }
 0x37a   : > { %v1539_v9 = vmul.f32 0.5, %v1538_v10 }
 0x37c   : > { %v1540_v11 = vsub.f32 1.5, %v1539_v9 }
 0x37e   : > { %v1541_v3 = vmul.f32 %v3157_v7, %v1540_v11 }
 0x380   : > { %v1545_v4 = vsel %vm1544_vm7, %v3157_v7, %v1541_v3 }
 0x381   : > { %v4199_v53 = vmul.f32 %v1545_v4, %v1534_v1 }
 0x383   : > { %v4207_v12 = vmul.f32 %v4199_v53, %v1528_v61 }
 0x385   : > { %v1549_v13 = vsub.f32 %v4204_v5, %v4207_v12 }
 0x386 LB: >> { %v1658_v36 = vld [vmem:[#allocation11 + $0xf8] sm:$0xff]  ;;  %v1657_v40 = vld [vmem:[#allocation11 + $0xf0] sm:$0xff]  ;;  %s2821_s20 = sshll.u32 %s3519_s7, 7  ;;  %s4924_s16 = sld [smem:[#allocation28_spill]]  ;;  %v1656_v44 = vld [vmem:[#allocation11 + $0xe8] sm:$0xff]  ;;  %v4234_v22 = vperm.slane %v4199_v53, 0  ;;  %s3519_s7 = sphi %s4211_s7, %s1556_s7  }
 0x387   : >> { %v1660_v14 = vld [vmem:[#allocation10 + $0x10] sm:$0xff]  ;;  %1775 = vmatpush.msra.mxu1 %v1658_v36  ;;  %2924 = vmatpush.msra.mxu2 %v1658_v36  ;;  %v1655_v33 = vld [vmem:[#allocation11 + $0xe0] sm:$0xff]  ;;  %v1653_v18 = vld [vmem:[#allocation11 + $0xd0] sm:$0xff]  ;;  %s4239_s29 = scalar_lea.vmem [#allocation2], %s2821_s20  ;;  %v4249_v23 = vperm.slane %v1549_v13, 0  ;;  %s4925_s5 = sld [smem:[#allocation31_spill]] }
 0x388   : >> { %1725 = vmatpush.msra.mxu0 %v1660_v14  ;;  %2923 = vmatpush.msra.mxu3 %v1660_v14  ;;  %v1654_v17 = vld [vmem:[#allocation11 + $0xd8] sm:$0xff]  ;;  %v1652_v19 = vld [vmem:[#allocation11 + $0xc8] sm:$0xff]  ;;  %v1651_v20 = vld [vmem:[#allocation11 + $0xc0] sm:$0xff]  ;;  %s1556_s7 = sadd.s32 1, %s3519_s7  }
 0x389   : >> { %1776 = vmatpush.msra.mxu1 %v1657_v40  ;;  %2926 = vmatpush.msra.mxu2 %v1657_v40  ;;  %v1650_v21 = vld [vmem:[#allocation11 + $0xb8] sm:$0xff]  ;;  %v1649_v41 = vld [vmem:[#allocation11 + $0xb0] sm:$0xff]  ;;  %v1559_v35 = vld [vmem:[%s4239_s29] sm:$0xff]  ;;  %p1553_p13 = scmp.ge.s32.totalorder %s1556_s7, 2  }
 0x38a   : >> { %2925 = vmatpush.msrb.mxu3 %v1658_v36  ;;  %v1565_v39 = vld [vmem:[%s4239_s29 + $0x30] sm:$0xff]  ;;  %v1648_v43 = vld [vmem:[#allocation11 + $0xa8] sm:$0xff]  ;;  %v1647_v47 = vld [vmem:[#allocation11 + $0xa0] sm:$0xff]  ;;  %v1576_v54 = vmul.f32 %v4234_v22, %v1559_v35  ;;  %s4926_s11 = sld [smem:[#allocation32_spill]] (%p1553_p13)  ;;  %s4392_s2 = smov (%p1553_p13), 0  }
 0x38b   : >> { %1777 = vmatpush.msra.mxu1 %v1656_v44  ;;  %2928 = vmatpush.msra.mxu2 %v1656_v44  ;;  %v1582_v24 = vmul.f32 %v4234_v22, %v1565_v39  ;;  %v1646_v25 = vld [vmem:[#allocation11 + $0x98] sm:$0xff]  ;;  %v1645_v26 = vld [vmem:[#allocation11 + $0x90] sm:$0xff]  ;;  %v1644_v48 = vld [vmem:[#allocation11 + $0x88] sm:$0xff]  ;;  %s4927_s23 = sld [smem:[#allocation33_spill]] (%p1553_p13) }
 0x38c   : >> { %s4222_s10 = scalar_lea.vmem %s4924_s16, %s2821_s20  ;;  %2927 = vmatpush.msrb.mxu3 %v1657_v40  ;;  %v1593_v27 = vadd.f32 %v4249_v23, %v1576_v54  ;;  %v1560_v30 = vld [vmem:[%s4239_s29 + $0x8] sm:$0xff]  ;;  %v1566_v31 = vld [vmem:[%s4239_s29 + $0x38] sm:$0xff]  ;;  %v1561_v58 = vld [vmem:[%s4239_s29 + $0x10] sm:$0xff] }
 0x38d   : >> { %v1626_v15 = vld [vmem:[%s4222_s10] sm:$0xff]  ;;  %v1636_v32 = vld [vmem:[%s4222_s10 + $0x50] sm:$0xff]  ;;  %1778 = vmatpush.msra.mxu1 %v1655_v33  ;;  %2930 = vmatpush.msra.mxu2 %v1655_v33  ;;  %v1627_v45 = vld [vmem:[%s4222_s10 + $0x8] sm:$0xff]  ;;  %v1599_v28 = vadd.f32 %v4249_v23, %v1582_v24  ;;  %v1577_v37 = vmul.f32 %v4234_v22, %v1560_v30  ;;  %v1583_v55 = vmul.f32 %v4234_v22, %v1566_v31 }
 0x38e   : >> { %2822 = vmatmul.msk.f32.vlgmr.msra.gmra.mxu0 %vm1250_vm4, %v1626_v15  ;;  %2832 = vmatmul.msk.f32.vlgmr.msra.gmra.mxu3 %vm1250_vm4, %v1636_v32  ;;  %v1637_v51 = vld [vmem:[%s4222_s10 + $0x58] sm:$0xff]  ;;  %v1628_v38 = vld [vmem:[%s4222_s10 + $0x10] sm:$0xff]  ;;  %v1638_v42 = vld [vmem:[%s4222_s10 + $0x60] sm:$0xff]  ;;  %v1609_v52 = vmax.f32 %v1593_v27, 0.0  ;;  %v1578_v60 = vmul.f32 %v4234_v22, %v1561_v58 }
 0x38f   : >> { %2929 = vmatpush.msrb.mxu3 %v1656_v44  ;;  %1779 = vmatpush.msra.mxu1 %v1654_v17  ;;  %v1629_v34 = vld [vmem:[%s4222_s10 + $0x18] sm:$0xff]  ;;  %v1639_v29 = vld [vmem:[%s4222_s10 + $0x68] sm:$0xff]  ;;  %v1615_v16 = vmax.f32 %v1599_v28, 0.0  ;;  %v1594_v56 = vadd.f32 %v4249_v23, %v1577_v37  ;;  %v1600_v57 = vadd.f32 %v4249_v23, %v1583_v55  ;;  %v1630_v46 = vld [vmem:[%s4222_s10 + $0x20] sm:$0xff] }
 0x390   : >> { %2932 = vmatpush.msra.mxu2 %v1654_v17  ;;  %v1643_v50 = vld [vmem:[#allocation11 + $0x80] sm:$0xff]  ;;  %v1640_v59 = vld [vmem:[%s4222_s10 + $0x70] sm:$0xff]  ;;  %v1572_v0 = vld [vmem:[%s4239_s29 + $0x68] sm:$0xff]  ;;  %v1595_v2 = vadd.f32 %v4249_v23, %v1578_v60 }
 0x391   : >> { %2931 = vmatpush.msrb.mxu3 %v1655_v33  ;;  %1780 = vmatpush.msra.mxu1 %v1653_v18  ;;  %v1567_v49 = vld [vmem:[%s4239_s29 + $0x40] sm:$0xff]  ;;  %v1610_v61 = vmax.f32 %v1594_v56, 0.0  ;;  %v1616_v62 = vmax.f32 %v1600_v57, 0.0  ;;  %v1631_v6 = vld [vmem:[%s4222_s10 + $0x28] sm:$0xff]  ;;  %v1589_v8 = vmul.f32 %v4234_v22, %v1572_v0  ;;  %v1641_v10 = vld [vmem:[%s4222_s10 + $0x78] sm:$0xff] }
 0x392   : >> { %2934 = vmatpush.msra.mxu2 %v1653_v18  ;;  %v1584_v63 = vmul.f32 %v4234_v22, %v1567_v49  ;;  %v1562_v9 = vld [vmem:[%s4239_s29 + $0x18] sm:$0xff]  ;;  %v1568_v11 = vld [vmem:[%s4239_s29 + $0x48] sm:$0xff]  ;;  %v1611_v1 = vmax.f32 %v1595_v2, 0.0  ;;  %v1573_v14 = vld [vmem:[%s4239_s29 + $0x70] sm:$0xff] }
 0x393   : >> { %1781 = vmatpush.msra.mxu1 %v1652_v19  ;;  %2933 = vmatpush.msrb.mxu3 %v1654_v17  ;;  %v1606_v4 = vadd.f32 %v4249_v23, %v1589_v8  ;;  %v1579_v36 = vmul.f32 %v4234_v22, %v1562_v9  ;;  %v1585_v40 = vmul.f32 %v4234_v22, %v1568_v11  ;;  %v1563_v17 = vld [vmem:[%s4239_s29 + $0x20] sm:$0xff]  ;;  %v1564_v54 = vld [vmem:[%s4239_s29 + $0x28] sm:$0xff]  ;;  %v1570_v24 = vld [vmem:[%s4239_s29 + $0x58] sm:$0xff] }
 0x394   : >> { %2936 = vmatpush.msra.mxu2 %v1652_v19  ;;  %v1601_v7 = vadd.f32 %v4249_v23, %v1584_v63  ;;  %v1590_v33 = vmul.f32 %v4234_v22, %v1573_v14  ;;  %v1581_v27 = vmul.f32 %v4234_v22, %v1564_v54  ;;  %v1587_v28 = vmul.f32 %v4234_v22, %v1570_v24  ;;  %v1635_v56 = vld [vmem:[%s4222_s10 + $0x48] sm:$0xff]  ;;  %v1945_v53 = vld [vmem:[%s4926_s11 + $0x2] sm:$0x1] (%p1553_p13) }
 0x395   : >> { %1782 = vmatpush.msra.mxu1 %v1651_v20  ;;  %2935 = vmatpush.msrb.mxu3 %v1653_v18  ;;  %v1622_v44 = vmax.f32 %v1606_v4, 0.0  ;;  %v1596_v15 = vadd.f32 %v4249_v23, %v1579_v36  ;;  %v1602_v32 = vadd.f32 %v4249_v23, %v1585_v40  ;;  %v1632_v18 = vld [vmem:[%s4222_s10 + $0x30] sm:$0xff] }
 0x396   : >> { %2823 = vmatmul.msk.f32.gmra.mxu0 %vm1250_vm4, %v1627_v45  ;;  %2833 = vmatmul.msk.f32.gmra.mxu3 %vm1250_vm4, %v1637_v51  ;;  %v1617_v3 = vmax.f32 %v1601_v7, 0.0  ;;  %v1569_v45 = vld [vmem:[%s4239_s29 + $0x50] sm:$0xff]  ;;  %v1580_v51 = vmul.f32 %v4234_v22, %v1563_v17  ;;  %v1598_v30 = vadd.f32 %v4249_v23, %v1581_v27  ;;  %v1604_v31 = vadd.f32 %v4249_v23, %v1587_v28 }
 0x397   : >> { %2938 = vmatpush.msra.mxu2 %v1651_v20  ;;  %1783 = vmatpush.msra.mxu1 %v1650_v21 }
 0x398   : >> { %2937 = vmatpush.msrb.mxu3 %v1652_v19  ;;  %v1612_v19 = vmax.f32 %v1596_v15, 0.0 }
 0x399   : >> { %2940 = vmatpush.msra.mxu2 %v1650_v21  ;;  %1784 = vmatpush.msra.mxu1 %v1649_v41 }
 0x39a   : >> { %2939 = vmatpush.msrb.mxu3 %v1651_v20  ;;  %v1618_v20 = vmax.f32 %v1602_v32, 0.0 }
 0x39b   : >> { %2942 = vmatpush.msra.mxu2 %v1649_v41  ;;  %1785 = vmatpush.msra.mxu1 %v1648_v43 }
 0x39c   : >> { %2941 = vmatpush.msrb.mxu3 %v1650_v21  ;;  %v1607_v21 = vadd.f32 %v4249_v23, %v1590_v33 }
 0x39d   : >> { %2944 = vmatpush.msra.mxu2 %v1648_v43  ;;  %1786 = vmatpush.msra.mxu1 %v1647_v47 }
 0x39e   : >> { %2824 = vmatmul.msk.f32.gmra.mxu0 %vm1250_vm4, %v1628_v38  ;;  %2834 = vmatmul.msk.f32.gmra.mxu3 %vm1250_vm4, %v1638_v42  ;;  %v1574_v38 = vld [vmem:[%s4239_s29 + $0x78] sm:$0xff]  ;;  %v1597_v42 = vadd.f32 %v4249_v23, %v1580_v51  ;;  %v1623_v35 = vmax.f32 %v1607_v21, 0.0 }
 0x39f   : >> { %2946 = vmatpush.msra.mxu2 %v1647_v47  ;;  %1787 = vmatpush.msra.mxu1 %v1646_v25 }
 0x3a0   : >> { %2943 = vmatpush.msrb.mxu3 %v1649_v41  ;;  %v1586_v41 = vmul.f32 %v4234_v22, %v1569_v45 }
 0x3a1   : >> { %2948 = vmatpush.msra.mxu2 %v1646_v25  ;;  %1788 = vmatpush.msra.mxu1 %v1645_v26 }
 0x3a2   : >> { %2945 = vmatpush.msrb.mxu3 %v1648_v43  ;;  %v1603_v39 = vadd.f32 %v4249_v23, %v1586_v41  ;;  %v1591_v43 = vmul.f32 %v4234_v22, %v1574_v38 }
 0x3a3   : >> { %2950 = vmatpush.msra.mxu2 %v1645_v26  ;;  %1789 = vmatpush.msra.mxu1 %v1644_v48 }
 0x3a4   : >> { %2947 = vmatpush.msrb.mxu3 %v1647_v47  ;;  %v1633_v47 = vld [vmem:[%s4222_s10 + $0x38] sm:$0xff] }
 0x3a5   : >> { %2952 = vmatpush.msra.mxu2 %v1644_v48  ;;  %1790 = vmatpush.msra.mxu1 %v1643_v50 }
 0x3a6   : >> { %2825 = vmatmul.msk.f32.gmra.mxu0 %vm1250_vm4, %v1629_v34  ;;  %2835 = vmatmul.msk.f32.gmra.mxu3 %vm1250_vm4, %v1639_v29  ;;  %v1608_v34 = vadd.f32 %v4249_v23, %v1591_v43 }
 0x3a7   : >> { %2954 = vmatpush.msra.mxu2 %v1643_v50  ;;  %1791 = vmatmul.f32.vlgmr.msra.gmra.mxu1 %v1609_v52  ;;  %v1614_v52 = vmax.f32 %v1598_v30, 0.0 }
 0x3a8   : >> { %1809 = vmatmul.f32.vlgmr.msra.gmra.mxu2 %v1615_v16  ;;  %2949 = vmatpush.msrb.mxu3 %v1646_v25  ;;  %v1613_v25 = vmax.f32 %v1597_v42, 0.0  ;;  %v1624_v29 = vmax.f32 %v1608_v34, 0.0  ;;  %v1620_v16 = vmax.f32 %v1604_v31, 0.0 }
 0x3aa   : >> { %2951 = vmatpush.msrb.mxu3 %v1645_v26  ;;  %v1619_v26 = vmax.f32 %v1603_v39, 0.0 }
 0x3ac   : >> { %2953 = vmatpush.msrb.mxu3 %v1644_v48  ;;  %v1634_v48 = vld [vmem:[%s4222_s10 + $0x40] sm:$0xff] }
 0x3ae   : >> { %2826 = vmatmul.msk.f32.gmra.mxu0 %vm1250_vm4, %v1630_v46  ;;  %2836 = vmatmul.msk.f32.gmra.mxu3 %vm1250_vm4, %v1640_v59 }
 0x3af   : >> { %1794 = vmatmul.f32.gmra.mxu1 %v1610_v61  ;;  %2955 = vmatpush.msrb.mxu3 %v1643_v50  ;;  %v1571_v50 = vld [vmem:[%s4239_s29 + $0x60] sm:$0xff] }
 0x3b0   : >> { %1812 = vmatmul.f32.gmra.mxu2 %v1616_v62  ;;  %v1588_v37 = vmul.f32 %v4234_v22, %v1571_v50 }
 0x3b2   : >> { %v1605_v55 = vadd.f32 %v4249_v23, %v1588_v37  ;;  %v4325_v23 = vld [vmem:[%s4925_s5 + $0x2] ss:$0 sm:$0xff] }
 0x3b4   : >> { %v1621_v57 = vmax.f32 %v1605_v55, 0.0 }
 0x3b6   : >> { %2827 = vmatmul.msk.f32.gmra.mxu0 %vm1250_vm4, %v1631_v6  ;;  %2837 = vmatmul.msk.f32.gmra.mxu3 %vm1250_vm4, %v1641_v10 }
 0x3b7   : >> { %1797 = vmatmul.f32.gmra.mxu1 %v1611_v1 }
 0x3b8   : >> { %1815 = vmatmul.f32.gmra.mxu2 %v1617_v3 }
 0x3be   : >> { %2828 = vmatmul.msk.f32.gmra.mxu0 %vm1250_vm4, %v1632_v18  ;;  %1830 = vmatmul.f32.vlgmr.msrb.gmra.mxu3 %v1622_v44 }
 0x3bf   : >> { %1800 = vmatmul.f32.gmra.mxu1 %v1612_v19 }
 0x3c0   : >> { %1818 = vmatmul.f32.gmra.mxu2 %v1618_v20 }
 0x3c6   : >> { %2829 = vmatmul.msk.f32.gmra.mxu0 %vm1250_vm4, %v1633_v47  ;;  %1833 = vmatmul.f32.gmra.mxu3 %v1623_v35 }
 0x3c7   : >> { %1803 = vmatmul.f32.gmra.mxu1 %v1613_v25 }
 0x3c8   : >> { %1821 = vmatmul.f32.gmra.mxu2 %v1619_v26 }
 0x3ce   : >> { %2830 = vmatmul.msk.f32.gmra.mxu0 %vm1250_vm4, %v1634_v48  ;;  %1836 = vmatmul.f32.gmra.mxu3 %v1624_v29 }
 0x3cf   : >> { %1806 = vmatmul.f32.gmra.mxu1 %v1614_v52 }
 0x3d0   : >> { %1824 = vmatmul.f32.gmra.mxu2 %v1620_v16 }
 0x3d6   : >> { %2831 = vmatmul.msk.f32.gmra.mxu0 %vm1250_vm4, %v1635_v56 }
 0x3d8   : >> { %1827 = vmatmul.f32.gmra.mxu2 %v1621_v57 }
 0x40b   : >> { %v1727_v58 = vpop.f32.mrf.mxu0 }
 0x411   : >> { %v4316_v46 = vpop.f32.mrf.mxu3 }
 0x413   : >> { %v1730_v59 = vpop.f32.mrf.mxu0 }
 0x419   : >> { %v4318_v49 = vpop.f32.mrf.mxu3 }
 0x41b   : >> { %v1733_v60 = vpop.f32.mrf.mxu0 }
 0x421   : >> { %v4320_v61 = vpop.f32.mrf.mxu3 }
 0x423   : >> { %v1736_v22 = vpop.f32.mrf.mxu0 }
 0x424   : >> { %v1792_v62 = vpop.f32.mrf.mxu1 }
 0x425   : >> { %v1793_v63 = vadd.f32 %v1792_v62, %v1727_v58 }
 0x427   : >> { %v1842_v2 = vadd.f32 %v4325_v23, %v1793_v63 }
 0x429   : >> { %v1766_v0 = vpop.f32.mrf.mxu3  ;;  %1858 = vst [vmem:[%s4239_s29] sm:$0xff] %v1842_v2  ;;  %v1899_v25 = vmul.f32 %v1842_v2, %v1842_v2 }
 0x42b   : >> { %v1739_v6 = vpop.f32.mrf.mxu0  ;;  %v1810_v7 = vpop.f32.mrf.mxu2 }
 0x42c   : >> { %v1795_v8 = vpop.f32.mrf.mxu1 }
 0x42d   : >> { %v1796_v10 = vadd.f32 %v1795_v8, %v1730_v59 }
 0x42f   : >> { %v1843_v11 = vadd.f32 %v4325_v23, %v1796_v10 }
 0x431   : >> { %v1769_v9 = vpop.f32.mrf.mxu3  ;;  %1859 = vst [vmem:[%s4239_s29 + $0x8] sm:$0xff] %v1843_v11  ;;  %v1900_v43 = vmul.f32 %v1843_v11, %v1843_v11  ;;  %v1875_v27 = vadd.f32 %v1843_v11, %v1842_v2 }
 0x433   : >> { %v1742_v1 = vpop.f32.mrf.mxu0  ;;  %v1813_v3 = vpop.f32.mrf.mxu2  ;;  %v1915_v30 = vadd.f32 %v1900_v43, %v1899_v25 }
 0x434   : >> { %v1798_v4 = vpop.f32.mrf.mxu1 }
 0x435   : >> { %v1799_v36 = vadd.f32 %v1798_v4, %v1733_v60 }
 0x437   : >> { %v1844_v14 = vadd.f32 %v4325_v23, %v1799_v36 }
 0x439   : >> { %v1772_v40 = vpop.f32.mrf.mxu3  ;;  %1860 = vst [vmem:[%s4239_s29 + $0x10] sm:$0xff] %v1844_v14  ;;  %v1901_v26 = vmul.f32 %v1844_v14, %v1844_v14  ;;  %v1876_v50 = vadd.f32 %v1875_v27, %v1844_v14 }
 0x43b   : >> { %v1745_v44 = vpop.f32.mrf.mxu0  ;;  %v1816_v32 = vpop.f32.mrf.mxu2  ;;  %v1916_v37 = vadd.f32 %v1915_v30, %v1901_v26 }
 0x43c   : >> { %v1811_v15 = vadd.f32 %v1810_v7, %v1745_v44  ;;  %v1801_v17 = vpop.f32.mrf.mxu1 }
 0x43d   : >> { %v1802_v18 = vadd.f32 %v1801_v17, %v1736_v22 }
 0x43e   : >> { %v1848_v33 = vadd.f32 %v4325_v23, %v1811_v15 }
 0x43f   : >> { %v1845_v51 = vadd.f32 %v4325_v23, %v1802_v18 }
 0x440   : >> { %1864 = vst [vmem:[%s4239_s29 + $0x30] sm:$0xff] %v1848_v33  ;;  %v1905_v11 = vmul.f32 %v1848_v33, %v1848_v33 }
 0x441   : >> { %v1831_v45 = vpop.f32.mrf.mxu3  ;;  %1861 = vst [vmem:[%s4239_s29 + $0x18] sm:$0xff] %v1845_v51  ;;  %v1902_v31 = vmul.f32 %v1845_v51, %v1845_v51  ;;  %v1877_v57 = vadd.f32 %v1876_v50, %v1845_v51 }
 0x442   : >> { %v1832_v19 = vadd.f32 %v1831_v45, %v1766_v0 }
 0x443   : >> { %v1748_v20 = vpop.f32.mrf.mxu0  ;;  %v1819_v38 = vpop.f32.mrf.mxu2  ;;  %v1917_v60 = vadd.f32 %v1916_v37, %v1902_v31 }
 0x444   : >> { %v4338_v21 = vadd.f32 %v4325_v23, %v1832_v19  ;;  %v1814_v41 = vadd.f32 %v1813_v3, %v1748_v20  ;;  %v1804_v35 = vpop.f32.mrf.mxu1 }
 0x445   : >> { %v1805_v39 = vadd.f32 %v1804_v35, %v1739_v6 }
 0x446   : >> { %1871 = vst [vmem:[%s4239_s29 + $0x68] sm:$0xff] %v4338_v21  ;;  %v1849_v42 = vadd.f32 %v4325_v23, %v1814_v41  ;;  %v1912_v25 = vmul.f32 %v4338_v21, %v4338_v21 }
 0x447   : >> { %v1846_v54 = vadd.f32 %v4325_v23, %v1805_v39 }
 0x448   : >> { %1865 = vst [vmem:[%s4239_s29 + $0x38] sm:$0xff] %v1849_v42 }
 0x449   : >> { %v1834_v47 = vpop.f32.mrf.mxu3  ;;  %1862 = vst [vmem:[%s4239_s29 + $0x20] sm:$0xff] %v1846_v54  ;;  %v1903_v55 = vmul.f32 %v1846_v54, %v1846_v54  ;;  %v1878_v62 = vadd.f32 %v1877_v57, %v1846_v54 }
 0x44a   : >> { %v1835_v24 = vadd.f32 %v1834_v47, %v1769_v9 }
 0x44b   : >> { %v1751_v34 = vpop.f32.mrf.mxu0  ;;  %v1822_v48 = vpop.f32.mrf.mxu2  ;;  %v1918_v2 = vadd.f32 %v1917_v60, %v1903_v55 }
 0x44c   : >> { %v4347_v28 = vadd.f32 %v4325_v23, %v1835_v24  ;;  %v1817_v29 = vadd.f32 %v1816_v32, %v1751_v34  ;;  %v1823_v16 = vadd.f32 %v1822_v48, %v4316_v46  ;;  %v1807_v56 = vpop.f32.mrf.mxu1 }
 0x44d   : >> { %v1808_v59 = vadd.f32 %v1807_v56, %v1742_v1 }
 0x44e   : >> { %1872 = vst [vmem:[%s4239_s29 + $0x70] sm:$0xff] %v4347_v28  ;;  %v1850_v52 = vadd.f32 %v4325_v23, %v1817_v29  ;;  %v1852_v58 = vadd.f32 %v4325_v23, %v1823_v16  ;;  %v1913_v27 = vmul.f32 %v4347_v28, %v4347_v28 }
 0x44f   : >> { %v1847_v63 = vadd.f32 %v4325_v23, %v1808_v59  ;;  %v1874_v59 = vld [vmem:[#allocation3] sm:$0x1] }
 0x450   : >> { %1866 = vst [vmem:[%s4239_s29 + $0x40] sm:$0xff] %v1850_v52  ;;  %v1907_v32 = vmul.f32 %v1850_v52, %v1850_v52  ;;  %v1909_v20 = vmul.f32 %v1852_v58, %v1852_v58 }
 0x451   : >> { %v1837_v22 = vpop.f32.mrf.mxu3  ;;  %1868 = vst [vmem:[%s4239_s29 + $0x50] sm:$0xff] %v1852_v58  ;;  %v1879_v6 = vadd.f32 %v1878_v62, %v1847_v63  ;;  %v1904_v7 = vmul.f32 %v1847_v63, %v1847_v63  ;;  %v1898_v62 = vld [vmem:[#allocation3 + $0x1] sm:$0x1] }
 0x452   : >> { %v1838_v0 = vadd.f32 %v1837_v22, %v1772_v40  ;;  %1863 = vst [vmem:[%s4239_s29 + $0x28] sm:$0xff] %v1847_v63  ;;  %v1906_v40 = vmul.f32 %v1849_v42, %v1849_v42 }
 0x453   : >> { %v1754_v46 = vpop.f32.mrf.mxu0  ;;  %v1825_v9 = vpop.f32.mrf.mxu2  ;;  %v1880_v1 = vadd.f32 %v1879_v6, %v1848_v33  ;;  %v1919_v3 = vadd.f32 %v1918_v2, %v1904_v7 }
 0x454   : >> { %v1857_v8 = vadd.f32 %v4325_v23, %v1838_v0  ;;  %v1820_v10 = vadd.f32 %v1819_v38, %v1754_v46  ;;  %v1826_v36 = vadd.f32 %v1825_v9, %v4318_v49 }
 0x455   : >> { %v1920_v14 = vadd.f32 %v1919_v3, %v1905_v11  ;;  %v1881_v44 = vadd.f32 %v1880_v1, %v1849_v42 }
 0x456   : >> { %1873 = vst [vmem:[%s4239_s29 + $0x78] sm:$0xff] %v1857_v8  ;;  %v1851_v4 = vadd.f32 %v4325_v23, %v1820_v10  ;;  %v1853_v15 = vadd.f32 %v4325_v23, %v1826_v36  ;;  %v1914_v30 = vmul.f32 %v1857_v8, %v1857_v8 }
 0x457   : >> { %v1882_v17 = vadd.f32 %v1881_v44, %v1850_v52  ;;  %v1921_v18 = vadd.f32 %v1920_v14, %v1906_v40  ;;  %v4385_v14 = vld [vmem:[%s4927_s23 + $0x2] sm:$0x1] (%p1553_p13) }
 0x458   : >> { %1867 = vst [vmem:[%s4239_s29 + $0x48] sm:$0xff] %v1851_v4  ;;  %v1908_v51 = vmul.f32 %v1851_v4, %v1851_v4  ;;  %v1910_v39 = vmul.f32 %v1853_v15, %v1853_v15 }
 0x459   : >> { %1869 = vst [vmem:[%s4239_s29 + $0x58] sm:$0xff] %v1853_v15  ;;  %v1883_v45 = vadd.f32 %v1882_v17, %v1851_v4  ;;  %v1922_v33 = vadd.f32 %v1921_v18, %v1907_v32 }
 0x45b   : >> { %v1828_v19 = vpop.f32.mrf.mxu2  ;;  %v1923_v41 = vadd.f32 %v1922_v33, %v1908_v51  ;;  %v1884_v38 = vadd.f32 %v1883_v45, %v1852_v58 }
 0x45c   : >> { %v1829_v49 = vadd.f32 %v1828_v19, %v4320_v61 }
 0x45d   : >> { %v1885_v35 = vadd.f32 %v1884_v38, %v1853_v15  ;;  %v1924_v43 = vadd.f32 %v1923_v41, %v1909_v20 }
 0x45e   : >> { %v1854_v42 = vadd.f32 %v4325_v23, %v1829_v49 }
 0x45f   : >> { %v1925_v47 = vadd.f32 %v1924_v43, %v1910_v39 }
 0x460   : >> { %1870 = vst [vmem:[%s4239_s29 + $0x60] sm:$0xff] %v1854_v42  ;;  %v1886_v54 = vadd.f32 %v1885_v35, %v1854_v42  ;;  %v1911_v24 = vmul.f32 %v1854_v42, %v1854_v42 }
 0x462   : >> { %v1887_v26 = vadd.f32 %v1886_v54, %v4338_v21  ;;  %v1926_v34 = vadd.f32 %v1925_v47, %v1911_v24 }
 0x464   : >> { %v1888_v61 = vadd.f32 %v1887_v26, %v4347_v28  ;;  %v1927_v29 = vadd.f32 %v1926_v34, %v1912_v25 }
 0x466   : >> { %v1889_v31 = vadd.f32 %v1888_v61, %v1857_v8  ;;  %v1928_v48 = vadd.f32 %v1927_v29, %v1913_v27 }
 0x468   : >> { %v1890_v23 = vrot.slane %v1889_v31, 4  ;;  %v1929_v50 = vadd.f32 %v1928_v48, %v1914_v30 }
 0x46a   : >> { %v1891_v52 = vadd.f32 %v1890_v23, %v1889_v31  ;;  %v1930_v16 = vrot.slane %v1929_v50, 4 }
 0x46c   : >> { %v1892_v37 = vrot.slane %v1891_v52, 2  ;;  %v1931_v55 = vadd.f32 %v1930_v16, %v1929_v50 }
 0x46e   : >> { %v1893_v56 = vadd.f32 %v1892_v37, %v1891_v52  ;;  %v1932_v57 = vrot.slane %v1931_v55, 2 }
 0x470   : >> { %v1894_v58 = vrot.slane %v1893_v56, 1  ;;  %v1933_v21 = vadd.f32 %v1932_v57, %v1931_v55 }
 0x472   : >> { %v1895_v60 = vadd.f32 %v1894_v58, %v1893_v56  ;;  %v1934_v22 = vrot.slane %v1933_v21, 1 }
 0x474   : >> { %v1896_v63 = vadd.f32 %v1895_v60, %v1874_v59  ;;  %v1935_v28 = vadd.f32 %v1934_v22, %v1933_v21  ;;  %1555 = sbr.rel (!%p1553_p13) target bundleno = 902 (0x386), region = 233 }
 0x476   : >> { %1897 = vst [vmem:[#allocation3] sm:$0x1] %v1896_v63  ;;  %v1936_v0 = vadd.f32 %v1935_v28, %v1898_v62 }
 0x478   : >> { %1937 = vst [vmem:[#allocation3 + $0x1] sm:$0x1] %v1936_v0 }
 0x47d   : > { %v1938_v2 = vld [vmem:[#allocation3] sm:$0x1] }
 0x47e   : > { %v1939_v6 = vmul.f32 0.00390625, %v1938_v2 }
 0x47f   : > { %v1940_v46 = vld [vmem:[#allocation3 + $0x1] sm:$0x1] }
 0x480   : > { %v1941_v7 = vmul.f32 0.00390625, %v1940_v46  ;;  %v1942_v8 = vmul.f32 %v1939_v6, %v1939_v6 }
 0x482   : > { %v1943_v10 = vsub.f32 %v1941_v7, %v1942_v8 }
 0x484   : > { %v1944_v9 = vmax.f32 %v1943_v10, 0.0 }
 0x486   : > { %v1946_v11 = vadd.f32 0.001, %v1944_v9 }
 0x488   : > { %3159 = vrsqrt.f32 %v1946_v11  ;;  %vm1953_vm8 = vweird.f32 %v1946_v11 }
 0x48e   : > { %v3160_v1 = vpop.eup %3159 }
 0x48f   : > { %v1948_v3 = vmul.f32 %v3160_v1, %v1946_v11  ;;  %vm1954_vm9 = vweird.f32 %v3160_v1 }
 0x490   : > { %vm1955_vm10 = vmor %vm1953_vm8, %vm1954_vm9 }
 0x491   : > { %v1949_v4 = vmul.f32 %v3160_v1, %v1948_v3 }
 0x493   : > { %v1950_v36 = vmul.f32 0.5, %v1949_v4 }
 0x495   : > { %v1951_v40 = vsub.f32 1.5, %v1950_v36 }
 0x497   : > { %v1952_v5 = vmul.f32 %v3160_v1, %v1951_v40 }
 0x499   : > { %v1956_v12 = vsel %vm1955_vm10, %v3160_v1, %v1952_v5 }
 0x49a   : > { %v4380_v13 = vmul.f32 %v1956_v12, %v1945_v53 }
 0x49c   : > { %v4388_v44 = vmul.f32 %v4380_v13, %v1939_v6 }
 0x49e   : > { %v1960_v15 = vsub.f32 %v4385_v14, %v4388_v44 }
 0x49f LB: >> { %v2066_v32 = vld [vmem:[#allocation13 + $0xf8] sm:$0xff]  ;;  %v2064_v17 = vld [vmem:[#allocation13 + $0xe8] sm:$0xff]  ;;  %v2065_v33 = vld [vmem:[#allocation13 + $0xf0] sm:$0xff]  ;;  %s4398_s15 = sshll.u32 %s3523_s2, 7  ;;  %v4401_v54 = vperm.slane %v4380_v13, 0  ;;  %s4928_s7 = sld [smem:[#allocation34_spill]]  ;;  %s3523_s2 = sphi %s4392_s2, %s1966_s2  }
 0x4a0   : >> { %2138 = vmatpush.msra.mxu1 %v2066_v32  ;;  %2972 = vmatpush.msra.mxu3 %v2066_v32  ;;  %v2062_v18 = vld [vmem:[#allocation13 + $0xd8] sm:$0xff]  ;;  %v2060_v45 = vld [vmem:[#allocation13 + $0xc8] sm:$0xff]  ;;  %v2063_v19 = vld [vmem:[#allocation13 + $0xe0] sm:$0xff]  ;;  %s4404_s14 = scalar_lea.vmem [#allocation2], %s4398_s15  ;;  %v4412_v30 = vperm.slane %v1960_v15, 0  ;;  %s2476_s20 = sshra.s32 %s4398_s15, 3 }
 0x4a1   : >> { %v2058_v51 = vld [vmem:[#allocation13 + $0xb8] sm:$0xff]  ;;  %v2056_v20 = vld [vmem:[#allocation13 + $0xa8] sm:$0xff]  ;;  %2073 = vmatpush.msra.mxu0 %v2065_v33  ;;  %2956 = vmatpush.msra.mxu2 %v2065_v33  ;;  %v2061_v41 = vld [vmem:[#allocation13 + $0xd0] sm:$0xff]  ;;  %s2862_s12 = smul.u32 24, %s2476_s20  ;;  %s4532_s16 = scalar_lea.vmem [#allocation5], %s4398_s15 }
 0x4a2   : >> { %2139 = vmatpush.msra.mxu1 %v2064_v17  ;;  %2973 = vmatpush.msra.mxu3 %v2064_v17  ;;  %v2054_v38 = vld [vmem:[#allocation13 + $0x98] sm:$0xff]  ;;  %v2059_v49 = vld [vmem:[#allocation13 + $0xc0] sm:$0xff]  ;;  %v2052_v35 = vld [vmem:[#allocation13 + $0x88] sm:$0xff]  ;;  %s1966_s2 = sadd.s32 1, %s3523_s2  }
 0x4a3   : >> { %2074 = vmatpush.msra.mxu0 %v2063_v19  ;;  %2957 = vmatpush.msra.mxu2 %v2063_v19  ;;  %v2057_v39 = vld [vmem:[#allocation13 + $0xb0] sm:$0xff]  ;;  %v2050_v43 = vld [vmem:[#allocation13 + $0x78] sm:$0xff]  ;;  %v2055_v42 = vld [vmem:[#allocation13 + $0xa0] sm:$0xff]  ;;  %s4475_s28 = scalar_lea.vmem [#allocation14], %s2862_s12  ;;  %p1963_p0 = scmp.ge.s32.totalorder %s1966_s2, 2  }
 0x4a4   : >> { %2140 = vmatpush.msra.mxu1 %v2062_v18  ;;  %2974 = vmatpush.msra.mxu3 %v2062_v18  ;;  %v2048_v47 = vld [vmem:[#allocation13 + $0x68] sm:$0xff]  ;;  %v2053_v26 = vld [vmem:[#allocation13 + $0x90] sm:$0xff]  ;;  %v2046_v34 = vld [vmem:[#allocation13 + $0x58] sm:$0xff] }
 0x4a5   : >> { %2075 = vmatpush.msra.mxu0 %v2061_v41  ;;  %2958 = vmatpush.msra.mxu2 %v2061_v41  ;;  %v1969_v24 = vld [vmem:[%s4404_s14] sm:$0xff]  ;;  %v2049_v48 = vld [vmem:[#allocation13 + $0x70] sm:$0xff]  ;;  %v2042_v23 = vld [vmem:[#allocation13 + $0x38] sm:$0xff] }
 0x4a6   : >> { %2141 = vmatpush.msra.mxu1 %v2060_v45  ;;  %2975 = vmatpush.msra.mxu3 %v2060_v45  ;;  %v1977_v25 = vld [vmem:[%s4404_s14 + $0x40] sm:$0xff]  ;;  %v1986_v29 = vmul.f32 %v4401_v54, %v1969_v24  ;;  %v1970_v55 = vld [vmem:[%s4404_s14 + $0x8] sm:$0xff]  ;;  %v2038_v58 = vld [vmem:[#allocation13 + $0x18] sm:$0xff] }
 0x4a7   : >> { %2076 = vmatpush.msra.mxu0 %v2059_v49  ;;  %2959 = vmatpush.msra.mxu2 %v2059_v49  ;;  %v2051_v27 = vld [vmem:[#allocation13 + $0x80] sm:$0xff]  ;;  %v2044_v61 = vld [vmem:[#allocation13 + $0x48] sm:$0xff]  ;;  %v1994_v31 = vmul.f32 %v4401_v54, %v1977_v25  ;;  %v2045_v57 = vld [vmem:[#allocation13 + $0x50] sm:$0xff]  ;;  %v1987_v62 = vmul.f32 %v4401_v54, %v1970_v55 }
 0x4a8   : >> { %2142 = vmatpush.msra.mxu1 %v2058_v51  ;;  %2976 = vmatpush.msra.mxu3 %v2058_v51  ;;  %v2047_v50 = vld [vmem:[#allocation13 + $0x60] sm:$0xff]  ;;  %v2040_v52 = vld [vmem:[#allocation13 + $0x28] sm:$0xff]  ;;  %v2003_v16 = vadd.f32 %v4412_v30, %v1986_v29  ;;  %v2041_v28 = vld [vmem:[#allocation13 + $0x30] sm:$0xff] }
 0x4a9   : >> { %2077 = vmatpush.msra.mxu0 %v2057_v39  ;;  %2960 = vmatpush.msra.mxu2 %v2057_v39  ;;  %v2011_v37 = vadd.f32 %v4412_v30, %v1994_v31  ;;  %v1978_v56 = vld [vmem:[%s4404_s14 + $0x48] sm:$0xff]  ;;  %v2043_v21 = vld [vmem:[#allocation13 + $0x40] sm:$0xff]  ;;  %v2004_v0 = vadd.f32 %v4412_v30, %v1987_v62  ;;  %v1971_v6 = vld [vmem:[%s4404_s14 + $0x10] sm:$0xff] }
 0x4aa   : >> { %2143 = vmatpush.msra.mxu1 %v2056_v20  ;;  %2977 = vmatpush.msra.mxu3 %v2056_v20  ;;  %v2036_v59 = vld [vmem:[#allocation13 + $0x8] sm:$0xff]  ;;  %v2019_v60 = vmax.f32 %v2003_v16, 0.0  ;;  %v1995_v63 = vmul.f32 %v4401_v54, %v1978_v56  ;;  %v2039_v46 = vld [vmem:[#allocation13 + $0x20] sm:$0xff]  ;;  %v1979_v7 = vld [vmem:[%s4404_s14 + $0x50] sm:$0xff]  ;;  %v1988_v11 = vmul.f32 %v4401_v54, %v1971_v6 }
 0x4ab   : >> { %2078 = vmatpush.msra.mxu0 %v2055_v42  ;;  %2961 = vmatpush.msra.mxu2 %v2055_v42  ;;  %v2027_v22 = vmax.f32 %v2011_v37, 0.0  ;;  %v2037_v8 = vld [vmem:[#allocation13 + $0x10] sm:$0xff]  ;;  %v2020_v10 = vmax.f32 %v2004_v0, 0.0  ;;  %v1996_v1 = vmul.f32 %v4401_v54, %v1979_v7  ;;  %v2035_v3 = vld [vmem:[#allocation13] sm:$0xff] }
 0x4ac   : >> { %2144 = vmatpush.msra.mxu1 %v2054_v38  ;;  %2978 = vmatpush.msra.mxu3 %v2054_v38  ;;  %v2012_v2 = vadd.f32 %v4412_v30, %v1995_v63  ;;  %v2005_v4 = vadd.f32 %v4412_v30, %v1988_v11  ;;  %v1972_v40 = vld [vmem:[%s4404_s14 + $0x18] sm:$0xff]  ;;  %v1973_v51 = vld [vmem:[%s4404_s14 + $0x20] sm:$0xff]  ;;  %v1974_v39 = vld [vmem:[%s4404_s14 + $0x28] sm:$0xff] }
 0x4ad   : >> { %2079 = vmatpush.msra.mxu0 %v2053_v26  ;;  %2962 = vmatpush.msra.mxu2 %v2053_v26  ;;  %v2013_v36 = vadd.f32 %v4412_v30, %v1996_v1  ;;  %v1980_v53 = vld [vmem:[%s4404_s14 + $0x58] sm:$0xff]  ;;  %v1989_v32 = vmul.f32 %v4401_v54, %v1972_v40  ;;  %v1981_v33 = vld [vmem:[%s4404_s14 + $0x60] sm:$0xff]  ;;  %v1990_v41 = vmul.f32 %v4401_v54, %v1973_v51 }
 0x4ae   : >> { %2145 = vmatpush.msra.mxu1 %v2052_v35  ;;  %2979 = vmatpush.msra.mxu3 %v2052_v35  ;;  %v2028_v9 = vmax.f32 %v2012_v2, 0.0  ;;  %v2021_v5 = vmax.f32 %v2005_v4, 0.0  ;;  %v1997_v17 = vmul.f32 %v4401_v54, %v1980_v53  ;;  %v1998_v38 = vmul.f32 %v4401_v54, %v1981_v33  ;;  %v1976_v16 = vld [vmem:[%s4404_s14 + $0x38] sm:$0xff] }
 0x4af   : >> { %2080 = vmatpush.msra.mxu0 %v2051_v27  ;;  %2963 = vmatpush.msra.mxu2 %v2051_v27  ;;  %v2029_v12 = vmax.f32 %v2013_v36, 0.0  ;;  %v2006_v18 = vadd.f32 %v4412_v30, %v1989_v32  ;;  %v2007_v49 = vadd.f32 %v4412_v30, %v1990_v41  ;;  %v1991_v24 = vmul.f32 %v4401_v54, %v1974_v39  ;;  %v1975_v27 = vld [vmem:[%s4404_s14 + $0x30] sm:$0xff]  ;;  %v1984_v37 = vld [vmem:[%s4404_s14 + $0x78] sm:$0xff] }
 0x4b0   : >> { %2146 = vmatpush.msra.mxu1 %v2050_v43  ;;  %2980 = vmatpush.msra.mxu3 %v2050_v43  ;;  %v2014_v45 = vadd.f32 %v4412_v30, %v1997_v17  ;;  %v2015_v35 = vadd.f32 %v4412_v30, %v1998_v38  ;;  %v1982_v43 = vld [vmem:[%s4404_s14 + $0x68] sm:$0xff] }
 0x4b1   : >> { %2081 = vmatpush.msra.mxu0 %v2049_v48  ;;  %2964 = vmatpush.msra.mxu2 %v2049_v48  ;;  %v2022_v19 = vmax.f32 %v2006_v18, 0.0  ;;  %v2023_v42 = vmax.f32 %v2007_v49, 0.0  ;;  %v1999_v25 = vmul.f32 %v4401_v54, %v1982_v43  ;;  %v2008_v26 = vadd.f32 %v4412_v30, %v1991_v24 }
 0x4b2   : >> { %2147 = vmatpush.msra.mxu1 %v2048_v47  ;;  %2981 = vmatpush.msra.mxu3 %v2048_v47  ;;  %v2030_v20 = vmax.f32 %v2014_v45, 0.0  ;;  %v2031_v47 = vmax.f32 %v2015_v35, 0.0  ;;  %v1992_v48 = vmul.f32 %v4401_v54, %v1975_v27 }
 0x4b3   : >> { %2082 = vmatpush.msra.mxu0 %v2047_v50  ;;  %2965 = vmatpush.msra.mxu2 %v2047_v50  ;;  %v2024_v29 = vmax.f32 %v2008_v26, 0.0 }
 0x4b4   : >> { %2148 = vmatpush.msra.mxu1 %v2046_v34  ;;  %2982 = vmatpush.msra.mxu3 %v2046_v34  ;;  %v2016_v34 = vadd.f32 %v4412_v30, %v1999_v25  ;;  %v2009_v50 = vadd.f32 %v4412_v30, %v1992_v48 }
 0x4b5   : >> { %2083 = vmatpush.msra.mxu0 %v2045_v57  ;;  %2966 = vmatpush.msra.mxu2 %v2045_v57  ;;  %v1993_v57 = vmul.f32 %v4401_v54, %v1976_v16 }
 0x4b6   : >> { %2149 = vmatpush.msra.mxu1 %v2044_v61  ;;  %2983 = vmatpush.msra.mxu3 %v2044_v61  ;;  %v1983_v61 = vld [vmem:[%s4404_s14 + $0x70] sm:$0xff]  ;;  %v2032_v31 = vmax.f32 %v2016_v34, 0.0  ;;  %v2025_v55 = vmax.f32 %v2009_v50, 0.0 }
 0x4b7   : >> { %2084 = vmatpush.msra.mxu0 %v2043_v21  ;;  %2967 = vmatpush.msra.mxu2 %v2043_v21  ;;  %v2010_v21 = vadd.f32 %v4412_v30, %v1993_v57  ;;  %v2428_v57 = vld [vmem:[%s4532_s16] sm:$0xff] }
 0x4b8   : >> { %2150 = vmatpush.msra.mxu1 %v2042_v23  ;;  %2984 = vmatpush.msra.mxu3 %v2042_v23  ;;  %v2000_v23 = vmul.f32 %v4401_v54, %v1983_v61 }
 0x4b9   : >> { %2085 = vmatpush.msra.mxu0 %v2041_v28  ;;  %2968 = vmatpush.msra.mxu2 %v2041_v28 }
 0x4ba   : >> { %2151 = vmatpush.msra.mxu1 %v2040_v52  ;;  %2985 = vmatpush.msra.mxu3 %v2040_v52  ;;  %v2017_v52 = vadd.f32 %v4412_v30, %v2000_v23 }
 0x4bb   : >> { %2086 = vmatpush.msra.mxu0 %v2039_v46  ;;  %2969 = vmatpush.msra.mxu2 %v2039_v46 }
 0x4bc   : >> { %2152 = vmatpush.msra.mxu1 %v2038_v58  ;;  %2986 = vmatpush.msra.mxu3 %v2038_v58  ;;  %v2033_v56 = vmax.f32 %v2017_v52, 0.0  ;;  %v2001_v58 = vmul.f32 %v4401_v54, %v1984_v37  ;;  %v2067_v54 = vld [vmem:[%s4928_s7] sm:$0x3] }
 0x4bd   : >> { %2087 = vmatpush.msra.mxu0 %v2037_v8  ;;  %2970 = vmatpush.msra.mxu2 %v2037_v8  ;;  %v4462_v62 = vperm.slane %v2067_v54, 1  ;;  %v4467_v46 = vperm.slane %v2067_v54, 0 }
 0x4be   : >> { %2153 = vmatpush.msra.mxu1 %v2036_v59  ;;  %2987 = vmatpush.msra.mxu3 %v2036_v59  ;;  %v2018_v59 = vadd.f32 %v4412_v30, %v2001_v58 }
 0x4bf   : >> { %2154 = vmatmul.f32.vlgmr.msra.gmra.mxu1 %v2019_v60  ;;  %2178 = vmatmul.f32.vlgmr.msra.gmra.mxu3 %v2027_v22 }
 0x4c0   : >> { %2088 = vmatpush.msra.mxu0 %v2035_v3  ;;  %2971 = vmatpush.msra.mxu2 %v2035_v3 }
 0x4c1   : >> { %2089 = vmatmul.f32.vlgmr.msra.gmra.mxu0 %v2019_v60  ;;  %2113 = vmatmul.f32.vlgmr.msra.gmra.mxu2 %v2027_v22  ;;  %v2026_v60 = vmax.f32 %v2010_v21, 0.0  ;;  %v2034_v22 = vmax.f32 %v2018_v59, 0.0 }
 0x4c7   : >> { %2157 = vmatmul.f32.gmra.mxu1 %v2020_v10  ;;  %2181 = vmatmul.f32.gmra.mxu3 %v2028_v9 }
 0x4c9   : >> { %2092 = vmatmul.f32.gmra.mxu0 %v2020_v10  ;;  %2116 = vmatmul.f32.gmra.mxu2 %v2028_v9 }
 0x4cf   : >> { %2160 = vmatmul.f32.gmra.mxu1 %v2021_v5  ;;  %2184 = vmatmul.f32.gmra.mxu3 %v2029_v12 }
 0x4d1   : >> { %2095 = vmatmul.f32.gmra.mxu0 %v2021_v5  ;;  %2119 = vmatmul.f32.gmra.mxu2 %v2029_v12 }
 0x4d7   : >> { %2163 = vmatmul.f32.gmra.mxu1 %v2022_v19  ;;  %2187 = vmatmul.f32.gmra.mxu3 %v2030_v20 }
 0x4d9   : >> { %2098 = vmatmul.f32.gmra.mxu0 %v2022_v19  ;;  %2122 = vmatmul.f32.gmra.mxu2 %v2030_v20 }
 0x4df   : >> { %2166 = vmatmul.f32.gmra.mxu1 %v2023_v42  ;;  %2190 = vmatmul.f32.gmra.mxu3 %v2031_v47 }
 0x4e1   : >> { %2101 = vmatmul.f32.gmra.mxu0 %v2023_v42  ;;  %2125 = vmatmul.f32.gmra.mxu2 %v2031_v47 }
 0x4e7   : >> { %2169 = vmatmul.f32.gmra.mxu1 %v2024_v29  ;;  %2193 = vmatmul.f32.gmra.mxu3 %v2032_v31 }
 0x4e9   : >> { %2104 = vmatmul.f32.gmra.mxu0 %v2024_v29  ;;  %2128 = vmatmul.f32.gmra.mxu2 %v2032_v31 }
 0x4ef   : >> { %2172 = vmatmul.f32.gmra.mxu1 %v2025_v55  ;;  %2196 = vmatmul.f32.gmra.mxu3 %v2033_v56 }
 0x4f1   : >> { %2107 = vmatmul.f32.gmra.mxu0 %v2025_v55  ;;  %2131 = vmatmul.f32.gmra.mxu2 %v2033_v56 }
 0x4f7   : >> { %2175 = vmatmul.f32.gmra.mxu1 %v2026_v60  ;;  %2199 = vmatmul.f32.gmra.mxu3 %v2034_v22 }
 0x4f9   : >> { %2110 = vmatmul.f32.gmra.mxu0 %v2026_v60  ;;  %2134 = vmatmul.f32.gmra.mxu2 %v2034_v22 }
 0x53c   : >> { %v2155_v63 = vpop.f32.mrf.mxu1 }
 0x53d   : >> { %v2156_v28 = vadd.f32 %v2155_v63, %v4462_v62 }
 0x53e   : >> { %v2090_v10 = vpop.f32.mrf.mxu0 }
 0x53f   : >> { %v2203_v30 = vmul.f32 1.442695, %v2156_v28  ;;  %v4473_v1 = vadd.f32 %v2090_v10, %v4467_v46 }
 0x541   : >> { %3161 = vpow2.f32 %v2203_v30  ;;  %2481 = vst [vmem:[%s4475_s28] sm:$0xff] %v4473_v1 }
 0x542   : >> { %v2179_v0 = vpop.f32.mrf.mxu3 }
 0x543   : >> { %v2180_v2 = vadd.f32 %v2179_v0, %v4462_v62 }
 0x544   : >> { %v2158_v6 = vpop.f32.mrf.mxu1  ;;  %v2114_v36 = vpop.f32.mrf.mxu2 }
 0x545   : >> { %v2219_v7 = vmul.f32 1.442695, %v2180_v2  ;;  %v2159_v8 = vadd.f32 %v2158_v6, %v4462_v62  ;;  %v4484_v53 = vadd.f32 %v2114_v36, %v4467_v46 }
 0x546   : >> { %v2093_v17 = vpop.f32.mrf.mxu0 }
 0x547   : >> { %v4470_v9 = vpop.eup %3161  ;;  %3163 = vpow2.f32 %v2219_v7  ;;  %v2205_v11 = vmul.f32 1.442695, %v2159_v8  ;;  %2489 = vst [vmem:[%s4475_s28 + $0xc0] sm:$0xff] %v4484_v53  ;;  %v4498_v19 = vadd.f32 %v2093_v17, %v4467_v46 }
 0x548   : >> { %2497 = vst [vmem:[%s4475_s28 + $0x8] sm:$0xff] %v4470_v9  ;;  %3165 = vrsqrt.f32 %v4470_v9  ;;  %vm2242_vm11 = vcmp.eq.f32.partialorder %v4470_v9, inf  ;;  %vm2244_vm12 = vcmp.eq.f32.partialorder %v4470_v9, 0.0  ;;  %v2245_v56 = vand.u32 2147483648, %v4470_v9 }
 0x549   : >> { %3167 = vpow2.f32 %v2205_v11  ;;  %2482 = vst [vmem:[%s4475_s28 + $0x18] sm:$0xff] %v4498_v19 }
 0x54a   : >> { %v2182_v3 = vpop.f32.mrf.mxu3 }
 0x54b   : >> { %v2183_v4 = vadd.f32 %v2182_v3, %v4462_v62 }
 0x54c   : >> { %v2161_v40 = vpop.f32.mrf.mxu1  ;;  %v2117_v35 = vpop.f32.mrf.mxu2 }
 0x54d   : >> { %v4486_v5 = vpop.eup %3163  ;;  %v2221_v12 = vmul.f32 1.442695, %v2183_v4  ;;  %v2162_v32 = vadd.f32 %v2161_v40, %v4462_v62  ;;  %v4507_v42 = vadd.f32 %v2117_v35, %v4467_v46 }
 0x54e   : >> { %v3166_v18 = vpop.eup %3165  ;;  %2505 = vst [vmem:[%s4475_s28 + $0xc8] sm:$0xff] %v4486_v5  ;;  %3169 = vrsqrt.f32 %v4486_v5  ;;  %v2096_v27 = vpop.f32.mrf.mxu0  ;;  %vm2338_vm13 = vcmp.eq.f32.partialorder %v4486_v5, inf  ;;  %vm2340_vm14 = vcmp.eq.f32.partialorder %v4486_v5, 0.0  ;;  %v2341_v30 = vand.u32 2147483648, %v4486_v5 }
 0x54f   : >> { %v4492_v45 = vpop.eup %3167  ;;  %3171 = vpow2.f32 %v2221_v12  ;;  %v2207_v51 = vmul.f32 1.442695, %v2162_v32  ;;  %v2236_v33 = vmul.f32 %v3166_v18, %v4470_v9  ;;  %2490 = vst [vmem:[%s4475_s28 + $0xd8] sm:$0xff] %v4507_v42  ;;  %v4524_v52 = vadd.f32 %v2096_v27, %v4467_v46 }
 0x550   : >> { %2498 = vst [vmem:[%s4475_s28 + $0x20] sm:$0xff] %v4492_v45  ;;  %3173 = vrsqrt.f32 %v4492_v45  ;;  %vm2254_vm15 = vcmp.eq.f32.partialorder %v4492_v45, inf  ;;  %vm2256_vm0 = vcmp.eq.f32.partialorder %v4492_v45, 0.0 }
 0x551   : >> { %3175 = vpow2.f32 %v2207_v51  ;;  %v2237_v20 = vmul.f32 %v3166_v18, %v2236_v33  ;;  %2483 = vst [vmem:[%s4475_s28 + $0x30] sm:$0xff] %v4524_v52 }
 0x552   : >> { %v2185_v41 = vpop.f32.mrf.mxu3 }
 0x553   : >> { %v2186_v38 = vadd.f32 %v2185_v41, %v4462_v62  ;;  %v2238_v49 = vmul.f32 0.5, %v2237_v20  ;;  %v2257_v41 = vand.u32 2147483648, %v4492_v45 }
 0x554   : >> { %v3170_v39 = vpop.eup %3169  ;;  %v2164_v43 = vpop.f32.mrf.mxu1 }
 0x555   : >> { %v4509_v47 = vpop.eup %3171  ;;  %v2223_v24 = vmul.f32 1.442695, %v2186_v38  ;;  %v2165_v25 = vadd.f32 %v2164_v43, %v4462_v62  ;;  %v2239_v26 = vsub.f32 1.5, %v2238_v49  ;;  %v2332_v34 = vmul.f32 %v3170_v39, %v4486_v5  ;;  %v2120_v22 = vpop.f32.mrf.mxu2 }
 0x556   : >> { %v3174_v61 = vpop.eup %3173  ;;  %2506 = vst [vmem:[%s4475_s28 + $0xe0] sm:$0xff] %v4509_v47  ;;  %3177 = vrsqrt.f32 %v4509_v47  ;;  %v4543_v2 = vadd.f32 %v2120_v22, %v4467_v46  ;;  %v2099_v11 = vpop.f32.mrf.mxu0  ;;  %vm2350_vm1 = vcmp.eq.f32.partialorder %v4509_v47, inf  ;;  %vm2352_vm2 = vcmp.eq.f32.partialorder %v4509_v47, 0.0 }
 0x557   : >> { %v4516_v29 = vpop.eup %3175  ;;  %3179 = vpow2.f32 %v2223_v24  ;;  %v2209_v31 = vmul.f32 1.442695, %v2165_v25  ;;  %v2240_v48 = vmul.f32 %v3166_v18, %v2239_v26  ;;  %v2333_v23 = vmul.f32 %v3170_v39, %v2332_v34  ;;  %v2436_v18 = vld [vmem:[%s4532_s16 + $0x40] sm:$0xff]  ;;  %v2429_v34 = vld [vmem:[%s4532_s16 + $0x8] sm:$0xff] }
 0x558   : >> { %2499 = vst [vmem:[%s4475_s28 + $0x38] sm:$0xff] %v4516_v29  ;;  %v2248_v50 = vmul.f32 %v3174_v61, %v4492_v45  ;;  %3181 = vrsqrt.f32 %v4516_v29  ;;  %v4570_v38 = vadd.f32 %v2099_v11, %v4467_v46  ;;  %vm2266_vm3 = vcmp.eq.f32.partialorder %v4516_v29, inf }
 0x559   : >> { %3183 = vpow2.f32 %v2209_v31  ;;  %v2241_v16 = vmul.f32 %v4470_v9, %v2240_v48  ;;  %v2334_v37 = vmul.f32 0.5, %v2333_v23  ;;  %2491 = vst [vmem:[%s4475_s28 + $0xf0] sm:$0xff] %v4543_v2  ;;  %vm2268_vm4 = vcmp.eq.f32.partialorder %v4516_v29, 0.0 }
 0x55a   : >> { %v2188_v55 = vpop.f32.mrf.mxu3  ;;  %v2249_v58 = vmul.f32 %v3174_v61, %v2248_v50  ;;  %2484 = vst [vmem:[%s4475_s28 + $0x48] sm:$0xff] %v4570_v38 }
 0x55b   : >> { %v2189_v21 = vadd.f32 %v2188_v55, %v4462_v62  ;;  %v2243_v59 = vsel %vm2242_vm11, %v4470_v9, %v2241_v16  ;;  %v2335_v60 = vsub.f32 1.5, %v2334_v37 }
 0x55c   : >> { %v3178_v54 = vpop.eup %3177  ;;  %v2246_v63 = vsel %vm2244_vm12, %v2245_v56, %v2243_v59  ;;  %v2167_v28 = vpop.f32.mrf.mxu1  ;;  %v2250_v0 = vmul.f32 0.5, %v2249_v58 }
 0x55d   : >> { %v4545_v6 = vpop.eup %3179  ;;  %v2225_v7 = vmul.f32 1.442695, %v2189_v21  ;;  %v2444_v8 = vmul.f32 %v2428_v57, %v2246_v63  ;;  %v2168_v10 = vadd.f32 %v2167_v28, %v4462_v62  ;;  %v2336_v9 = vmul.f32 %v3170_v39, %v2335_v60  ;;  %v2123_v27 = vpop.f32.mrf.mxu2 }
 0x55e   : >> { %v3182_v3 = vpop.eup %3181  ;;  %2507 = vst [vmem:[%s4475_s28 + $0xf8] sm:$0xff] %v4545_v6  ;;  %v2251_v4 = vsub.f32 1.5, %v2250_v0  ;;  %v2344_v36 = vmul.f32 %v3178_v54, %v4509_v47  ;;  %3185 = vrsqrt.f32 %v4545_v6  ;;  %v2102_v57 = vpop.f32.mrf.mxu0  ;;  %v4599_v63 = vadd.f32 %v2123_v27, %v4467_v46 }
 0x55f   : >> { %v4553_v40 = vpop.eup %3183  ;;  %3187 = vpow2.f32 %v2225_v7  ;;  %v2460_v12 = vadd.f32 %v2444_v8, %v4473_v1  ;;  %v2211_v32 = vmul.f32 1.442695, %v2168_v10  ;;  %v2337_v17 = vmul.f32 %v4486_v5, %v2336_v9  ;;  %v2437_v8 = vld [vmem:[%s4532_s16 + $0x48] sm:$0xff] }
 0x560   : >> { %2500 = vst [vmem:[%s4475_s28 + $0x50] sm:$0xff] %v4553_v40  ;;  %v2252_v51 = vmul.f32 %v3174_v61, %v2251_v4  ;;  %v2345_v33 = vmul.f32 %v3178_v54, %v2344_v36  ;;  %v2260_v20 = vmul.f32 %v3182_v3, %v4516_v29  ;;  %v2269_v10 = vand.u32 2147483648, %v4516_v29 }
 0x561   : >> { %2513 = vst [vmem:[%s4475_s28 + $0x10] sm:$0xff] %v2460_v12  ;;  %3189 = vpow2.f32 %v2211_v32  ;;  %v2339_v1 = vsel %vm2338_vm13, %v4486_v5, %v2337_v17  ;;  %v2430_v32 = vld [vmem:[%s4532_s16 + $0x10] sm:$0xff]  ;;  %v4623_v17 = vadd.f32 %v2102_v57, %v4467_v46  ;;  %vm2362_vm5 = vcmp.eq.f32.partialorder %v4545_v6, inf }
 0x562   : >> { %v2342_v49 = vsel %vm2340_vm14, %v2341_v30, %v2339_v1  ;;  %v2191_v35 = vpop.f32.mrf.mxu3  ;;  %v2253_v39 = vmul.f32 %v4492_v45, %v2252_v51  ;;  %v2346_v43 = vmul.f32 0.5, %v2345_v33  ;;  %v2261_v24 = vmul.f32 %v3182_v3, %v2260_v20  ;;  %2492 = vst [vmem:[%s4475_s28 + $0x108] sm:$0xff] %v4599_v63 }
 0x563   : >> { %v2452_v25 = vmul.f32 %v2436_v18, %v2342_v49  ;;  %v2192_v26 = vadd.f32 %v2191_v35, %v4462_v62  ;;  %3191 = vrsqrt.f32 %v4553_v40  ;;  %2485 = vst [vmem:[%s4475_s28 + $0x60] sm:$0xff] %v4623_v17  ;;  %vm2364_vm6 = vcmp.eq.f32.partialorder %v4545_v6, 0.0 }
 0x564   : >> { %v3186_v61 = vpop.eup %3185  ;;  %v2255_v5 = vsel %vm2254_vm15, %v4492_v45, %v2253_v39  ;;  %v2170_v31 = vpop.f32.mrf.mxu1  ;;  %v2347_v48 = vsub.f32 1.5, %v2346_v43  ;;  %v2262_v23 = vmul.f32 0.5, %v2261_v24  ;;  %v2353_v45 = vand.u32 2147483648, %v4509_v47 }
 0x565   : >> { %v4585_v50 = vpop.eup %3187  ;;  %v2468_v16 = vadd.f32 %v2452_v25, %v4484_v53  ;;  %v2227_v37 = vmul.f32 1.442695, %v2192_v26  ;;  %v2258_v55 = vsel %vm2256_vm0, %v2257_v41, %v2255_v5  ;;  %v2171_v56 = vadd.f32 %v2170_v31, %v4462_v62  ;;  %v2126_v18 = vpop.f32.mrf.mxu2 }
 0x566   : >> { %2508 = vst [vmem:[%s4475_s28 + $0x110] sm:$0xff] %v4585_v50  ;;  %v2445_v58 = vmul.f32 %v2429_v34, %v2258_v55  ;;  %v2348_v21 = vmul.f32 %v3178_v54, %v2347_v48  ;;  %v2263_v59 = vsub.f32 1.5, %v2262_v23  ;;  %v2356_v60 = vmul.f32 %v3186_v61, %v4545_v6  ;;  %v2105_v27 = vpop.f32.mrf.mxu0  ;;  %v2438_v23 = vld [vmem:[%s4532_s16 + $0x50] sm:$0xff] }
 0x567   : >> { %v4594_v22 = vpop.eup %3189  ;;  %2521 = vst [vmem:[%s4475_s28 + $0xd0] sm:$0xff] %v2468_v16  ;;  %3193 = vpow2.f32 %v2227_v37  ;;  %v2213_v53 = vmul.f32 1.442695, %v2171_v56  ;;  %v2365_v48 = vand.u32 2147483648, %v4545_v6  ;;  %vm2278_vm7 = vcmp.eq.f32.partialorder %v4553_v40, inf }
 0x568   : >> { %2501 = vst [vmem:[%s4475_s28 + $0x68] sm:$0xff] %v4594_v22  ;;  %v2461_v54 = vadd.f32 %v2445_v58, %v4498_v19  ;;  %v2349_v28 = vmul.f32 %v4509_v47, %v2348_v21  ;;  %v2264_v30 = vmul.f32 %v3182_v3, %v2263_v59  ;;  %v2357_v0 = vmul.f32 %v3186_v61, %v2356_v60 }
 0x569   : >> { %v3192_v7 = vpop.eup %3191  ;;  %3195 = vpow2.f32 %v2213_v53  ;;  %v4652_v16 = vadd.f32 %v2126_v18, %v4467_v46  ;;  %vm2280_vm8 = vcmp.eq.f32.partialorder %v4553_v40, 0.0  ;;  %v4665_v59 = vadd.f32 %v2105_v27, %v4467_v46 }
 0x56a   : >> { %2514 = vst [vmem:[%s4475_s28 + $0x28] sm:$0xff] %v2461_v54  ;;  %v2351_v19 = vsel %vm2350_vm1, %v4509_v47, %v2349_v28  ;;  %v2194_v9 = vpop.f32.mrf.mxu3  ;;  %v2265_v11 = vmul.f32 %v4516_v29, %v2264_v30  ;;  %v2358_v3 = vmul.f32 0.5, %v2357_v0  ;;  %v2272_v4 = vmul.f32 %v3192_v7, %v4553_v40 }
 0x56b   : >> { %v2354_v36 = vsel %vm2352_vm2, %v2353_v45, %v2351_v19  ;;  %v2195_v12 = vadd.f32 %v2194_v9, %v4462_v62  ;;  %3197 = vrsqrt.f32 %v4585_v50  ;;  %2493 = vst [vmem:[%s4475_s28 + $0x120] sm:$0xff] %v4652_v16  ;;  %vm2374_vm9 = vcmp.eq.f32.partialorder %v4585_v50, inf }
 0x56c   : >> { %v2453_v51 = vmul.f32 %v2437_v8, %v2354_v36  ;;  %v2267_v33 = vsel %vm2266_vm3, %v4516_v29, %v2265_v11  ;;  %v2173_v20 = vpop.f32.mrf.mxu1  ;;  %v2359_v1 = vsub.f32 1.5, %v2358_v3  ;;  %v2273_v47 = vmul.f32 %v3192_v7, %v2272_v4  ;;  %v2431_v8 = vld [vmem:[%s4532_s16 + $0x18] sm:$0xff]  ;;  %2486 = vst [vmem:[%s4475_s28 + $0x78] sm:$0xff] %v4665_v59 }
 0x56d   : >> { %v4628_v41 = vpop.eup %3193  ;;  %v2229_v49 = vmul.f32 1.442695, %v2195_v12  ;;  %v2270_v35 = vsel %vm2268_vm4, %v2269_v10, %v2267_v33  ;;  %v2174_v39 = vadd.f32 %v2173_v20, %v4462_v62  ;;  %3199 = vrsqrt.f32 %v4594_v22  ;;  %v2129_v60 = vpop.f32.mrf.mxu2 }
 0x56e   : >> { %2509 = vst [vmem:[%s4475_s28 + $0x128] sm:$0xff] %v4628_v41  ;;  %v2469_v43 = vadd.f32 %v2453_v51, %v4507_v42  ;;  %v2446_v24 = vmul.f32 %v2430_v32, %v2270_v35  ;;  %v2360_v25 = vmul.f32 %v3186_v61, %v2359_v1  ;;  %v2274_v26 = vmul.f32 0.5, %v2273_v47 }
 0x56f   : >> { %v4639_v34 = vpop.eup %3195  ;;  %3201 = vpow2.f32 %v2229_v49  ;;  %v2215_v29 = vmul.f32 1.442695, %v2174_v39  ;;  %v4693_v20 = vadd.f32 %v2129_v60, %v4467_v46  ;;  %vm2376_vm10 = vcmp.eq.f32.partialorder %v4585_v50, 0.0 }
 0x570   : >> { %2502 = vst [vmem:[%s4475_s28 + $0x80] sm:$0xff] %v4639_v34  ;;  %v2462_v5 = vadd.f32 %v2446_v24, %v4524_v52  ;;  %v2361_v31 = vmul.f32 %v4545_v6, %v2360_v25  ;;  %v2275_v42 = vsub.f32 1.5, %v2274_v26  ;;  %vm2290_vm11 = vcmp.eq.f32.partialorder %v4594_v22, inf }
 0x571   : >> { %v3198_v61 = vpop.eup %3197  ;;  %2522 = vst [vmem:[%s4475_s28 + $0xe8] sm:$0xff] %v2469_v43  ;;  %3203 = vpow2.f32 %v2215_v29  ;;  %v2377_v43 = vand.u32 2147483648, %v4585_v50  ;;  %vm2292_vm12 = vcmp.eq.f32.partialorder %v4594_v22, 0.0  ;;  %vm2386_vm13 = vcmp.eq.f32.partialorder %v4628_v41, inf }
 0x572   : >> { %2515 = vst [vmem:[%s4475_s28 + $0x40] sm:$0xff] %v2462_v5  ;;  %v2363_v52 = vsel %vm2362_vm5, %v4545_v6, %v2361_v31  ;;  %v2197_v37 = vpop.f32.mrf.mxu3  ;;  %v2276_v55 = vmul.f32 %v3192_v7, %v2275_v42  ;;  %v2368_v56 = vmul.f32 %v3198_v61, %v4585_v50  ;;  %3205 = vrsqrt.f32 %v4628_v41  ;;  %v2439_v31 = vld [vmem:[%s4532_s16 + $0x58] sm:$0xff] }
 0x573   : >> { %v3200_v57 = vpop.eup %3199  ;;  %v2366_v58 = vsel %vm2364_vm6, %v2365_v48, %v2363_v52  ;;  %v2198_v21 = vadd.f32 %v2197_v37, %v4462_v62  ;;  %v2281_v7 = vand.u32 2147483648, %v4553_v40  ;;  %3207 = vrsqrt.f32 %v4639_v34  ;;  %2494 = vst [vmem:[%s4475_s28 + $0x138] sm:$0xff] %v4693_v20 }
 0x574   : >> { %v2454_v53 = vmul.f32 %v2438_v23, %v2366_v58  ;;  %v2277_v45 = vmul.f32 %v4553_v40, %v2276_v55  ;;  %v2176_v54 = vpop.f32.mrf.mxu1  ;;  %v2369_v28 = vmul.f32 %v3198_v61, %v2368_v56  ;;  %v2284_v6 = vmul.f32 %v3200_v57, %v4594_v22 }
 0x575   : >> { %v4669_v30 = vpop.eup %3201  ;;  %v2231_v0 = vmul.f32 1.442695, %v2198_v21  ;;  %v2177_v10 = vadd.f32 %v2176_v54, %v4462_v62  ;;  %v2132_v26 = vpop.f32.mrf.mxu2  ;;  %v2293_v56 = vand.u32 2147483648, %v4594_v22  ;;  %vm2388_vm14 = vcmp.eq.f32.partialorder %v4628_v41, 0.0 }
 0x576   : >> { %2510 = vst [vmem:[%s4475_s28 + $0x140] sm:$0xff] %v4669_v30  ;;  %v2470_v19 = vadd.f32 %v2454_v53, %v4543_v2  ;;  %v2279_v9 = vsel %vm2278_vm7, %v4553_v40, %v2277_v45  ;;  %v2370_v11 = vmul.f32 0.5, %v2369_v28  ;;  %v2285_v3 = vmul.f32 %v3200_v57, %v2284_v6  ;;  %v2108_v40 = vpop.f32.mrf.mxu0 }
 0x577   : >> { %v4683_v4 = vpop.eup %3203  ;;  %3209 = vpow2.f32 %v2231_v0  ;;  %v2282_v36 = vsel %vm2280_vm8, %v2281_v7, %v2279_v9  ;;  %v2217_v12 = vmul.f32 1.442695, %v2177_v10  ;;  %vm2302_vm15 = vcmp.eq.f32.partialorder %v4639_v34, inf }
 0x578   : >> { %v3206_v32 = vpop.eup %3205  ;;  %2503 = vst [vmem:[%s4475_s28 + $0x98] sm:$0xff] %v4683_v4  ;;  %v2447_v18 = vmul.f32 %v2431_v8, %v2282_v36  ;;  %v2371_v51 = vsub.f32 1.5, %v2370_v11  ;;  %v2286_v33 = vmul.f32 0.5, %v2285_v3  ;;  %vm2304_vm0 = vcmp.eq.f32.partialorder %v4639_v34, 0.0 }
 0x579   : >> { %2523 = vst [vmem:[%s4475_s28 + $0x100] sm:$0xff] %v2470_v19  ;;  %3211 = vpow2.f32 %v2217_v12  ;;  %v2380_v2 = vmul.f32 %v3206_v32, %v4628_v41  ;;  %v3208_v39 = vpop.eup %3207  ;;  %v2389_v19 = vand.u32 2147483648, %v4628_v41  ;;  %vm2398_vm1 = vcmp.eq.f32.partialorder %v4669_v30, inf }
 0x57a   : >> { %v2463_v1 = vadd.f32 %v2447_v18, %v4570_v38  ;;  %v2372_v47 = vmul.f32 %v3198_v61, %v2371_v51  ;;  %v2200_v49 = vpop.f32.mrf.mxu3  ;;  %v2287_v35 = vsub.f32 1.5, %v2286_v33  ;;  %3213 = vrsqrt.f32 %v4669_v30 }
 0x57b   : >> { %v2201_v24 = vadd.f32 %v2200_v49, %v4462_v62  ;;  %v2381_v25 = vmul.f32 %v3206_v32, %v2380_v2  ;;  %v2296_v27 = vmul.f32 %v3208_v39, %v4639_v34  ;;  %v4710_v62 = vadd.f32 %v2108_v40, %v4467_v46 }
 0x57c   : >> { %2516 = vst [vmem:[%s4475_s28 + $0x58] sm:$0xff] %v2463_v1  ;;  %v2373_v38 = vmul.f32 %v4585_v50, %v2372_v47  ;;  %v2288_v29 = vmul.f32 %v3200_v57, %v2287_v35  ;;  %3215 = vrsqrt.f32 %v4683_v4  ;;  %v2432_v57 = vld [vmem:[%s4532_s16 + $0x20] sm:$0xff]  ;;  %v2305_v35 = vand.u32 2147483648, %v4639_v34 }
 0x57d   : >> { %v4706_v5 = vpop.eup %3209  ;;  %v2233_v42 = vmul.f32 1.442695, %v2201_v24  ;;  %v2382_v61 = vmul.f32 0.5, %v2381_v25  ;;  %v2297_v52 = vmul.f32 %v3208_v39, %v2296_v27  ;;  %2487 = vst [vmem:[%s4475_s28 + $0x90] sm:$0xff] %v4710_v62  ;;  %vm2400_vm2 = vcmp.eq.f32.partialorder %v4669_v30, 0.0 }
 0x57e   : >> { %2511 = vst [vmem:[%s4475_s28 + $0x158] sm:$0xff] %v4706_v5  ;;  %v2375_v48 = vsel %vm2374_vm9, %v4585_v50, %v2373_v38  ;;  %v2289_v23 = vmul.f32 %v4594_v22, %v2288_v29  ;;  %v4734_v50 = vadd.f32 %v2132_v26, %v4467_v46  ;;  %v2111_v11 = vpop.f32.mrf.mxu0  ;;  %vm2314_vm3 = vcmp.eq.f32.partialorder %v4683_v4, inf }
 0x57f   : >> { %v4720_v37 = vpop.eup %3211  ;;  %v2378_v55 = vsel %vm2376_vm10, %v2377_v43, %v2375_v48  ;;  %3217 = vpow2.f32 %v2233_v42  ;;  %v2383_v58 = vsub.f32 1.5, %v2382_v61  ;;  %v2298_v45 = vmul.f32 0.5, %v2297_v52 }
 0x580   : >> { %v3214_v21 = vpop.eup %3213  ;;  %2504 = vst [vmem:[%s4475_s28 + $0xb0] sm:$0xff] %v4720_v37  ;;  %v2455_v60 = vmul.f32 %v2439_v31, %v2378_v55  ;;  %v2291_v53 = vsel %vm2290_vm11, %v4594_v22, %v2289_v23  ;;  %3219 = vrsqrt.f32 %v4706_v5  ;;  %v4763_v1 = vadd.f32 %v2111_v11, %v4467_v46 }
 0x581   : >> { %v2294_v54 = vsel %vm2292_vm12, %v2293_v56, %v2291_v53  ;;  %v2384_v28 = vmul.f32 %v3206_v32, %v2383_v58  ;;  %v2392_v6 = vmul.f32 %v3214_v21, %v4669_v30  ;;  %v2299_v8 = vsub.f32 1.5, %v2298_v45  ;;  %2495 = vst [vmem:[%s4475_s28 + $0x150] sm:$0xff] %v4734_v50  ;;  %v2135_v32 = vpop.f32.mrf.mxu2 }
 0x582   : >> { %v2471_v0 = vadd.f32 %v2455_v60, %v4599_v63  ;;  %v2448_v7 = vmul.f32 %v2432_v57, %v2294_v54  ;;  %v3216_v22 = vpop.eup %3215  ;;  %v2440_v63 = vld [vmem:[%s4532_s16 + $0x60] sm:$0xff]  ;;  %3221 = vrsqrt.f32 %v4720_v37  ;;  %v4769_v24 = vadd.f32 %v2135_v32, %v4467_v46  ;;  %2488 = vst [vmem:[%s4475_s28 + $0xa8] sm:$0xff] %v4763_v1 }
 0x583   : >> { %v2385_v10 = vmul.f32 %v4628_v41, %v2384_v28  ;;  %v2393_v9 = vmul.f32 %v3214_v21, %v2392_v6  ;;  %v2300_v36 = vmul.f32 %v3208_v39, %v2299_v8  ;;  %v2308_v12 = vmul.f32 %v3216_v22, %v4683_v4  ;;  %v2433_v39 = vld [vmem:[%s4532_s16 + $0x28] sm:$0xff]  ;;  %v2434_v28 = vld [vmem:[%s4532_s16 + $0x30] sm:$0xff] }
 0x584   : >> { %2524 = vst [vmem:[%s4475_s28 + $0x118] sm:$0xff] %v2471_v0  ;;  %v2464_v3 = vadd.f32 %v2448_v7, %v4623_v17  ;;  %v2401_v23 = vand.u32 2147483648, %v4669_v30  ;;  %vm2316_vm4 = vcmp.eq.f32.partialorder %v4683_v4, 0.0  ;;  %vm2410_vm5 = vcmp.eq.f32.partialorder %v4706_v5, inf }
 0x585   : >> { %v4750_v18 = vpop.eup %3217  ;;  %v2387_v51 = vsel %vm2386_vm13, %v4628_v41, %v2385_v10  ;;  %v2394_v33 = vmul.f32 0.5, %v2393_v9  ;;  %v2301_v2 = vmul.f32 %v4639_v34, %v2300_v36  ;;  %v2309_v40 = vmul.f32 %v3216_v22, %v2308_v12  ;;  %2496 = vst [vmem:[%s4475_s28 + $0x168] sm:$0xff] %v4769_v24 }
 0x586   : >> { %2512 = vst [vmem:[%s4475_s28 + $0x170] sm:$0xff] %v4750_v18  ;;  %v2390_v17 = vsel %vm2388_vm14, %v2389_v19, %v2387_v51  ;;  %v3220_v47 = vpop.eup %3219  ;;  %3223 = vrsqrt.f32 %v4750_v18  ;;  %vm2412_vm6 = vcmp.eq.f32.partialorder %v4706_v5, 0.0  ;;  %vm2326_vm7 = vcmp.eq.f32.partialorder %v4720_v37, inf }
 0x587   : >> { %2517 = vst [vmem:[%s4475_s28 + $0x70] sm:$0xff] %v2464_v3  ;;  %v2456_v49 = vmul.f32 %v2440_v63, %v2390_v17  ;;  %v2395_v43 = vsub.f32 1.5, %v2394_v33  ;;  %v2303_v41 = vsel %vm2302_vm15, %v4639_v34, %v2301_v2  ;;  %v2310_v25 = vmul.f32 0.5, %v2309_v40  ;;  %v2441_v34 = vld [vmem:[%s4532_s16 + $0x68] sm:$0xff]  ;;  %v2442_v63 = vld [vmem:[%s4532_s16 + $0x70] sm:$0xff]  ;;  %v2435_v40 = vld [vmem:[%s4532_s16 + $0x38] sm:$0xff] }
 0x588   : >> { %v2404_v26 = vmul.f32 %v3220_v47, %v4706_v5  ;;  %v2306_v29 = vsel %vm2304_vm0, %v2305_v35, %v2303_v41  ;;  %v3222_v61 = vpop.eup %3221  ;;  %v2413_v3 = vand.u32 2147483648, %v4706_v5  ;;  %v2329_v2 = vand.u32 2147483648, %v4720_v37  ;;  %v2443_v41 = vld [vmem:[%s4532_s16 + $0x78] sm:$0xff] }
 0x589   : >> { %v2472_v38 = vadd.f32 %v2456_v49, %v4652_v16  ;;  %v2396_v27 = vmul.f32 %v3214_v21, %v2395_v43  ;;  %v2449_v46 = vmul.f32 %v2433_v39, %v2306_v29  ;;  %v2311_v31 = vsub.f32 1.5, %v2310_v25 }
 0x58a   : >> { %v2405_v42 = vmul.f32 %v3220_v47, %v2404_v26  ;;  %v2320_v56 = vmul.f32 %v3222_v61, %v4720_v37  ;;  %vm2328_vm8 = vcmp.eq.f32.partialorder %v4720_v37, 0.0  ;;  %vm2422_vm9 = vcmp.eq.f32.partialorder %v4750_v18, inf }
 0x58b   : >> { %2525 = vst [vmem:[%s4475_s28 + $0x130] sm:$0xff] %v2472_v38  ;;  %v2397_v48 = vmul.f32 %v4669_v30, %v2396_v27  ;;  %v2465_v16 = vadd.f32 %v2449_v46, %v4665_v59  ;;  %v2312_v52 = vmul.f32 %v3216_v22, %v2311_v31  ;;  %v2317_v59 = vand.u32 2147483648, %v4683_v4 }
 0x58c   : >> { %v2406_v55 = vmul.f32 0.5, %v2405_v42  ;;  %v3224_v58 = vpop.eup %3223  ;;  %v2321_v45 = vmul.f32 %v3222_v61, %v2320_v56  ;;  %v2425_v43 = vand.u32 2147483648, %v4750_v18  ;;  %vm2424_vm10 = vcmp.eq.f32.partialorder %v4750_v18, 0.0 }
 0x58d   : >> { %v2399_v57 = vsel %vm2398_vm1, %v4669_v30, %v2397_v48  ;;  %2518 = vst [vmem:[%s4475_s28 + $0x88] sm:$0xff] %v2465_v16  ;;  %v2313_v60 = vmul.f32 %v4683_v4, %v2312_v52  ;;  %v2416_v6 = vmul.f32 %v3224_v58, %v4750_v18 }
 0x58e   : >> { %v2402_v21 = vsel %vm2400_vm2, %v2401_v23, %v2399_v57  ;;  %v2407_v53 = vsub.f32 1.5, %v2406_v55  ;;  %v2322_v7 = vmul.f32 0.5, %v2321_v45 }
 0x58f   : >> { %v2457_v54 = vmul.f32 %v2441_v34, %v2402_v21  ;;  %v2315_v0 = vsel %vm2314_vm3, %v4683_v4, %v2313_v60  ;;  %v2417_v10 = vmul.f32 %v3224_v58, %v2416_v6 }
 0x590   : >> { %v2408_v30 = vmul.f32 %v3220_v47, %v2407_v53  ;;  %v2318_v22 = vsel %vm2316_vm4, %v2317_v59, %v2315_v0  ;;  %v2323_v11 = vsub.f32 1.5, %v2322_v7 }
 0x591   : >> { %v2473_v8 = vadd.f32 %v2457_v54, %v4693_v20  ;;  %v2450_v19 = vmul.f32 %v2434_v28, %v2318_v22  ;;  %v2418_v36 = vmul.f32 0.5, %v2417_v10 }
 0x592   : >> { %v2409_v9 = vmul.f32 %v4706_v5, %v2408_v30  ;;  %v2324_v20 = vmul.f32 %v3222_v61, %v2323_v11 }
 0x593   : >> { %2526 = vst [vmem:[%s4475_s28 + $0x148] sm:$0xff] %v2473_v8  ;;  %v2466_v4 = vadd.f32 %v2450_v19, %v4710_v62  ;;  %v2419_v51 = vsub.f32 1.5, %v2418_v36 }
 0x594   : >> { %v2411_v12 = vsel %vm2410_vm5, %v4706_v5, %v2409_v9  ;;  %v2325_v17 = vmul.f32 %v4720_v37, %v2324_v20 }
 0x595   : >> { %v2414_v32 = vsel %vm2412_vm6, %v2413_v3, %v2411_v12  ;;  %2519 = vst [vmem:[%s4475_s28 + $0xa0] sm:$0xff] %v2466_v4  ;;  %v2420_v47 = vmul.f32 %v3224_v58, %v2419_v51 }
 0x596   : >> { %v2458_v33 = vmul.f32 %v2442_v63, %v2414_v32  ;;  %v2327_v5 = vsel %vm2326_vm7, %v4720_v37, %v2325_v17 }
 0x597   : >> { %v2330_v49 = vsel %vm2328_vm8, %v2329_v2, %v2327_v5  ;;  %v2421_v35 = vmul.f32 %v4750_v18, %v2420_v47 }
 0x598   : >> { %v2474_v62 = vadd.f32 %v2458_v33, %v4734_v50  ;;  %v2451_v39 = vmul.f32 %v2435_v40, %v2330_v49 }
 0x599   : >> { %v2423_v25 = vsel %vm2422_vm9, %v4750_v18, %v2421_v35 }
 0x59a   : >> { %2527 = vst [vmem:[%s4475_s28 + $0x160] sm:$0xff] %v2474_v62  ;;  %v2467_v50 = vadd.f32 %v2451_v39, %v4763_v1  ;;  %v2426_v26 = vsel %vm2424_vm10, %v2425_v43, %v2423_v25 }
 0x59b   : >> { %v2459_v38 = vmul.f32 %v2443_v41, %v2426_v26  ;;  %1965 = sbr.rel (!%p1963_p0) target bundleno = 1183 (0x49f), region = 244 }
 0x59c   : >> { %2520 = vst [vmem:[%s4475_s28 + $0xb8] sm:$0xff] %v2467_v50 }
 0x59d   : >> { %v2475_v37 = vadd.f32 %v2459_v38, %v4769_v24 }
 0x59f   : >> { %2528 = vst [vmem:[%s4475_s28 + $0x178] sm:$0xff] %v2475_v37 }
 0x5a0 PF: > { %p3031_p1 = scmp.eq.s32.totalorder %s3651_s27, 3  ;;  %s4929_s17 = sld [smem:[#allocation35_spill]] }
 0x5a1   : > { %s3537_s5 = smov [#allocation14]   ;;  %s3538_s8 = smov 384  }
 0x5a2   : > { %s2534_s6 = sshll.u32 %s3537_s5, 4  ;;  %s3539_s11 = smov 24   ;;  %s2535_s6 = int_to_ptr.vmem [resolvable:$true] %s2534_s6 }
 0x5a6   : > { %s2536_s1 = sshll.u32 %s4929_s17, 4  ;;  %s2537_s1 = int_to_ptr.hbm [resolvable:$true] %s2536_s1 }
 0x5a7   : > { %3007 = dma.vmem_to_hbm [thread:$0]  (%p3031_p1), %s2535_s6, 12288, %s2537_s1, [#allocation7], %s3538_s8, %s3538_s8, %s3539_s11  }
 0x5a8   : > { %3470 = dma.done.wait (%p3031_p1), [#allocation7], 12288  }
 0x5a9   : > { %3472 = vsyncadd (%p3031_p1), [#allocation7], 4294955008 }
 0x5aa PF: > { %s27_s26 = sadd.s32 1, %s3511_s26   ;;  %s4930_s17 = sld [smem:[#allocation20_spill]] }
 0x5ab   : > { %p24_p2 = scmp.ge.s32.totalorder %s27_s26, 6   ;;  %s4931_s27 = sld [smem:[#allocation26_spill]] }
 0x5ac   : > { %s4932_s22 = sld [smem:[#allocation27_spill]]  ;;  %s4935_s18 = smov %s3483_s19 }
 0x5ad   : > { %s4933_s2 = sld [smem:[#allocation23_spill]]  ;;  %s4937_s20 = smov %s3491_s21 }
 0x5ae   : > { %s4934_s15 = sld [smem:[#allocation24_spill]]  ;;  %s4940_s23 = smov %s3507_s25 }
 0x5b0   :  { %26 = sbr.rel (!%p24_p2) target bundleno = 18 (0x12), region = 255 }
 0x5b1   : > { %s4936_s19 = smov %s4931_s27 }
 0x5b2   : > { %s4938_s21 = smov %s4932_s22  ;;  %s4939_s22 = smov %s3503_s24 }
 0x5b3   : > { %s4941_s24 = smov %s4933_s2 }
 0x5b4   : > { %s4942_s25 = smov %s4934_s15 }
 0x5b5   :  { %2553 = vsyncpa [#allocation6], 1 }
 0x5b6   :  { %2555 = vsyncpa [#allocation6 + $0x1], 1 }
 0x5b7   :  { %2556 = vsyncpa [#allocation9], 1 }
 0x5b8   :  { %2558 = vsyncpa [#allocation9 + $0x1], 1 }
 0x5b9   :  { %2559 = vsyncpa [#allocation12], 1 }
 0x5ba   :  { %2560 = vsyncpa [#allocation7], 1 }
 0x5bb   :  { %2562 = vsyncpa [#allocation7 + $0x1], 1 }

// kernel: tpu_custom_call.1
= control target key start
LH: loop header
LB: loop body
LE: loop exit
PB: predicated region body
PF: predicated region fallthrough
CT: control target
= control target key end

     0   :  { %s4865_s0 = inlined_call_operand.vmem [shape: bf16[256,256], index: 0, kind: input, shape index: {}]   ;;  %s4866_s1 = inlined_call_operand.vmem [shape: f32[256,8], index: 1, kind: input, shape index: {}]   ;;  %s4867_s2 = inlined_call_operand.hbm [shape: f32[256,128], index: 2, kind: input, shape index: {}]   ;;  %s4868_s3 = inlined_call_operand.hbm [shape: bf16[256,128], index: 3, kind: input, shape index: {}]   ;;  %s4869_s4 = inlined_call_operand.hbm [shape: f32[3,8,128], index: 4, kind: input, shape index: {}]   ;;  %s4870_s5 = inlined_call_operand.hbm [shape: f32[2,128,128], index: 5, kind: input, shape index: {}]   ;;  %s4871_s6 = inlined_call_operand.vmem [shape: f32[3,128], index: 6, kind: input, shape index: {}]   ;;  %s4872_s7 = inlined_call_operand.vmem [shape: f32[3,128], index: 7, kind: input, shape index: {}]   ;;  %s4873_s8 = inlined_call_operand.vmem [shape: f32[3,128], index: 8, kind: input, shape index: {}]   ;;  %s4874_s9 = inlined_call_operand.hbm [shape: f32[128,256], index: 9, kind: input, shape index: {}]   ;;  %s4875_s10 = inlined_call_operand.vmem [shape: f32[1,256], index: 10, kind: input, shape index: {}]   ;;  %s4876_s11 = inlined_call_operand.hbm [shape: f32[256,384], index: 11, kind: output, shape index: {}]  }
   0x1   :  { %4883 = sst [smem:[#allocation28_spill]] %s4866_s1 }
   0x2   :  { %4884 = sst [smem:[#allocation29_spill]] %s4867_s2 }
   0x3   :  { %4885 = sst [smem:[#allocation30_spill]] %s4870_s5 }
   0x4   :  { %4886 = sst [smem:[#allocation31_spill]] %s4871_s6 }
   0x5   :  { %4887 = sst [smem:[#allocation32_spill]] %s4872_s7 }
   0x6   :  { %4888 = sst [smem:[#allocation33_spill]] %s4873_s8 }
   0x7   :  { %4889 = sst [smem:[#allocation34_spill]] %s4875_s10 }
   0x8   :  { %4890 = sst [smem:[#allocation35_spill]] %s4876_s11 }
   0x9   :  { %16 = vsyncpa [#allocation6], 0 }
   0xa   :  { %17 = vsyncpa [#allocation9], 0 }
   0xb   :  { %19 = vsyncpa [#allocation9 + $0x1], 0 }
   0xc   :  { %20 = vsyncpa [#allocation12], 0 }
   0xd   :  { %21 = vsyncpa [#allocation7], 0  ;;  %s3600_s17 = smov 0   ;;  %s3602_s18 = smov 0  }
   0xe   :  { %s3604_s19 = smov 0   ;;  %s3606_s20 = smov 0  }
   0xf   :  { %s3608_s21 = smov 0   ;;  %s3610_s22 = smov 0  }
  0x10   :  { %s3612_s23 = smov 0   ;;  %s3614_s24 = smov 0  }
  0x11   :  { %s3616_s25 = smov 0   ;;  %s3618_s26 = smov 0  }
  0x12 LB: > { %4891 = sst [smem:[#allocation20_spill]] %s3479_s18  ;;  %s3651_s27 = sadd.s32 4294967295, %s3511_s26   ;;  %s3511_s26 = sphi %s3618_s26, %s27_s26   ;;  %s3507_s25 = sphi %s3616_s25, %s4942_s25   ;;  %s3503_s24 = sphi %s3614_s24, %s4941_s24   ;;  %s3499_s23 = sphi %s3612_s23, %s4940_s23   ;;  %s3495_s22 = sphi %s3610_s22, %s4939_s22   ;;  %s3491_s21 = sphi %s3608_s21, %s4938_s21   ;;  %s3487_s20 = sphi %s3606_s20, %s4937_s20   ;;  %s3483_s19 = sphi %s3604_s19, %s4936_s19   ;;  %s3479_s18 = sphi %s3602_s18, %s4935_s18   ;;  %s3475_s17 = sphi %s3600_s17, %s4930_s17  }
  0x13   : > { %4892 = sst [smem:[#allocation21_spill]] %s3495_s22  ;;  %s36_s28 = sadd.s32 1, %s3503_s24 }
  0x14   : > { %4893 = sst [smem:[#allocation22_spill]] %s3499_s23  ;;  %p37_p0 = scmp.ge.s32.totalorder %s36_s28, 2 }
  0x15   : > { %s39_s29 = sadd.s32 1, %s3507_s25  ;;  %s48_s30 = sadd.s32 1, %s3491_s21 }
  0x16   : > { %p55_p1 = scmp.ne.s32.totalorder %s3491_s21, %s3487_s20  ;;  %s4944_s28 = smov (%p37_p0, %s36_s28), 0 }
  0x17   : > { %4894 = sst [smem:[#allocation23_spill]] %s4944_s28  ;;  %s4946_s29 = smov (!%p37_p0, %s39_s29), %s3507_s25 }
  0x18   : > { %s43_s12 = ssub.s32 %s3503_s24, %s4944_s28  ;;  %p56_p2 = scmp.eq.s32.totalorder %s3511_s26, 0 }
  0x19   : > { %p41_p3 = scmp.ge.s32.totalorder %s4946_s29, 2  ;;  %s116_s13 = sadd.s32 1, %s3483_s19 }
  0x1a   : > { %p3665_p4 = por %p56_p2, %p55_p1  ;;  %p123_p5 = scmp.ne.s32.totalorder %s3483_s19, %s3479_s18 }
  0x1b   : > { %s4948_s29 = smov (%p41_p3, %s4946_s29), 0  ;;  %p129_p7 = scmp.ne.s32.totalorder %s3479_s18, %s3475_s17 }
  0x1c   : > { %4896 = sst [smem:[#allocation24_spill]] %s4948_s29  ;;  %p3673_p6 = por %p123_p5, %p56_p2 }
  0x1d   : > { %s44_s16 = ssub.s32 %s3507_s25, %s4948_s29  ;;  %p130_p8 = scmp.eq.s32.totalorder %s3651_s27, 0 }
  0x1e   : > { %s45_s28 = sor.u32 %s44_s16, %s43_s12  ;;  %p114_p9 = scmp.eq.s32.totalorder %s44_s16, 0 }
  0x1f   : > { %p46_p10 = scmp.eq.s32.totalorder %s45_s28, 0  ;;  %p3684_p11 = por %p130_p8, %p129_p7 }
  0x20   : > { %s3689_s10 = scalar_select %p114_p9, %s3483_s19, %s116_s13  }
  0x21   : > { %s4898_s11 = scalar_select %p3684_p11, 1, 0 }
  0x22   : > { %4900 = sst [smem:[#allocation26_spill]] %s3689_s10  ;;  %p2700_p12 = scmp.ge.s32.totalorder %s3511_s26, 1 }
  0x23   : > { %4899 = sst [smem:[#allocation25_spill]] %s4898_s11  ;;  %p308_p13 = scmp.lt.s32.totalorder %s3511_s26, 5 }
  0x24   : > { %s3692_s8 = scalar_select %p46_p10, %s3491_s21, %s48_s30  }
  0x25   : > { %p3696_p0 = pnand %p2700_p12, %p308_p13  ;;  %s4903_s5 = sld [smem:[#allocation30_spill]] }
  0x26   : > { %4901 = sst [smem:[#allocation27_spill]] %s3692_s8  ;;  %s3525_s12 = smov [#allocation11]  }
  0x27   : > { %p3010_p1 = pneg %p3696_p0  ;;  %s352_s16 = sshll.u32 %s3525_s12, 4  ;;  %s353_s16 = int_to_ptr.vmem [resolvable:$true] %s352_s16 }
  0x28   : > { %s3526_s13 = smov 128   ;;  %s3527_s8 = smov 8  }
  0x29   : > { %p3707_p2 = pnand %p3010_p1, %p130_p8  ;;  %s4905_s2 = sld [smem:[#allocation29_spill]] }
  0x2a   : > { %s3528_s10 = smov [#allocation5]   ;;  %s336_s23 = sshll.u32 %s4869_s4, 4  ;;  %s337_s23 = int_to_ptr.hbm [resolvable:$true] %s336_s23 }
  0x2b   : > { %s350_s28 = sshll.u32 %s4903_s5, 4  ;;  %s324_s12 = sshll.u32 %s3528_s10, 4  ;;  %s351_s28 = int_to_ptr.hbm [resolvable:$true] %s350_s28  ;;  %s325_s12 = int_to_ptr.vmem [resolvable:$true] %s324_s12 }
  0x2c   : > { %3019 = dma.hbm_to_vmem [thread:$0]  (!%p3707_p2), %s351_s28, 4096, %s353_s16, [#allocation12], %s3526_s13, %s3526_s13, %s3527_s8  }
  0x2d   : > { %s3529_s22 = smov [#allocation10]   ;;  %s373_s16 = sshll.u32 %s4874_s9, 4  ;;  %s374_s16 = int_to_ptr.hbm [resolvable:$true] %s373_s16 }
  0x2e   : > { %s338_s11 = sshll.u32 %s3529_s22, 4  ;;  %s3530_s10 = smov [#allocation13]   ;;  %s339_s11 = int_to_ptr.vmem [resolvable:$true] %s338_s11 }
  0x2f   : > { %s322_s5 = sshll.u32 %s4905_s2, 4  ;;  %s375_s29 = sshll.u32 %s3530_s10, 4  ;;  %s323_s5 = int_to_ptr.hbm [resolvable:$true] %s322_s5  ;;  %s376_s29 = int_to_ptr.vmem [resolvable:$true] %s375_s29 }
  0x30   : > { %3013 = dma.hbm_to_vmem [thread:$0]  (!%p3707_p2), %s323_s5, 4096, %s325_s12, [#allocation6], %s3526_s13, %s3526_s13, %s3527_s8  }
  0x31   : > { %3016 = dma.hbm_to_vmem [thread:$0]  (!%p3707_p2), %s337_s23, 384, %s339_s11, [#allocation9], %s3526_s13, %s3526_s13, %s3527_s8  }
  0x32   : > { %s3531_s17 = smov 256   ;;  %s3532_s2 = smov 16  }
  0x33   : > { %3022 = dma.hbm_to_vmem [thread:$0]  (!%p3707_p2), %s374_s16, 4096, %s376_s29, [#allocation12], %s3531_s17, %s3531_s17, %s3532_s2  }
  0x34   : > { %p2705_p3 = scmp.ge.s32.totalorder %s3511_s26, 4 }
  0x36   : > { %388 = sbr.rel (%p2705_p3) target bundleno = 88 (0x58), region = 52 }
  0x3b   : > { %391 = sbr.rel (!%p3665_p4) target bundleno = 81 (0x51), region = 56  ;;  %s393_s1 = sand.u32 (%p3665_p4), 1, %s3491_s21  }
  0x3c   : > { %s2844_s5 = sshll.u32 (%p3665_p4), %s3503_s24, 5  ;;  %s2706_s6 = sshll.u32 (%p3665_p4), %s393_s1, 6 }
  0x3d   : > { %s398_s8 = sadd.s32 (%p3665_p4), %s3507_s25, %s2844_s5  ;;  %s395_s2 = scalar_lea.vmem (%p3665_p4), [#allocation4], %s2706_s6 }
  0x3e   : > { %s2709_s11 = sshll.u32 (%p3665_p4), %s398_s8, 2 }
  0x3f   : > { %s3737_s23 = scalar_lea.vmem (%p3665_p4), %s4865_s0, %s2709_s11 }
  0x40   : > { %v417_v0 = vld [vmem:[%s3737_s23] sm:$0xf]  ;;  %v419_v1 = vld [vmem:[%s3737_s23 + $0x8] sm:$0xf]  ;;  %v421_v2 = vld [vmem:[%s3737_s23 + $0x10] sm:$0xf] }
  0x41   : > { %418 = vst [vmem:[%s395_s2] sm:$0xf] %v417_v0  ;;  %v423_v3 = vld [vmem:[%s3737_s23 + $0x18] sm:$0xf]  ;;  %v425_v4 = vld [vmem:[%s3737_s23 + $0x20] sm:$0xf] }
  0x42   : > { %420 = vst [vmem:[%s395_s2 + $0x4] sm:$0xf] %v419_v1  ;;  %v427_v5 = vld [vmem:[%s3737_s23 + $0x28] sm:$0xf]  ;;  %v429_v6 = vld [vmem:[%s3737_s23 + $0x30] sm:$0xf] }
  0x43   : > { %422 = vst [vmem:[%s395_s2 + $0x8] sm:$0xf] %v421_v2  ;;  %v431_v7 = vld [vmem:[%s3737_s23 + $0x38] sm:$0xf]  ;;  %v433_v8 = vld [vmem:[%s3737_s23 + $0x40] sm:$0xf] }
  0x44   : > { %424 = vst [vmem:[%s395_s2 + $0xc] sm:$0xf] %v423_v3  ;;  %v435_v9 = vld [vmem:[%s3737_s23 + $0x48] sm:$0xf]  ;;  %v437_v10 = vld [vmem:[%s3737_s23 + $0x50] sm:$0xf] }
  0x45   : > { %426 = vst [vmem:[%s395_s2 + $0x10] sm:$0xf] %v425_v4  ;;  %v439_v11 = vld [vmem:[%s3737_s23 + $0x58] sm:$0xf]  ;;  %v441_v12 = vld [vmem:[%s3737_s23 + $0x60] sm:$0xf] }
  0x46   : > { %428 = vst [vmem:[%s395_s2 + $0x14] sm:$0xf] %v427_v5  ;;  %v443_v13 = vld [vmem:[%s3737_s23 + $0x68] sm:$0xf]  ;;  %v445_v14 = vld [vmem:[%s3737_s23 + $0x70] sm:$0xf] }
  0x47   : > { %430 = vst [vmem:[%s395_s2 + $0x18] sm:$0xf] %v429_v6  ;;  %v447_v15 = vld [vmem:[%s3737_s23 + $0x78] sm:$0xf] }
  0x48   : > { %432 = vst [vmem:[%s395_s2 + $0x1c] sm:$0xf] %v431_v7 }
  0x49   : > { %434 = vst [vmem:[%s395_s2 + $0x20] sm:$0xf] %v433_v8 }
  0x4a   : > { %436 = vst [vmem:[%s395_s2 + $0x24] sm:$0xf] %v435_v9 }
  0x4b   : > { %438 = vst [vmem:[%s395_s2 + $0x28] sm:$0xf] %v437_v10 }
  0x4c   : > { %440 = vst [vmem:[%s395_s2 + $0x2c] sm:$0xf] %v439_v11 }
  0x4d   : > { %442 = vst [vmem:[%s395_s2 + $0x30] sm:$0xf] %v441_v12 }
  0x4e   : > { %444 = vst [vmem:[%s395_s2 + $0x34] sm:$0xf] %v443_v13 }
  0x4f   : > { %446 = vst [vmem:[%s395_s2 + $0x38] sm:$0xf] %v445_v14 }
  0x50   : > { %448 = vst [vmem:[%s395_s2 + $0x3c] sm:$0xf] %v447_v15 }
  0x51 PF: > { %s505_s14 = sand.u32 1, %s3511_s26   ;;  %s507_s30 = sand.u32 1, %s3483_s19  }
  0x52   : > { %s2710_s13 = sshll.u32 %s507_s30, 6  ;;  %s2845_s12 = sshll.u32 %s3507_s25, 6 }
  0x53   : > { %s514_s10 = scalar_lea.hbm %s4868_s3, %s2845_s12  ;;  %s509_s29 = scalar_lea.vmem [#allocation8], %s2710_s13 }
  0x54   : > { %s517_s17 = sshll.u32 %s509_s29, 4  ;;  %s515_s1 = sshll.u32 %s514_s10, 4  ;;  %s518_s17 = int_to_ptr.vmem [resolvable:$true] %s517_s17  ;;  %s516_s1 = int_to_ptr.hbm [resolvable:$true] %s515_s1 }
  0x55   : > { %s506_s5 = scalar_lea.sflag [#allocation9], %s505_s14  ;;  %s3533_s6 = smov 64  }
  0x56   : > { %s3534_s8 = smov 4  }
  0x57   : > { %2996 = dma.hbm_to_vmem [thread:$0]  (%p3673_p6), %s516_s1, 1024, %s518_s17, %s506_s5, %s3533_s6, %s3533_s6, %s3534_s8  }
  0x58 PF: > { %529 = sbr.rel (%p3696_p0) target bundleno = 1450 (0x5aa), region = 101  ;;  %s532_s11 = sand.u32 (!%p3696_p0), 1, %s3487_s20  }
  0x59   : > { %s2714_s18 = sshll.u32 (!%p3696_p0), %s532_s11, 6 }
  0x5a   : > { %s3766_s22 = scalar_lea.vmem (!%p3696_p0), [#allocation4], %s2714_s18 }
  0x5d   : > { %3454 = dma.done.wait (%p130_p8), [#allocation6], 4096  }
  0x5e   : > { %3456 = vsyncadd (%p130_p8), [#allocation6], 4294963200  ;;  %s4906_s23 = sld [smem:[#allocation20_spill]]  ;;  %s543_s15 = sand.u32 1, %s3651_s27  }
  0x5f   : > { %s544_s13 = scalar_lea.sflag [#allocation9], %s543_s15 }
  0x64   : > { %s545_s14 = sand.u32 1, %s4906_s23  }
  0x65   : > { %s2716_s30 = sshll.u32 %s545_s14, 6 }
  0x66   : > { %s3774_s7 = scalar_lea.vmem [#allocation8], %s2716_s30 }
  0x67   : > { %3458 = dma.done.wait (%p3684_p11), %s544_s13, 1024  }
  0x68   : > { %3460 = vsyncadd (%p3684_p11), %s544_s13, 4294966272 }
  0x69   : > { %3462 = dma.done.wait (%p130_p8), [#allocation9], 384  }
  0x6a   : > { %3464 = vsyncadd (%p130_p8), [#allocation9], 4294966912 }
  0x6b   : > { %3466 = dma.done.wait (%p130_p8), [#allocation12], 8192  }
  0x6c   : > { %3468 = vsyncadd (%p130_p8), [#allocation12], 4294959104  ;;  %s4908_s20 = sld [smem:[#allocation21_spill]]  ;;  %v2861_v16 = vld [vmem:[%s3774_s7 + $0x38] sm:$0xff]  ;;  %v2860_v17 = vld [vmem:[%s3774_s7 + $0x30] sm:$0xff] }
  0x6d   : > { %732 = vmatpush.bf16.msra.mxu0 %v2861_v16  ;;  %2863 = vmatpush.bf16.msra.mxu1 %v2861_v16  ;;  %v2859_v18 = vld [vmem:[%s3774_s7 + $0x28] sm:$0xff]  ;;  %v2858_v19 = vld [vmem:[%s3774_s7 + $0x20] sm:$0xff]  ;;  %v2857_v20 = vld [vmem:[%s3774_s7 + $0x18] sm:$0xff]  ;;  %s4909_s28 = sld [smem:[#allocation22_spill]] }
  0x6e   : > { %2864 = vmatpush.bf16.msra.mxu2 %v2861_v16  ;;  %2865 = vmatpush.bf16.msra.mxu3 %v2861_v16  ;;  %v2856_v21 = vld [vmem:[%s3774_s7 + $0x10] sm:$0xff]  ;;  %v2855_v22 = vld [vmem:[%s3774_s7 + $0x8] sm:$0xff]  ;;  %v2854_v23 = vld [vmem:[%s3774_s7] sm:$0xff] }
  0x6f   : > { %v2846_v24 = vld [vmem:[%s3766_s22] sm:$0xff]  ;;  %v2848_v25 = vld [vmem:[%s3766_s22 + $0x10] sm:$0xff]  ;;  %v2847_v28 = vld [vmem:[%s3766_s22 + $0x8] sm:$0xff] }
  0x70   : > { %v2850_v26 = vld [vmem:[%s3766_s22 + $0x20] sm:$0xff]  ;;  %v2852_v27 = vld [vmem:[%s3766_s22 + $0x30] sm:$0xff]  ;;  %v2849_v29 = vld [vmem:[%s3766_s22 + $0x18] sm:$0xff] }
  0x71   : > { %733 = vmatpush.bf16.msra.mxu0 %v2860_v17  ;;  %2866 = vmatpush.bf16.msra.mxu1 %v2860_v17  ;;  %v2851_v30 = vld [vmem:[%s3766_s22 + $0x28] sm:$0xff]  ;;  %v2853_v31 = vld [vmem:[%s3766_s22 + $0x38] sm:$0xff] }
  0x72   : > { %s3789_s12 = sshll.u32 %s4908_s20, 7  ;;  %2867 = vmatpush.bf16.msra.mxu2 %v2860_v17  ;;  %2868 = vmatpush.bf16.msra.mxu3 %v2860_v17 }
  0x73   : > { %p2785_p4 = scmp.ne.s32.totalorder %s4909_s28, 0 }
  0x74   : > { %s4910_s29 = sld [smem:[#allocation28_spill]] (!%p2785_p4)  ;;  %s3888_s8 = scalar_lea.vmem (!%p2785_p4), [#allocation2], %s3789_s12 }
  0x75   : > { %734 = vmatpush.bf16.msra.mxu0 %v2859_v18  ;;  %2869 = vmatpush.bf16.msra.mxu1 %v2859_v18  ;;  %s4911_s6 = sld [smem:[#allocation31_spill]] (!%p2785_p4) }
  0x76   : > { %2870 = vmatpush.bf16.msra.mxu2 %v2859_v18  ;;  %2871 = vmatpush.bf16.msra.mxu3 %v2859_v18 }
  0x79   : > { %735 = vmatpush.bf16.msra.mxu0 %v2858_v19  ;;  %2872 = vmatpush.bf16.msra.mxu1 %v2858_v19 }
  0x7a   : > { %2873 = vmatpush.bf16.msra.mxu2 %v2858_v19  ;;  %2874 = vmatpush.bf16.msra.mxu3 %v2858_v19  ;;  %s3844_s17 = scalar_lea.vmem (!%p2785_p4), %s4910_s29, %s3789_s12 }
  0x7d   : > { %736 = vmatpush.bf16.msra.mxu0 %v2857_v20  ;;  %2875 = vmatpush.bf16.msra.mxu1 %v2857_v20 }
  0x7e   : > { %2876 = vmatpush.bf16.msra.mxu2 %v2857_v20  ;;  %2877 = vmatpush.bf16.msra.mxu3 %v2857_v20 }
  0x81   : > { %737 = vmatpush.bf16.msra.mxu0 %v2856_v21  ;;  %2878 = vmatpush.bf16.msra.mxu1 %v2856_v21 }
  0x82   : > { %2879 = vmatpush.bf16.msra.mxu2 %v2856_v21  ;;  %2880 = vmatpush.bf16.msra.mxu3 %v2856_v21 }
  0x85   : > { %738 = vmatpush.bf16.msra.mxu0 %v2855_v22  ;;  %2881 = vmatpush.bf16.msra.mxu1 %v2855_v22 }
  0x86   : > { %2882 = vmatpush.bf16.msra.mxu2 %v2855_v22  ;;  %2883 = vmatpush.bf16.msra.mxu3 %v2855_v22 }
  0x89   : > { %739 = vmatpush.bf16.msra.mxu0 %v2854_v23  ;;  %2884 = vmatpush.bf16.msra.mxu1 %v2854_v23 }
  0x8a   : > { %2885 = vmatpush.bf16.msra.mxu2 %v2854_v23  ;;  %2886 = vmatpush.bf16.msra.mxu3 %v2854_v23 }
  0x8c   : > { %740 = vmatmul.bf16.vlgmr.msra.gmra.mxu0 %v2846_v24  ;;  %750 = vmatmul.bf16.vlgmr.msra.gmra.mxu1 %v2848_v25 }
  0x8d   : > { %760 = vmatmul.bf16.vlgmr.msra.gmra.mxu2 %v2850_v26  ;;  %770 = vmatmul.bf16.vlgmr.msra.gmra.mxu3 %v2852_v27 }
  0x9c   : > { %745 = vmatmul.bf16.gmra.mxu0 %v2847_v28  ;;  %755 = vmatmul.bf16.gmra.mxu1 %v2849_v29 }
  0x9d   : > { %765 = vmatmul.bf16.gmra.mxu2 %v2851_v30  ;;  %775 = vmatmul.bf16.gmra.mxu3 %v2853_v31 }
 0x109   : > { %v3807_v32 = vpop.f32.mrf.mxu0  ;;  %v3809_v33 = vpop.f32.mrf.mxu1 }
 0x110   : > { %v3811_v34 = vpop.f32.mrf.mxu2  ;;  %v3813_v35 = vpop.f32.mrf.mxu3 }
 0x111   : > { %v3815_v36 = vpop.f32.mrf.mxu0  ;;  %v3817_v37 = vpop.f32.mrf.mxu1 }
 0x118   : > { %v3819_v38 = vpop.f32.mrf.mxu2  ;;  %v3821_v39 = vpop.f32.mrf.mxu3 }
 0x119   : > { %v3823_v40 = vpop.f32.mrf.mxu0  ;;  %v3825_v41 = vpop.f32.mrf.mxu1 }
 0x120   : > { %v3827_v42 = vpop.f32.mrf.mxu2  ;;  %v3829_v43 = vpop.f32.mrf.mxu3 }
 0x121   : > { %v3831_v44 = vpop.f32.mrf.mxu0  ;;  %v3833_v45 = vpop.f32.mrf.mxu1 }
 0x124   : > { %784 = sbr.rel (%p2785_p4) target bundleno = 461 (0x1cd), region = 129 }
 0x128   : > { %v3835_v46 = vpop.f32.mrf.mxu2  ;;  %v3837_v47 = vpop.f32.mrf.mxu3 }
 0x129   : > { %v802_v48 = vld [vmem:[#allocation10] sm:$0xff]  ;;  %vm803_vm0 = vcmask 64512   ;;  %v796_v57 = vld [vmem:[%s3844_s17 + $0x50] sm:$0xff]  ;;  %v797_v61 = vld [vmem:[%s3844_s17 + $0x58] sm:$0xff] }
 0x12a   : > { %2888 = vmatpush.msra.mxu2 %v802_v48  ;;  %2889 = vmatpush.msra.mxu3 %v802_v48  ;;  %v794_v49 = vld [vmem:[%s3844_s17 + $0x40] sm:$0xff]  ;;  %v795_v53 = vld [vmem:[%s3844_s17 + $0x48] sm:$0xff]  ;;  %v800_v58 = vld [vmem:[%s3844_s17 + $0x70] sm:$0xff] }
 0x12b   : > { %v798_v50 = vld [vmem:[%s3844_s17 + $0x60] sm:$0xff]  ;;  %2794 = vmatmul.msk.f32.vlgmr.msra.gmra.mxu2 %vm803_vm0, %v794_v49  ;;  %867 = vmatpush.msra.mxu0 %v802_v48  ;;  %v799_v54 = vld [vmem:[%s3844_s17 + $0x68] sm:$0xff]  ;;  %v788_v59 = vld [vmem:[%s3844_s17 + $0x10] sm:$0xff] }
 0x12c   : > { %v786_v51 = vld [vmem:[%s3844_s17] sm:$0xff]  ;;  %2798 = vmatmul.msk.f32.vlgmr.msra.gmra.mxu3 %vm803_vm0, %v798_v50  ;;  %2887 = vmatpush.msra.mxu1 %v802_v48  ;;  %v787_v55 = vld [vmem:[%s3844_s17 + $0x8] sm:$0xff]  ;;  %v792_v60 = vld [vmem:[%s3844_s17 + $0x30] sm:$0xff] }
 0x12d   : > { %v790_v52 = vld [vmem:[%s3844_s17 + $0x20] sm:$0xff]  ;;  %2786 = vmatmul.msk.f32.vlgmr.msra.gmra.mxu0 %vm803_vm0, %v786_v51  ;;  %v791_v56 = vld [vmem:[%s3844_s17 + $0x28] sm:$0xff]  ;;  %v801_v62 = vld [vmem:[%s3844_s17 + $0x78] sm:$0xff] }
 0x12e   : > { %2790 = vmatmul.msk.f32.vlgmr.msra.gmra.mxu1 %vm803_vm0, %v790_v52  ;;  %v789_v63 = vld [vmem:[%s3844_s17 + $0x18] sm:$0xff]  ;;  %v3881_v1 = vld [vmem:[%s4911_s6] ss:$0 sm:$0xff] }
 0x12f   : > { %v793_v0 = vld [vmem:[%s3844_s17 + $0x38] sm:$0xff] }
 0x133   : > { %2795 = vmatmul.msk.f32.gmra.mxu2 %vm803_vm0, %v795_v53 }
 0x134   : > { %2799 = vmatmul.msk.f32.gmra.mxu3 %vm803_vm0, %v799_v54 }
 0x135   : > { %2787 = vmatmul.msk.f32.gmra.mxu0 %vm803_vm0, %v787_v55 }
 0x136   : > { %2791 = vmatmul.msk.f32.gmra.mxu1 %vm803_vm0, %v791_v56 }
 0x13b   : > { %2796 = vmatmul.msk.f32.gmra.mxu2 %vm803_vm0, %v796_v57 }
 0x13c   : > { %2800 = vmatmul.msk.f32.gmra.mxu3 %vm803_vm0, %v800_v58 }
 0x13d   : > { %2788 = vmatmul.msk.f32.gmra.mxu0 %vm803_vm0, %v788_v59 }
 0x13e   : > { %2792 = vmatmul.msk.f32.gmra.mxu1 %vm803_vm0, %v792_v60 }
 0x143   : > { %2797 = vmatmul.msk.f32.gmra.mxu2 %vm803_vm0, %v797_v61 }
 0x144   : > { %2801 = vmatmul.msk.f32.gmra.mxu3 %vm803_vm0, %v801_v62 }
 0x145   : > { %2789 = vmatmul.msk.f32.gmra.mxu0 %vm803_vm0, %v789_v63 }
 0x146   : > { %2793 = vmatmul.msk.f32.gmra.mxu1 %vm803_vm0, %v793_v0 }
 0x1aa   : > { %v869_v2 = vpop.f32.mrf.mxu0 }
 0x1ab   : > { %v881_v3 = vpop.f32.mrf.mxu1  ;;  %v917_v4 = vadd.f32 %v869_v2, %v3807_v32 }
 0x1ac   : > { %v921_v5 = vadd.f32 %v881_v3, %v3809_v33 }
 0x1ad   : > { %v935_v6 = vadd.f32 %v3881_v1, %v917_v4 }
 0x1ae   : > { %v939_v7 = vadd.f32 %v3881_v1, %v921_v5  ;;  %v893_v8 = vpop.f32.mrf.mxu2 }
 0x1af   : > { %v905_v9 = vpop.f32.mrf.mxu3  ;;  %952 = vst [vmem:[%s3888_s8] sm:$0xff] %v935_v6  ;;  %v925_v10 = vadd.f32 %v893_v8, %v3811_v34 }
 0x1b0   : > { %v929_v11 = vadd.f32 %v905_v9, %v3813_v35  ;;  %956 = vst [vmem:[%s3888_s8 + $0x20] sm:$0xff] %v939_v7 }
 0x1b1   : > { %v943_v12 = vadd.f32 %v3881_v1, %v925_v10 }
 0x1b2   : > { %v947_v13 = vadd.f32 %v3881_v1, %v929_v11  ;;  %v872_v14 = vpop.f32.mrf.mxu0 }
 0x1b3   : > { %v884_v15 = vpop.f32.mrf.mxu1  ;;  %960 = vst [vmem:[%s3888_s8 + $0x40] sm:$0xff] %v943_v12  ;;  %v918_v16 = vadd.f32 %v872_v14, %v3815_v36 }
 0x1b4   : > { %v922_v17 = vadd.f32 %v884_v15, %v3817_v37  ;;  %964 = vst [vmem:[%s3888_s8 + $0x60] sm:$0xff] %v947_v13 }
 0x1b5   : > { %v936_v18 = vadd.f32 %v3881_v1, %v918_v16 }
 0x1b6   : > { %v940_v19 = vadd.f32 %v3881_v1, %v922_v17  ;;  %v896_v20 = vpop.f32.mrf.mxu2 }
 0x1b7   : > { %v908_v21 = vpop.f32.mrf.mxu3  ;;  %953 = vst [vmem:[%s3888_s8 + $0x8] sm:$0xff] %v936_v18  ;;  %v926_v22 = vadd.f32 %v896_v20, %v3819_v38 }
 0x1b8   : > { %v930_v23 = vadd.f32 %v908_v21, %v3821_v39  ;;  %957 = vst [vmem:[%s3888_s8 + $0x28] sm:$0xff] %v940_v19 }
 0x1b9   : > { %v944_v24 = vadd.f32 %v3881_v1, %v926_v22 }
 0x1ba   : > { %v948_v25 = vadd.f32 %v3881_v1, %v930_v23  ;;  %v875_v26 = vpop.f32.mrf.mxu0 }
 0x1bb   : > { %v887_v27 = vpop.f32.mrf.mxu1  ;;  %961 = vst [vmem:[%s3888_s8 + $0x48] sm:$0xff] %v944_v24  ;;  %v919_v28 = vadd.f32 %v875_v26, %v3823_v40 }
 0x1bc   : > { %v923_v29 = vadd.f32 %v887_v27, %v3825_v41  ;;  %965 = vst [vmem:[%s3888_s8 + $0x68] sm:$0xff] %v948_v25 }
 0x1bd   : > { %v937_v30 = vadd.f32 %v3881_v1, %v919_v28 }
 0x1be   : > { %v941_v31 = vadd.f32 %v3881_v1, %v923_v29  ;;  %v899_v48 = vpop.f32.mrf.mxu2 }
 0x1bf   : > { %v911_v49 = vpop.f32.mrf.mxu3  ;;  %954 = vst [vmem:[%s3888_s8 + $0x10] sm:$0xff] %v937_v30  ;;  %v927_v50 = vadd.f32 %v899_v48, %v3827_v42 }
 0x1c0   : > { %v931_v51 = vadd.f32 %v911_v49, %v3829_v43  ;;  %958 = vst [vmem:[%s3888_s8 + $0x30] sm:$0xff] %v941_v31 }
 0x1c1   : > { %v945_v52 = vadd.f32 %v3881_v1, %v927_v50 }
 0x1c2   : > { %v949_v53 = vadd.f32 %v3881_v1, %v931_v51  ;;  %v878_v54 = vpop.f32.mrf.mxu0 }
 0x1c3   : > { %v890_v55 = vpop.f32.mrf.mxu1  ;;  %962 = vst [vmem:[%s3888_s8 + $0x50] sm:$0xff] %v945_v52  ;;  %v920_v56 = vadd.f32 %v878_v54, %v3831_v44 }
 0x1c4   : > { %v924_v57 = vadd.f32 %v890_v55, %v3833_v45  ;;  %966 = vst [vmem:[%s3888_s8 + $0x70] sm:$0xff] %v949_v53 }
 0x1c5   : > { %v938_v58 = vadd.f32 %v3881_v1, %v920_v56 }
 0x1c6   : > { %v942_v59 = vadd.f32 %v3881_v1, %v924_v57  ;;  %v902_v60 = vpop.f32.mrf.mxu2 }
 0x1c7   : > { %v914_v61 = vpop.f32.mrf.mxu3  ;;  %955 = vst [vmem:[%s3888_s8 + $0x18] sm:$0xff] %v938_v58  ;;  %v928_v62 = vadd.f32 %v902_v60, %v3835_v46 }
 0x1c8   : > { %v932_v63 = vadd.f32 %v914_v61, %v3837_v47  ;;  %959 = vst [vmem:[%s3888_s8 + $0x38] sm:$0xff] %v942_v59 }
 0x1c9   : > { %v946_v0 = vadd.f32 %v3881_v1, %v928_v62 }
 0x1ca   : > { %v950_v2 = vadd.f32 %v3881_v1, %v932_v63 }
 0x1cb   : > { %963 = vst [vmem:[%s3888_s8 + $0x58] sm:$0xff] %v946_v0 }
 0x1cc   : > { %967 = vst [vmem:[%s3888_s8 + $0x78] sm:$0xff] %v950_v2 }
 0x1cd PF: > { %s4912_s11 = sld [smem:[#allocation22_spill]] }
 0x1d3   : > { %p2802_p5 = scmp.eq.s32.totalorder %s4912_s11, 0 }
 0x1d4   : > { %s3936_s18 = scalar_lea.vmem (!%p2802_p5), [#allocation2], %s3789_s12 }
 0x1d5   : > { %971 = sbr.rel (%p2802_p5) target bundleno = 493 (0x1ed), region = 133 }
 0x1da   : > { %v973_v1 = vld [vmem:[%s3936_s18] sm:$0xff]  ;;  %v974_v3 = vld [vmem:[%s3936_s18 + $0x8] sm:$0xff]  ;;  %v975_v4 = vld [vmem:[%s3936_s18 + $0x10] sm:$0xff] }
 0x1db   : > { %v989_v5 = vadd.f32 %v973_v1, %v3807_v32  ;;  %v990_v6 = vadd.f32 %v974_v3, %v3815_v36  ;;  %v991_v7 = vadd.f32 %v975_v4, %v3823_v40  ;;  %v976_v8 = vld [vmem:[%s3936_s18 + $0x18] sm:$0xff]  ;;  %v977_v9 = vld [vmem:[%s3936_s18 + $0x20] sm:$0xff]  ;;  %v978_v10 = vld [vmem:[%s3936_s18 + $0x28] sm:$0xff] }
 0x1dc   : > { %v992_v11 = vadd.f32 %v976_v8, %v3831_v44  ;;  %v979_v12 = vld [vmem:[%s3936_s18 + $0x30] sm:$0xff]  ;;  %v993_v13 = vadd.f32 %v977_v9, %v3809_v33  ;;  %v980_v32 = vld [vmem:[%s3936_s18 + $0x38] sm:$0xff]  ;;  %v994_v36 = vadd.f32 %v978_v10, %v3817_v37  ;;  %v981_v40 = vld [vmem:[%s3936_s18 + $0x40] sm:$0xff] }
 0x1dd   : > { %1005 = vst [vmem:[%s3936_s18] sm:$0xff] %v989_v5  ;;  %v995_v14 = vadd.f32 %v979_v12, %v3825_v41  ;;  %v982_v44 = vld [vmem:[%s3936_s18 + $0x48] sm:$0xff]  ;;  %v996_v15 = vadd.f32 %v980_v32, %v3833_v45  ;;  %v983_v33 = vld [vmem:[%s3936_s18 + $0x50] sm:$0xff]  ;;  %v997_v16 = vadd.f32 %v981_v40, %v3811_v34  ;;  %v984_v37 = vld [vmem:[%s3936_s18 + $0x58] sm:$0xff] }
 0x1de   : > { %1006 = vst [vmem:[%s3936_s18 + $0x8] sm:$0xff] %v990_v6  ;;  %v998_v17 = vadd.f32 %v982_v44, %v3819_v38  ;;  %v985_v18 = vld [vmem:[%s3936_s18 + $0x60] sm:$0xff]  ;;  %v999_v41 = vadd.f32 %v983_v33, %v3827_v42  ;;  %v986_v45 = vld [vmem:[%s3936_s18 + $0x68] sm:$0xff]  ;;  %v1000_v19 = vadd.f32 %v984_v37, %v3835_v46  ;;  %v987_v20 = vld [vmem:[%s3936_s18 + $0x70] sm:$0xff] }
 0x1df   : > { %1007 = vst [vmem:[%s3936_s18 + $0x10] sm:$0xff] %v991_v7  ;;  %v1001_v34 = vadd.f32 %v985_v18, %v3813_v35  ;;  %v988_v21 = vld [vmem:[%s3936_s18 + $0x78] sm:$0xff]  ;;  %v1002_v38 = vadd.f32 %v986_v45, %v3821_v39  ;;  %v1003_v22 = vadd.f32 %v987_v20, %v3829_v43 }
 0x1e0   : > { %1008 = vst [vmem:[%s3936_s18 + $0x18] sm:$0xff] %v992_v11  ;;  %v1004_v42 = vadd.f32 %v988_v21, %v3837_v47 }
 0x1e1   : > { %1009 = vst [vmem:[%s3936_s18 + $0x20] sm:$0xff] %v993_v13 }
 0x1e2   : > { %1010 = vst [vmem:[%s3936_s18 + $0x28] sm:$0xff] %v994_v36 }
 0x1e3   : > { %1011 = vst [vmem:[%s3936_s18 + $0x30] sm:$0xff] %v995_v14 }
 0x1e4   : > { %1012 = vst [vmem:[%s3936_s18 + $0x38] sm:$0xff] %v996_v15 }
 0x1e5   : > { %1013 = vst [vmem:[%s3936_s18 + $0x40] sm:$0xff] %v997_v16 }
 0x1e6   : > { %1014 = vst [vmem:[%s3936_s18 + $0x48] sm:$0xff] %v998_v17 }
 0x1e7   : > { %1015 = vst [vmem:[%s3936_s18 + $0x50] sm:$0xff] %v999_v41 }
 0x1e8   : > { %1016 = vst [vmem:[%s3936_s18 + $0x58] sm:$0xff] %v1000_v19 }
 0x1e9   : > { %1017 = vst [vmem:[%s3936_s18 + $0x60] sm:$0xff] %v1001_v34 }
 0x1ea   : > { %1018 = vst [vmem:[%s3936_s18 + $0x68] sm:$0xff] %v1002_v38 }
 0x1eb   : > { %1019 = vst [vmem:[%s3936_s18 + $0x70] sm:$0xff] %v1003_v22 }
 0x1ec   : > { %1020 = vst [vmem:[%s3936_s18 + $0x78] sm:$0xff] %v1004_v42 }
 0x1ed PF: > { %s4913_s22 = sld [smem:[#allocation22_spill]] }
 0x1ee   : > { %s4914_s23 = sld [smem:[#allocation21_spill]] }
 0x1f3   : > { %p1021_p6 = scmp.eq.s32.totalorder %s4913_s22, 1 }
 0x1f4   : > { %p1022_p7 = scmp.eq.s32.totalorder %s4914_s23, 0 }
 0x1f6   : > { %p1023_p8 = pnand %p1022_p7, %p1021_p6 }
 0x1f8   : > { %1026 = sbr.rel (%p1023_p8) target bundleno = 511 (0x1ff), region = 137 }
 0x1fd   : > { %v3535_v35 = vmov 0.0  }
 0x1fe   : > { %1027 = vst [vmem:[#allocation3] sm:$0x3] %v3535_v35 }
 0x1ff PF: > { %s4915_s2 = sld [smem:[#allocation22_spill]] }
 0x205   : > { %p2803_p9 = scmp.ne.s32.totalorder %s4915_s2, 1 }
 0x206   : > { %s3992_s15 = scalar_lea.vmem (!%p2803_p9), [#allocation2], %s3789_s12 }
 0x207   : > { %1030 = sbr.rel (%p2803_p9) target bundleno = 572 (0x23c), region = 141 }
 0x20c   : > { %v1032_v39 = vld [vmem:[%s3992_s15] sm:$0xff]  ;;  %v1033_v43 = vld [vmem:[%s3992_s15 + $0x8] sm:$0xff]  ;;  %v1034_v46 = vld [vmem:[%s3992_s15 + $0x10] sm:$0xff] }
 0x20d   : > { %v1035_v47 = vld [vmem:[%s3992_s15 + $0x18] sm:$0xff]  ;;  %v1049_v23 = vadd.f32 %v1033_v43, %v1032_v39  ;;  %v1073_v24 = vmul.f32 %v1032_v39, %v1032_v39  ;;  %v1074_v25 = vmul.f32 %v1033_v43, %v1033_v43  ;;  %v1075_v26 = vmul.f32 %v1034_v46, %v1034_v46  ;;  %v1036_v27 = vld [vmem:[%s3992_s15 + $0x20] sm:$0xff]  ;;  %v1037_v31 = vld [vmem:[%s3992_s15 + $0x28] sm:$0xff] }
 0x20e   : > { %v1076_v29 = vmul.f32 %v1035_v47, %v1035_v47  ;;  %v1077_v49 = vmul.f32 %v1036_v27, %v1036_v27  ;;  %v1038_v51 = vld [vmem:[%s3992_s15 + $0x30] sm:$0xff]  ;;  %v1078_v53 = vmul.f32 %v1037_v31, %v1037_v31  ;;  %v1039_v55 = vld [vmem:[%s3992_s15 + $0x38] sm:$0xff]  ;;  %v1040_v59 = vld [vmem:[%s3992_s15 + $0x40] sm:$0xff] }
 0x20f   : > { %v1050_v28 = vadd.f32 %v1049_v23, %v1034_v46  ;;  %v1089_v30 = vadd.f32 %v1074_v25, %v1073_v24  ;;  %v1079_v57 = vmul.f32 %v1038_v51, %v1038_v51  ;;  %v1080_v61 = vmul.f32 %v1039_v55, %v1039_v55  ;;  %v1041_v63 = vld [vmem:[%s3992_s15 + $0x48] sm:$0xff]  ;;  %v1042_v3 = vld [vmem:[%s3992_s15 + $0x50] sm:$0xff]  ;;  %v1043_v7 = vld [vmem:[%s3992_s15 + $0x58] sm:$0xff] }
 0x210   : > { %v1081_v2 = vmul.f32 %v1040_v59, %v1040_v59  ;;  %v1082_v5 = vmul.f32 %v1041_v63, %v1041_v63  ;;  %v1083_v9 = vmul.f32 %v1042_v3, %v1042_v3  ;;  %v1044_v11 = vld [vmem:[%s3992_s15 + $0x60] sm:$0xff]  ;;  %v1084_v13 = vmul.f32 %v1043_v7, %v1043_v7  ;;  %v1045_v36 = vld [vmem:[%s3992_s15 + $0x68] sm:$0xff]  ;;  %v1046_v15 = vld [vmem:[%s3992_s15 + $0x70] sm:$0xff] }
 0x211   : > { %v1051_v48 = vadd.f32 %v1050_v28, %v1035_v47  ;;  %v1090_v50 = vadd.f32 %v1089_v30, %v1075_v26  ;;  %v1085_v14 = vmul.f32 %v1044_v11, %v1044_v11  ;;  %v1086_v16 = vmul.f32 %v1045_v36, %v1045_v36  ;;  %v1047_v17 = vld [vmem:[%s3992_s15 + $0x78] sm:$0xff]  ;;  %v1048_v25 = vld [vmem:[#allocation3] sm:$0x1]  ;;  %v1072_v30 = vld [vmem:[#allocation3 + $0x1] sm:$0x1] }
 0x212   : > { %v1087_v41 = vmul.f32 %v1046_v15, %v1046_v15  ;;  %v1088_v20 = vmul.f32 %v1047_v17, %v1047_v17 }
 0x213   : > { %v1052_v52 = vadd.f32 %v1051_v48, %v1036_v27  ;;  %v1091_v54 = vadd.f32 %v1090_v50, %v1076_v29 }
 0x215   : > { %v1053_v56 = vadd.f32 %v1052_v52, %v1037_v31  ;;  %v1092_v58 = vadd.f32 %v1091_v54, %v1077_v49 }
 0x217   : > { %v1054_v60 = vadd.f32 %v1053_v56, %v1038_v51  ;;  %v1093_v62 = vadd.f32 %v1092_v58, %v1078_v53 }
 0x219   : > { %v1055_v0 = vadd.f32 %v1054_v60, %v1039_v55  ;;  %v1094_v1 = vadd.f32 %v1093_v62, %v1079_v57 }
 0x21b   : > { %v1056_v4 = vadd.f32 %v1055_v0, %v1040_v59  ;;  %v1095_v6 = vadd.f32 %v1094_v1, %v1080_v61 }
 0x21d   : > { %v1057_v8 = vadd.f32 %v1056_v4, %v1041_v63  ;;  %v1096_v10 = vadd.f32 %v1095_v6, %v1081_v2 }
 0x21f   : > { %v1058_v12 = vadd.f32 %v1057_v8, %v1042_v3  ;;  %v1097_v32 = vadd.f32 %v1096_v10, %v1082_v5 }
 0x221   : > { %v1059_v40 = vadd.f32 %v1058_v12, %v1043_v7  ;;  %v1098_v44 = vadd.f32 %v1097_v32, %v1083_v9 }
 0x223   : > { %v1060_v33 = vadd.f32 %v1059_v40, %v1044_v11  ;;  %v1099_v37 = vadd.f32 %v1098_v44, %v1084_v13 }
 0x225   : > { %v1061_v18 = vadd.f32 %v1060_v33, %v1045_v36  ;;  %v1100_v45 = vadd.f32 %v1099_v37, %v1085_v14 }
 0x227   : > { %v1062_v19 = vadd.f32 %v1061_v18, %v1046_v15  ;;  %v1101_v34 = vadd.f32 %v1100_v45, %v1086_v16 }
 0x229   : > { %v1063_v21 = vadd.f32 %v1062_v19, %v1047_v17  ;;  %v1102_v38 = vadd.f32 %v1101_v34, %v1087_v41 }
 0x22b   : > { %v1064_v22 = vrot.slane %v1063_v21, 4  ;;  %v1103_v42 = vadd.f32 %v1102_v38, %v1088_v20 }
 0x22d   : > { %v1065_v35 = vadd.f32 %v1064_v22, %v1063_v21  ;;  %v1104_v39 = vrot.slane %v1103_v42, 4 }
 0x22f   : > { %v1066_v43 = vrot.slane %v1065_v35, 2  ;;  %v1105_v46 = vadd.f32 %v1104_v39, %v1103_v42 }
 0x231   : > { %v1067_v47 = vadd.f32 %v1066_v43, %v1065_v35  ;;  %v1106_v23 = vrot.slane %v1105_v46, 2 }
 0x233   : > { %v1068_v24 = vrot.slane %v1067_v47, 1  ;;  %v1107_v26 = vadd.f32 %v1106_v23, %v1105_v46 }
 0x235   : > { %v1069_v27 = vadd.f32 %v1068_v24, %v1067_v47  ;;  %v1108_v28 = vrot.slane %v1107_v26, 1 }
 0x237   : > { %v1070_v29 = vadd.f32 %v1069_v27, %v1048_v25  ;;  %v1109_v31 = vadd.f32 %v1108_v28, %v1107_v26 }
 0x239   : > { %1071 = vst [vmem:[#allocation3] sm:$0x1] %v1070_v29  ;;  %v1110_v48 = vadd.f32 %v1109_v31, %v1072_v30 }
 0x23b   : > { %1111 = vst [vmem:[#allocation3 + $0x1] sm:$0x1] %v1110_v48 }
 0x23c PF: > { %s4916_s14 = sld [smem:[#allocation21_spill]] }
 0x242   : > { %p1112_p10 = scmp.eq.s32.totalorder %s4916_s14, 1 }
 0x244   : > { %p1113_p11 = pnand %p1112_p10, %p1021_p6 }
 0x245   : > { %s4918_s20 = sld [smem:[#allocation32_spill]] (!%p1113_p11)  ;;  %s4029_s10 = smov (!%p1113_p11), 0  }
 0x246   : > { %1116 = sbr.rel (%p1113_p11) target bundleno = 1440 (0x5a0), region = 145  ;;  %s4919_s16 = sld [smem:[#allocation33_spill]] (!%p1113_p11) }
 0x24b   : > { %v1117_v49 = vld [vmem:[#allocation3] sm:$0x1]  ;;  %v1119_v50 = vld [vmem:[#allocation3 + $0x1] sm:$0x1]  ;;  %v3536_v53 = vmov 0.0  }
 0x24c   : > { %v1118_v51 = vmul.f32 0.00390625, %v1117_v49  ;;  %v1120_v52 = vmul.f32 0.00390625, %v1119_v50  ;;  %1140 = vst [vmem:[#allocation3] sm:$0x3] %v3536_v53  ;;  %v1124_v63 = vld [vmem:[%s4918_s20] sm:$0x1] }
 0x24d   : > { %v4022_v3 = vld [vmem:[%s4919_s16] sm:$0x1] }
 0x24e   : > { %v1121_v54 = vmul.f32 %v1118_v51, %v1118_v51 }
 0x250   : > { %v1122_v55 = vsub.f32 %v1120_v52, %v1121_v54 }
 0x252   : > { %v1123_v56 = vmax.f32 %v1122_v55, 0.0 }
 0x254   : > { %v1125_v57 = vadd.f32 0.001, %v1123_v56 }
 0x256   : > { %3153 = vrsqrt.f32 %v1125_v57  ;;  %vm1132_vm1 = vweird.f32 %v1125_v57 }
 0x25c   : > { %v3154_v58 = vpop.eup %3153 }
 0x25d   : > { %v1127_v59 = vmul.f32 %v3154_v58, %v1125_v57  ;;  %vm1133_vm2 = vweird.f32 %v3154_v58 }
 0x25e   : > { %vm1134_vm3 = vmor %vm1132_vm1, %vm1133_vm2 }
 0x25f   : > { %v1128_v60 = vmul.f32 %v3154_v58, %v1127_v59 }
 0x261   : > { %v1129_v61 = vmul.f32 0.5, %v1128_v60 }
 0x263   : > { %v1130_v62 = vsub.f32 1.5, %v1129_v61 }
 0x265   : > { %v1131_v0 = vmul.f32 %v3154_v58, %v1130_v62 }
 0x267   : > { %v1135_v2 = vsel %vm1134_vm3, %v3154_v58, %v1131_v0 }
 0x268   : > { %v4017_v1 = vmul.f32 %v1135_v2, %v1124_v63 }
 0x26a   : > { %v4025_v4 = vmul.f32 %v4017_v1, %v1118_v51 }
 0x26c   : > { %v1139_v5 = vsub.f32 %v4022_v3, %v4025_v4 }
 0x26d LB: >> { %v1247_v6 = vld [vmem:[#allocation11 + $0x78] sm:$0xff]  ;;  %v1246_v7 = vld [vmem:[#allocation11 + $0x70] sm:$0xff]  ;;  %s2804_s29 = sshll.u32 %s3515_s10, 7  ;;  %vm1250_vm4 = vcmask 64512   ;;  %s4920_s5 = sld [smem:[#allocation28_spill]]  ;;  %v1245_v9 = vld [vmem:[#allocation11 + $0x68] sm:$0xff]  ;;  %s3515_s10 = sphi %s4029_s10, %s1146_s10  }
 0x26e   : >> { %v1249_v8 = vld [vmem:[#allocation10 + $0x8] sm:$0xff]  ;;  %1364 = vmatpush.msra.mxu1 %v1247_v6  ;;  %2891 = vmatpush.msra.mxu2 %v1247_v6  ;;  %v1244_v12 = vld [vmem:[#allocation11 + $0x60] sm:$0xff]  ;;  %v1243_v13 = vld [vmem:[#allocation11 + $0x58] sm:$0xff]  ;;  %v4052_v37 = vperm.slane %v4017_v1, 0  ;;  %s4057_s8 = scalar_lea.vmem [#allocation2], %s2804_s29  ;;  %v4067_v34 = vperm.slane %v1139_v5, 0 }
 0x26f   : >> { %1314 = vmatpush.msra.mxu0 %v1249_v8  ;;  %2890 = vmatpush.msra.mxu3 %v1249_v8  ;;  %v1242_v32 = vld [vmem:[#allocation11 + $0x50] sm:$0xff]  ;;  %v1241_v14 = vld [vmem:[#allocation11 + $0x48] sm:$0xff]  ;;  %v1240_v44 = vld [vmem:[#allocation11 + $0x40] sm:$0xff]  ;;  %s4921_s22 = sld [smem:[#allocation31_spill]]  ;;  %s1146_s10 = sadd.s32 1, %s3515_s10  }
 0x270   : >> { %1365 = vmatpush.msra.mxu1 %v1246_v7  ;;  %2893 = vmatpush.msra.mxu2 %v1246_v7  ;;  %v1239_v15 = vld [vmem:[#allocation11 + $0x38] sm:$0xff]  ;;  %v1238_v33 = vld [vmem:[#allocation11 + $0x30] sm:$0xff]  ;;  %v1149_v18 = vld [vmem:[%s4057_s8] sm:$0xff]  ;;  %p1143_p12 = scmp.ge.s32.totalorder %s1146_s10, 2  }
 0x271   : >> { %2892 = vmatpush.msrb.mxu3 %v1247_v6  ;;  %v1155_v41 = vld [vmem:[%s4057_s8 + $0x30] sm:$0xff]  ;;  %v1237_v45 = vld [vmem:[#allocation11 + $0x28] sm:$0xff]  ;;  %v1236_v19 = vld [vmem:[#allocation11 + $0x20] sm:$0xff]  ;;  %v1166_v20 = vmul.f32 %v4052_v37, %v1149_v18  ;;  %s4922_s15 = sld [smem:[#allocation32_spill]] (%p1143_p12)  ;;  %s4211_s7 = smov (%p1143_p12), 0  }
 0x272   : >> { %1366 = vmatpush.msra.mxu1 %v1245_v9  ;;  %2895 = vmatpush.msra.mxu2 %v1245_v9  ;;  %v1172_v21 = vmul.f32 %v4052_v37, %v1155_v41  ;;  %v1235_v38 = vld [vmem:[#allocation11 + $0x18] sm:$0xff]  ;;  %v1234_v22 = vld [vmem:[#allocation11 + $0x10] sm:$0xff]  ;;  %v1233_v23 = vld [vmem:[#allocation11 + $0x8] sm:$0xff]  ;;  %s4923_s13 = sld [smem:[#allocation33_spill]] (%p1143_p12) }
 0x273   : >> { %s4040_s6 = scalar_lea.vmem %s4920_s5, %s2804_s29  ;;  %2894 = vmatpush.msrb.mxu3 %v1246_v7  ;;  %v1183_v35 = vadd.f32 %v4067_v34, %v1166_v20  ;;  %v1150_v46 = vld [vmem:[%s4057_s8 + $0x8] sm:$0xff]  ;;  %v1156_v47 = vld [vmem:[%s4057_s8 + $0x38] sm:$0xff]  ;;  %v1151_v31 = vld [vmem:[%s4057_s8 + $0x10] sm:$0xff] }
 0x274   : >> { %v1216_v10 = vld [vmem:[%s4040_s6] sm:$0xff]  ;;  %v1226_v11 = vld [vmem:[%s4040_s6 + $0x50] sm:$0xff]  ;;  %1367 = vmatpush.msra.mxu1 %v1244_v12  ;;  %2897 = vmatpush.msra.mxu2 %v1244_v12  ;;  %v1217_v36 = vld [vmem:[%s4040_s6 + $0x8] sm:$0xff]  ;;  %v1189_v39 = vadd.f32 %v4067_v34, %v1172_v21  ;;  %v1167_v27 = vmul.f32 %v4052_v37, %v1150_v46  ;;  %v1173_v28 = vmul.f32 %v4052_v37, %v1156_v47 }
 0x275   : >> { %2805 = vmatmul.msk.f32.vlgmr.msra.gmra.mxu0 %vm1250_vm4, %v1216_v10  ;;  %2815 = vmatmul.msk.f32.vlgmr.msra.gmra.mxu3 %vm1250_vm4, %v1226_v11  ;;  %v1227_v40 = vld [vmem:[%s4040_s6 + $0x58] sm:$0xff]  ;;  %v1218_v16 = vld [vmem:[%s4040_s6 + $0x10] sm:$0xff]  ;;  %v1228_v17 = vld [vmem:[%s4040_s6 + $0x60] sm:$0xff]  ;;  %v1199_v25 = vmax.f32 %v1183_v35, 0.0  ;;  %v1168_v51 = vmul.f32 %v4052_v37, %v1151_v31 }
 0x276   : >> { %2896 = vmatpush.msrb.mxu3 %v1245_v9  ;;  %1368 = vmatpush.msra.mxu1 %v1243_v13  ;;  %v1219_v42 = vld [vmem:[%s4040_s6 + $0x18] sm:$0xff]  ;;  %v1229_v43 = vld [vmem:[%s4040_s6 + $0x68] sm:$0xff]  ;;  %v1205_v26 = vmax.f32 %v1189_v39, 0.0  ;;  %v1184_v29 = vadd.f32 %v4067_v34, %v1167_v27  ;;  %v1190_v30 = vadd.f32 %v4067_v34, %v1173_v28  ;;  %v1220_v48 = vld [vmem:[%s4040_s6 + $0x20] sm:$0xff] }
 0x277   : >> { %2899 = vmatpush.msra.mxu2 %v1243_v13  ;;  %v1232_v24 = vld [vmem:[#allocation11] sm:$0xff]  ;;  %v1230_v49 = vld [vmem:[%s4040_s6 + $0x70] sm:$0xff]  ;;  %v1162_v56 = vld [vmem:[%s4057_s8 + $0x68] sm:$0xff]  ;;  %v1185_v57 = vadd.f32 %v4067_v34, %v1168_v51 }
 0x278   : >> { %2898 = vmatpush.msrb.mxu3 %v1244_v12  ;;  %1369 = vmatpush.msra.mxu1 %v1242_v32  ;;  %v1157_v50 = vld [vmem:[%s4057_s8 + $0x40] sm:$0xff]  ;;  %v1200_v52 = vmax.f32 %v1184_v29, 0.0  ;;  %v1206_v54 = vmax.f32 %v1190_v30, 0.0  ;;  %v1221_v58 = vld [vmem:[%s4040_s6 + $0x28] sm:$0xff]  ;;  %v1179_v60 = vmul.f32 %v4052_v37, %v1162_v56  ;;  %v1231_v61 = vld [vmem:[%s4040_s6 + $0x78] sm:$0xff] }
 0x279   : >> { %2901 = vmatpush.msra.mxu2 %v1242_v32  ;;  %v1174_v55 = vmul.f32 %v4052_v37, %v1157_v50  ;;  %v1152_v62 = vld [vmem:[%s4057_s8 + $0x18] sm:$0xff]  ;;  %v1158_v63 = vld [vmem:[%s4057_s8 + $0x48] sm:$0xff]  ;;  %v1201_v0 = vmax.f32 %v1185_v57, 0.0  ;;  %v1163_v9 = vld [vmem:[%s4057_s8 + $0x70] sm:$0xff] }
 0x27a   : >> { %1370 = vmatpush.msra.mxu1 %v1241_v14  ;;  %2900 = vmatpush.msrb.mxu3 %v1243_v13  ;;  %v1196_v6 = vadd.f32 %v4067_v34, %v1179_v60  ;;  %v1169_v7 = vmul.f32 %v4052_v37, %v1152_v62  ;;  %v1175_v8 = vmul.f32 %v4052_v37, %v1158_v63  ;;  %v1223_v20 = vld [vmem:[%s4040_s6 + $0x38] sm:$0xff]  ;;  %v1154_v21 = vld [vmem:[%s4057_s8 + $0x28] sm:$0xff]  ;;  %v1534_v1 = vld [vmem:[%s4922_s15 + $0x1] sm:$0x1] (%p1143_p12) }
 0x27b   : >> { %2903 = vmatpush.msra.mxu2 %v1241_v14  ;;  %v1191_v59 = vadd.f32 %v4067_v34, %v1174_v55  ;;  %v1180_v13 = vmul.f32 %v4052_v37, %v1163_v9  ;;  %v1171_v39 = vmul.f32 %v4052_v37, %v1154_v21  ;;  %v1225_v30 = vld [vmem:[%s4040_s6 + $0x48] sm:$0xff]  ;;  %v4204_v5 = vld [vmem:[%s4923_s13 + $0x1] sm:$0x1] (%p1143_p12) }
 0x27c   : >> { %1371 = vmatpush.msra.mxu1 %v1240_v44  ;;  %2902 = vmatpush.msrb.mxu3 %v1242_v32  ;;  %v1212_v10 = vmax.f32 %v1196_v6, 0.0  ;;  %v1186_v11 = vadd.f32 %v4067_v34, %v1169_v7  ;;  %v1192_v12 = vadd.f32 %v4067_v34, %v1175_v8  ;;  %v1153_v32 = vld [vmem:[%s4057_s8 + $0x20] sm:$0xff] }
 0x27d   : >> { %2806 = vmatmul.msk.f32.gmra.mxu0 %vm1250_vm4, %v1217_v36  ;;  %2816 = vmatmul.msk.f32.gmra.mxu3 %vm1250_vm4, %v1227_v40  ;;  %v1207_v2 = vmax.f32 %v1191_v59, 0.0  ;;  %v1222_v36 = vld [vmem:[%s4040_s6 + $0x30] sm:$0xff]  ;;  %v1188_v47 = vadd.f32 %v4067_v34, %v1171_v39 }
 0x27e   : >> { %2905 = vmatpush.msra.mxu2 %v1240_v44  ;;  %1372 = vmatpush.msra.mxu1 %v1239_v15  ;;  %v1159_v40 = vld [vmem:[%s4057_s8 + $0x50] sm:$0xff] }
 0x27f   : >> { %2904 = vmatpush.msrb.mxu3 %v1241_v14  ;;  %v1170_v14 = vmul.f32 %v4052_v37, %v1153_v32 }
 0x280   : >> { %2907 = vmatpush.msra.mxu2 %v1239_v15  ;;  %1373 = vmatpush.msra.mxu1 %v1238_v33 }
 0x281   : >> { %2906 = vmatpush.msrb.mxu3 %v1240_v44  ;;  %v1202_v44 = vmax.f32 %v1186_v11, 0.0  ;;  %v1187_v18 = vadd.f32 %v4067_v34, %v1170_v14 }
 0x282   : >> { %2909 = vmatpush.msra.mxu2 %v1238_v33  ;;  %1374 = vmatpush.msra.mxu1 %v1237_v45 }
 0x283   : >> { %2908 = vmatpush.msrb.mxu3 %v1239_v15  ;;  %v1208_v15 = vmax.f32 %v1192_v12, 0.0 }
 0x284   : >> { %2911 = vmatpush.msra.mxu2 %v1237_v45  ;;  %1375 = vmatpush.msra.mxu1 %v1236_v19 }
 0x285   : >> { %2807 = vmatmul.msk.f32.gmra.mxu0 %vm1250_vm4, %v1218_v16  ;;  %2817 = vmatmul.msk.f32.gmra.mxu3 %vm1250_vm4, %v1228_v17  ;;  %v1176_v16 = vmul.f32 %v4052_v37, %v1159_v40  ;;  %v1164_v17 = vld [vmem:[%s4057_s8 + $0x78] sm:$0xff] }
 0x286   : >> { %2913 = vmatpush.msra.mxu2 %v1236_v19  ;;  %1376 = vmatpush.msra.mxu1 %v1235_v38 }
 0x287   : >> { %2910 = vmatpush.msrb.mxu3 %v1238_v33  ;;  %v1197_v33 = vadd.f32 %v4067_v34, %v1180_v13 }
 0x288   : >> { %2915 = vmatpush.msra.mxu2 %v1235_v38  ;;  %1377 = vmatpush.msra.mxu1 %v1234_v22 }
 0x289   : >> { %2912 = vmatpush.msrb.mxu3 %v1237_v45  ;;  %v1213_v41 = vmax.f32 %v1197_v33, 0.0  ;;  %v1193_v45 = vadd.f32 %v4067_v34, %v1176_v16 }
 0x28a   : >> { %2917 = vmatpush.msra.mxu2 %v1234_v22  ;;  %1378 = vmatpush.msra.mxu1 %v1233_v23 }
 0x28b   : >> { %2914 = vmatpush.msrb.mxu3 %v1236_v19  ;;  %v1181_v19 = vmul.f32 %v4052_v37, %v1164_v17 }
 0x28c   : >> { %2919 = vmatpush.msra.mxu2 %v1233_v23  ;;  %1379 = vmatpush.msra.mxu1 %v1232_v24 }
 0x28d   : >> { %2808 = vmatmul.msk.f32.gmra.mxu0 %vm1250_vm4, %v1219_v42  ;;  %2818 = vmatmul.msk.f32.gmra.mxu3 %vm1250_vm4, %v1229_v43  ;;  %v1209_v42 = vmax.f32 %v1193_v45, 0.0  ;;  %v1198_v35 = vadd.f32 %v4067_v34, %v1181_v19 }
 0x28e   : >> { %2921 = vmatpush.msra.mxu2 %v1232_v24  ;;  %1380 = vmatmul.f32.vlgmr.msra.gmra.mxu1 %v1199_v25  ;;  %v1161_v25 = vld [vmem:[%s4057_s8 + $0x60] sm:$0xff] }
 0x28f   : >> { %1398 = vmatmul.f32.vlgmr.msra.gmra.mxu2 %v1205_v26  ;;  %2916 = vmatpush.msrb.mxu3 %v1235_v38  ;;  %v1160_v38 = vld [vmem:[%s4057_s8 + $0x58] sm:$0xff]  ;;  %v1214_v46 = vmax.f32 %v1198_v35, 0.0  ;;  %v1204_v26 = vmax.f32 %v1188_v47, 0.0  ;;  %v1178_v28 = vmul.f32 %v4052_v37, %v1161_v25 }
 0x290   : >> { %v1177_v43 = vmul.f32 %v4052_v37, %v1160_v38 }
 0x291   : >> { %2918 = vmatpush.msrb.mxu3 %v1234_v22  ;;  %v1203_v22 = vmax.f32 %v1187_v18, 0.0  ;;  %v1195_v29 = vadd.f32 %v4067_v34, %v1178_v28 }
 0x293   : >> { %2920 = vmatpush.msrb.mxu3 %v1233_v23  ;;  %v1194_v23 = vadd.f32 %v4067_v34, %v1177_v43  ;;  %v1211_v31 = vmax.f32 %v1195_v29, 0.0  ;;  %v4143_v34 = vld [vmem:[%s4921_s22 + $0x1] ss:$0 sm:$0xff] }
 0x295   : >> { %2809 = vmatmul.msk.f32.gmra.mxu0 %vm1250_vm4, %v1220_v48  ;;  %2819 = vmatmul.msk.f32.gmra.mxu3 %vm1250_vm4, %v1230_v49  ;;  %v1210_v27 = vmax.f32 %v1194_v23, 0.0 }
 0x296   : >> { %1383 = vmatmul.f32.gmra.mxu1 %v1200_v52  ;;  %2922 = vmatpush.msrb.mxu3 %v1232_v24  ;;  %v1224_v24 = vld [vmem:[%s4040_s6 + $0x40] sm:$0xff] }
 0x297   : >> { %1401 = vmatmul.f32.gmra.mxu2 %v1206_v54 }
 0x29d   : >> { %2810 = vmatmul.msk.f32.gmra.mxu0 %vm1250_vm4, %v1221_v58  ;;  %2820 = vmatmul.msk.f32.gmra.mxu3 %vm1250_vm4, %v1231_v61 }
 0x29e   : >> { %1386 = vmatmul.f32.gmra.mxu1 %v1201_v0 }
 0x29f   : >> { %1404 = vmatmul.f32.gmra.mxu2 %v1207_v2 }
 0x2a5   : >> { %2811 = vmatmul.msk.f32.gmra.mxu0 %vm1250_vm4, %v1222_v36  ;;  %1419 = vmatmul.f32.vlgmr.msrb.gmra.mxu3 %v1212_v10 }
 0x2a6   : >> { %1389 = vmatmul.f32.gmra.mxu1 %v1202_v44 }
 0x2a7   : >> { %1407 = vmatmul.f32.gmra.mxu2 %v1208_v15 }
 0x2ad   : >> { %2812 = vmatmul.msk.f32.gmra.mxu0 %vm1250_vm4, %v1223_v20  ;;  %1422 = vmatmul.f32.gmra.mxu3 %v1213_v41 }
 0x2ae   : >> { %1392 = vmatmul.f32.gmra.mxu1 %v1203_v22 }
 0x2af   : >> { %1410 = vmatmul.f32.gmra.mxu2 %v1209_v42 }
 0x2b5   : >> { %2813 = vmatmul.msk.f32.gmra.mxu0 %vm1250_vm4, %v1224_v24  ;;  %1425 = vmatmul.f32.gmra.mxu3 %v1214_v46 }
 0x2b6   : >> { %1395 = vmatmul.f32.gmra.mxu1 %v1204_v26 }
 0x2b7   : >> { %1413 = vmatmul.f32.gmra.mxu2 %v1210_v27 }
 0x2bd   : >> { %2814 = vmatmul.msk.f32.gmra.mxu0 %vm1250_vm4, %v1225_v30 }
 0x2bf   : >> { %1416 = vmatmul.f32.gmra.mxu2 %v1211_v31 }
 0x2f2   : >> { %v1316_v48 = vpop.f32.mrf.mxu0 }
 0x2f8   : >> { %v4134_v49 = vpop.f32.mrf.mxu3 }
 0x2fa   : >> { %v1319_v50 = vpop.f32.mrf.mxu0 }
 0x300   : >> { %v4136_v51 = vpop.f32.mrf.mxu3 }
 0x302   : >> { %v1322_v52 = vpop.f32.mrf.mxu0 }
 0x308   : >> { %v4138_v54 = vpop.f32.mrf.mxu3 }
 0x30a   : >> { %v1325_v37 = vpop.f32.mrf.mxu0 }
 0x30b   : >> { %v1381_v55 = vpop.f32.mrf.mxu1 }
 0x30c   : >> { %v1382_v56 = vadd.f32 %v1381_v55, %v1316_v48 }
 0x30e   : >> { %v1431_v58 = vadd.f32 %v4143_v34, %v1382_v56 }
 0x310   : >> { %v1355_v57 = vpop.f32.mrf.mxu3  ;;  %1447 = vst [vmem:[%s4057_s8] sm:$0xff] %v1431_v58  ;;  %v1488_v42 = vmul.f32 %v1431_v58, %v1431_v58 }
 0x312   : >> { %v1328_v59 = vpop.f32.mrf.mxu0  ;;  %v1399_v60 = vpop.f32.mrf.mxu2 }
 0x313   : >> { %v1384_v61 = vpop.f32.mrf.mxu1 }
 0x314   : >> { %v1385_v62 = vadd.f32 %v1384_v61, %v1319_v50 }
 0x316   : >> { %v1432_v0 = vadd.f32 %v4143_v34, %v1385_v62 }
 0x318   : >> { %v1358_v63 = vpop.f32.mrf.mxu3  ;;  %1448 = vst [vmem:[%s4057_s8 + $0x8] sm:$0xff] %v1432_v0  ;;  %v1489_v20 = vmul.f32 %v1432_v0, %v1432_v0  ;;  %v1464_v43 = vadd.f32 %v1432_v0, %v1431_v58 }
 0x31a   : >> { %v1331_v2 = vpop.f32.mrf.mxu0  ;;  %v1402_v6 = vpop.f32.mrf.mxu2  ;;  %v1504_v23 = vadd.f32 %v1489_v20, %v1488_v42 }
 0x31b   : >> { %v1387_v7 = vpop.f32.mrf.mxu1 }
 0x31c   : >> { %v1388_v8 = vadd.f32 %v1387_v7, %v1322_v52 }
 0x31e   : >> { %v1433_v10 = vadd.f32 %v4143_v34, %v1388_v8 }
 0x320   : >> { %v1361_v9 = vpop.f32.mrf.mxu3  ;;  %1449 = vst [vmem:[%s4057_s8 + $0x10] sm:$0xff] %v1433_v10  ;;  %v1490_v35 = vmul.f32 %v1433_v10, %v1433_v10  ;;  %v1465_v26 = vadd.f32 %v1464_v43, %v1433_v10 }
 0x322   : >> { %v1334_v11 = vpop.f32.mrf.mxu0  ;;  %v1405_v13 = vpop.f32.mrf.mxu2  ;;  %v1505_v29 = vadd.f32 %v1504_v23, %v1490_v35 }
 0x323   : >> { %v1400_v12 = vadd.f32 %v1399_v60, %v1334_v11  ;;  %v1390_v36 = vpop.f32.mrf.mxu1 }
 0x324   : >> { %v1391_v40 = vadd.f32 %v1390_v36, %v1325_v37 }
 0x325   : >> { %v1437_v32 = vadd.f32 %v4143_v34, %v1400_v12 }
 0x326   : >> { %v1434_v44 = vadd.f32 %v4143_v34, %v1391_v40 }
 0x327   : >> { %1453 = vst [vmem:[%s4057_s8 + $0x30] sm:$0xff] %v1437_v32 }
 0x328   : >> { %v1420_v14 = vpop.f32.mrf.mxu3  ;;  %1450 = vst [vmem:[%s4057_s8 + $0x18] sm:$0xff] %v1434_v44  ;;  %v1491_v24 = vmul.f32 %v1434_v44, %v1434_v44  ;;  %v1466_v48 = vadd.f32 %v1465_v26, %v1434_v44 }
 0x329   : >> { %v1421_v15 = vadd.f32 %v1420_v14, %v1355_v57 }
 0x32a   : >> { %v1337_v33 = vpop.f32.mrf.mxu0  ;;  %v1408_v18 = vpop.f32.mrf.mxu2  ;;  %v1506_v37 = vadd.f32 %v1505_v29, %v1491_v24 }
 0x32b   : >> { %v4156_v16 = vadd.f32 %v4143_v34, %v1421_v15  ;;  %v1403_v17 = vadd.f32 %v1402_v6, %v1337_v33  ;;  %v1393_v45 = vpop.f32.mrf.mxu1 }
 0x32c   : >> { %v1394_v19 = vadd.f32 %v1393_v45, %v1328_v59 }
 0x32d   : >> { %1460 = vst [vmem:[%s4057_s8 + $0x68] sm:$0xff] %v4156_v16  ;;  %v1438_v41 = vadd.f32 %v4143_v34, %v1403_v17  ;;  %v1501_v35 = vmul.f32 %v4156_v16, %v4156_v16 }
 0x32e   : >> { %v1435_v38 = vadd.f32 %v4143_v34, %v1394_v19 }
 0x32f   : >> { %1454 = vst [vmem:[%s4057_s8 + $0x38] sm:$0xff] %v1438_v41 }
 0x330   : >> { %v1423_v21 = vpop.f32.mrf.mxu3  ;;  %1451 = vst [vmem:[%s4057_s8 + $0x20] sm:$0xff] %v1435_v38  ;;  %v1492_v30 = vmul.f32 %v1435_v38, %v1435_v38  ;;  %v1467_v56 = vadd.f32 %v1466_v48, %v1435_v38 }
 0x331   : >> { %v1424_v22 = vadd.f32 %v1423_v21, %v1358_v63 }
 0x332   : >> { %v1340_v39 = vpop.f32.mrf.mxu0  ;;  %v1411_v25 = vpop.f32.mrf.mxu2  ;;  %v1507_v59 = vadd.f32 %v1506_v37, %v1492_v30  ;;  %v1463_v37 = vld [vmem:[#allocation3] sm:$0x1] }
 0x333   : >> { %v4165_v46 = vadd.f32 %v4143_v34, %v1424_v22  ;;  %v1406_v47 = vadd.f32 %v1405_v13, %v1340_v39  ;;  %v1412_v28 = vadd.f32 %v1411_v25, %v4134_v49  ;;  %v1396_v31 = vpop.f32.mrf.mxu1 }
 0x334   : >> { %v1397_v52 = vadd.f32 %v1396_v31, %v1331_v2  ;;  %v1494_v2 = vmul.f32 %v1437_v32, %v1437_v32 }
 0x335   : >> { %1461 = vst [vmem:[%s4057_s8 + $0x70] sm:$0xff] %v4165_v46  ;;  %v1439_v27 = vadd.f32 %v4143_v34, %v1406_v47  ;;  %v1441_v50 = vadd.f32 %v4143_v34, %v1412_v28  ;;  %v1502_v47 = vmul.f32 %v4165_v46, %v4165_v46 }
 0x336   : >> { %v1436_v57 = vadd.f32 %v4143_v34, %v1397_v52 }
 0x337   : >> { %1455 = vst [vmem:[%s4057_s8 + $0x40] sm:$0xff] %v1439_v27  ;;  %v1496_v36 = vmul.f32 %v1439_v27, %v1439_v27  ;;  %v1498_v17 = vmul.f32 %v1441_v50, %v1441_v50 }
 0x338   : >> { %v1426_v55 = vpop.f32.mrf.mxu3  ;;  %1457 = vst [vmem:[%s4057_s8 + $0x50] sm:$0xff] %v1441_v50  ;;  %v1468_v60 = vadd.f32 %v1467_v56, %v1436_v57  ;;  %v1493_v61 = vmul.f32 %v1436_v57, %v1436_v57 }
 0x339   : >> { %v1427_v58 = vadd.f32 %v1426_v55, %v1361_v9  ;;  %1452 = vst [vmem:[%s4057_s8 + $0x28] sm:$0xff] %v1436_v57  ;;  %v1495_v9 = vmul.f32 %v1438_v41, %v1438_v41  ;;  %v1487_v57 = vld [vmem:[#allocation3 + $0x1] sm:$0x1] }
 0x33a   : >> { %v1343_v49 = vpop.f32.mrf.mxu0  ;;  %v1414_v0 = vpop.f32.mrf.mxu2  ;;  %v1469_v6 = vadd.f32 %v1468_v60, %v1437_v32  ;;  %v1508_v7 = vadd.f32 %v1507_v59, %v1493_v61 }
 0x33b   : >> { %v1446_v62 = vadd.f32 %v4143_v34, %v1427_v58  ;;  %v1409_v63 = vadd.f32 %v1408_v18, %v1343_v49  ;;  %v1415_v10 = vadd.f32 %v1414_v0, %v4136_v51 }
 0x33c   : >> { %v1509_v11 = vadd.f32 %v1508_v7, %v1494_v2  ;;  %v1470_v12 = vadd.f32 %v1469_v6, %v1438_v41 }
 0x33d   : >> { %1462 = vst [vmem:[%s4057_s8 + $0x78] sm:$0xff] %v1446_v62  ;;  %v1440_v8 = vadd.f32 %v4143_v34, %v1409_v63  ;;  %v1442_v13 = vadd.f32 %v4143_v34, %v1415_v10  ;;  %v1503_v24 = vmul.f32 %v1446_v62, %v1446_v62 }
 0x33e   : >> { %v1471_v40 = vadd.f32 %v1470_v12, %v1439_v27  ;;  %v1510_v14 = vadd.f32 %v1509_v11, %v1495_v9 }
 0x33f   : >> { %1456 = vst [vmem:[%s4057_s8 + $0x48] sm:$0xff] %v1440_v8  ;;  %v1497_v15 = vmul.f32 %v1440_v8, %v1440_v8  ;;  %v1499_v20 = vmul.f32 %v1442_v13, %v1442_v13 }
 0x340   : >> { %1458 = vst [vmem:[%s4057_s8 + $0x58] sm:$0xff] %v1442_v13  ;;  %v1472_v44 = vadd.f32 %v1471_v40, %v1440_v8  ;;  %v1511_v32 = vadd.f32 %v1510_v14, %v1496_v36 }
 0x342   : >> { %v1417_v33 = vpop.f32.mrf.mxu2  ;;  %v1512_v18 = vadd.f32 %v1511_v32, %v1497_v15  ;;  %v1473_v45 = vadd.f32 %v1472_v44, %v1441_v50 }
 0x343   : >> { %v1418_v51 = vadd.f32 %v1417_v33, %v4138_v54 }
 0x344   : >> { %v1474_v19 = vadd.f32 %v1473_v45, %v1442_v13  ;;  %v1513_v21 = vadd.f32 %v1512_v18, %v1498_v17 }
 0x345   : >> { %v1443_v41 = vadd.f32 %v4143_v34, %v1418_v51 }
 0x346   : >> { %v1514_v38 = vadd.f32 %v1513_v21, %v1499_v20 }
 0x347   : >> { %1459 = vst [vmem:[%s4057_s8 + $0x60] sm:$0xff] %v1443_v41  ;;  %v1475_v22 = vadd.f32 %v1474_v19, %v1443_v41  ;;  %v1500_v42 = vmul.f32 %v1443_v41, %v1443_v41 }
 0x349   : >> { %v1476_v39 = vadd.f32 %v1475_v22, %v4156_v16  ;;  %v1515_v43 = vadd.f32 %v1514_v38, %v1500_v42 }
 0x34b   : >> { %v1477_v54 = vadd.f32 %v1476_v39, %v4165_v46  ;;  %v1516_v23 = vadd.f32 %v1515_v43, %v1501_v35 }
 0x34d   : >> { %v1478_v25 = vadd.f32 %v1477_v54, %v1446_v62  ;;  %v1517_v26 = vadd.f32 %v1516_v23, %v1502_v47 }
 0x34f   : >> { %v1479_v34 = vrot.slane %v1478_v25, 4  ;;  %v1518_v27 = vadd.f32 %v1517_v26, %v1503_v24 }
 0x351   : >> { %v1480_v28 = vadd.f32 %v1479_v34, %v1478_v25  ;;  %v1519_v29 = vrot.slane %v1518_v27, 4 }
 0x353   : >> { %v1481_v30 = vrot.slane %v1480_v28, 2  ;;  %v1520_v31 = vadd.f32 %v1519_v29, %v1518_v27 }
 0x355   : >> { %v1482_v48 = vadd.f32 %v1481_v30, %v1480_v28  ;;  %v1521_v50 = vrot.slane %v1520_v31, 2 }
 0x357   : >> { %v1483_v52 = vrot.slane %v1482_v48, 1  ;;  %v1522_v16 = vadd.f32 %v1521_v50, %v1520_v31 }
 0x359   : >> { %v1484_v55 = vadd.f32 %v1483_v52, %v1482_v48  ;;  %v1523_v56 = vrot.slane %v1522_v16, 1 }
 0x35b   : >> { %v1485_v58 = vadd.f32 %v1484_v55, %v1463_v37  ;;  %v1524_v46 = vadd.f32 %v1523_v56, %v1522_v16  ;;  %1145 = sbr.rel (!%p1143_p12) target bundleno = 621 (0x26d), region = 222 }
 0x35d   : >> { %1486 = vst [vmem:[#allocation3] sm:$0x1] %v1485_v58  ;;  %v1525_v59 = vadd.f32 %v1524_v46, %v1487_v57 }
 0x35f   : >> { %1526 = vst [vmem:[#allocation3 + $0x1] sm:$0x1] %v1525_v59 }
 0x364   : > { %v1527_v49 = vld [vmem:[#allocation3] sm:$0x1] }
 0x365   : > { %v1528_v61 = vmul.f32 0.00390625, %v1527_v49 }
 0x366   : > { %v1529_v60 = vld [vmem:[#allocation3 + $0x1] sm:$0x1] }
 0x367   : > { %v1530_v62 = vmul.f32 0.00390625, %v1529_v60  ;;  %1550 = vst [vmem:[#allocation3] sm:$0x3] %v3536_v53  ;;  %v1531_v63 = vmul.f32 %v1528_v61, %v1528_v61 }
 0x369   : > { %v1532_v0 = vsub.f32 %v1530_v62, %v1531_v63 }
 0x36b   : > { %v1533_v2 = vmax.f32 %v1532_v0, 0.0 }
 0x36d   : > { %v1535_v6 = vadd.f32 0.001, %v1533_v2 }
 0x36f   : > { %3156 = vrsqrt.f32 %v1535_v6  ;;  %vm1542_vm5 = vweird.f32 %v1535_v6 }
 0x375   : > { %v3157_v7 = vpop.eup %3156 }
 0x376   : > { %v1537_v8 = vmul.f32 %v3157_v7, %v1535_v6  ;;  %vm1543_vm6 = vweird.f32 %v3157_v7 }
 0x377   : > { %vm1544_vm7 = vmor %vm1542_vm5, %vm1543_vm6 }
 0x378   : > { %v1538_v10 = vmul.f32 %v3157_v7, %v1537_v8 }
 0x37a   : > { %v1539_v9 = vmul.f32 0.5, %v1538_v10 }
 0x37c   : > { %v1540_v11 = vsub.f32 1.5, %v1539_v9 }
 0x37e   : > { %v1541_v3 = vmul.f32 %v3157_v7, %v1540_v11 }
 0x380   : > { %v1545_v4 = vsel %vm1544_vm7, %v3157_v7, %v1541_v3 }
 0x381   : > { %v4199_v53 = vmul.f32 %v1545_v4, %v1534_v1 }
 0x383   : > { %v4207_v12 = vmul.f32 %v4199_v53, %v1528_v61 }
 0x385   : > { %v1549_v13 = vsub.f32 %v4204_v5, %v4207_v12 }
 0x386 LB: >> { %v1658_v36 = vld [vmem:[#allocation11 + $0xf8] sm:$0xff]  ;;  %v1657_v40 = vld [vmem:[#allocation11 + $0xf0] sm:$0xff]  ;;  %s2821_s20 = sshll.u32 %s3519_s7, 7  ;;  %s4924_s16 = sld [smem:[#allocation28_spill]]  ;;  %v1656_v44 = vld [vmem:[#allocation11 + $0xe8] sm:$0xff]  ;;  %v4234_v22 = vperm.slane %v4199_v53, 0  ;;  %s3519_s7 = sphi %s4211_s7, %s1556_s7  }
 0x387   : >> { %v1660_v14 = vld [vmem:[#allocation10 + $0x10] sm:$0xff]  ;;  %1775 = vmatpush.msra.mxu1 %v1658_v36  ;;  %2924 = vmatpush.msra.mxu2 %v1658_v36  ;;  %v1655_v33 = vld [vmem:[#allocation11 + $0xe0] sm:$0xff]  ;;  %v1653_v18 = vld [vmem:[#allocation11 + $0xd0] sm:$0xff]  ;;  %s4239_s29 = scalar_lea.vmem [#allocation2], %s2821_s20  ;;  %v4249_v23 = vperm.slane %v1549_v13, 0  ;;  %s4925_s5 = sld [smem:[#allocation31_spill]] }
 0x388   : >> { %1725 = vmatpush.msra.mxu0 %v1660_v14  ;;  %2923 = vmatpush.msra.mxu3 %v1660_v14  ;;  %v1654_v17 = vld [vmem:[#allocation11 + $0xd8] sm:$0xff]  ;;  %v1652_v19 = vld [vmem:[#allocation11 + $0xc8] sm:$0xff]  ;;  %v1651_v20 = vld [vmem:[#allocation11 + $0xc0] sm:$0xff]  ;;  %s1556_s7 = sadd.s32 1, %s3519_s7  }
 0x389   : >> { %1776 = vmatpush.msra.mxu1 %v1657_v40  ;;  %2926 = vmatpush.msra.mxu2 %v1657_v40  ;;  %v1650_v21 = vld [vmem:[#allocation11 + $0xb8] sm:$0xff]  ;;  %v1649_v41 = vld [vmem:[#allocation11 + $0xb0] sm:$0xff]  ;;  %v1559_v35 = vld [vmem:[%s4239_s29] sm:$0xff]  ;;  %p1553_p13 = scmp.ge.s32.totalorder %s1556_s7, 2  }
 0x38a   : >> { %2925 = vmatpush.msrb.mxu3 %v1658_v36  ;;  %v1565_v39 = vld [vmem:[%s4239_s29 + $0x30] sm:$0xff]  ;;  %v1648_v43 = vld [vmem:[#allocation11 + $0xa8] sm:$0xff]  ;;  %v1647_v47 = vld [vmem:[#allocation11 + $0xa0] sm:$0xff]  ;;  %v1576_v54 = vmul.f32 %v4234_v22, %v1559_v35  ;;  %s4926_s11 = sld [smem:[#allocation32_spill]] (%p1553_p13)  ;;  %s4392_s2 = smov (%p1553_p13), 0  }
 0x38b   : >> { %1777 = vmatpush.msra.mxu1 %v1656_v44  ;;  %2928 = vmatpush.msra.mxu2 %v1656_v44  ;;  %v1582_v24 = vmul.f32 %v4234_v22, %v1565_v39  ;;  %v1646_v25 = vld [vmem:[#allocation11 + $0x98] sm:$0xff]  ;;  %v1645_v26 = vld [vmem:[#allocation11 + $0x90] sm:$0xff]  ;;  %v1644_v48 = vld [vmem:[#allocation11 + $0x88] sm:$0xff]  ;;  %s4927_s23 = sld [smem:[#allocation33_spill]] (%p1553_p13) }
 0x38c   : >> { %s4222_s10 = scalar_lea.vmem %s4924_s16, %s2821_s20  ;;  %2927 = vmatpush.msrb.mxu3 %v1657_v40  ;;  %v1593_v27 = vadd.f32 %v4249_v23, %v1576_v54  ;;  %v1560_v30 = vld [vmem:[%s4239_s29 + $0x8] sm:$0xff]  ;;  %v1566_v31 = vld [vmem:[%s4239_s29 + $0x38] sm:$0xff]  ;;  %v1561_v58 = vld [vmem:[%s4239_s29 + $0x10] sm:$0xff] }
 0x38d   : >> { %v1626_v15 = vld [vmem:[%s4222_s10] sm:$0xff]  ;;  %v1636_v32 = vld [vmem:[%s4222_s10 + $0x50] sm:$0xff]  ;;  %1778 = vmatpush.msra.mxu1 %v1655_v33  ;;  %2930 = vmatpush.msra.mxu2 %v1655_v33  ;;  %v1627_v45 = vld [vmem:[%s4222_s10 + $0x8] sm:$0xff]  ;;  %v1599_v28 = vadd.f32 %v4249_v23, %v1582_v24  ;;  %v1577_v37 = vmul.f32 %v4234_v22, %v1560_v30  ;;  %v1583_v55 = vmul.f32 %v4234_v22, %v1566_v31 }
 0x38e   : >> { %2822 = vmatmul.msk.f32.vlgmr.msra.gmra.mxu0 %vm1250_vm4, %v1626_v15  ;;  %2832 = vmatmul.msk.f32.vlgmr.msra.gmra.mxu3 %vm1250_vm4, %v1636_v32  ;;  %v1637_v51 = vld [vmem:[%s4222_s10 + $0x58] sm:$0xff]  ;;  %v1628_v38 = vld [vmem:[%s4222_s10 + $0x10] sm:$0xff]  ;;  %v1638_v42 = vld [vmem:[%s4222_s10 + $0x60] sm:$0xff]  ;;  %v1609_v52 = vmax.f32 %v1593_v27, 0.0  ;;  %v1578_v60 = vmul.f32 %v4234_v22, %v1561_v58 }
 0x38f   : >> { %2929 = vmatpush.msrb.mxu3 %v1656_v44  ;;  %1779 = vmatpush.msra.mxu1 %v1654_v17  ;;  %v1629_v34 = vld [vmem:[%s4222_s10 + $0x18] sm:$0xff]  ;;  %v1639_v29 = vld [vmem:[%s4222_s10 + $0x68] sm:$0xff]  ;;  %v1615_v16 = vmax.f32 %v1599_v28, 0.0  ;;  %v1594_v56 = vadd.f32 %v4249_v23, %v1577_v37  ;;  %v1600_v57 = vadd.f32 %v4249_v23, %v1583_v55  ;;  %v1630_v46 = vld [vmem:[%s4222_s10 + $0x20] sm:$0xff] }
 0x390   : >> { %2932 = vmatpush.msra.mxu2 %v1654_v17  ;;  %v1643_v50 = vld [vmem:[#allocation11 + $0x80] sm:$0xff]  ;;  %v1640_v59 = vld [vmem:[%s4222_s10 + $0x70] sm:$0xff]  ;;  %v1572_v0 = vld [vmem:[%s4239_s29 + $0x68] sm:$0xff]  ;;  %v1595_v2 = vadd.f32 %v4249_v23, %v1578_v60 }
 0x391   : >> { %2931 = vmatpush.msrb.mxu3 %v1655_v33  ;;  %1780 = vmatpush.msra.mxu1 %v1653_v18  ;;  %v1567_v49 = vld [vmem:[%s4239_s29 + $0x40] sm:$0xff]  ;;  %v1610_v61 = vmax.f32 %v1594_v56, 0.0  ;;  %v1616_v62 = vmax.f32 %v1600_v57, 0.0  ;;  %v1631_v6 = vld [vmem:[%s4222_s10 + $0x28] sm:$0xff]  ;;  %v1589_v8 = vmul.f32 %v4234_v22, %v1572_v0  ;;  %v1641_v10 = vld [vmem:[%s4222_s10 + $0x78] sm:$0xff] }
 0x392   : >> { %2934 = vmatpush.msra.mxu2 %v1653_v18  ;;  %v1584_v63 = vmul.f32 %v4234_v22, %v1567_v49  ;;  %v1562_v9 = vld [vmem:[%s4239_s29 + $0x18] sm:$0xff]  ;;  %v1568_v11 = vld [vmem:[%s4239_s29 + $0x48] sm:$0xff]  ;;  %v1611_v1 = vmax.f32 %v1595_v2, 0.0  ;;  %v1573_v14 = vld [vmem:[%s4239_s29 + $0x70] sm:$0xff] }
 0x393   : >> { %1781 = vmatpush.msra.mxu1 %v1652_v19  ;;  %2933 = vmatpush.msrb.mxu3 %v1654_v17  ;;  %v1606_v4 = vadd.f32 %v4249_v23, %v1589_v8  ;;  %v1579_v36 = vmul.f32 %v4234_v22, %v1562_v9  ;;  %v1585_v40 = vmul.f32 %v4234_v22, %v1568_v11  ;;  %v1563_v17 = vld [vmem:[%s4239_s29 + $0x20] sm:$0xff]  ;;  %v1564_v54 = vld [vmem:[%s4239_s29 + $0x28] sm:$0xff]  ;;  %v1570_v24 = vld [vmem:[%s4239_s29 + $0x58] sm:$0xff] }
 0x394   : >> { %2936 = vmatpush.msra.mxu2 %v1652_v19  ;;  %v1601_v7 = vadd.f32 %v4249_v23, %v1584_v63  ;;  %v1590_v33 = vmul.f32 %v4234_v22, %v1573_v14  ;;  %v1581_v27 = vmul.f32 %v4234_v22, %v1564_v54  ;;  %v1587_v28 = vmul.f32 %v4234_v22, %v1570_v24  ;;  %v1635_v56 = vld [vmem:[%s4222_s10 + $0x48] sm:$0xff]  ;;  %v1945_v53 = vld [vmem:[%s4926_s11 + $0x2] sm:$0x1] (%p1553_p13) }
 0x395   : >> { %1782 = vmatpush.msra.mxu1 %v1651_v20  ;;  %2935 = vmatpush.msrb.mxu3 %v1653_v18  ;;  %v1622_v44 = vmax.f32 %v1606_v4, 0.0  ;;  %v1596_v15 = vadd.f32 %v4249_v23, %v1579_v36  ;;  %v1602_v32 = vadd.f32 %v4249_v23, %v1585_v40  ;;  %v1632_v18 = vld [vmem:[%s4222_s10 + $0x30] sm:$0xff] }
 0x396   : >> { %2823 = vmatmul.msk.f32.gmra.mxu0 %vm1250_vm4, %v1627_v45  ;;  %2833 = vmatmul.msk.f32.gmra.mxu3 %vm1250_vm4, %v1637_v51  ;;  %v1617_v3 = vmax.f32 %v1601_v7, 0.0  ;;  %v1569_v45 = vld [vmem:[%s4239_s29 + $0x50] sm:$0xff]  ;;  %v1580_v51 = vmul.f32 %v4234_v22, %v1563_v17  ;;  %v1598_v30 = vadd.f32 %v4249_v23, %v1581_v27  ;;  %v1604_v31 = vadd.f32 %v4249_v23, %v1587_v28 }
 0x397   : >> { %2938 = vmatpush.msra.mxu2 %v1651_v20  ;;  %1783 = vmatpush.msra.mxu1 %v1650_v21 }
 0x398   : >> { %2937 = vmatpush.msrb.mxu3 %v1652_v19  ;;  %v1612_v19 = vmax.f32 %v1596_v15, 0.0 }
 0x399   : >> { %2940 = vmatpush.msra.mxu2 %v1650_v21  ;;  %1784 = vmatpush.msra.mxu1 %v1649_v41 }
 0x39a   : >> { %2939 = vmatpush.msrb.mxu3 %v1651_v20  ;;  %v1618_v20 = vmax.f32 %v1602_v32, 0.0 }
 0x39b   : >> { %2942 = vmatpush.msra.mxu2 %v1649_v41  ;;  %1785 = vmatpush.msra.mxu1 %v1648_v43 }
 0x39c   : >> { %2941 = vmatpush.msrb.mxu3 %v1650_v21  ;;  %v1607_v21 = vadd.f32 %v4249_v23, %v1590_v33 }
 0x39d   : >> { %2944 = vmatpush.msra.mxu2 %v1648_v43  ;;  %1786 = vmatpush.msra.mxu1 %v1647_v47 }
 0x39e   : >> { %2824 = vmatmul.msk.f32.gmra.mxu0 %vm1250_vm4, %v1628_v38  ;;  %2834 = vmatmul.msk.f32.gmra.mxu3 %vm1250_vm4, %v1638_v42  ;;  %v1574_v38 = vld [vmem:[%s4239_s29 + $0x78] sm:$0xff]  ;;  %v1597_v42 = vadd.f32 %v4249_v23, %v1580_v51  ;;  %v1623_v35 = vmax.f32 %v1607_v21, 0.0 }
 0x39f   : >> { %2946 = vmatpush.msra.mxu2 %v1647_v47  ;;  %1787 = vmatpush.msra.mxu1 %v1646_v25 }
 0x3a0   : >> { %2943 = vmatpush.msrb.mxu3 %v1649_v41  ;;  %v1586_v41 = vmul.f32 %v4234_v22, %v1569_v45 }
 0x3a1   : >> { %2948 = vmatpush.msra.mxu2 %v1646_v25  ;;  %1788 = vmatpush.msra.mxu1 %v1645_v26 }
 0x3a2   : >> { %2945 = vmatpush.msrb.mxu3 %v1648_v43  ;;  %v1603_v39 = vadd.f32 %v4249_v23, %v1586_v41  ;;  %v1591_v43 = vmul.f32 %v4234_v22, %v1574_v38 }
 0x3a3   : >> { %2950 = vmatpush.msra.mxu2 %v1645_v26  ;;  %1789 = vmatpush.msra.mxu1 %v1644_v48 }
 0x3a4   : >> { %2947 = vmatpush.msrb.mxu3 %v1647_v47  ;;  %v1633_v47 = vld [vmem:[%s4222_s10 + $0x38] sm:$0xff] }
 0x3a5   : >> { %2952 = vmatpush.msra.mxu2 %v1644_v48  ;;  %1790 = vmatpush.msra.mxu1 %v1643_v50 }
 0x3a6   : >> { %2825 = vmatmul.msk.f32.gmra.mxu0 %vm1250_vm4, %v1629_v34  ;;  %2835 = vmatmul.msk.f32.gmra.mxu3 %vm1250_vm4, %v1639_v29  ;;  %v1608_v34 = vadd.f32 %v4249_v23, %v1591_v43 }
 0x3a7   : >> { %2954 = vmatpush.msra.mxu2 %v1643_v50  ;;  %1791 = vmatmul.f32.vlgmr.msra.gmra.mxu1 %v1609_v52  ;;  %v1614_v52 = vmax.f32 %v1598_v30, 0.0 }
 0x3a8   : >> { %1809 = vmatmul.f32.vlgmr.msra.gmra.mxu2 %v1615_v16  ;;  %2949 = vmatpush.msrb.mxu3 %v1646_v25  ;;  %v1613_v25 = vmax.f32 %v1597_v42, 0.0  ;;  %v1624_v29 = vmax.f32 %v1608_v34, 0.0  ;;  %v1620_v16 = vmax.f32 %v1604_v31, 0.0 }
 0x3aa   : >> { %2951 = vmatpush.msrb.mxu3 %v1645_v26  ;;  %v1619_v26 = vmax.f32 %v1603_v39, 0.0 }
 0x3ac   : >> { %2953 = vmatpush.msrb.mxu3 %v1644_v48  ;;  %v1634_v48 = vld [vmem:[%s4222_s10 + $0x40] sm:$0xff] }
 0x3ae   : >> { %2826 = vmatmul.msk.f32.gmra.mxu0 %vm1250_vm4, %v1630_v46  ;;  %2836 = vmatmul.msk.f32.gmra.mxu3 %vm1250_vm4, %v1640_v59 }
 0x3af   : >> { %1794 = vmatmul.f32.gmra.mxu1 %v1610_v61  ;;  %2955 = vmatpush.msrb.mxu3 %v1643_v50  ;;  %v1571_v50 = vld [vmem:[%s4239_s29 + $0x60] sm:$0xff] }
 0x3b0   : >> { %1812 = vmatmul.f32.gmra.mxu2 %v1616_v62  ;;  %v1588_v37 = vmul.f32 %v4234_v22, %v1571_v50 }
 0x3b2   : >> { %v1605_v55 = vadd.f32 %v4249_v23, %v1588_v37  ;;  %v4325_v23 = vld [vmem:[%s4925_s5 + $0x2] ss:$0 sm:$0xff] }
 0x3b4   : >> { %v1621_v57 = vmax.f32 %v1605_v55, 0.0 }
 0x3b6   : >> { %2827 = vmatmul.msk.f32.gmra.mxu0 %vm1250_vm4, %v1631_v6  ;;  %2837 = vmatmul.msk.f32.gmra.mxu3 %vm1250_vm4, %v1641_v10 }
 0x3b7   : >> { %1797 = vmatmul.f32.gmra.mxu1 %v1611_v1 }
 0x3b8   : >> { %1815 = vmatmul.f32.gmra.mxu2 %v1617_v3 }
 0x3be   : >> { %2828 = vmatmul.msk.f32.gmra.mxu0 %vm1250_vm4, %v1632_v18  ;;  %1830 = vmatmul.f32.vlgmr.msrb.gmra.mxu3 %v1622_v44 }
 0x3bf   : >> { %1800 = vmatmul.f32.gmra.mxu1 %v1612_v19 }
 0x3c0   : >> { %1818 = vmatmul.f32.gmra.mxu2 %v1618_v20 }
 0x3c6   : >> { %2829 = vmatmul.msk.f32.gmra.mxu0 %vm1250_vm4, %v1633_v47  ;;  %1833 = vmatmul.f32.gmra.mxu3 %v1623_v35 }
 0x3c7   : >> { %1803 = vmatmul.f32.gmra.mxu1 %v1613_v25 }
 0x3c8   : >> { %1821 = vmatmul.f32.gmra.mxu2 %v1619_v26 }
 0x3ce   : >> { %2830 = vmatmul.msk.f32.gmra.mxu0 %vm1250_vm4, %v1634_v48  ;;  %1836 = vmatmul.f32.gmra.mxu3 %v1624_v29 }
 0x3cf   : >> { %1806 = vmatmul.f32.gmra.mxu1 %v1614_v52 }
 0x3d0   : >> { %1824 = vmatmul.f32.gmra.mxu2 %v1620_v16 }
 0x3d6   : >> { %2831 = vmatmul.msk.f32.gmra.mxu0 %vm1250_vm4, %v1635_v56 }
 0x3d8   : >> { %1827 = vmatmul.f32.gmra.mxu2 %v1621_v57 }
 0x40b   : >> { %v1727_v58 = vpop.f32.mrf.mxu0 }
 0x411   : >> { %v4316_v46 = vpop.f32.mrf.mxu3 }
 0x413   : >> { %v1730_v59 = vpop.f32.mrf.mxu0 }
 0x419   : >> { %v4318_v49 = vpop.f32.mrf.mxu3 }
 0x41b   : >> { %v1733_v60 = vpop.f32.mrf.mxu0 }
 0x421   : >> { %v4320_v61 = vpop.f32.mrf.mxu3 }
 0x423   : >> { %v1736_v22 = vpop.f32.mrf.mxu0 }
 0x424   : >> { %v1792_v62 = vpop.f32.mrf.mxu1 }
 0x425   : >> { %v1793_v63 = vadd.f32 %v1792_v62, %v1727_v58 }
 0x427   : >> { %v1842_v2 = vadd.f32 %v4325_v23, %v1793_v63 }
 0x429   : >> { %v1766_v0 = vpop.f32.mrf.mxu3  ;;  %1858 = vst [vmem:[%s4239_s29] sm:$0xff] %v1842_v2  ;;  %v1899_v25 = vmul.f32 %v1842_v2, %v1842_v2 }
 0x42b   : >> { %v1739_v6 = vpop.f32.mrf.mxu0  ;;  %v1810_v7 = vpop.f32.mrf.mxu2 }
 0x42c   : >> { %v1795_v8 = vpop.f32.mrf.mxu1 }
 0x42d   : >> { %v1796_v10 = vadd.f32 %v1795_v8, %v1730_v59 }
 0x42f   : >> { %v1843_v11 = vadd.f32 %v4325_v23, %v1796_v10 }
 0x431   : >> { %v1769_v9 = vpop.f32.mrf.mxu3  ;;  %1859 = vst [vmem:[%s4239_s29 + $0x8] sm:$0xff] %v1843_v11  ;;  %v1900_v43 = vmul.f32 %v1843_v11, %v1843_v11  ;;  %v1875_v27 = vadd.f32 %v1843_v11, %v1842_v2 }
 0x433   : >> { %v1742_v1 = vpop.f32.mrf.mxu0  ;;  %v1813_v3 = vpop.f32.mrf.mxu2  ;;  %v1915_v30 = vadd.f32 %v1900_v43, %v1899_v25 }
 0x434   : >> { %v1798_v4 = vpop.f32.mrf.mxu1 }
 0x435   : >> { %v1799_v36 = vadd.f32 %v1798_v4, %v1733_v60 }
 0x437   : >> { %v1844_v14 = vadd.f32 %v4325_v23, %v1799_v36 }
 0x439   : >> { %v1772_v40 = vpop.f32.mrf.mxu3  ;;  %1860 = vst [vmem:[%s4239_s29 + $0x10] sm:$0xff] %v1844_v14  ;;  %v1901_v26 = vmul.f32 %v1844_v14, %v1844_v14  ;;  %v1876_v50 = vadd.f32 %v1875_v27, %v1844_v14 }
 0x43b   : >> { %v1745_v44 = vpop.f32.mrf.mxu0  ;;  %v1816_v32 = vpop.f32.mrf.mxu2  ;;  %v1916_v37 = vadd.f32 %v1915_v30, %v1901_v26 }
 0x43c   : >> { %v1811_v15 = vadd.f32 %v1810_v7, %v1745_v44  ;;  %v1801_v17 = vpop.f32.mrf.mxu1 }
 0x43d   : >> { %v1802_v18 = vadd.f32 %v1801_v17, %v1736_v22 }
 0x43e   : >> { %v1848_v33 = vadd.f32 %v4325_v23, %v1811_v15 }
 0x43f   : >> { %v1845_v51 = vadd.f32 %v4325_v23, %v1802_v18 }
 0x440   : >> { %1864 = vst [vmem:[%s4239_s29 + $0x30] sm:$0xff] %v1848_v33  ;;  %v1905_v11 = vmul.f32 %v1848_v33, %v1848_v33 }
 0x441   : >> { %v1831_v45 = vpop.f32.mrf.mxu3  ;;  %1861 = vst [vmem:[%s4239_s29 + $0x18] sm:$0xff] %v1845_v51  ;;  %v1902_v31 = vmul.f32 %v1845_v51, %v1845_v51  ;;  %v1877_v57 = vadd.f32 %v1876_v50, %v1845_v51 }
 0x442   : >> { %v1832_v19 = vadd.f32 %v1831_v45, %v1766_v0 }
 0x443   : >> { %v1748_v20 = vpop.f32.mrf.mxu0  ;;  %v1819_v38 = vpop.f32.mrf.mxu2  ;;  %v1917_v60 = vadd.f32 %v1916_v37, %v1902_v31 }
 0x444   : >> { %v4338_v21 = vadd.f32 %v4325_v23, %v1832_v19  ;;  %v1814_v41 = vadd.f32 %v1813_v3, %v1748_v20  ;;  %v1804_v35 = vpop.f32.mrf.mxu1 }
 0x445   : >> { %v1805_v39 = vadd.f32 %v1804_v35, %v1739_v6 }
 0x446   : >> { %1871 = vst [vmem:[%s4239_s29 + $0x68] sm:$0xff] %v4338_v21  ;;  %v1849_v42 = vadd.f32 %v4325_v23, %v1814_v41  ;;  %v1912_v25 = vmul.f32 %v4338_v21, %v4338_v21 }
 0x447   : >> { %v1846_v54 = vadd.f32 %v4325_v23, %v1805_v39 }
 0x448   : >> { %1865 = vst [vmem:[%s4239_s29 + $0x38] sm:$0xff] %v1849_v42 }
 0x449   : >> { %v1834_v47 = vpop.f32.mrf.mxu3  ;;  %1862 = vst [vmem:[%s4239_s29 + $0x20] sm:$0xff] %v1846_v54  ;;  %v1903_v55 = vmul.f32 %v1846_v54, %v1846_v54  ;;  %v1878_v62 = vadd.f32 %v1877_v57, %v1846_v54 }
 0x44a   : >> { %v1835_v24 = vadd.f32 %v1834_v47, %v1769_v9 }
 0x44b   : >> { %v1751_v34 = vpop.f32.mrf.mxu0  ;;  %v1822_v48 = vpop.f32.mrf.mxu2  ;;  %v1918_v2 = vadd.f32 %v1917_v60, %v1903_v55 }
 0x44c   : >> { %v4347_v28 = vadd.f32 %v4325_v23, %v1835_v24  ;;  %v1817_v29 = vadd.f32 %v1816_v32, %v1751_v34  ;;  %v1823_v16 = vadd.f32 %v1822_v48, %v4316_v46  ;;  %v1807_v56 = vpop.f32.mrf.mxu1 }
 0x44d   : >> { %v1808_v59 = vadd.f32 %v1807_v56, %v1742_v1 }
 0x44e   : >> { %1872 = vst [vmem:[%s4239_s29 + $0x70] sm:$0xff] %v4347_v28  ;;  %v1850_v52 = vadd.f32 %v4325_v23, %v1817_v29  ;;  %v1852_v58 = vadd.f32 %v4325_v23, %v1823_v16  ;;  %v1913_v27 = vmul.f32 %v4347_v28, %v4347_v28 }
 0x44f   : >> { %v1847_v63 = vadd.f32 %v4325_v23, %v1808_v59  ;;  %v1874_v59 = vld [vmem:[#allocation3] sm:$0x1] }
 0x450   : >> { %1866 = vst [vmem:[%s4239_s29 + $0x40] sm:$0xff] %v1850_v52  ;;  %v1907_v32 = vmul.f32 %v1850_v52, %v1850_v52  ;;  %v1909_v20 = vmul.f32 %v1852_v58, %v1852_v58 }
 0x451   : >> { %v1837_v22 = vpop.f32.mrf.mxu3  ;;  %1868 = vst [vmem:[%s4239_s29 + $0x50] sm:$0xff] %v1852_v58  ;;  %v1879_v6 = vadd.f32 %v1878_v62, %v1847_v63  ;;  %v1904_v7 = vmul.f32 %v1847_v63, %v1847_v63  ;;  %v1898_v62 = vld [vmem:[#allocation3 + $0x1] sm:$0x1] }
 0x452   : >> { %v1838_v0 = vadd.f32 %v1837_v22, %v1772_v40  ;;  %1863 = vst [vmem:[%s4239_s29 + $0x28] sm:$0xff] %v1847_v63  ;;  %v1906_v40 = vmul.f32 %v1849_v42, %v1849_v42 }
 0x453   : >> { %v1754_v46 = vpop.f32.mrf.mxu0  ;;  %v1825_v9 = vpop.f32.mrf.mxu2  ;;  %v1880_v1 = vadd.f32 %v1879_v6, %v1848_v33  ;;  %v1919_v3 = vadd.f32 %v1918_v2, %v1904_v7 }
 0x454   : >> { %v1857_v8 = vadd.f32 %v4325_v23, %v1838_v0  ;;  %v1820_v10 = vadd.f32 %v1819_v38, %v1754_v46  ;;  %v1826_v36 = vadd.f32 %v1825_v9, %v4318_v49 }
 0x455   : >> { %v1920_v14 = vadd.f32 %v1919_v3, %v1905_v11  ;;  %v1881_v44 = vadd.f32 %v1880_v1, %v1849_v42 }
 0x456   : >> { %1873 = vst [vmem:[%s4239_s29 + $0x78] sm:$0xff] %v1857_v8  ;;  %v1851_v4 = vadd.f32 %v4325_v23, %v1820_v10  ;;  %v1853_v15 = vadd.f32 %v4325_v23, %v1826_v36  ;;  %v1914_v30 = vmul.f32 %v1857_v8, %v1857_v8 }
 0x457   : >> { %v1882_v17 = vadd.f32 %v1881_v44, %v1850_v52  ;;  %v1921_v18 = vadd.f32 %v1920_v14, %v1906_v40  ;;  %v4385_v14 = vld [vmem:[%s4927_s23 + $0x2] sm:$0x1] (%p1553_p13) }
 0x458   : >> { %1867 = vst [vmem:[%s4239_s29 + $0x48] sm:$0xff] %v1851_v4  ;;  %v1908_v51 = vmul.f32 %v1851_v4, %v1851_v4  ;;  %v1910_v39 = vmul.f32 %v1853_v15, %v1853_v15 }
 0x459   : >> { %1869 = vst [vmem:[%s4239_s29 + $0x58] sm:$0xff] %v1853_v15  ;;  %v1883_v45 = vadd.f32 %v1882_v17, %v1851_v4  ;;  %v1922_v33 = vadd.f32 %v1921_v18, %v1907_v32 }
 0x45b   : >> { %v1828_v19 = vpop.f32.mrf.mxu2  ;;  %v1923_v41 = vadd.f32 %v1922_v33, %v1908_v51  ;;  %v1884_v38 = vadd.f32 %v1883_v45, %v1852_v58 }
 0x45c   : >> { %v1829_v49 = vadd.f32 %v1828_v19, %v4320_v61 }
 0x45d   : >> { %v1885_v35 = vadd.f32 %v1884_v38, %v1853_v15  ;;  %v1924_v43 = vadd.f32 %v1923_v41, %v1909_v20 }
 0x45e   : >> { %v1854_v42 = vadd.f32 %v4325_v23, %v1829_v49 }
 0x45f   : >> { %v1925_v47 = vadd.f32 %v1924_v43, %v1910_v39 }
 0x460   : >> { %1870 = vst [vmem:[%s4239_s29 + $0x60] sm:$0xff] %v1854_v42  ;;  %v1886_v54 = vadd.f32 %v1885_v35, %v1854_v42  ;;  %v1911_v24 = vmul.f32 %v1854_v42, %v1854_v42 }
 0x462   : >> { %v1887_v26 = vadd.f32 %v1886_v54, %v4338_v21  ;;  %v1926_v34 = vadd.f32 %v1925_v47, %v1911_v24 }
 0x464   : >> { %v1888_v61 = vadd.f32 %v1887_v26, %v4347_v28  ;;  %v1927_v29 = vadd.f32 %v1926_v34, %v1912_v25 }
 0x466   : >> { %v1889_v31 = vadd.f32 %v1888_v61, %v1857_v8  ;;  %v1928_v48 = vadd.f32 %v1927_v29, %v1913_v27 }
 0x468   : >> { %v1890_v23 = vrot.slane %v1889_v31, 4  ;;  %v1929_v50 = vadd.f32 %v1928_v48, %v1914_v30 }
 0x46a   : >> { %v1891_v52 = vadd.f32 %v1890_v23, %v1889_v31  ;;  %v1930_v16 = vrot.slane %v1929_v50, 4 }
 0x46c   : >> { %v1892_v37 = vrot.slane %v1891_v52, 2  ;;  %v1931_v55 = vadd.f32 %v1930_v16, %v1929_v50 }
 0x46e   : >> { %v1893_v56 = vadd.f32 %v1892_v37, %v1891_v52  ;;  %v1932_v57 = vrot.slane %v1931_v55, 2 }
 0x470   : >> { %v1894_v58 = vrot.slane %v1893_v56, 1  ;;  %v1933_v21 = vadd.f32 %v1932_v57, %v1931_v55 }
 0x472   : >> { %v1895_v60 = vadd.f32 %v1894_v58, %v1893_v56  ;;  %v1934_v22 = vrot.slane %v1933_v21, 1 }
 0x474   : >> { %v1896_v63 = vadd.f32 %v1895_v60, %v1874_v59  ;;  %v1935_v28 = vadd.f32 %v1934_v22, %v1933_v21  ;;  %1555 = sbr.rel (!%p1553_p13) target bundleno = 902 (0x386), region = 233 }
 0x476   : >> { %1897 = vst [vmem:[#allocation3] sm:$0x1] %v1896_v63  ;;  %v1936_v0 = vadd.f32 %v1935_v28, %v1898_v62 }
 0x478   : >> { %1937 = vst [vmem:[#allocation3 + $0x1] sm:$0x1] %v1936_v0 }
 0x47d   : > { %v1938_v2 = vld [vmem:[#allocation3] sm:$0x1] }
 0x47e   : > { %v1939_v6 = vmul.f32 0.00390625, %v1938_v2 }
 0x47f   : > { %v1940_v46 = vld [vmem:[#allocation3 + $0x1] sm:$0x1] }
 0x480   : > { %v1941_v7 = vmul.f32 0.00390625, %v1940_v46  ;;  %v1942_v8 = vmul.f32 %v1939_v6, %v1939_v6 }
 0x482   : > { %v1943_v10 = vsub.f32 %v1941_v7, %v1942_v8 }
 0x484   : > { %v1944_v9 = vmax.f32 %v1943_v10, 0.0 }
 0x486   : > { %v1946_v11 = vadd.f32 0.001, %v1944_v9 }
 0x488   : > { %3159 = vrsqrt.f32 %v1946_v11  ;;  %vm1953_vm8 = vweird.f32 %v1946_v11 }
 0x48e   : > { %v3160_v1 = vpop.eup %3159 }
 0x48f   : > { %v1948_v3 = vmul.f32 %v3160_v1, %v1946_v11  ;;  %vm1954_vm9 = vweird.f32 %v3160_v1 }
 0x490   : > { %vm1955_vm10 = vmor %vm1953_vm8, %vm1954_vm9 }
 0x491   : > { %v1949_v4 = vmul.f32 %v3160_v1, %v1948_v3 }
 0x493   : > { %v1950_v36 = vmul.f32 0.5, %v1949_v4 }
 0x495   : > { %v1951_v40 = vsub.f32 1.5, %v1950_v36 }
 0x497   : > { %v1952_v5 = vmul.f32 %v3160_v1, %v1951_v40 }
 0x499   : > { %v1956_v12 = vsel %vm1955_vm10, %v3160_v1, %v1952_v5 }
 0x49a   : > { %v4380_v13 = vmul.f32 %v1956_v12, %v1945_v53 }
 0x49c   : > { %v4388_v44 = vmul.f32 %v4380_v13, %v1939_v6 }
 0x49e   : > { %v1960_v15 = vsub.f32 %v4385_v14, %v4388_v44 }
 0x49f LB: >> { %v2066_v32 = vld [vmem:[#allocation13 + $0xf8] sm:$0xff]  ;;  %v2064_v17 = vld [vmem:[#allocation13 + $0xe8] sm:$0xff]  ;;  %v2065_v33 = vld [vmem:[#allocation13 + $0xf0] sm:$0xff]  ;;  %s4398_s15 = sshll.u32 %s3523_s2, 7  ;;  %v4401_v54 = vperm.slane %v4380_v13, 0  ;;  %s4928_s7 = sld [smem:[#allocation34_spill]]  ;;  %s3523_s2 = sphi %s4392_s2, %s1966_s2  }
 0x4a0   : >> { %2138 = vmatpush.msra.mxu1 %v2066_v32  ;;  %2972 = vmatpush.msra.mxu3 %v2066_v32  ;;  %v2062_v18 = vld [vmem:[#allocation13 + $0xd8] sm:$0xff]  ;;  %v2060_v45 = vld [vmem:[#allocation13 + $0xc8] sm:$0xff]  ;;  %v2063_v19 = vld [vmem:[#allocation13 + $0xe0] sm:$0xff]  ;;  %s4404_s14 = scalar_lea.vmem [#allocation2], %s4398_s15  ;;  %v4412_v30 = vperm.slane %v1960_v15, 0  ;;  %s2476_s20 = sshra.s32 %s4398_s15, 3 }
 0x4a1   : >> { %v2058_v51 = vld [vmem:[#allocation13 + $0xb8] sm:$0xff]  ;;  %v2056_v20 = vld [vmem:[#allocation13 + $0xa8] sm:$0xff]  ;;  %2073 = vmatpush.msra.mxu0 %v2065_v33  ;;  %2956 = vmatpush.msra.mxu2 %v2065_v33  ;;  %v2061_v41 = vld [vmem:[#allocation13 + $0xd0] sm:$0xff]  ;;  %s2862_s12 = smul.u32 24, %s2476_s20  ;;  %s4532_s16 = scalar_lea.vmem [#allocation5], %s4398_s15 }
 0x4a2   : >> { %2139 = vmatpush.msra.mxu1 %v2064_v17  ;;  %2973 = vmatpush.msra.mxu3 %v2064_v17  ;;  %v2054_v38 = vld [vmem:[#allocation13 + $0x98] sm:$0xff]  ;;  %v2059_v49 = vld [vmem:[#allocation13 + $0xc0] sm:$0xff]  ;;  %v2052_v35 = vld [vmem:[#allocation13 + $0x88] sm:$0xff]  ;;  %s1966_s2 = sadd.s32 1, %s3523_s2  }
 0x4a3   : >> { %2074 = vmatpush.msra.mxu0 %v2063_v19  ;;  %2957 = vmatpush.msra.mxu2 %v2063_v19  ;;  %v2057_v39 = vld [vmem:[#allocation13 + $0xb0] sm:$0xff]  ;;  %v2050_v43 = vld [vmem:[#allocation13 + $0x78] sm:$0xff]  ;;  %v2055_v42 = vld [vmem:[#allocation13 + $0xa0] sm:$0xff]  ;;  %s4475_s28 = scalar_lea.vmem [#allocation14], %s2862_s12  ;;  %p1963_p0 = scmp.ge.s32.totalorder %s1966_s2, 2  }
 0x4a4   : >> { %2140 = vmatpush.msra.mxu1 %v2062_v18  ;;  %2974 = vmatpush.msra.mxu3 %v2062_v18  ;;  %v2048_v47 = vld [vmem:[#allocation13 + $0x68] sm:$0xff]  ;;  %v2053_v26 = vld [vmem:[#allocation13 + $0x90] sm:$0xff]  ;;  %v2046_v34 = vld [vmem:[#allocation13 + $0x58] sm:$0xff] }
 0x4a5   : >> { %2075 = vmatpush.msra.mxu0 %v2061_v41  ;;  %2958 = vmatpush.msra.mxu2 %v2061_v41  ;;  %v1969_v24 = vld [vmem:[%s4404_s14] sm:$0xff]  ;;  %v2049_v48 = vld [vmem:[#allocation13 + $0x70] sm:$0xff]  ;;  %v2042_v23 = vld [vmem:[#allocation13 + $0x38] sm:$0xff] }
 0x4a6   : >> { %2141 = vmatpush.msra.mxu1 %v2060_v45  ;;  %2975 = vmatpush.msra.mxu3 %v2060_v45  ;;  %v1977_v25 = vld [vmem:[%s4404_s14 + $0x40] sm:$0xff]  ;;  %v1986_v29 = vmul.f32 %v4401_v54, %v1969_v24  ;;  %v1970_v55 = vld [vmem:[%s4404_s14 + $0x8] sm:$0xff]  ;;  %v2038_v58 = vld [vmem:[#allocation13 + $0x18] sm:$0xff] }
 0x4a7   : >> { %2076 = vmatpush.msra.mxu0 %v2059_v49  ;;  %2959 = vmatpush.msra.mxu2 %v2059_v49  ;;  %v2051_v27 = vld [vmem:[#allocation13 + $0x80] sm:$0xff]  ;;  %v2044_v61 = vld [vmem:[#allocation13 + $0x48] sm:$0xff]  ;;  %v1994_v31 = vmul.f32 %v4401_v54, %v1977_v25  ;;  %v2045_v57 = vld [vmem:[#allocation13 + $0x50] sm:$0xff]  ;;  %v1987_v62 = vmul.f32 %v4401_v54, %v1970_v55 }
 0x4a8   : >> { %2142 = vmatpush.msra.mxu1 %v2058_v51  ;;  %2976 = vmatpush.msra.mxu3 %v2058_v51  ;;  %v2047_v50 = vld [vmem:[#allocation13 + $0x60] sm:$0xff]  ;;  %v2040_v52 = vld [vmem:[#allocation13 + $0x28] sm:$0xff]  ;;  %v2003_v16 = vadd.f32 %v4412_v30, %v1986_v29  ;;  %v2041_v28 = vld [vmem:[#allocation13 + $0x30] sm:$0xff] }
 0x4a9   : >> { %2077 = vmatpush.msra.mxu0 %v2057_v39  ;;  %2960 = vmatpush.msra.mxu2 %v2057_v39  ;;  %v2011_v37 = vadd.f32 %v4412_v30, %v1994_v31  ;;  %v1978_v56 = vld [vmem:[%s4404_s14 + $0x48] sm:$0xff]  ;;  %v2043_v21 = vld [vmem:[#allocation13 + $0x40] sm:$0xff]  ;;  %v2004_v0 = vadd.f32 %v4412_v30, %v1987_v62  ;;  %v1971_v6 = vld [vmem:[%s4404_s14 + $0x10] sm:$0xff] }
 0x4aa   : >> { %2143 = vmatpush.msra.mxu1 %v2056_v20  ;;  %2977 = vmatpush.msra.mxu3 %v2056_v20  ;;  %v2036_v59 = vld [vmem:[#allocation13 + $0x8] sm:$0xff]  ;;  %v2019_v60 = vmax.f32 %v2003_v16, 0.0  ;;  %v1995_v63 = vmul.f32 %v4401_v54, %v1978_v56  ;;  %v2039_v46 = vld [vmem:[#allocation13 + $0x20] sm:$0xff]  ;;  %v1979_v7 = vld [vmem:[%s4404_s14 + $0x50] sm:$0xff]  ;;  %v1988_v11 = vmul.f32 %v4401_v54, %v1971_v6 }
 0x4ab   : >> { %2078 = vmatpush.msra.mxu0 %v2055_v42  ;;  %2961 = vmatpush.msra.mxu2 %v2055_v42  ;;  %v2027_v22 = vmax.f32 %v2011_v37, 0.0  ;;  %v2037_v8 = vld [vmem:[#allocation13 + $0x10] sm:$0xff]  ;;  %v2020_v10 = vmax.f32 %v2004_v0, 0.0  ;;  %v1996_v1 = vmul.f32 %v4401_v54, %v1979_v7  ;;  %v2035_v3 = vld [vmem:[#allocation13] sm:$0xff] }
 0x4ac   : >> { %2144 = vmatpush.msra.mxu1 %v2054_v38  ;;  %2978 = vmatpush.msra.mxu3 %v2054_v38  ;;  %v2012_v2 = vadd.f32 %v4412_v30, %v1995_v63  ;;  %v2005_v4 = vadd.f32 %v4412_v30, %v1988_v11  ;;  %v1972_v40 = vld [vmem:[%s4404_s14 + $0x18] sm:$0xff]  ;;  %v1973_v51 = vld [vmem:[%s4404_s14 + $0x20] sm:$0xff]  ;;  %v1974_v39 = vld [vmem:[%s4404_s14 + $0x28] sm:$0xff] }
 0x4ad   : >> { %2079 = vmatpush.msra.mxu0 %v2053_v26  ;;  %2962 = vmatpush.msra.mxu2 %v2053_v26  ;;  %v2013_v36 = vadd.f32 %v4412_v30, %v1996_v1  ;;  %v1980_v53 = vld [vmem:[%s4404_s14 + $0x58] sm:$0xff]  ;;  %v1989_v32 = vmul.f32 %v4401_v54, %v1972_v40  ;;  %v1981_v33 = vld [vmem:[%s4404_s14 + $0x60] sm:$0xff]  ;;  %v1990_v41 = vmul.f32 %v4401_v54, %v1973_v51 }
 0x4ae   : >> { %2145 = vmatpush.msra.mxu1 %v2052_v35  ;;  %2979 = vmatpush.msra.mxu3 %v2052_v35  ;;  %v2028_v9 = vmax.f32 %v2012_v2, 0.0  ;;  %v2021_v5 = vmax.f32 %v2005_v4, 0.0  ;;  %v1997_v17 = vmul.f32 %v4401_v54, %v1980_v53  ;;  %v1998_v38 = vmul.f32 %v4401_v54, %v1981_v33  ;;  %v1976_v16 = vld [vmem:[%s4404_s14 + $0x38] sm:$0xff] }
 0x4af   : >> { %2080 = vmatpush.msra.mxu0 %v2051_v27  ;;  %2963 = vmatpush.msra.mxu2 %v2051_v27  ;;  %v2029_v12 = vmax.f32 %v2013_v36, 0.0  ;;  %v2006_v18 = vadd.f32 %v4412_v30, %v1989_v32  ;;  %v2007_v49 = vadd.f32 %v4412_v30, %v1990_v41  ;;  %v1991_v24 = vmul.f32 %v4401_v54, %v1974_v39  ;;  %v1975_v27 = vld [vmem:[%s4404_s14 + $0x30] sm:$0xff]  ;;  %v1984_v37 = vld [vmem:[%s4404_s14 + $0x78] sm:$0xff] }
 0x4b0   : >> { %2146 = vmatpush.msra.mxu1 %v2050_v43  ;;  %2980 = vmatpush.msra.mxu3 %v2050_v43  ;;  %v2014_v45 = vadd.f32 %v4412_v30, %v1997_v17  ;;  %v2015_v35 = vadd.f32 %v4412_v30, %v1998_v38  ;;  %v1982_v43 = vld [vmem:[%s4404_s14 + $0x68] sm:$0xff] }
 0x4b1   : >> { %2081 = vmatpush.msra.mxu0 %v2049_v48  ;;  %2964 = vmatpush.msra.mxu2 %v2049_v48  ;;  %v2022_v19 = vmax.f32 %v2006_v18, 0.0  ;;  %v2023_v42 = vmax.f32 %v2007_v49, 0.0  ;;  %v1999_v25 = vmul.f32 %v4401_v54, %v1982_v43  ;;  %v2008_v26 = vadd.f32 %v4412_v30, %v1991_v24 }
 0x4b2   : >> { %2147 = vmatpush.msra.mxu1 %v2048_v47  ;;  %2981 = vmatpush.msra.mxu3 %v2048_v47  ;;  %v2030_v20 = vmax.f32 %v2014_v45, 0.0  ;;  %v2031_v47 = vmax.f32 %v2015_v35, 0.0  ;;  %v1992_v48 = vmul.f32 %v4401_v54, %v1975_v27 }
 0x4b3   : >> { %2082 = vmatpush.msra.mxu0 %v2047_v50  ;;  %2965 = vmatpush.msra.mxu2 %v2047_v50  ;;  %v2024_v29 = vmax.f32 %v2008_v26, 0.0 }
 0x4b4   : >> { %2148 = vmatpush.msra.mxu1 %v2046_v34  ;;  %2982 = vmatpush.msra.mxu3 %v2046_v34  ;;  %v2016_v34 = vadd.f32 %v4412_v30, %v1999_v25  ;;  %v2009_v50 = vadd.f32 %v4412_v30, %v1992_v48 }
 0x4b5   : >> { %2083 = vmatpush.msra.mxu0 %v2045_v57  ;;  %2966 = vmatpush.msra.mxu2 %v2045_v57  ;;  %v1993_v57 = vmul.f32 %v4401_v54, %v1976_v16 }
 0x4b6   : >> { %2149 = vmatpush.msra.mxu1 %v2044_v61  ;;  %2983 = vmatpush.msra.mxu3 %v2044_v61  ;;  %v1983_v61 = vld [vmem:[%s4404_s14 + $0x70] sm:$0xff]  ;;  %v2032_v31 = vmax.f32 %v2016_v34, 0.0  ;;  %v2025_v55 = vmax.f32 %v2009_v50, 0.0 }
 0x4b7   : >> { %2084 = vmatpush.msra.mxu0 %v2043_v21  ;;  %2967 = vmatpush.msra.mxu2 %v2043_v21  ;;  %v2010_v21 = vadd.f32 %v4412_v30, %v1993_v57  ;;  %v2428_v57 = vld [vmem:[%s4532_s16] sm:$0xff] }
 0x4b8   : >> { %2150 = vmatpush.msra.mxu1 %v2042_v23  ;;  %2984 = vmatpush.msra.mxu3 %v2042_v23  ;;  %v2000_v23 = vmul.f32 %v4401_v54, %v1983_v61 }
 0x4b9   : >> { %2085 = vmatpush.msra.mxu0 %v2041_v28  ;;  %2968 = vmatpush.msra.mxu2 %v2041_v28 }
 0x4ba   : >> { %2151 = vmatpush.msra.mxu1 %v2040_v52  ;;  %2985 = vmatpush.msra.mxu3 %v2040_v52  ;;  %v2017_v52 = vadd.f32 %v4412_v30, %v2000_v23 }
 0x4bb   : >> { %2086 = vmatpush.msra.mxu0 %v2039_v46  ;;  %2969 = vmatpush.msra.mxu2 %v2039_v46 }
 0x4bc   : >> { %2152 = vmatpush.msra.mxu1 %v2038_v58  ;;  %2986 = vmatpush.msra.mxu3 %v2038_v58  ;;  %v2033_v56 = vmax.f32 %v2017_v52, 0.0  ;;  %v2001_v58 = vmul.f32 %v4401_v54, %v1984_v37  ;;  %v2067_v54 = vld [vmem:[%s4928_s7] sm:$0x3] }
 0x4bd   : >> { %2087 = vmatpush.msra.mxu0 %v2037_v8  ;;  %2970 = vmatpush.msra.mxu2 %v2037_v8  ;;  %v4462_v62 = vperm.slane %v2067_v54, 1  ;;  %v4467_v46 = vperm.slane %v2067_v54, 0 }
 0x4be   : >> { %2153 = vmatpush.msra.mxu1 %v2036_v59  ;;  %2987 = vmatpush.msra.mxu3 %v2036_v59  ;;  %v2018_v59 = vadd.f32 %v4412_v30, %v2001_v58 }
 0x4bf   : >> { %2154 = vmatmul.f32.vlgmr.msra.gmra.mxu1 %v2019_v60  ;;  %2178 = vmatmul.f32.vlgmr.msra.gmra.mxu3 %v2027_v22 }
 0x4c0   : >> { %2088 = vmatpush.msra.mxu0 %v2035_v3  ;;  %2971 = vmatpush.msra.mxu2 %v2035_v3 }
 0x4c1   : >> { %2089 = vmatmul.f32.vlgmr.msra.gmra.mxu0 %v2019_v60  ;;  %2113 = vmatmul.f32.vlgmr.msra.gmra.mxu2 %v2027_v22  ;;  %v2026_v60 = vmax.f32 %v2010_v21, 0.0  ;;  %v2034_v22 = vmax.f32 %v2018_v59, 0.0 }
 0x4c7   : >> { %2157 = vmatmul.f32.gmra.mxu1 %v2020_v10  ;;  %2181 = vmatmul.f32.gmra.mxu3 %v2028_v9 }
 0x4c9   : >> { %2092 = vmatmul.f32.gmra.mxu0 %v2020_v10  ;;  %2116 = vmatmul.f32.gmra.mxu2 %v2028_v9 }
 0x4cf   : >> { %2160 = vmatmul.f32.gmra.mxu1 %v2021_v5  ;;  %2184 = vmatmul.f32.gmra.mxu3 %v2029_v12 }
 0x4d1   : >> { %2095 = vmatmul.f32.gmra.mxu0 %v2021_v5  ;;  %2119 = vmatmul.f32.gmra.mxu2 %v2029_v12 }
 0x4d7   : >> { %2163 = vmatmul.f32.gmra.mxu1 %v2022_v19  ;;  %2187 = vmatmul.f32.gmra.mxu3 %v2030_v20 }
 0x4d9   : >> { %2098 = vmatmul.f32.gmra.mxu0 %v2022_v19  ;;  %2122 = vmatmul.f32.gmra.mxu2 %v2030_v20 }
 0x4df   : >> { %2166 = vmatmul.f32.gmra.mxu1 %v2023_v42  ;;  %2190 = vmatmul.f32.gmra.mxu3 %v2031_v47 }
 0x4e1   : >> { %2101 = vmatmul.f32.gmra.mxu0 %v2023_v42  ;;  %2125 = vmatmul.f32.gmra.mxu2 %v2031_v47 }
 0x4e7   : >> { %2169 = vmatmul.f32.gmra.mxu1 %v2024_v29  ;;  %2193 = vmatmul.f32.gmra.mxu3 %v2032_v31 }
 0x4e9   : >> { %2104 = vmatmul.f32.gmra.mxu0 %v2024_v29  ;;  %2128 = vmatmul.f32.gmra.mxu2 %v2032_v31 }
 0x4ef   : >> { %2172 = vmatmul.f32.gmra.mxu1 %v2025_v55  ;;  %2196 = vmatmul.f32.gmra.mxu3 %v2033_v56 }
 0x4f1   : >> { %2107 = vmatmul.f32.gmra.mxu0 %v2025_v55  ;;  %2131 = vmatmul.f32.gmra.mxu2 %v2033_v56 }
 0x4f7   : >> { %2175 = vmatmul.f32.gmra.mxu1 %v2026_v60  ;;  %2199 = vmatmul.f32.gmra.mxu3 %v2034_v22 }
 0x4f9   : >> { %2110 = vmatmul.f32.gmra.mxu0 %v2026_v60  ;;  %2134 = vmatmul.f32.gmra.mxu2 %v2034_v22 }
 0x53c   : >> { %v2155_v63 = vpop.f32.mrf.mxu1 }
 0x53d   : >> { %v2156_v28 = vadd.f32 %v2155_v63, %v4462_v62 }
 0x53e   : >> { %v2090_v10 = vpop.f32.mrf.mxu0 }
 0x53f   : >> { %v2203_v30 = vmul.f32 1.442695, %v2156_v28  ;;  %v4473_v1 = vadd.f32 %v2090_v10, %v4467_v46 }
 0x541   : >> { %3161 = vpow2.f32 %v2203_v30  ;;  %2481 = vst [vmem:[%s4475_s28] sm:$0xff] %v4473_v1 }
 0x542   : >> { %v2179_v0 = vpop.f32.mrf.mxu3 }
 0x543   : >> { %v2180_v2 = vadd.f32 %v2179_v0, %v4462_v62 }
 0x544   : >> { %v2158_v6 = vpop.f32.mrf.mxu1  ;;  %v2114_v36 = vpop.f32.mrf.mxu2 }
 0x545   : >> { %v2219_v7 = vmul.f32 1.442695, %v2180_v2  ;;  %v2159_v8 = vadd.f32 %v2158_v6, %v4462_v62  ;;  %v4484_v53 = vadd.f32 %v2114_v36, %v4467_v46 }
 0x546   : >> { %v2093_v17 = vpop.f32.mrf.mxu0 }
 0x547   : >> { %v4470_v9 = vpop.eup %3161  ;;  %3163 = vpow2.f32 %v2219_v7  ;;  %v2205_v11 = vmul.f32 1.442695, %v2159_v8  ;;  %2489 = vst [vmem:[%s4475_s28 + $0xc0] sm:$0xff] %v4484_v53  ;;  %v4498_v19 = vadd.f32 %v2093_v17, %v4467_v46 }
 0x548   : >> { %2497 = vst [vmem:[%s4475_s28 + $0x8] sm:$0xff] %v4470_v9  ;;  %3165 = vrsqrt.f32 %v4470_v9  ;;  %vm2242_vm11 = vcmp.eq.f32.partialorder %v4470_v9, inf  ;;  %vm2244_vm12 = vcmp.eq.f32.partialorder %v4470_v9, 0.0  ;;  %v2245_v56 = vand.u32 2147483648, %v4470_v9 }
 0x549   : >> { %3167 = vpow2.f32 %v2205_v11  ;;  %2482 = vst [vmem:[%s4475_s28 + $0x18] sm:$0xff] %v4498_v19 }
 0x54a   : >> { %v2182_v3 = vpop.f32.mrf.mxu3 }
 0x54b   : >> { %v2183_v4 = vadd.f32 %v2182_v3, %v4462_v62 }
 0x54c   : >> { %v2161_v40 = vpop.f32.mrf.mxu1  ;;  %v2117_v35 = vpop.f32.mrf.mxu2 }
 0x54d   : >> { %v4486_v5 = vpop.eup %3163  ;;  %v2221_v12 = vmul.f32 1.442695, %v2183_v4  ;;  %v2162_v32 = vadd.f32 %v2161_v40, %v4462_v62  ;;  %v4507_v42 = vadd.f32 %v2117_v35, %v4467_v46 }
 0x54e   : >> { %v3166_v18 = vpop.eup %3165  ;;  %2505 = vst [vmem:[%s4475_s28 + $0xc8] sm:$0xff] %v4486_v5  ;;  %3169 = vrsqrt.f32 %v4486_v5  ;;  %v2096_v27 = vpop.f32.mrf.mxu0  ;;  %vm2338_vm13 = vcmp.eq.f32.partialorder %v4486_v5, inf  ;;  %vm2340_vm14 = vcmp.eq.f32.partialorder %v4486_v5, 0.0  ;;  %v2341_v30 = vand.u32 2147483648, %v4486_v5 }
 0x54f   : >> { %v4492_v45 = vpop.eup %3167  ;;  %3171 = vpow2.f32 %v2221_v12  ;;  %v2207_v51 = vmul.f32 1.442695, %v2162_v32  ;;  %v2236_v33 = vmul.f32 %v3166_v18, %v4470_v9  ;;  %2490 = vst [vmem:[%s4475_s28 + $0xd8] sm:$0xff] %v4507_v42  ;;  %v4524_v52 = vadd.f32 %v2096_v27, %v4467_v46 }
 0x550   : >> { %2498 = vst [vmem:[%s4475_s28 + $0x20] sm:$0xff] %v4492_v45  ;;  %3173 = vrsqrt.f32 %v4492_v45  ;;  %vm2254_vm15 = vcmp.eq.f32.partialorder %v4492_v45, inf  ;;  %vm2256_vm0 = vcmp.eq.f32.partialorder %v4492_v45, 0.0 }
 0x551   : >> { %3175 = vpow2.f32 %v2207_v51  ;;  %v2237_v20 = vmul.f32 %v3166_v18, %v2236_v33  ;;  %2483 = vst [vmem:[%s4475_s28 + $0x30] sm:$0xff] %v4524_v52 }
 0x552   : >> { %v2185_v41 = vpop.f32.mrf.mxu3 }
 0x553   : >> { %v2186_v38 = vadd.f32 %v2185_v41, %v4462_v62  ;;  %v2238_v49 = vmul.f32 0.5, %v2237_v20  ;;  %v2257_v41 = vand.u32 2147483648, %v4492_v45 }
 0x554   : >> { %v3170_v39 = vpop.eup %3169  ;;  %v2164_v43 = vpop.f32.mrf.mxu1 }
 0x555   : >> { %v4509_v47 = vpop.eup %3171  ;;  %v2223_v24 = vmul.f32 1.442695, %v2186_v38  ;;  %v2165_v25 = vadd.f32 %v2164_v43, %v4462_v62  ;;  %v2239_v26 = vsub.f32 1.5, %v2238_v49  ;;  %v2332_v34 = vmul.f32 %v3170_v39, %v4486_v5  ;;  %v2120_v22 = vpop.f32.mrf.mxu2 }
 0x556   : >> { %v3174_v61 = vpop.eup %3173  ;;  %2506 = vst [vmem:[%s4475_s28 + $0xe0] sm:$0xff] %v4509_v47  ;;  %3177 = vrsqrt.f32 %v4509_v47  ;;  %v4543_v2 = vadd.f32 %v2120_v22, %v4467_v46  ;;  %v2099_v11 = vpop.f32.mrf.mxu0  ;;  %vm2350_vm1 = vcmp.eq.f32.partialorder %v4509_v47, inf  ;;  %vm2352_vm2 = vcmp.eq.f32.partialorder %v4509_v47, 0.0 }
 0x557   : >> { %v4516_v29 = vpop.eup %3175  ;;  %3179 = vpow2.f32 %v2223_v24  ;;  %v2209_v31 = vmul.f32 1.442695, %v2165_v25  ;;  %v2240_v48 = vmul.f32 %v3166_v18, %v2239_v26  ;;  %v2333_v23 = vmul.f32 %v3170_v39, %v2332_v34  ;;  %v2436_v18 = vld [vmem:[%s4532_s16 + $0x40] sm:$0xff]  ;;  %v2429_v34 = vld [vmem:[%s4532_s16 + $0x8] sm:$0xff] }
 0x558   : >> { %2499 = vst [vmem:[%s4475_s28 + $0x38] sm:$0xff] %v4516_v29  ;;  %v2248_v50 = vmul.f32 %v3174_v61, %v4492_v45  ;;  %3181 = vrsqrt.f32 %v4516_v29  ;;  %v4570_v38 = vadd.f32 %v2099_v11, %v4467_v46  ;;  %vm2266_vm3 = vcmp.eq.f32.partialorder %v4516_v29, inf }
 0x559   : >> { %3183 = vpow2.f32 %v2209_v31  ;;  %v2241_v16 = vmul.f32 %v4470_v9, %v2240_v48  ;;  %v2334_v37 = vmul.f32 0.5, %v2333_v23  ;;  %2491 = vst [vmem:[%s4475_s28 + $0xf0] sm:$0xff] %v4543_v2  ;;  %vm2268_vm4 = vcmp.eq.f32.partialorder %v4516_v29, 0.0 }
 0x55a   : >> { %v2188_v55 = vpop.f32.mrf.mxu3  ;;  %v2249_v58 = vmul.f32 %v3174_v61, %v2248_v50  ;;  %2484 = vst [vmem:[%s4475_s28 + $0x48] sm:$0xff] %v4570_v38 }
 0x55b   : >> { %v2189_v21 = vadd.f32 %v2188_v55, %v4462_v62  ;;  %v2243_v59 = vsel %vm2242_vm11, %v4470_v9, %v2241_v16  ;;  %v2335_v60 = vsub.f32 1.5, %v2334_v37 }
 0x55c   : >> { %v3178_v54 = vpop.eup %3177  ;;  %v2246_v63 = vsel %vm2244_vm12, %v2245_v56, %v2243_v59  ;;  %v2167_v28 = vpop.f32.mrf.mxu1  ;;  %v2250_v0 = vmul.f32 0.5, %v2249_v58 }
 0x55d   : >> { %v4545_v6 = vpop.eup %3179  ;;  %v2225_v7 = vmul.f32 1.442695, %v2189_v21  ;;  %v2444_v8 = vmul.f32 %v2428_v57, %v2246_v63  ;;  %v2168_v10 = vadd.f32 %v2167_v28, %v4462_v62  ;;  %v2336_v9 = vmul.f32 %v3170_v39, %v2335_v60  ;;  %v2123_v27 = vpop.f32.mrf.mxu2 }
 0x55e   : >> { %v3182_v3 = vpop.eup %3181  ;;  %2507 = vst [vmem:[%s4475_s28 + $0xf8] sm:$0xff] %v4545_v6  ;;  %v2251_v4 = vsub.f32 1.5, %v2250_v0  ;;  %v2344_v36 = vmul.f32 %v3178_v54, %v4509_v47  ;;  %3185 = vrsqrt.f32 %v4545_v6  ;;  %v2102_v57 = vpop.f32.mrf.mxu0  ;;  %v4599_v63 = vadd.f32 %v2123_v27, %v4467_v46 }
 0x55f   : >> { %v4553_v40 = vpop.eup %3183  ;;  %3187 = vpow2.f32 %v2225_v7  ;;  %v2460_v12 = vadd.f32 %v2444_v8, %v4473_v1  ;;  %v2211_v32 = vmul.f32 1.442695, %v2168_v10  ;;  %v2337_v17 = vmul.f32 %v4486_v5, %v2336_v9  ;;  %v2437_v8 = vld [vmem:[%s4532_s16 + $0x48] sm:$0xff] }
 0x560   : >> { %2500 = vst [vmem:[%s4475_s28 + $0x50] sm:$0xff] %v4553_v40  ;;  %v2252_v51 = vmul.f32 %v3174_v61, %v2251_v4  ;;  %v2345_v33 = vmul.f32 %v3178_v54, %v2344_v36  ;;  %v2260_v20 = vmul.f32 %v3182_v3, %v4516_v29  ;;  %v2269_v10 = vand.u32 2147483648, %v4516_v29 }
 0x561   : >> { %2513 = vst [vmem:[%s4475_s28 + $0x10] sm:$0xff] %v2460_v12  ;;  %3189 = vpow2.f32 %v2211_v32  ;;  %v2339_v1 = vsel %vm2338_vm13, %v4486_v5, %v2337_v17  ;;  %v2430_v32 = vld [vmem:[%s4532_s16 + $0x10] sm:$0xff]  ;;  %v4623_v17 = vadd.f32 %v2102_v57, %v4467_v46  ;;  %vm2362_vm5 = vcmp.eq.f32.partialorder %v4545_v6, inf }
 0x562   : >> { %v2342_v49 = vsel %vm2340_vm14, %v2341_v30, %v2339_v1  ;;  %v2191_v35 = vpop.f32.mrf.mxu3  ;;  %v2253_v39 = vmul.f32 %v4492_v45, %v2252_v51  ;;  %v2346_v43 = vmul.f32 0.5, %v2345_v33  ;;  %v2261_v24 = vmul.f32 %v3182_v3, %v2260_v20  ;;  %2492 = vst [vmem:[%s4475_s28 + $0x108] sm:$0xff] %v4599_v63 }
 0x563   : >> { %v2452_v25 = vmul.f32 %v2436_v18, %v2342_v49  ;;  %v2192_v26 = vadd.f32 %v2191_v35, %v4462_v62  ;;  %3191 = vrsqrt.f32 %v4553_v40  ;;  %2485 = vst [vmem:[%s4475_s28 + $0x60] sm:$0xff] %v4623_v17  ;;  %vm2364_vm6 = vcmp.eq.f32.partialorder %v4545_v6, 0.0 }
 0x564   : >> { %v3186_v61 = vpop.eup %3185  ;;  %v2255_v5 = vsel %vm2254_vm15, %v4492_v45, %v2253_v39  ;;  %v2170_v31 = vpop.f32.mrf.mxu1  ;;  %v2347_v48 = vsub.f32 1.5, %v2346_v43  ;;  %v2262_v23 = vmul.f32 0.5, %v2261_v24  ;;  %v2353_v45 = vand.u32 2147483648, %v4509_v47 }
 0x565   : >> { %v4585_v50 = vpop.eup %3187  ;;  %v2468_v16 = vadd.f32 %v2452_v25, %v4484_v53  ;;  %v2227_v37 = vmul.f32 1.442695, %v2192_v26  ;;  %v2258_v55 = vsel %vm2256_vm0, %v2257_v41, %v2255_v5  ;;  %v2171_v56 = vadd.f32 %v2170_v31, %v4462_v62  ;;  %v2126_v18 = vpop.f32.mrf.mxu2 }
 0x566   : >> { %2508 = vst [vmem:[%s4475_s28 + $0x110] sm:$0xff] %v4585_v50  ;;  %v2445_v58 = vmul.f32 %v2429_v34, %v2258_v55  ;;  %v2348_v21 = vmul.f32 %v3178_v54, %v2347_v48  ;;  %v2263_v59 = vsub.f32 1.5, %v2262_v23  ;;  %v2356_v60 = vmul.f32 %v3186_v61, %v4545_v6  ;;  %v2105_v27 = vpop.f32.mrf.mxu0  ;;  %v2438_v23 = vld [vmem:[%s4532_s16 + $0x50] sm:$0xff] }
 0x567   : >> { %v4594_v22 = vpop.eup %3189  ;;  %2521 = vst [vmem:[%s4475_s28 + $0xd0] sm:$0xff] %v2468_v16  ;;  %3193 = vpow2.f32 %v2227_v37  ;;  %v2213_v53 = vmul.f32 1.442695, %v2171_v56  ;;  %v2365_v48 = vand.u32 2147483648, %v4545_v6  ;;  %vm2278_vm7 = vcmp.eq.f32.partialorder %v4553_v40, inf }
 0x568   : >> { %2501 = vst [vmem:[%s4475_s28 + $0x68] sm:$0xff] %v4594_v22  ;;  %v2461_v54 = vadd.f32 %v2445_v58, %v4498_v19  ;;  %v2349_v28 = vmul.f32 %v4509_v47, %v2348_v21  ;;  %v2264_v30 = vmul.f32 %v3182_v3, %v2263_v59  ;;  %v2357_v0 = vmul.f32 %v3186_v61, %v2356_v60 }
 0x569   : >> { %v3192_v7 = vpop.eup %3191  ;;  %3195 = vpow2.f32 %v2213_v53  ;;  %v4652_v16 = vadd.f32 %v2126_v18, %v4467_v46  ;;  %vm2280_vm8 = vcmp.eq.f32.partialorder %v4553_v40, 0.0  ;;  %v4665_v59 = vadd.f32 %v2105_v27, %v4467_v46 }
 0x56a   : >> { %2514 = vst [vmem:[%s4475_s28 + $0x28] sm:$0xff] %v2461_v54  ;;  %v2351_v19 = vsel %vm2350_vm1, %v4509_v47, %v2349_v28  ;;  %v2194_v9 = vpop.f32.mrf.mxu3  ;;  %v2265_v11 = vmul.f32 %v4516_v29, %v2264_v30  ;;  %v2358_v3 = vmul.f32 0.5, %v2357_v0  ;;  %v2272_v4 = vmul.f32 %v3192_v7, %v4553_v40 }
 0x56b   : >> { %v2354_v36 = vsel %vm2352_vm2, %v2353_v45, %v2351_v19  ;;  %v2195_v12 = vadd.f32 %v2194_v9, %v4462_v62  ;;  %3197 = vrsqrt.f32 %v4585_v50  ;;  %2493 = vst [vmem:[%s4475_s28 + $0x120] sm:$0xff] %v4652_v16  ;;  %vm2374_vm9 = vcmp.eq.f32.partialorder %v4585_v50, inf }
 0x56c   : >> { %v2453_v51 = vmul.f32 %v2437_v8, %v2354_v36  ;;  %v2267_v33 = vsel %vm2266_vm3, %v4516_v29, %v2265_v11  ;;  %v2173_v20 = vpop.f32.mrf.mxu1  ;;  %v2359_v1 = vsub.f32 1.5, %v2358_v3  ;;  %v2273_v47 = vmul.f32 %v3192_v7, %v2272_v4  ;;  %v2431_v8 = vld [vmem:[%s4532_s16 + $0x18] sm:$0xff]  ;;  %2486 = vst [vmem:[%s4475_s28 + $0x78] sm:$0xff] %v4665_v59 }
 0x56d   : >> { %v4628_v41 = vpop.eup %3193  ;;  %v2229_v49 = vmul.f32 1.442695, %v2195_v12  ;;  %v2270_v35 = vsel %vm2268_vm4, %v2269_v10, %v2267_v33  ;;  %v2174_v39 = vadd.f32 %v2173_v20, %v4462_v62  ;;  %3199 = vrsqrt.f32 %v4594_v22  ;;  %v2129_v60 = vpop.f32.mrf.mxu2 }
 0x56e   : >> { %2509 = vst [vmem:[%s4475_s28 + $0x128] sm:$0xff] %v4628_v41  ;;  %v2469_v43 = vadd.f32 %v2453_v51, %v4507_v42  ;;  %v2446_v24 = vmul.f32 %v2430_v32, %v2270_v35  ;;  %v2360_v25 = vmul.f32 %v3186_v61, %v2359_v1  ;;  %v2274_v26 = vmul.f32 0.5, %v2273_v47 }
 0x56f   : >> { %v4639_v34 = vpop.eup %3195  ;;  %3201 = vpow2.f32 %v2229_v49  ;;  %v2215_v29 = vmul.f32 1.442695, %v2174_v39  ;;  %v4693_v20 = vadd.f32 %v2129_v60, %v4467_v46  ;;  %vm2376_vm10 = vcmp.eq.f32.partialorder %v4585_v50, 0.0 }
 0x570   : >> { %2502 = vst [vmem:[%s4475_s28 + $0x80] sm:$0xff] %v4639_v34  ;;  %v2462_v5 = vadd.f32 %v2446_v24, %v4524_v52  ;;  %v2361_v31 = vmul.f32 %v4545_v6, %v2360_v25  ;;  %v2275_v42 = vsub.f32 1.5, %v2274_v26  ;;  %vm2290_vm11 = vcmp.eq.f32.partialorder %v4594_v22, inf }
 0x571   : >> { %v3198_v61 = vpop.eup %3197  ;;  %2522 = vst [vmem:[%s4475_s28 + $0xe8] sm:$0xff] %v2469_v43  ;;  %3203 = vpow2.f32 %v2215_v29  ;;  %v2377_v43 = vand.u32 2147483648, %v4585_v50  ;;  %vm2292_vm12 = vcmp.eq.f32.partialorder %v4594_v22, 0.0  ;;  %vm2386_vm13 = vcmp.eq.f32.partialorder %v4628_v41, inf }
 0x572   : >> { %2515 = vst [vmem:[%s4475_s28 + $0x40] sm:$0xff] %v2462_v5  ;;  %v2363_v52 = vsel %vm2362_vm5, %v4545_v6, %v2361_v31  ;;  %v2197_v37 = vpop.f32.mrf.mxu3  ;;  %v2276_v55 = vmul.f32 %v3192_v7, %v2275_v42  ;;  %v2368_v56 = vmul.f32 %v3198_v61, %v4585_v50  ;;  %3205 = vrsqrt.f32 %v4628_v41  ;;  %v2439_v31 = vld [vmem:[%s4532_s16 + $0x58] sm:$0xff] }
 0x573   : >> { %v3200_v57 = vpop.eup %3199  ;;  %v2366_v58 = vsel %vm2364_vm6, %v2365_v48, %v2363_v52  ;;  %v2198_v21 = vadd.f32 %v2197_v37, %v4462_v62  ;;  %v2281_v7 = vand.u32 2147483648, %v4553_v40  ;;  %3207 = vrsqrt.f32 %v4639_v34  ;;  %2494 = vst [vmem:[%s4475_s28 + $0x138] sm:$0xff] %v4693_v20 }
 0x574   : >> { %v2454_v53 = vmul.f32 %v2438_v23, %v2366_v58  ;;  %v2277_v45 = vmul.f32 %v4553_v40, %v2276_v55  ;;  %v2176_v54 = vpop.f32.mrf.mxu1  ;;  %v2369_v28 = vmul.f32 %v3198_v61, %v2368_v56  ;;  %v2284_v6 = vmul.f32 %v3200_v57, %v4594_v22 }
 0x575   : >> { %v4669_v30 = vpop.eup %3201  ;;  %v2231_v0 = vmul.f32 1.442695, %v2198_v21  ;;  %v2177_v10 = vadd.f32 %v2176_v54, %v4462_v62  ;;  %v2132_v26 = vpop.f32.mrf.mxu2  ;;  %v2293_v56 = vand.u32 2147483648, %v4594_v22  ;;  %vm2388_vm14 = vcmp.eq.f32.partialorder %v4628_v41, 0.0 }
 0x576   : >> { %2510 = vst [vmem:[%s4475_s28 + $0x140] sm:$0xff] %v4669_v30  ;;  %v2470_v19 = vadd.f32 %v2454_v53, %v4543_v2  ;;  %v2279_v9 = vsel %vm2278_vm7, %v4553_v40, %v2277_v45  ;;  %v2370_v11 = vmul.f32 0.5, %v2369_v28  ;;  %v2285_v3 = vmul.f32 %v3200_v57, %v2284_v6  ;;  %v2108_v40 = vpop.f32.mrf.mxu0 }
 0x577   : >> { %v4683_v4 = vpop.eup %3203  ;;  %3209 = vpow2.f32 %v2231_v0  ;;  %v2282_v36 = vsel %vm2280_vm8, %v2281_v7, %v2279_v9  ;;  %v2217_v12 = vmul.f32 1.442695, %v2177_v10  ;;  %vm2302_vm15 = vcmp.eq.f32.partialorder %v4639_v34, inf }
 0x578   : >> { %v3206_v32 = vpop.eup %3205  ;;  %2503 = vst [vmem:[%s4475_s28 + $0x98] sm:$0xff] %v4683_v4  ;;  %v2447_v18 = vmul.f32 %v2431_v8, %v2282_v36  ;;  %v2371_v51 = vsub.f32 1.5, %v2370_v11  ;;  %v2286_v33 = vmul.f32 0.5, %v2285_v3  ;;  %vm2304_vm0 = vcmp.eq.f32.partialorder %v4639_v34, 0.0 }
 0x579   : >> { %2523 = vst [vmem:[%s4475_s28 + $0x100] sm:$0xff] %v2470_v19  ;;  %3211 = vpow2.f32 %v2217_v12  ;;  %v2380_v2 = vmul.f32 %v3206_v32, %v4628_v41  ;;  %v3208_v39 = vpop.eup %3207  ;;  %v2389_v19 = vand.u32 2147483648, %v4628_v41  ;;  %vm2398_vm1 = vcmp.eq.f32.partialorder %v4669_v30, inf }
 0x57a   : >> { %v2463_v1 = vadd.f32 %v2447_v18, %v4570_v38  ;;  %v2372_v47 = vmul.f32 %v3198_v61, %v2371_v51  ;;  %v2200_v49 = vpop.f32.mrf.mxu3  ;;  %v2287_v35 = vsub.f32 1.5, %v2286_v33  ;;  %3213 = vrsqrt.f32 %v4669_v30 }
 0x57b   : >> { %v2201_v24 = vadd.f32 %v2200_v49, %v4462_v62  ;;  %v2381_v25 = vmul.f32 %v3206_v32, %v2380_v2  ;;  %v2296_v27 = vmul.f32 %v3208_v39, %v4639_v34  ;;  %v4710_v62 = vadd.f32 %v2108_v40, %v4467_v46 }
 0x57c   : >> { %2516 = vst [vmem:[%s4475_s28 + $0x58] sm:$0xff] %v2463_v1  ;;  %v2373_v38 = vmul.f32 %v4585_v50, %v2372_v47  ;;  %v2288_v29 = vmul.f32 %v3200_v57, %v2287_v35  ;;  %3215 = vrsqrt.f32 %v4683_v4  ;;  %v2432_v57 = vld [vmem:[%s4532_s16 + $0x20] sm:$0xff]  ;;  %v2305_v35 = vand.u32 2147483648, %v4639_v34 }
 0x57d   : >> { %v4706_v5 = vpop.eup %3209  ;;  %v2233_v42 = vmul.f32 1.442695, %v2201_v24  ;;  %v2382_v61 = vmul.f32 0.5, %v2381_v25  ;;  %v2297_v52 = vmul.f32 %v3208_v39, %v2296_v27  ;;  %2487 = vst [vmem:[%s4475_s28 + $0x90] sm:$0xff] %v4710_v62  ;;  %vm2400_vm2 = vcmp.eq.f32.partialorder %v4669_v30, 0.0 }
 0x57e   : >> { %2511 = vst [vmem:[%s4475_s28 + $0x158] sm:$0xff] %v4706_v5  ;;  %v2375_v48 = vsel %vm2374_vm9, %v4585_v50, %v2373_v38  ;;  %v2289_v23 = vmul.f32 %v4594_v22, %v2288_v29  ;;  %v4734_v50 = vadd.f32 %v2132_v26, %v4467_v46  ;;  %v2111_v11 = vpop.f32.mrf.mxu0  ;;  %vm2314_vm3 = vcmp.eq.f32.partialorder %v4683_v4, inf }
 0x57f   : >> { %v4720_v37 = vpop.eup %3211  ;;  %v2378_v55 = vsel %vm2376_vm10, %v2377_v43, %v2375_v48  ;;  %3217 = vpow2.f32 %v2233_v42  ;;  %v2383_v58 = vsub.f32 1.5, %v2382_v61  ;;  %v2298_v45 = vmul.f32 0.5, %v2297_v52 }
 0x580   : >> { %v3214_v21 = vpop.eup %3213  ;;  %2504 = vst [vmem:[%s4475_s28 + $0xb0] sm:$0xff] %v4720_v37  ;;  %v2455_v60 = vmul.f32 %v2439_v31, %v2378_v55  ;;  %v2291_v53 = vsel %vm2290_vm11, %v4594_v22, %v2289_v23  ;;  %3219 = vrsqrt.f32 %v4706_v5  ;;  %v4763_v1 = vadd.f32 %v2111_v11, %v4467_v46 }
 0x581   : >> { %v2294_v54 = vsel %vm2292_vm12, %v2293_v56, %v2291_v53  ;;  %v2384_v28 = vmul.f32 %v3206_v32, %v2383_v58  ;;  %v2392_v6 = vmul.f32 %v3214_v21, %v4669_v30  ;;  %v2299_v8 = vsub.f32 1.5, %v2298_v45  ;;  %2495 = vst [vmem:[%s4475_s28 + $0x150] sm:$0xff] %v4734_v50  ;;  %v2135_v32 = vpop.f32.mrf.mxu2 }
 0x582   : >> { %v2471_v0 = vadd.f32 %v2455_v60, %v4599_v63  ;;  %v2448_v7 = vmul.f32 %v2432_v57, %v2294_v54  ;;  %v3216_v22 = vpop.eup %3215  ;;  %v2440_v63 = vld [vmem:[%s4532_s16 + $0x60] sm:$0xff]  ;;  %3221 = vrsqrt.f32 %v4720_v37  ;;  %v4769_v24 = vadd.f32 %v2135_v32, %v4467_v46  ;;  %2488 = vst [vmem:[%s4475_s28 + $0xa8] sm:$0xff] %v4763_v1 }
 0x583   : >> { %v2385_v10 = vmul.f32 %v4628_v41, %v2384_v28  ;;  %v2393_v9 = vmul.f32 %v3214_v21, %v2392_v6  ;;  %v2300_v36 = vmul.f32 %v3208_v39, %v2299_v8  ;;  %v2308_v12 = vmul.f32 %v3216_v22, %v4683_v4  ;;  %v2433_v39 = vld [vmem:[%s4532_s16 + $0x28] sm:$0xff]  ;;  %v2434_v28 = vld [vmem:[%s4532_s16 + $0x30] sm:$0xff] }
 0x584   : >> { %2524 = vst [vmem:[%s4475_s28 + $0x118] sm:$0xff] %v2471_v0  ;;  %v2464_v3 = vadd.f32 %v2448_v7, %v4623_v17  ;;  %v2401_v23 = vand.u32 2147483648, %v4669_v30  ;;  %vm2316_vm4 = vcmp.eq.f32.partialorder %v4683_v4, 0.0  ;;  %vm2410_vm5 = vcmp.eq.f32.partialorder %v4706_v5, inf }
 0x585   : >> { %v4750_v18 = vpop.eup %3217  ;;  %v2387_v51 = vsel %vm2386_vm13, %v4628_v41, %v2385_v10  ;;  %v2394_v33 = vmul.f32 0.5, %v2393_v9  ;;  %v2301_v2 = vmul.f32 %v4639_v34, %v2300_v36  ;;  %v2309_v40 = vmul.f32 %v3216_v22, %v2308_v12  ;;  %2496 = vst [vmem:[%s4475_s28 + $0x168] sm:$0xff] %v4769_v24 }
 0x586   : >> { %2512 = vst [vmem:[%s4475_s28 + $0x170] sm:$0xff] %v4750_v18  ;;  %v2390_v17 = vsel %vm2388_vm14, %v2389_v19, %v2387_v51  ;;  %v3220_v47 = vpop.eup %3219  ;;  %3223 = vrsqrt.f32 %v4750_v18  ;;  %vm2412_vm6 = vcmp.eq.f32.partialorder %v4706_v5, 0.0  ;;  %vm2326_vm7 = vcmp.eq.f32.partialorder %v4720_v37, inf }
 0x587   : >> { %2517 = vst [vmem:[%s4475_s28 + $0x70] sm:$0xff] %v2464_v3  ;;  %v2456_v49 = vmul.f32 %v2440_v63, %v2390_v17  ;;  %v2395_v43 = vsub.f32 1.5, %v2394_v33  ;;  %v2303_v41 = vsel %vm2302_vm15, %v4639_v34, %v2301_v2  ;;  %v2310_v25 = vmul.f32 0.5, %v2309_v40  ;;  %v2441_v34 = vld [vmem:[%s4532_s16 + $0x68] sm:$0xff]  ;;  %v2442_v63 = vld [vmem:[%s4532_s16 + $0x70] sm:$0xff]  ;;  %v2435_v40 = vld [vmem:[%s4532_s16 + $0x38] sm:$0xff] }
 0x588   : >> { %v2404_v26 = vmul.f32 %v3220_v47, %v4706_v5  ;;  %v2306_v29 = vsel %vm2304_vm0, %v2305_v35, %v2303_v41  ;;  %v3222_v61 = vpop.eup %3221  ;;  %v2413_v3 = vand.u32 2147483648, %v4706_v5  ;;  %v2329_v2 = vand.u32 2147483648, %v4720_v37  ;;  %v2443_v41 = vld [vmem:[%s4532_s16 + $0x78] sm:$0xff] }
 0x589   : >> { %v2472_v38 = vadd.f32 %v2456_v49, %v4652_v16  ;;  %v2396_v27 = vmul.f32 %v3214_v21, %v2395_v43  ;;  %v2449_v46 = vmul.f32 %v2433_v39, %v2306_v29  ;;  %v2311_v31 = vsub.f32 1.5, %v2310_v25 }
 0x58a   : >> { %v2405_v42 = vmul.f32 %v3220_v47, %v2404_v26  ;;  %v2320_v56 = vmul.f32 %v3222_v61, %v4720_v37  ;;  %vm2328_vm8 = vcmp.eq.f32.partialorder %v4720_v37, 0.0  ;;  %vm2422_vm9 = vcmp.eq.f32.partialorder %v4750_v18, inf }
 0x58b   : >> { %2525 = vst [vmem:[%s4475_s28 + $0x130] sm:$0xff] %v2472_v38  ;;  %v2397_v48 = vmul.f32 %v4669_v30, %v2396_v27  ;;  %v2465_v16 = vadd.f32 %v2449_v46, %v4665_v59  ;;  %v2312_v52 = vmul.f32 %v3216_v22, %v2311_v31  ;;  %v2317_v59 = vand.u32 2147483648, %v4683_v4 }
 0x58c   : >> { %v2406_v55 = vmul.f32 0.5, %v2405_v42  ;;  %v3224_v58 = vpop.eup %3223  ;;  %v2321_v45 = vmul.f32 %v3222_v61, %v2320_v56  ;;  %v2425_v43 = vand.u32 2147483648, %v4750_v18  ;;  %vm2424_vm10 = vcmp.eq.f32.partialorder %v4750_v18, 0.0 }
 0x58d   : >> { %v2399_v57 = vsel %vm2398_vm1, %v4669_v30, %v2397_v48  ;;  %2518 = vst [vmem:[%s4475_s28 + $0x88] sm:$0xff] %v2465_v16  ;;  %v2313_v60 = vmul.f32 %v4683_v4, %v2312_v52  ;;  %v2416_v6 = vmul.f32 %v3224_v58, %v4750_v18 }
 0x58e   : >> { %v2402_v21 = vsel %vm2400_vm2, %v2401_v23, %v2399_v57  ;;  %v2407_v53 = vsub.f32 1.5, %v2406_v55  ;;  %v2322_v7 = vmul.f32 0.5, %v2321_v45 }
 0x58f   : >> { %v2457_v54 = vmul.f32 %v2441_v34, %v2402_v21  ;;  %v2315_v0 = vsel %vm2314_vm3, %v4683_v4, %v2313_v60  ;;  %v2417_v10 = vmul.f32 %v3224_v58, %v2416_v6 }
 0x590   : >> { %v2408_v30 = vmul.f32 %v3220_v47, %v2407_v53  ;;  %v2318_v22 = vsel %vm2316_vm4, %v2317_v59, %v2315_v0  ;;  %v2323_v11 = vsub.f32 1.5, %v2322_v7 }
 0x591   : >> { %v2473_v8 = vadd.f32 %v2457_v54, %v4693_v20  ;;  %v2450_v19 = vmul.f32 %v2434_v28, %v2318_v22  ;;  %v2418_v36 = vmul.f32 0.5, %v2417_v10 }
 0x592   : >> { %v2409_v9 = vmul.f32 %v4706_v5, %v2408_v30  ;;  %v2324_v20 = vmul.f32 %v3222_v61, %v2323_v11 }
 0x593   : >> { %2526 = vst [vmem:[%s4475_s28 + $0x148] sm:$0xff] %v2473_v8  ;;  %v2466_v4 = vadd.f32 %v2450_v19, %v4710_v62  ;;  %v2419_v51 = vsub.f32 1.5, %v2418_v36 }
 0x594   : >> { %v2411_v12 = vsel %vm2410_vm5, %v4706_v5, %v2409_v9  ;;  %v2325_v17 = vmul.f32 %v4720_v37, %v2324_v20 }
 0x595   : >> { %v2414_v32 = vsel %vm2412_vm6, %v2413_v3, %v2411_v12  ;;  %2519 = vst [vmem:[%s4475_s28 + $0xa0] sm:$0xff] %v2466_v4  ;;  %v2420_v47 = vmul.f32 %v3224_v58, %v2419_v51 }
 0x596   : >> { %v2458_v33 = vmul.f32 %v2442_v63, %v2414_v32  ;;  %v2327_v5 = vsel %vm2326_vm7, %v4720_v37, %v2325_v17 }
 0x597   : >> { %v2330_v49 = vsel %vm2328_vm8, %v2329_v2, %v2327_v5  ;;  %v2421_v35 = vmul.f32 %v4750_v18, %v2420_v47 }
 0x598   : >> { %v2474_v62 = vadd.f32 %v2458_v33, %v4734_v50  ;;  %v2451_v39 = vmul.f32 %v2435_v40, %v2330_v49 }
 0x599   : >> { %v2423_v25 = vsel %vm2422_vm9, %v4750_v18, %v2421_v35 }
 0x59a   : >> { %2527 = vst [vmem:[%s4475_s28 + $0x160] sm:$0xff] %v2474_v62  ;;  %v2467_v50 = vadd.f32 %v2451_v39, %v4763_v1  ;;  %v2426_v26 = vsel %vm2424_vm10, %v2425_v43, %v2423_v25 }
 0x59b   : >> { %v2459_v38 = vmul.f32 %v2443_v41, %v2426_v26  ;;  %1965 = sbr.rel (!%p1963_p0) target bundleno = 1183 (0x49f), region = 244 }
 0x59c   : >> { %2520 = vst [vmem:[%s4475_s28 + $0xb8] sm:$0xff] %v2467_v50 }
 0x59d   : >> { %v2475_v37 = vadd.f32 %v2459_v38, %v4769_v24 }
 0x59f   : >> { %2528 = vst [vmem:[%s4475_s28 + $0x178] sm:$0xff] %v2475_v37 }
 0x5a0 PF: > { %p3031_p1 = scmp.eq.s32.totalorder %s3651_s27, 3  ;;  %s4929_s17 = sld [smem:[#allocation35_spill]] }
 0x5a1   : > { %s3537_s5 = smov [#allocation14]   ;;  %s3538_s8 = smov 384  }
 0x5a2   : > { %s2534_s6 = sshll.u32 %s3537_s5, 4  ;;  %s3539_s11 = smov 24   ;;  %s2535_s6 = int_to_ptr.vmem [resolvable:$true] %s2534_s6 }
 0x5a6   : > { %s2536_s1 = sshll.u32 %s4929_s17, 4  ;;  %s2537_s1 = int_to_ptr.hbm [resolvable:$true] %s2536_s1 }
 0x5a7   : > { %3007 = dma.vmem_to_hbm [thread:$0]  (%p3031_p1), %s2535_s6, 12288, %s2537_s1, [#allocation7], %s3538_s8, %s3538_s8, %s3539_s11  }
 0x5a8   : > { %3470 = dma.done.wait (%p3031_p1), [#allocation7], 12288  }
 0x5a9   : > { %3472 = vsyncadd (%p3031_p1), [#allocation7], 4294955008 }
 0x5aa PF: > { %s27_s26 = sadd.s32 1, %s3511_s26   ;;  %s4930_s17 = sld [smem:[#allocation20_spill]] }
 0x5ab   : > { %p24_p2 = scmp.ge.s32.totalorder %s27_s26, 6   ;;  %s4931_s27 = sld [smem:[#allocation26_spill]] }
 0x5ac   : > { %s4932_s22 = sld [smem:[#allocation27_spill]]  ;;  %s4935_s18 = smov %s3483_s19 }
 0x5ad   : > { %s4933_s2 = sld [smem:[#allocation23_spill]]  ;;  %s4937_s20 = smov %s3491_s21 }
 0x5ae   : > { %s4934_s15 = sld [smem:[#allocation24_spill]]  ;;  %s4940_s23 = smov %s3507_s25 }
 0x5b0   :  { %26 = sbr.rel (!%p24_p2) target bundleno = 18 (0x12), region = 255 }
 0x5b1   : > { %s4936_s19 = smov %s4931_s27 }
 0x5b2   : > { %s4938_s21 = smov %s4932_s22  ;;  %s4939_s22 = smov %s3503_s24 }
 0x5b3   : > { %s4941_s24 = smov %s4933_s2 }
 0x5b4   : > { %s4942_s25 = smov %s4934_s15 }
 0x5b5   :  { %2553 = vsyncpa [#allocation6], 1 }
 0x5b6   :  { %2555 = vsyncpa [#allocation6 + $0x1], 1 }
 0x5b7   :  { %2556 = vsyncpa [#allocation9], 1 }
 0x5b8   :  { %2558 = vsyncpa [#allocation9 + $0x1], 1 }
 0x5b9   :  { %2559 = vsyncpa [#allocation12], 1 }
 0x5ba   :  { %2560 = vsyncpa [#allocation7], 1 }
 0x5bb   :  { %2562 = vsyncpa [#allocation7 + $0x1], 1 }

</bundles_post_ra>
